<compile_context>
chip_gen: v6e
topology: v6e:2x2x1
jax: 0.10.0
libtpu: 0.0.40
codegen_flags: <defaults>
</compile_context>

<pallas_src>
import functools

import jax
import jax.numpy as jnp
import numpy as np
from jax import lax
from jax.experimental import pallas as pl
from jax.experimental.pallas import tpu as pltpu


# ---------------------------------------------------------------------------
# Kernels
# ---------------------------------------------------------------------------
def _adain_residual_kernel(x_ref, s_ref, w1_ref, b1_ref, w2_ref, b2_ref,
                           fw_ref, fb_ref, out_ref, pad_ref, *, alpha, eps):
    """adain + alpha-blend + ResidualLayer(filterMod=True) for one batch element.

    x_ref  : (1, H, W, C)   content activation (NHWC, C on lanes)
    s_ref  : (1, Hs, Ws, C) style activation for adain
    w*_ref : (9, C, C)      conv taps [tap, cin, cout], tap = dh*3 + dw
    b*_ref : (1, C)         conv biases
    fw/fb  : (1, 1, C)      per-sample filterMod weight / bias
    out_ref: (1, H, W, C)
    pad_ref: VMEM scratch (H+2, W+9, C); un-padded pixels start at column 8 so
             the big center store stays sublane-aligned.
    """
    h = x_ref.shape[1]
    w = x_ref.shape[2]
    c = x_ref.shape[3]

    x = x_ref[0]                                   # (H, W, C)
    s = s_ref[0]                                   # (Hs, Ws, C)

    def _inst_stats(t):
        hw = t.shape[0] * t.shape[1]
        s1 = jnp.sum(jnp.sum(t, axis=0), axis=0, keepdims=True)       # (1, C)
        s2 = jnp.sum(jnp.sum(t * t, axis=0), axis=0, keepdims=True)   # (1, C)
        mean = s1 / hw
        var = jnp.maximum(s2 / hw - mean * mean, 0.0)
        return mean, var

    # TODO(synk): adain() is not defined in the provided source; the standard
    # AdaIN formulation (per-channel instance mean/std matching, eps=1e-5) is
    # used here and in the pure-JAX reference below.
    cm, cv = _inst_stats(x)
    sm, sv = _inst_stats(s)
    xn = (x - cm) * lax.rsqrt(cv + eps) * jnp.sqrt(sv + eps) + sm
    x1 = alpha * xn + (1.0 - alpha) * x            # (H, W, C)

    cl = 8                                         # scratch column of pixel col 0

    def _conv3x3(t_hwc, wt_ref, bias_ref):
        # Reflect-pad(1) into the scratch, then 9 shifted-window MXU matmuls.
        pad_ref[1:h + 1, cl:cl + w, :] = t_hwc
        pad_ref[0:1, cl:cl + w, :] = t_hwc[1:2]
        pad_ref[h + 1:h + 2, cl:cl + w, :] = t_hwc[h - 2:h - 1]
        pad_ref[:, cl - 1:cl, :] = pad_ref[:, cl + 1:cl + 2, :]
        pad_ref[:, cl + w:cl + w + 1, :] = pad_ref[:, cl + w - 2:cl + w - 1, :]
        cout = wt_ref.shape[2]
        acc = jnp.zeros((h * w, cout), dtype=jnp.float32)
        for tap in range(9):
            dh, dw = tap // 3, tap % 3
            win = pad_ref[dh:dh + h, cl - 1 + dw:cl - 1 + dw + w, :]
            acc = acc + jnp.dot(win.reshape(h * w, c), wt_ref[tap],
                                preferred_element_type=jnp.float32)
        return acc + bias_ref[...]                 # (H*W, Cout)

    fw = fw_ref[0]                                 # (1, C)
    fb = fb_ref[0]
    x1_flat = x1.reshape(h * w, c)

    y1 = _conv3x3(x1, w1_ref, b1_ref)              # conv1(x1)  (bias included)
    x2 = fw * y1 + fb * x1_flat                    # filterMod
    x3 = jnp.maximum(x2, 0.0)                      # relu
    y4 = _conv3x3(x3.reshape(h, w, c), w2_ref, b2_ref)
    x5 = fw * y4 + fb * x3                         # filterMod
    out_ref[0] = (x1_flat + x5).reshape(h, w, c)   # residual


def _upsample_block_kernel(xp_ref, w1_ref, b1_ref, w2_ref, b2_ref,
                           fw_ref, fb_ref, out_ref, *, rt):
    """Upsample stage conv stack on an already-upsampled, reflect-padded input.

    xp_ref : (1, H2+2, W2+2, Cin)  resident across the row-tile grid axis
    w1_ref : (9, Cin, Cout)        densified grouped-conv taps
    w2_ref : (Cin2=Cout, Cout)     1x1 conv matrix
    fw/fb  : (1, 1, Cout)          per-sample filterMod weight / bias (s[6]/s[7] etc.)
    out_ref: (1, rt, W2, Cout)
    """
    cin = xp_ref.shape[3]
    wp = xp_ref.shape[2]
    wd = wp - 2
    cout = out_ref.shape[3]
    r = pl.program_id(1)
    row0 = r * rt

    acc = jnp.zeros((rt * wd, cout), dtype=jnp.float32)
    for tap in range(9):
        dh, dw = tap // 3, tap % 3
        win = xp_ref[0, pl.ds(row0 + dh, rt), pl.ds(dw, wd), :]
        acc = acc + jnp.dot(win.reshape(rt * wd, cin), w1_ref[tap],
                            preferred_element_type=jnp.float32)
    y1 = jnp.maximum(acc + b1_ref[...], 0.0)                       # relu(conv1)
    y2 = jnp.dot(y1, w2_ref[...],
                 preferred_element_type=jnp.float32) + b2_ref[...]  # 1x1 conv
    fw = fw_ref[0]
    fb = fb_ref[0]
    out_ref[0] = jnp.maximum(fw * y2 + fb * y1, 0.0).reshape(rt, wd, cout)


def _conv9x9_kernel(xp_ref, w_ref, b_ref, out_ref, *, rt):
    """Final reflect-pad(4) + 9x9 conv (16 -> 3), row-tiled.

    xp_ref : (1, H+8, W+8, 16) padded activation, resident per batch element
    w_ref  : (81, 16, 3)       taps, tap = dh*9 + dw
    out_ref: (1, rt, W, 3)
    """
    cin = xp_ref.shape[3]
    wp = xp_ref.shape[2]
    wd = wp - 8
    cout = out_ref.shape[3]
    r = pl.program_id(1)
    row0 = r * rt

    acc = jnp.zeros((rt * wd, cout), dtype=jnp.float32)
    for tap in range(81):
        dh, dw = tap // 9, tap % 9
        win = xp_ref[0, pl.ds(row0 + dh, rt), pl.ds(dw, wd), :]
        acc = acc + jnp.dot(win.reshape(rt * wd, cin), w_ref[tap],
                            preferred_element_type=jnp.float32)
    out_ref[0] = (acc + b_ref[...]).reshape(rt, wd, cout)


# ---------------------------------------------------------------------------
# Host-side helpers (layout / weight transforms / XLA glue)
# ---------------------------------------------------------------------------
def _to_nhwc(x):
    return jnp.transpose(x, (0, 2, 3, 1))


def _to_nchw(x):
    return jnp.transpose(x, (0, 3, 1, 2))


def _conv_taps(wgt):
    """(Cout, Cin, kh, kw) torch layout -> (kh*kw, Cin, Cout) tap matrices."""
    co, ci, kh, kw = wgt.shape
    return jnp.transpose(wgt, (2, 3, 1, 0)).reshape(kh * kw, ci, co)


def _grouped_taps_dense(wgt):
    """Grouped Conv2d(2g -> g, k=3, groups=g) weight -> dense (9, 2g, g) taps."""
    co = wgt.shape[0]
    ci = 2 * co
    dense = jnp.zeros((co, ci, 3, 3), wgt.dtype)
    idx = jnp.arange(co)
    dense = dense.at[idx, 2 * idx, :, :].set(wgt[:, 0])
    dense = dense.at[idx, 2 * idx + 1, :, :].set(wgt[:, 1])
    return _conv_taps(dense)


def _bilinear_up2_nhwc(x):
    """Bilinear x2 upsample (PyTorch nn.Upsample, align_corners=False)."""
    def up_axis(t, axis):
        sz = t.shape[axis]
        first = lax.slice_in_dim(t, 0, 1, axis=axis)
        last = lax.slice_in_dim(t, sz - 1, sz, axis=axis)
        tm1 = jnp.concatenate([first, lax.slice_in_dim(t, 0, sz - 1, axis=axis)],
                              axis=axis)
        tp1 = jnp.concatenate([lax.slice_in_dim(t, 1, sz, axis=axis), last],
                              axis=axis)
        even = 0.25 * tm1 + 0.75 * t
        odd = 0.75 * t + 0.25 * tp1
        stacked = jnp.stack([even, odd], axis=axis + 1)
        newshape = list(t.shape)
        newshape[axis] = 2 * sz
        return stacked.reshape(newshape)

    x = up_axis(x, 1)
    x = up_axis(x, 2)
    return x


def _reflect_pad_nhwc(x, p):
    return jnp.pad(x, ((0, 0), (p, p), (p, p), (0, 0)), mode="reflect")


# ---------------------------------------------------------------------------
# Stage wrappers (pallas_call)
# ---------------------------------------------------------------------------
def adain_residual_block(x_nhwc, s_nhwc, fw, fb, p, alpha):
    n, h, wdt, c = x_nhwc.shape
    hs, ws = s_nhwc.shape[1], s_nhwc.shape[2]
    w1t = _conv_taps(p["conv1_w"])
    b1 = p["conv1_b"].reshape(1, c)
    w2t = _conv_taps(p["conv2_w"])
    b2 = p["conv2_b"].reshape(1, c)
    fw3 = fw.reshape(n, 1, c)
    fb3 = fb.reshape(n, 1, c)
    kern = functools.partial(_adain_residual_kernel, alpha=float(alpha), eps=1e-5)
    return pl.pallas_call(
        kern,
        out_shape=jax.ShapeDtypeStruct((n, h, wdt, c), jnp.float32),
        grid_spec=pltpu.PrefetchScalarGridSpec(
            num_scalar_prefetch=0,
            grid=(n,),
            in_specs=[
                pl.BlockSpec((1, h, wdt, c), lambda i: (i, 0, 0, 0)),
                pl.BlockSpec((1, hs, ws, c), lambda i: (i, 0, 0, 0)),
                pl.BlockSpec((9, c, c), lambda i: (0, 0, 0)),
                pl.BlockSpec((1, c), lambda i: (0, 0)),
                pl.BlockSpec((9, c, c), lambda i: (0, 0, 0)),
                pl.BlockSpec((1, c), lambda i: (0, 0)),
                pl.BlockSpec((1, 1, c), lambda i: (i, 0, 0)),
                pl.BlockSpec((1, 1, c), lambda i: (i, 0, 0)),
            ],
            out_specs=pl.BlockSpec((1, h, wdt, c), lambda i: (i, 0, 0, 0)),
            scratch_shapes=[pltpu.VMEM((h + 2, wdt + 9, c), jnp.float32)],
        ),
        compiler_params=pltpu.CompilerParams(dimension_semantics=("parallel",)),
    )(x_nhwc, s_nhwc, w1t, b1, w2t, b2, fw3, fb3)


def upsample_block(x_nhwc, fw, fb, p, rt=8):
    n, h, wdt, cin = x_nhwc.shape
    cout = p["conv1_b"].shape[0]
    xu = _bilinear_up2_nhwc(x_nhwc)               # (n, 2H, 2W, Cin)
    xp = _reflect_pad_nhwc(xu, 1)
    h2, w2 = 2 * h, 2 * wdt
    assert h2 % rt == 0
    w1t = _grouped_taps_dense(p["conv1_w"])        # (9, Cin, Cout)
    b1 = p["conv1_b"].reshape(1, cout)
    w2m = p["conv2_w"].reshape(cout, cout).T       # (Cin2, Cout)
    b2 = p["conv2_b"].reshape(1, cout)
    fw3 = fw.reshape(n, 1, cout)
    fb3 = fb.reshape(n, 1, cout)
    kern = functools.partial(_upsample_block_kernel, rt=rt)
    return pl.pallas_call(
        kern,
        out_shape=jax.ShapeDtypeStruct((n, h2, w2, cout), jnp.float32),
        grid_spec=pltpu.PrefetchScalarGridSpec(
            num_scalar_prefetch=0,
            grid=(n, h2 // rt),
            in_specs=[
                pl.BlockSpec((1, h2 + 2, w2 + 2, cin), lambda i, r: (i, 0, 0, 0)),
                pl.BlockSpec((9, cin, cout), lambda i, r: (0, 0, 0)),
                pl.BlockSpec((1, cout), lambda i, r: (0, 0)),
                pl.BlockSpec((cout, cout), lambda i, r: (0, 0)),
                pl.BlockSpec((1, cout), lambda i, r: (0, 0)),
                pl.BlockSpec((1, 1, cout), lambda i, r: (i, 0, 0)),
                pl.BlockSpec((1, 1, cout), lambda i, r: (i, 0, 0)),
            ],
            out_specs=pl.BlockSpec((1, rt, w2, cout), lambda i, r: (i, r, 0, 0)),
        ),
        compiler_params=pltpu.CompilerParams(
            dimension_semantics=("parallel", "arbitrary")),
    )(xp, w1t, b1, w2m, b2, fw3, fb3)


def final_conv9(x_nhwc, p, rt=8):
    n, h, wdt, cin = x_nhwc.shape
    cout = p["conv_b"].shape[0]
    assert h % rt == 0
    xp = _reflect_pad_nhwc(x_nhwc, 4)
    wt = _conv_taps(p["conv_w"])                   # (81, Cin, Cout)
    bb = p["conv_b"].reshape(1, cout)
    kern = functools.partial(_conv9x9_kernel, rt=rt)
    return pl.pallas_call(
        kern,
        out_shape=jax.ShapeDtypeStruct((n, h, wdt, cout), jnp.float32),
        grid_spec=pltpu.PrefetchScalarGridSpec(
            num_scalar_prefetch=0,
            grid=(n, h // rt),
            in_specs=[
                pl.BlockSpec((1, h + 8, wdt + 8, cin), lambda i, r: (i, 0, 0, 0)),
                pl.BlockSpec((81, cin, cout), lambda i, r: (0, 0, 0)),
                pl.BlockSpec((1, cout), lambda i, r: (0, 0)),
            ],
            out_specs=pl.BlockSpec((1, rt, wdt, cout), lambda i, r: (i, r, 0, 0)),
        ),
        compiler_params=pltpu.CompilerParams(
            dimension_semantics=("parallel", "arbitrary")),
    )(xp, wt, bb)


def decoder_forward(params, action, encs, alpha=1.0):
    """Pallas equivalent of Decoder.forward(action, encs, alpha). NCHW in/out."""
    _, s, wmod, bmod = encs
    x = _to_nhwc(action)
    x2 = adain_residual_block(x, _to_nhwc(s[1]), wmod[1], bmod[1],
                              params["dec1"], alpha)
    x4 = adain_residual_block(x2, _to_nhwc(s[0]), wmod[0], bmod[0],
                              params["dec2"], alpha)
    x5 = upsample_block(x4, s[6], s[7], params["dec3"])
    x6 = upsample_block(x5, s[4], s[5], params["dec4"])
    out = final_conv9(x6, params["dec5"])
    return _to_nchw(out)


# ---------------------------------------------------------------------------
# Pure-JAX reference (mirrors the PyTorch module) for correctness checking
# ---------------------------------------------------------------------------
def _ref_reflect_pad(x, p):
    return jnp.pad(x, ((0, 0), (0, 0), (p, p), (p, p)), mode="reflect")


def _ref_conv(x, wgt, bia, groups=1, pad=0):
    xp = _ref_reflect_pad(x, pad) if pad > 0 else x
    y = lax.conv_general_dilated(
        xp, wgt, window_strides=(1, 1), padding="VALID",
        dimension_numbers=("NCHW", "OIHW", "NCHW"),
        feature_group_count=groups, precision=lax.Precision.HIGHEST)
    return y + bia.reshape(1, -1, 1, 1)


def _ref_adain(x, s, eps=1e-5):
    cm = jnp.mean(x, axis=(2, 3), keepdims=True)
    cv = jnp.var(x, axis=(2, 3), keepdims=True)
    sm = jnp.mean(s, axis=(2, 3), keepdims=True)
    sv = jnp.var(s, axis=(2, 3), keepdims=True)
    return (x - cm) / jnp.sqrt(cv + eps) * jnp.sqrt(sv + eps) + sm


def _ref_residual(x, fw, fb, p):
    x1 = _ref_conv(x, p["conv1_w"], p["conv1_b"], groups=1, pad=1)
    x2 = fw * x1 + fb * x
    x3 = jax.nn.relu(x2)
    x4 = _ref_conv(x3, p["conv2_w"], p["conv2_b"], groups=1, pad=1)
    x5 = fw * x4 + fb * x3
    return x + x5


def _ref_up2(x):
    _, _, h, w = x.shape

    def idx(size):
        out = jnp.arange(2 * size)
        src = jnp.clip((out + 0.5) / 2.0 - 0.5, 0.0, size - 1.0)
        i0 = jnp.floor(src).astype(jnp.int32)
        i1 = jnp.minimum(i0 + 1, size - 1)
        return i0, i1, src - i0

    i0, i1, fh = idx(h)
    j0, j1, fw_ = idx(w)
    xh = (x[:, :, i0, :] * (1.0 - fh)[None, None, :, None]
          + x[:, :, i1, :] * fh[None, None, :, None])
    return (xh[:, :, :, j0] * (1.0 - fw_)[None, None, None, :]
            + xh[:, :, :, j1] * fw_[None, None, None, :])


def _ref_upsample(x, fw, fb, p):
    xu = _ref_up2(x)
    y1 = jax.nn.relu(_ref_conv(xu, p["conv1_w"], p["conv1_b"],
                               groups=p["conv1_w"].shape[0], pad=1))
    y2 = _ref_conv(y1, p["conv2_w"], p["conv2_b"], groups=1, pad=0)
    return jax.nn.relu(fw * y2 + fb * y1)


def _ref_decoder(params, action, encs, alpha=1.0):
    _, s, wmod, bmod = encs
    x1 = alpha * _ref_adain(action, s[1]) + (1.0 - alpha) * action
    x2 = _ref_residual(x1, wmod[1], bmod[1], params["dec1"])
    x3 = alpha * _ref_adain(x2, s[0]) + (1.0 - alpha) * x2
    x4 = _ref_residual(x3, wmod[0], bmod[0], params["dec2"])
    x5 = _ref_upsample(x4, s[6], s[7], params["dec3"])
    x6 = _ref_upsample(x5, s[4], s[5], params["dec4"])
    return _ref_conv(x6, params["dec5"]["conv_w"], params["dec5"]["conv_b"],
                     groups=1, pad=4)


# ---------------------------------------------------------------------------
# Test
# ---------------------------------------------------------------------------
if __name__ == "__main__":
    key = jax.random.PRNGKey(0)
    kit = iter(jax.random.split(key, 40))

    def conv_param(co, ci_per_group, k):
        bound = 1.0 / np.sqrt(ci_per_group * k * k)
        wgt = jax.random.uniform(next(kit), (co, ci_per_group, k, k),
                                 minval=-bound, maxval=bound, dtype=jnp.float32)
        bia = jax.random.uniform(next(kit), (co,),
                                 minval=-bound, maxval=bound, dtype=jnp.float32)
        return wgt, bia

    params = {}
    for name in ("dec1", "dec2"):
        w1_, b1_ = conv_param(64, 64, 3)
        w2_, b2_ = conv_param(64, 64, 3)
        params[name] = {"conv1_w": w1_, "conv1_b": b1_,
                        "conv2_w": w2_, "conv2_b": b2_}
    w1_, b1_ = conv_param(32, 2, 3)
    w2_, b2_ = conv_param(32, 32, 1)
    params["dec3"] = {"conv1_w": w1_, "conv1_b": b1_, "conv2_w": w2_, "conv2_b": b2_}
    w1_, b1_ = conv_param(16, 2, 3)
    w2_, b2_ = conv_param(16, 16, 1)
    params["dec4"] = {"conv1_w": w1_, "conv1_b": b1_, "conv2_w": w2_, "conv2_b": b2_}
    w5_, b5_ = conv_param(3, 16, 9)
    params["dec5"] = {"conv_w": w5_, "conv_b": b5_}

    N, H, W = 2, 16, 16
    action = jax.random.normal(next(kit), (N, 64, H, W), dtype=jnp.float32)
    s = [
        jax.random.normal(next(kit), (N, 64, H, W), dtype=jnp.float32),   # s[0]
        jax.random.normal(next(kit), (N, 64, H, W), dtype=jnp.float32),   # s[1]
        jnp.zeros((1,), jnp.float32),                                     # s[2] (unused)
        jnp.zeros((1,), jnp.float32),                                     # s[3] (unused)
        jax.random.normal(next(kit), (N, 16, 1, 1), dtype=jnp.float32),   # s[4]
        jax.random.normal(next(kit), (N, 16, 1, 1), dtype=jnp.float32),   # s[5]
        jax.random.normal(next(kit), (N, 32, 1, 1), dtype=jnp.float32),   # s[6]
        jax.random.normal(next(kit), (N, 32, 1, 1), dtype=jnp.float32),   # s[7]
    ]
    wmod = [jax.random.normal(next(kit), (N, 64, 1, 1), dtype=jnp.float32)
            for _ in range(2)]
    bmod = [jax.random.normal(next(kit), (N, 64, 1, 1), dtype=jnp.float32)
            for _ in range(2)]
    encs = (None, s, wmod, bmod)
    alpha = 0.75

    out = decoder_forward(params, action, encs, alpha=alpha)
    out = jax.block_until_ready(out)
    assert out.shape == (N, 3, 4 * H, 4 * W)

    ref = _ref_decoder(params, action, encs, alpha=alpha)
    ref = jax.block_until_ready(ref)
    np.testing.assert_allclose(np.asarray(out), np.asarray(ref),
                               rtol=1e-2, atol=1e-2)
    print("KERNEL_OK")
</pallas_src>

<mosaic_0001>
module attributes {stable_mosaic.version = 11 : i64} {
  func.func @_adain_residual_kernel(%arg0: i32, %arg1: memref<1x16x16x64xf32, #tpu.memory_space<vmem>>, %arg2: memref<1x16x16x64xf32, #tpu.memory_space<vmem>>, %arg3: memref<9x64x64xf32, #tpu.memory_space<vmem>>, %arg4: memref<1x64xf32, #tpu.memory_space<vmem>>, %arg5: memref<9x64x64xf32, #tpu.memory_space<vmem>>, %arg6: memref<1x64xf32, #tpu.memory_space<vmem>>, %arg7: memref<1x1x64xf32, #tpu.memory_space<vmem>>, %arg8: memref<1x1x64xf32, #tpu.memory_space<vmem>>, %arg9: memref<1x16x16x64xf32, #tpu.memory_space<vmem>>, %arg10: memref<18x25x64xf32, #tpu.memory_space<vmem>>) attributes {dimension_semantics = [#tpu.dimension_semantics<parallel>], iteration_bounds = array<i64: 2>, scalar_prefetch = 0 : i64, scratch_operands = 1 : i64, tpu.core_type = #tpu.core_type<tc>, window_params = [{transform_indices = @transform_0, window_bounds = array<i64: 1, 16, 16, 64>}, {transform_indices = @transform_1, window_bounds = array<i64: 1, 16, 16, 64>}, {pipeline_mode = #tpu.pipeline_mode<synchronous>, transform_indices = @transform_2, window_bounds = array<i64: 9, 64, 64>}, {pipeline_mode = #tpu.pipeline_mode<synchronous>, transform_indices = @transform_3, window_bounds = array<i64: 1, 64>}, {pipeline_mode = #tpu.pipeline_mode<synchronous>, transform_indices = @transform_4, window_bounds = array<i64: 9, 64, 64>}, {pipeline_mode = #tpu.pipeline_mode<synchronous>, transform_indices = @transform_5, window_bounds = array<i64: 1, 64>}, {transform_indices = @transform_6, window_bounds = array<i64: 1, 1, 64>}, {transform_indices = @transform_7, window_bounds = array<i64: 1, 1, 64>}, {transform_indices = @transform_8, window_bounds = array<i64: 1, 16, 16, 64>}]} {
    %c0 = arith.constant 0 : index
    %c0_0 = arith.constant 0 : index
    %c0_1 = arith.constant 0 : index
    %c0_2 = arith.constant 0 : index
    %0 = vector.load %arg1[%c0, %c0_0, %c0_1, %c0_2] : memref<1x16x16x64xf32, #tpu.memory_space<vmem>>, vector<1x16x16x64xf32>
    %1 = vector.shape_cast %0 : vector<1x16x16x64xf32> to vector<16x16x64xf32>
    %c0_3 = arith.constant 0 : index
    %c0_4 = arith.constant 0 : index
    %c0_5 = arith.constant 0 : index
    %c0_6 = arith.constant 0 : index
    %2 = vector.load %arg2[%c0_3, %c0_4, %c0_5, %c0_6] : memref<1x16x16x64xf32, #tpu.memory_space<vmem>>, vector<1x16x16x64xf32>
    %3 = vector.shape_cast %2 : vector<1x16x16x64xf32> to vector<16x16x64xf32>
    %cst = arith.constant dense<0.000000e+00> : vector<16x64xf32>
    %4 = vector.multi_reduction <add>, %1, %cst [0] : vector<16x16x64xf32> to vector<16x64xf32>
    %cst_7 = arith.constant dense<0.000000e+00> : vector<64xf32>
    %5 = vector.multi_reduction <add>, %4, %cst_7 [0] : vector<16x64xf32> to vector<64xf32>
    %6 = vector.shape_cast %5 : vector<64xf32> to vector<1x64xf32>
    %7 = arith.mulf %1, %1 : vector<16x16x64xf32>
    %cst_8 = arith.constant dense<0.000000e+00> : vector<16x64xf32>
    %8 = vector.multi_reduction <add>, %7, %cst_8 [0] : vector<16x16x64xf32> to vector<16x64xf32>
    %cst_9 = arith.constant dense<0.000000e+00> : vector<64xf32>
    %9 = vector.multi_reduction <add>, %8, %cst_9 [0] : vector<16x64xf32> to vector<64xf32>
    %10 = vector.shape_cast %9 : vector<64xf32> to vector<1x64xf32>
    %cst_10 = arith.constant 2.560000e+02 : f32
    %11 = vector.broadcast %cst_10 : f32 to vector<1x64xf32>
    %12 = arith.divf %6, %11 : vector<1x64xf32>
    %cst_11 = arith.constant 2.560000e+02 : f32
    %13 = vector.broadcast %cst_11 : f32 to vector<1x64xf32>
    %14 = arith.divf %10, %13 : vector<1x64xf32>
    %15 = arith.mulf %12, %12 : vector<1x64xf32>
    %16 = arith.subf %14, %15 : vector<1x64xf32>
    %cst_12 = arith.constant 0.000000e+00 : f32
    %17 = vector.broadcast %cst_12 : f32 to vector<1x64xf32>
    %18 = arith.maximumf %16, %17 : vector<1x64xf32>
    %cst_13 = arith.constant dense<0.000000e+00> : vector<16x64xf32>
    %19 = vector.multi_reduction <add>, %3, %cst_13 [0] : vector<16x16x64xf32> to vector<16x64xf32>
    %cst_14 = arith.constant dense<0.000000e+00> : vector<64xf32>
    %20 = vector.multi_reduction <add>, %19, %cst_14 [0] : vector<16x64xf32> to vector<64xf32>
    %21 = vector.shape_cast %20 : vector<64xf32> to vector<1x64xf32>
    %22 = arith.mulf %3, %3 : vector<16x16x64xf32>
    %cst_15 = arith.constant dense<0.000000e+00> : vector<16x64xf32>
    %23 = vector.multi_reduction <add>, %22, %cst_15 [0] : vector<16x16x64xf32> to vector<16x64xf32>
    %cst_16 = arith.constant dense<0.000000e+00> : vector<64xf32>
    %24 = vector.multi_reduction <add>, %23, %cst_16 [0] : vector<16x64xf32> to vector<64xf32>
    %25 = vector.shape_cast %24 : vector<64xf32> to vector<1x64xf32>
    %cst_17 = arith.constant 2.560000e+02 : f32
    %26 = vector.broadcast %cst_17 : f32 to vector<1x64xf32>
    %27 = arith.divf %21, %26 : vector<1x64xf32>
    %cst_18 = arith.constant 2.560000e+02 : f32
    %28 = vector.broadcast %cst_18 : f32 to vector<1x64xf32>
    %29 = arith.divf %25, %28 : vector<1x64xf32>
    %30 = arith.mulf %27, %27 : vector<1x64xf32>
    %31 = arith.subf %29, %30 : vector<1x64xf32>
    %cst_19 = arith.constant 0.000000e+00 : f32
    %32 = vector.broadcast %cst_19 : f32 to vector<1x64xf32>
    %33 = arith.maximumf %31, %32 : vector<1x64xf32>
    %34 = vector.shape_cast %12 : vector<1x64xf32> to vector<1x1x64xf32>
    %35 = vector.broadcast %34 : vector<1x1x64xf32> to vector<16x16x64xf32>
    %36 = arith.subf %1, %35 : vector<16x16x64xf32>
    %cst_20 = arith.constant 9.99999974E-6 : f32
    %37 = vector.broadcast %cst_20 : f32 to vector<1x64xf32>
    %38 = arith.addf %18, %37 : vector<1x64xf32>
    %39 = math.rsqrt %38 : vector<1x64xf32>
    %40 = vector.shape_cast %39 : vector<1x64xf32> to vector<1x1x64xf32>
    %41 = vector.broadcast %40 : vector<1x1x64xf32> to vector<16x16x64xf32>
    %42 = arith.mulf %36, %41 : vector<16x16x64xf32>
    %cst_21 = arith.constant 9.99999974E-6 : f32
    %43 = vector.broadcast %cst_21 : f32 to vector<1x64xf32>
    %44 = arith.addf %33, %43 : vector<1x64xf32>
    %45 = math.sqrt %44 : vector<1x64xf32>
    %46 = vector.shape_cast %45 : vector<1x64xf32> to vector<1x1x64xf32>
    %47 = vector.broadcast %46 : vector<1x1x64xf32> to vector<16x16x64xf32>
    %48 = arith.mulf %42, %47 : vector<16x16x64xf32>
    %49 = vector.shape_cast %27 : vector<1x64xf32> to vector<1x1x64xf32>
    %50 = vector.broadcast %49 : vector<1x1x64xf32> to vector<16x16x64xf32>
    %51 = arith.addf %48, %50 : vector<16x16x64xf32>
    %cst_22 = arith.constant 7.500000e-01 : f32
    %52 = vector.broadcast %cst_22 : f32 to vector<16x16x64xf32>
    %53 = arith.mulf %52, %51 : vector<16x16x64xf32>
    %cst_23 = arith.constant 2.500000e-01 : f32
    %54 = vector.broadcast %cst_23 : f32 to vector<16x16x64xf32>
    %55 = arith.mulf %54, %1 : vector<16x16x64xf32>
    %56 = arith.addf %53, %55 : vector<16x16x64xf32>
    %c0_24 = arith.constant 0 : index
    %c0_25 = arith.constant 0 : index
    %c0_26 = arith.constant 0 : index
    %57 = vector.load %arg7[%c0_24, %c0_25, %c0_26] : memref<1x1x64xf32, #tpu.memory_space<vmem>>, vector<1x1x64xf32>
    %58 = vector.shape_cast %57 : vector<1x1x64xf32> to vector<1x64xf32>
    %c0_27 = arith.constant 0 : index
    %c0_28 = arith.constant 0 : index
    %c0_29 = arith.constant 0 : index
    %59 = vector.load %arg8[%c0_27, %c0_28, %c0_29] : memref<1x1x64xf32, #tpu.memory_space<vmem>>, vector<1x1x64xf32>
    %60 = vector.shape_cast %59 : vector<1x1x64xf32> to vector<1x64xf32>
    %61 = vector.shape_cast %56 : vector<16x16x64xf32> to vector<256x64xf32>
    %c1 = arith.constant 1 : index
    %c8 = arith.constant 8 : index
    %c0_30 = arith.constant 0 : index
    %62 = vector.load %arg10[%c1, %c8, %c0_30] : memref<18x25x64xf32, #tpu.memory_space<vmem>>, vector<16x16x64xf32>
    tpu.vector_store %arg10[%c1, %c8, %c0_30], %56 {strides = array<i32>} : memref<18x25x64xf32, #tpu.memory_space<vmem>>, vector<16x16x64xf32>,
    %63 = vector.extract_strided_slice %56 {offsets = [1, 0, 0], sizes = [1, 16, 64], strides = [1, 1, 1]} : vector<16x16x64xf32> to vector<1x16x64xf32>
    %c0_31 = arith.constant 0 : index
    %c8_32 = arith.constant 8 : index
    %c0_33 = arith.constant 0 : index
    %64 = vector.load %arg10[%c0_31, %c8_32, %c0_33] : memref<18x25x64xf32, #tpu.memory_space<vmem>>, vector<1x16x64xf32>
    tpu.vector_store %arg10[%c0_31, %c8_32, %c0_33], %63 {strides = array<i32>} : memref<18x25x64xf32, #tpu.memory_space<vmem>>, vector<1x16x64xf32>,
    %65 = vector.extract_strided_slice %56 {offsets = [14, 0, 0], sizes = [1, 16, 64], strides = [1, 1, 1]} : vector<16x16x64xf32> to vector<1x16x64xf32>
    %c17 = arith.constant 17 : index
    %c8_34 = arith.constant 8 : index
    %c0_35 = arith.constant 0 : index
    %66 = vector.load %arg10[%c17, %c8_34, %c0_35] : memref<18x25x64xf32, #tpu.memory_space<vmem>>, vector<1x16x64xf32>
    tpu.vector_store %arg10[%c17, %c8_34, %c0_35], %65 {strides = array<i32>} : memref<18x25x64xf32, #tpu.memory_space<vmem>>, vector<1x16x64xf32>,
    %c0_36 = arith.constant 0 : index
    %c9 = arith.constant 9 : index
    %c0_37 = arith.constant 0 : index
    %67 = vector.load %arg10[%c0_36, %c9, %c0_37] : memref<18x25x64xf32, #tpu.memory_space<vmem>>, vector<18x1x64xf32>
    %c0_38 = arith.constant 0 : index
    %c7 = arith.constant 7 : index
    %c0_39 = arith.constant 0 : index
    %68 = vector.load %arg10[%c0_38, %c7, %c0_39] : memref<18x25x64xf32, #tpu.memory_space<vmem>>, vector<18x1x64xf32>
    tpu.vector_store %arg10[%c0_38, %c7, %c0_39], %67 {strides = array<i32>} : memref<18x25x64xf32, #tpu.memory_space<vmem>>, vector<18x1x64xf32>,
    %c0_40 = arith.constant 0 : index
    %c22 = arith.constant 22 : index
    %c0_41 = arith.constant 0 : index
    %69 = vector.load %arg10[%c0_40, %c22, %c0_41] : memref<18x25x64xf32, #tpu.memory_space<vmem>>, vector<18x1x64xf32>
    %c0_42 = arith.constant 0 : index
    %c24 = arith.constant 24 : index
    %c0_43 = arith.constant 0 : index
    %70 = vector.load %arg10[%c0_42, %c24, %c0_43] : memref<18x25x64xf32, #tpu.memory_space<vmem>>, vector<18x1x64xf32>
    tpu.vector_store %arg10[%c0_42, %c24, %c0_43], %69 {strides = array<i32>} : memref<18x25x64xf32, #tpu.memory_space<vmem>>, vector<18x1x64xf32>,
    %cst_44 = arith.constant 0.000000e+00 : f32
    %71 = vector.broadcast %cst_44 : f32 to vector<256x64xf32>
    %c0_45 = arith.constant 0 : index
    %c7_46 = arith.constant 7 : index
    %c0_47 = arith.constant 0 : index
    %72 = vector.load %arg10[%c0_45, %c7_46, %c0_47] : memref<18x25x64xf32, #tpu.memory_space<vmem>>, vector<16x16x64xf32>
    %73 = vector.shape_cast %72 : vector<16x16x64xf32> to vector<256x64xf32>
    %c0_48 = arith.constant 0 : index
    %c0_49 = arith.constant 0 : index
    %c0_50 = arith.constant 0 : index
    %74 = vector.load %arg3[%c0_48, %c0_49, %c0_50] : memref<9x64x64xf32, #tpu.memory_space<vmem>>, vector<1x64x64xf32>
    %75 = vector.shape_cast %74 : vector<1x64x64xf32> to vector<64x64xf32>
    %cst_51 = arith.constant dense<0.000000e+00> : vector<256x64xf32>
    %76 = tpu.matmul %73, %75, %cst_51 {dimension_numbers = #tpu.dot_dimension_numbers<[1], [0], [0], [1], [0, 0, 1, 1], [], []>} : vector<256x64xf32>, vector<64x64xf32>, vector<256x64xf32> -> vector<256x64xf32>
    %77 = arith.addf %71, %76 : vector<256x64xf32>
    %c0_52 = arith.constant 0 : index
    %c8_53 = arith.constant 8 : index
    %c0_54 = arith.constant 0 : index
    %78 = vector.load %arg10[%c0_52, %c8_53, %c0_54] : memref<18x25x64xf32, #tpu.memory_space<vmem>>, vector<16x16x64xf32>
    %79 = vector.shape_cast %78 : vector<16x16x64xf32> to vector<256x64xf32>
    %c1_55 = arith.constant 1 : index
    %c0_56 = arith.constant 0 : index
    %c0_57 = arith.constant 0 : index
    %80 = vector.load %arg3[%c1_55, %c0_56, %c0_57] : memref<9x64x64xf32, #tpu.memory_space<vmem>>, vector<1x64x64xf32>
    %81 = vector.shape_cast %80 : vector<1x64x64xf32> to vector<64x64xf32>
    %cst_58 = arith.constant dense<0.000000e+00> : vector<256x64xf32>
    %82 = tpu.matmul %79, %81, %cst_58 {dimension_numbers = #tpu.dot_dimension_numbers<[1], [0], [0], [1], [0, 0, 1, 1], [], []>} : vector<256x64xf32>, vector<64x64xf32>, vector<256x64xf32> -> vector<256x64xf32>
    %83 = arith.addf %77, %82 : vector<256x64xf32>
    %c0_59 = arith.constant 0 : index
    %c9_60 = arith.constant 9 : index
    %c0_61 = arith.constant 0 : index
    %84 = vector.load %arg10[%c0_59, %c9_60, %c0_61] : memref<18x25x64xf32, #tpu.memory_space<vmem>>, vector<16x16x64xf32>
    %85 = vector.shape_cast %84 : vector<16x16x64xf32> to vector<256x64xf32>
    %c2 = arith.constant 2 : index
    %c0_62 = arith.constant 0 : index
    %c0_63 = arith.constant 0 : index
    %86 = vector.load %arg3[%c2, %c0_62, %c0_63] : memref<9x64x64xf32, #tpu.memory_space<vmem>>, vector<1x64x64xf32>
    %87 = vector.shape_cast %86 : vector<1x64x64xf32> to vector<64x64xf32>
    %cst_64 = arith.constant dense<0.000000e+00> : vector<256x64xf32>
    %88 = tpu.matmul %85, %87, %cst_64 {dimension_numbers = #tpu.dot_dimension_numbers<[1], [0], [0], [1], [0, 0, 1, 1], [], []>} : vector<256x64xf32>, vector<64x64xf32>, vector<256x64xf32> -> vector<256x64xf32>
    %89 = arith.addf %83, %88 : vector<256x64xf32>
    %c1_65 = arith.constant 1 : index
    %c7_66 = arith.constant 7 : index
    %c0_67 = arith.constant 0 : index
    %90 = vector.load %arg10[%c1_65, %c7_66, %c0_67] : memref<18x25x64xf32, #tpu.memory_space<vmem>>, vector<16x16x64xf32>
    %91 = vector.shape_cast %90 : vector<16x16x64xf32> to vector<256x64xf32>
    %c3 = arith.constant 3 : index
    %c0_68 = arith.constant 0 : index
    %c0_69 = arith.constant 0 : index
    %92 = vector.load %arg3[%c3, %c0_68, %c0_69] : memref<9x64x64xf32, #tpu.memory_space<vmem>>, vector<1x64x64xf32>
    %93 = vector.shape_cast %92 : vector<1x64x64xf32> to vector<64x64xf32>
    %cst_70 = arith.constant dense<0.000000e+00> : vector<256x64xf32>
    %94 = tpu.matmul %91, %93, %cst_70 {dimension_numbers = #tpu.dot_dimension_numbers<[1], [0], [0], [1], [0, 0, 1, 1], [], []>} : vector<256x64xf32>, vector<64x64xf32>, vector<256x64xf32> -> vector<256x64xf32>
    %95 = arith.addf %89, %94 : vector<256x64xf32>
    %c1_71 = arith.constant 1 : index
    %c8_72 = arith.constant 8 : index
    %c0_73 = arith.constant 0 : index
    %96 = vector.load %arg10[%c1_71, %c8_72, %c0_73] : memref<18x25x64xf32, #tpu.memory_space<vmem>>, vector<16x16x64xf32>
    %97 = vector.shape_cast %96 : vector<16x16x64xf32> to vector<256x64xf32>
    %c4 = arith.constant 4 : index
    %c0_74 = arith.constant 0 : index
    %c0_75 = arith.constant 0 : index
    %98 = vector.load %arg3[%c4, %c0_74, %c0_75] : memref<9x64x64xf32, #tpu.memory_space<vmem>>, vector<1x64x64xf32>
    %99 = vector.shape_cast %98 : vector<1x64x64xf32> to vector<64x64xf32>
    %cst_76 = arith.constant dense<0.000000e+00> : vector<256x64xf32>
    %100 = tpu.matmul %97, %99, %cst_76 {dimension_numbers = #tpu.dot_dimension_numbers<[1], [0], [0], [1], [0, 0, 1, 1], [], []>} : vector<256x64xf32>, vector<64x64xf32>, vector<256x64xf32> -> vector<256x64xf32>
    %101 = arith.addf %95, %100 : vector<256x64xf32>
    %c1_77 = arith.constant 1 : index
    %c9_78 = arith.constant 9 : index
    %c0_79 = arith.constant 0 : index
    %102 = vector.load %arg10[%c1_77, %c9_78, %c0_79] : memref<18x25x64xf32, #tpu.memory_space<vmem>>, vector<16x16x64xf32>
    %103 = vector.shape_cast %102 : vector<16x16x64xf32> to vector<256x64xf32>
    %c5 = arith.constant 5 : index
    %c0_80 = arith.constant 0 : index
    %c0_81 = arith.constant 0 : index
    %104 = vector.load %arg3[%c5, %c0_80, %c0_81] : memref<9x64x64xf32, #tpu.memory_space<vmem>>, vector<1x64x64xf32>
    %105 = vector.shape_cast %104 : vector<1x64x64xf32> to vector<64x64xf32>
    %cst_82 = arith.constant dense<0.000000e+00> : vector<256x64xf32>
    %106 = tpu.matmul %103, %105, %cst_82 {dimension_numbers = #tpu.dot_dimension_numbers<[1], [0], [0], [1], [0, 0, 1, 1], [], []>} : vector<256x64xf32>, vector<64x64xf32>, vector<256x64xf32> -> vector<256x64xf32>
    %107 = arith.addf %101, %106 : vector<256x64xf32>
    %c2_83 = arith.constant 2 : index
    %c7_84 = arith.constant 7 : index
    %c0_85 = arith.constant 0 : index
    %108 = vector.load %arg10[%c2_83, %c7_84, %c0_85] : memref<18x25x64xf32, #tpu.memory_space<vmem>>, vector<16x16x64xf32>
    %109 = vector.shape_cast %108 : vector<16x16x64xf32> to vector<256x64xf32>
    %c6 = arith.constant 6 : index
    %c0_86 = arith.constant 0 : index
    %c0_87 = arith.constant 0 : index
    %110 = vector.load %arg3[%c6, %c0_86, %c0_87] : memref<9x64x64xf32, #tpu.memory_space<vmem>>, vector<1x64x64xf32>
    %111 = vector.shape_cast %110 : vector<1x64x64xf32> to vector<64x64xf32>
    %cst_88 = arith.constant dense<0.000000e+00> : vector<256x64xf32>
    %112 = tpu.matmul %109, %111, %cst_88 {dimension_numbers = #tpu.dot_dimension_numbers<[1], [0], [0], [1], [0, 0, 1, 1], [], []>} : vector<256x64xf32>, vector<64x64xf32>, vector<256x64xf32> -> vector<256x64xf32>
    %113 = arith.addf %107, %112 : vector<256x64xf32>
    %c2_89 = arith.constant 2 : index
    %c8_90 = arith.constant 8 : index
    %c0_91 = arith.constant 0 : index
    %114 = vector.load %arg10[%c2_89, %c8_90, %c0_91] : memref<18x25x64xf32, #tpu.memory_space<vmem>>, vector<16x16x64xf32>
    %115 = vector.shape_cast %114 : vector<16x16x64xf32> to vector<256x64xf32>
    %c7_92 = arith.constant 7 : index
    %c0_93 = arith.constant 0 : index
    %c0_94 = arith.constant 0 : index
    %116 = vector.load %arg3[%c7_92, %c0_93, %c0_94] : memref<9x64x64xf32, #tpu.memory_space<vmem>>, vector<1x64x64xf32>
    %117 = vector.shape_cast %116 : vector<1x64x64xf32> to vector<64x64xf32>
    %cst_95 = arith.constant dense<0.000000e+00> : vector<256x64xf32>
    %118 = tpu.matmul %115, %117, %cst_95 {dimension_numbers = #tpu.dot_dimension_numbers<[1], [0], [0], [1], [0, 0, 1, 1], [], []>} : vector<256x64xf32>, vector<64x64xf32>, vector<256x64xf32> -> vector<256x64xf32>
    %119 = arith.addf %113, %118 : vector<256x64xf32>
    %c2_96 = arith.constant 2 : index
    %c9_97 = arith.constant 9 : index
    %c0_98 = arith.constant 0 : index
    %120 = vector.load %arg10[%c2_96, %c9_97, %c0_98] : memref<18x25x64xf32, #tpu.memory_space<vmem>>, vector<16x16x64xf32>
    %121 = vector.shape_cast %120 : vector<16x16x64xf32> to vector<256x64xf32>
    %c8_99 = arith.constant 8 : index
    %c0_100 = arith.constant 0 : index
    %c0_101 = arith.constant 0 : index
    %122 = vector.load %arg3[%c8_99, %c0_100, %c0_101] : memref<9x64x64xf32, #tpu.memory_space<vmem>>, vector<1x64x64xf32>
    %123 = vector.shape_cast %122 : vector<1x64x64xf32> to vector<64x64xf32>
    %cst_102 = arith.constant dense<0.000000e+00> : vector<256x64xf32>
    %124 = tpu.matmul %121, %123, %cst_102 {dimension_numbers = #tpu.dot_dimension_numbers<[1], [0], [0], [1], [0, 0, 1, 1], [], []>} : vector<256x64xf32>, vector<64x64xf32>, vector<256x64xf32> -> vector<256x64xf32>
    %125 = arith.addf %119, %124 : vector<256x64xf32>
    %c0_103 = arith.constant 0 : index
    %c0_104 = arith.constant 0 : index
    %126 = vector.load %arg4[%c0_103, %c0_104] : memref<1x64xf32, #tpu.memory_space<vmem>>, vector<1x64xf32>
    %127 = vector.broadcast %126 : vector<1x64xf32> to vector<256x64xf32>
    %128 = arith.addf %125, %127 : vector<256x64xf32>
    %129 = vector.broadcast %58 : vector<1x64xf32> to vector<256x64xf32>
    %130 = arith.mulf %129, %128 : vector<256x64xf32>
    %131 = vector.broadcast %60 : vector<1x64xf32> to vector<256x64xf32>
    %132 = arith.mulf %131, %61 : vector<256x64xf32>
    %133 = arith.addf %130, %132 : vector<256x64xf32>
    %cst_105 = arith.constant 0.000000e+00 : f32
    %134 = vector.broadcast %cst_105 : f32 to vector<256x64xf32>
    %135 = arith.maximumf %133, %134 : vector<256x64xf32>
    %136 = vector.shape_cast %135 : vector<256x64xf32> to vector<16x16x64xf32>
    %c1_106 = arith.constant 1 : index
    %c8_107 = arith.constant 8 : index
    %c0_108 = arith.constant 0 : index
    %137 = vector.load %arg10[%c1_106, %c8_107, %c0_108] : memref<18x25x64xf32, #tpu.memory_space<vmem>>, vector<16x16x64xf32>
    tpu.vector_store %arg10[%c1_106, %c8_107, %c0_108], %136 {strides = array<i32>} : memref<18x25x64xf32, #tpu.memory_space<vmem>>, vector<16x16x64xf32>,
    %138 = vector.extract_strided_slice %136 {offsets = [1, 0, 0], sizes = [1, 16, 64], strides = [1, 1, 1]} : vector<16x16x64xf32> to vector<1x16x64xf32>
    %c0_109 = arith.constant 0 : index
    %c8_110 = arith.constant 8 : index
    %c0_111 = arith.constant 0 : index
    %139 = vector.load %arg10[%c0_109, %c8_110, %c0_111] : memref<18x25x64xf32, #tpu.memory_space<vmem>>, vector<1x16x64xf32>
    tpu.vector_store %arg10[%c0_109, %c8_110, %c0_111], %138 {strides = array<i32>} : memref<18x25x64xf32, #tpu.memory_space<vmem>>, vector<1x16x64xf32>,
    %140 = vector.extract_strided_slice %136 {offsets = [14, 0, 0], sizes = [1, 16, 64], strides = [1, 1, 1]} : vector<16x16x64xf32> to vector<1x16x64xf32>
    %c17_112 = arith.constant 17 : index
    %c8_113 = arith.constant 8 : index
    %c0_114 = arith.constant 0 : index
    %141 = vector.load %arg10[%c17_112, %c8_113, %c0_114] : memref<18x25x64xf32, #tpu.memory_space<vmem>>, vector<1x16x64xf32>
    tpu.vector_store %arg10[%c17_112, %c8_113, %c0_114], %140 {strides = array<i32>} : memref<18x25x64xf32, #tpu.memory_space<vmem>>, vector<1x16x64xf32>,
    %c0_115 = arith.constant 0 : index
    %c9_116 = arith.constant 9 : index
    %c0_117 = arith.constant 0 : index
    %142 = vector.load %arg10[%c0_115, %c9_116, %c0_117] : memref<18x25x64xf32, #tpu.memory_space<vmem>>, vector<18x1x64xf32>
    %c0_118 = arith.constant 0 : index
    %c7_119 = arith.constant 7 : index
    %c0_120 = arith.constant 0 : index
    %143 = vector.load %arg10[%c0_118, %c7_119, %c0_120] : memref<18x25x64xf32, #tpu.memory_space<vmem>>, vector<18x1x64xf32>
    tpu.vector_store %arg10[%c0_118, %c7_119, %c0_120], %142 {strides = array<i32>} : memref<18x25x64xf32, #tpu.memory_space<vmem>>, vector<18x1x64xf32>,
    %c0_121 = arith.constant 0 : index
    %c22_122 = arith.constant 22 : index
    %c0_123 = arith.constant 0 : index
    %144 = vector.load %arg10[%c0_121, %c22_122, %c0_123] : memref<18x25x64xf32, #tpu.memory_space<vmem>>, vector<18x1x64xf32>
    %c0_124 = arith.constant 0 : index
    %c24_125 = arith.constant 24 : index
    %c0_126 = arith.constant 0 : index
    %145 = vector.load %arg10[%c0_124, %c24_125, %c0_126] : memref<18x25x64xf32, #tpu.memory_space<vmem>>, vector<18x1x64xf32>
    tpu.vector_store %arg10[%c0_124, %c24_125, %c0_126], %144 {strides = array<i32>} : memref<18x25x64xf32, #tpu.memory_space<vmem>>, vector<18x1x64xf32>,
    %cst_127 = arith.constant 0.000000e+00 : f32
    %146 = vector.broadcast %cst_127 : f32 to vector<256x64xf32>
    %c0_128 = arith.constant 0 : index
    %c7_129 = arith.constant 7 : index
    %c0_130 = arith.constant 0 : index
    %147 = vector.load %arg10[%c0_128, %c7_129, %c0_130] : memref<18x25x64xf32, #tpu.memory_space<vmem>>, vector<16x16x64xf32>
    %148 = vector.shape_cast %147 : vector<16x16x64xf32> to vector<256x64xf32>
    %c0_131 = arith.constant 0 : index
    %c0_132 = arith.constant 0 : index
    %c0_133 = arith.constant 0 : index
    %149 = vector.load %arg5[%c0_131, %c0_132, %c0_133] : memref<9x64x64xf32, #tpu.memory_space<vmem>>, vector<1x64x64xf32>
    %150 = vector.shape_cast %149 : vector<1x64x64xf32> to vector<64x64xf32>
    %cst_134 = arith.constant dense<0.000000e+00> : vector<256x64xf32>
    %151 = tpu.matmul %148, %150, %cst_134 {dimension_numbers = #tpu.dot_dimension_numbers<[1], [0], [0], [1], [0, 0, 1, 1], [], []>} : vector<256x64xf32>, vector<64x64xf32>, vector<256x64xf32> -> vector<256x64xf32>
    %152 = arith.addf %146, %151 : vector<256x64xf32>
    %c0_135 = arith.constant 0 : index
    %c8_136 = arith.constant 8 : index
    %c0_137 = arith.constant 0 : index
    %153 = vector.load %arg10[%c0_135, %c8_136, %c0_137] : memref<18x25x64xf32, #tpu.memory_space<vmem>>, vector<16x16x64xf32>
    %154 = vector.shape_cast %153 : vector<16x16x64xf32> to vector<256x64xf32>
    %c1_138 = arith.constant 1 : index
    %c0_139 = arith.constant 0 : index
    %c0_140 = arith.constant 0 : index
    %155 = vector.load %arg5[%c1_138, %c0_139, %c0_140] : memref<9x64x64xf32, #tpu.memory_space<vmem>>, vector<1x64x64xf32>
    %156 = vector.shape_cast %155 : vector<1x64x64xf32> to vector<64x64xf32>
    %cst_141 = arith.constant dense<0.000000e+00> : vector<256x64xf32>
    %157 = tpu.matmul %154, %156, %cst_141 {dimension_numbers = #tpu.dot_dimension_numbers<[1], [0], [0], [1], [0, 0, 1, 1], [], []>} : vector<256x64xf32>, vector<64x64xf32>, vector<256x64xf32> -> vector<256x64xf32>
    %158 = arith.addf %152, %157 : vector<256x64xf32>
    %c0_142 = arith.constant 0 : index
    %c9_143 = arith.constant 9 : index
    %c0_144 = arith.constant 0 : index
    %159 = vector.load %arg10[%c0_142, %c9_143, %c0_144] : memref<18x25x64xf32, #tpu.memory_space<vmem>>, vector<16x16x64xf32>
    %160 = vector.shape_cast %159 : vector<16x16x64xf32> to vector<256x64xf32>
    %c2_145 = arith.constant 2 : index
    %c0_146 = arith.constant 0 : index
    %c0_147 = arith.constant 0 : index
    %161 = vector.load %arg5[%c2_145, %c0_146, %c0_147] : memref<9x64x64xf32, #tpu.memory_space<vmem>>, vector<1x64x64xf32>
    %162 = vector.shape_cast %161 : vector<1x64x64xf32> to vector<64x64xf32>
    %cst_148 = arith.constant dense<0.000000e+00> : vector<256x64xf32>
    %163 = tpu.matmul %160, %162, %cst_148 {dimension_numbers = #tpu.dot_dimension_numbers<[1], [0], [0], [1], [0, 0, 1, 1], [], []>} : vector<256x64xf32>, vector<64x64xf32>, vector<256x64xf32> -> vector<256x64xf32>
    %164 = arith.addf %158, %163 : vector<256x64xf32>
    %c1_149 = arith.constant 1 : index
    %c7_150 = arith.constant 7 : index
    %c0_151 = arith.constant 0 : index
    %165 = vector.load %arg10[%c1_149, %c7_150, %c0_151] : memref<18x25x64xf32, #tpu.memory_space<vmem>>, vector<16x16x64xf32>
    %166 = vector.shape_cast %165 : vector<16x16x64xf32> to vector<256x64xf32>
    %c3_152 = arith.constant 3 : index
    %c0_153 = arith.constant 0 : index
    %c0_154 = arith.constant 0 : index
    %167 = vector.load %arg5[%c3_152, %c0_153, %c0_154] : memref<9x64x64xf32, #tpu.memory_space<vmem>>, vector<1x64x64xf32>
    %168 = vector.shape_cast %167 : vector<1x64x64xf32> to vector<64x64xf32>
    %cst_155 = arith.constant dense<0.000000e+00> : vector<256x64xf32>
    %169 = tpu.matmul %166, %168, %cst_155 {dimension_numbers = #tpu.dot_dimension_numbers<[1], [0], [0], [1], [0, 0, 1, 1], [], []>} : vector<256x64xf32>, vector<64x64xf32>, vector<256x64xf32> -> vector<256x64xf32>
    %170 = arith.addf %164, %169 : vector<256x64xf32>
    %c1_156 = arith.constant 1 : index
    %c8_157 = arith.constant 8 : index
    %c0_158 = arith.constant 0 : index
    %171 = vector.load %arg10[%c1_156, %c8_157, %c0_158] : memref<18x25x64xf32, #tpu.memory_space<vmem>>, vector<16x16x64xf32>
    %172 = vector.shape_cast %171 : vector<16x16x64xf32> to vector<256x64xf32>
    %c4_159 = arith.constant 4 : index
    %c0_160 = arith.constant 0 : index
    %c0_161 = arith.constant 0 : index
    %173 = vector.load %arg5[%c4_159, %c0_160, %c0_161] : memref<9x64x64xf32, #tpu.memory_space<vmem>>, vector<1x64x64xf32>
    %174 = vector.shape_cast %173 : vector<1x64x64xf32> to vector<64x64xf32>
    %cst_162 = arith.constant dense<0.000000e+00> : vector<256x64xf32>
    %175 = tpu.matmul %172, %174, %cst_162 {dimension_numbers = #tpu.dot_dimension_numbers<[1], [0], [0], [1], [0, 0, 1, 1], [], []>} : vector<256x64xf32>, vector<64x64xf32>, vector<256x64xf32> -> vector<256x64xf32>
    %176 = arith.addf %170, %175 : vector<256x64xf32>
    %c1_163 = arith.constant 1 : index
    %c9_164 = arith.constant 9 : index
    %c0_165 = arith.constant 0 : index
    %177 = vector.load %arg10[%c1_163, %c9_164, %c0_165] : memref<18x25x64xf32, #tpu.memory_space<vmem>>, vector<16x16x64xf32>
    %178 = vector.shape_cast %177 : vector<16x16x64xf32> to vector<256x64xf32>
    %c5_166 = arith.constant 5 : index
    %c0_167 = arith.constant 0 : index
    %c0_168 = arith.constant 0 : index
    %179 = vector.load %arg5[%c5_166, %c0_167, %c0_168] : memref<9x64x64xf32, #tpu.memory_space<vmem>>, vector<1x64x64xf32>
    %180 = vector.shape_cast %179 : vector<1x64x64xf32> to vector<64x64xf32>
    %cst_169 = arith.constant dense<0.000000e+00> : vector<256x64xf32>
    %181 = tpu.matmul %178, %180, %cst_169 {dimension_numbers = #tpu.dot_dimension_numbers<[1], [0], [0], [1], [0, 0, 1, 1], [], []>} : vector<256x64xf32>, vector<64x64xf32>, vector<256x64xf32> -> vector<256x64xf32>
    %182 = arith.addf %176, %181 : vector<256x64xf32>
    %c2_170 = arith.constant 2 : index
    %c7_171 = arith.constant 7 : index
    %c0_172 = arith.constant 0 : index
    %183 = vector.load %arg10[%c2_170, %c7_171, %c0_172] : memref<18x25x64xf32, #tpu.memory_space<vmem>>, vector<16x16x64xf32>
    %184 = vector.shape_cast %183 : vector<16x16x64xf32> to vector<256x64xf32>
    %c6_173 = arith.constant 6 : index
    %c0_174 = arith.constant 0 : index
    %c0_175 = arith.constant 0 : index
    %185 = vector.load %arg5[%c6_173, %c0_174, %c0_175] : memref<9x64x64xf32, #tpu.memory_space<vmem>>, vector<1x64x64xf32>
    %186 = vector.shape_cast %185 : vector<1x64x64xf32> to vector<64x64xf32>
    %cst_176 = arith.constant dense<0.000000e+00> : vector<256x64xf32>
    %187 = tpu.matmul %184, %186, %cst_176 {dimension_numbers = #tpu.dot_dimension_numbers<[1], [0], [0], [1], [0, 0, 1, 1], [], []>} : vector<256x64xf32>, vector<64x64xf32>, vector<256x64xf32> -> vector<256x64xf32>
    %188 = arith.addf %182, %187 : vector<256x64xf32>
    %c2_177 = arith.constant 2 : index
    %c8_178 = arith.constant 8 : index
    %c0_179 = arith.constant 0 : index
    %189 = vector.load %arg10[%c2_177, %c8_178, %c0_179] : memref<18x25x64xf32, #tpu.memory_space<vmem>>, vector<16x16x64xf32>
    %190 = vector.shape_cast %189 : vector<16x16x64xf32> to vector<256x64xf32>
    %c7_180 = arith.constant 7 : index
    %c0_181 = arith.constant 0 : index
    %c0_182 = arith.constant 0 : index
    %191 = vector.load %arg5[%c7_180, %c0_181, %c0_182] : memref<9x64x64xf32, #tpu.memory_space<vmem>>, vector<1x64x64xf32>
    %192 = vector.shape_cast %191 : vector<1x64x64xf32> to vector<64x64xf32>
    %cst_183 = arith.constant dense<0.000000e+00> : vector<256x64xf32>
    %193 = tpu.matmul %190, %192, %cst_183 {dimension_numbers = #tpu.dot_dimension_numbers<[1], [0], [0], [1], [0, 0, 1, 1], [], []>} : vector<256x64xf32>, vector<64x64xf32>, vector<256x64xf32> -> vector<256x64xf32>
    %194 = arith.addf %188, %193 : vector<256x64xf32>
    %c2_184 = arith.constant 2 : index
    %c9_185 = arith.constant 9 : index
    %c0_186 = arith.constant 0 : index
    %195 = vector.load %arg10[%c2_184, %c9_185, %c0_186] : memref<18x25x64xf32, #tpu.memory_space<vmem>>, vector<16x16x64xf32>
    %196 = vector.shape_cast %195 : vector<16x16x64xf32> to vector<256x64xf32>
    %c8_187 = arith.constant 8 : index
    %c0_188 = arith.constant 0 : index
    %c0_189 = arith.constant 0 : index
    %197 = vector.load %arg5[%c8_187, %c0_188, %c0_189] : memref<9x64x64xf32, #tpu.memory_space<vmem>>, vector<1x64x64xf32>
    %198 = vector.shape_cast %197 : vector<1x64x64xf32> to vector<64x64xf32>
    %cst_190 = arith.constant dense<0.000000e+00> : vector<256x64xf32>
    %199 = tpu.matmul %196, %198, %cst_190 {dimension_numbers = #tpu.dot_dimension_numbers<[1], [0], [0], [1], [0, 0, 1, 1], [], []>} : vector<256x64xf32>, vector<64x64xf32>, vector<256x64xf32> -> vector<256x64xf32>
    %200 = arith.addf %194, %199 : vector<256x64xf32>
    %c0_191 = arith.constant 0 : index
    %c0_192 = arith.constant 0 : index
    %201 = vector.load %arg6[%c0_191, %c0_192] : memref<1x64xf32, #tpu.memory_space<vmem>>, vector<1x64xf32>
    %202 = vector.broadcast %201 : vector<1x64xf32> to vector<256x64xf32>
    %203 = arith.addf %200, %202 : vector<256x64xf32>
    %204 = vector.broadcast %58 : vector<1x64xf32> to vector<256x64xf32>
    %205 = arith.mulf %204, %203 : vector<256x64xf32>
    %206 = vector.broadcast %60 : vector<1x64xf32> to vector<256x64xf32>
    %207 = arith.mulf %206, %135 : vector<256x64xf32>
    %208 = arith.addf %205, %207 : vector<256x64xf32>
    %209 = arith.addf %61, %208 : vector<256x64xf32>
    %210 = vector.shape_cast %209 : vector<256x64xf32> to vector<16x16x64xf32>
    %c0_193 = arith.constant 0 : index
    %c0_194 = arith.constant 0 : index
    %c0_195 = arith.constant 0 : index
    %c0_196 = arith.constant 0 : index
    %211 = vector.load %arg9[%c0_193, %c0_194, %c0_195, %c0_196] : memref<1x16x16x64xf32, #tpu.memory_space<vmem>>, vector<1x16x16x64xf32>
    %212 = vector.shape_cast %211 : vector<1x16x16x64xf32> to vector<16x16x64xf32>
    %213 = vector.shape_cast %210 : vector<16x16x64xf32> to vector<1x16x16x64xf32>
    tpu.vector_store %arg9[%c0_193, %c0_194, %c0_195, %c0_196], %213 {strides = array<i32>} : memref<1x16x16x64xf32, #tpu.memory_space<vmem>>, vector<1x16x16x64xf32>,
    return
  }
  func.func @transform_0(%arg0: i32) -> (i32, i32, i32, i32) {
    %c0_i32 = arith.constant 0 : i32
    %c0_i32_0 = arith.constant 0 : i32
    %c0_i32_1 = arith.constant 0 : i32
    %c0_i32_2 = arith.constant 0 : i32
    return %arg0, %c0_i32, %c0_i32_0, %c0_i32_1 : i32, i32, i32, i32
  }
  func.func @transform_1(%arg0: i32) -> (i32, i32, i32, i32) {
    %c0_i32 = arith.constant 0 : i32
    %c0_i32_0 = arith.constant 0 : i32
    %c0_i32_1 = arith.constant 0 : i32
    %c0_i32_2 = arith.constant 0 : i32
    return %arg0, %c0_i32, %c0_i32_0, %c0_i32_1 : i32, i32, i32, i32
  }
  func.func @transform_2(%arg0: i32) -> (i32, i32, i32) {
    %c0_i32 = arith.constant 0 : i32
    %c0_i32_0 = arith.constant 0 : i32
    %c0_i32_1 = arith.constant 0 : i32
    %c0_i32_2 = arith.constant 0 : i32
    return %c0_i32, %c0_i32_0, %c0_i32_1 : i32, i32, i32
  }
  func.func @transform_3(%arg0: i32) -> (i32, i32) {
    %c0_i32 = arith.constant 0 : i32
    %c0_i32_0 = arith.constant 0 : i32
    %c0_i32_1 = arith.constant 0 : i32
    return %c0_i32, %c0_i32_0 : i32, i32
  }
  func.func @transform_4(%arg0: i32) -> (i32, i32, i32) {
    %c0_i32 = arith.constant 0 : i32
    %c0_i32_0 = arith.constant 0 : i32
    %c0_i32_1 = arith.constant 0 : i32
    %c0_i32_2 = arith.constant 0 : i32
    return %c0_i32, %c0_i32_0, %c0_i32_1 : i32, i32, i32
  }
  func.func @transform_5(%arg0: i32) -> (i32, i32) {
    %c0_i32 = arith.constant 0 : i32
    %c0_i32_0 = arith.constant 0 : i32
    %c0_i32_1 = arith.constant 0 : i32
    return %c0_i32, %c0_i32_0 : i32, i32
  }
  func.func @transform_6(%arg0: i32) -> (i32, i32, i32) {
    %c0_i32 = arith.constant 0 : i32
    %c0_i32_0 = arith.constant 0 : i32
    %c0_i32_1 = arith.constant 0 : i32
    return %arg0, %c0_i32, %c0_i32_0 : i32, i32, i32
  }
  func.func @transform_7(%arg0: i32) -> (i32, i32, i32) {
    %c0_i32 = arith.constant 0 : i32
    %c0_i32_0 = arith.constant 0 : i32
    %c0_i32_1 = arith.constant 0 : i32
    return %arg0, %c0_i32, %c0_i32_0 : i32, i32, i32
  }
  func.func @transform_8(%arg0: i32) -> (i32, i32, i32, i32) {
    %c0_i32 = arith.constant 0 : i32
    %c0_i32_0 = arith.constant 0 : i32
    %c0_i32_1 = arith.constant 0 : i32
    %c0_i32_2 = arith.constant 0 : i32
    return %arg0, %c0_i32, %c0_i32_0, %c0_i32_1 : i32, i32, i32, i32
  }
}

</mosaic_0001>

<bundles_post_ra>
// kernel: tpu_custom_call.1
= control target key start
LH: loop header
LB: loop body
LE: loop exit
PB: predicated region body
PF: predicated region fallthrough
CT: control target
= control target key end

     0   :  { %s16457_s0 = inlined_call_operand.hbm [shape: f32[2,16,16,64], index: 0, kind: input, shape index: {}]   ;;  %s16458_s1 = inlined_call_operand.hbm [shape: f32[2,16,16,64], index: 1, kind: input, shape index: {}]   ;;  %s16459_s2 = inlined_call_operand.hbm [shape: f32[9,64,64], index: 2, kind: input, shape index: {}]   ;;  %s16460_s3 = inlined_call_operand.vmem [shape: f32[1,64], index: 3, kind: input, shape index: {}]   ;;  %s16461_s4 = inlined_call_operand.hbm [shape: f32[9,64,64], index: 4, kind: input, shape index: {}]   ;;  %s16462_s5 = inlined_call_operand.vmem [shape: f32[1,64], index: 5, kind: input, shape index: {}]   ;;  %s16463_s6 = inlined_call_operand.vmem [shape: f32[2,1,64], index: 6, kind: input, shape index: {}]   ;;  %s16464_s7 = inlined_call_operand.vmem [shape: f32[2,1,64], index: 7, kind: input, shape index: {}]   ;;  %s16465_s8 = inlined_call_operand.hbm [shape: f32[2,16,16,64], index: 8, kind: output, shape index: {}]  }
   0x1   :  { %16628 = sst [smem:[#allocation148_spill]] %s16457_s0 }
   0x2   :  { %16629 = sst [smem:[#allocation149_spill]] %s16459_s2 }
   0x3   :  { %16630 = sst [smem:[#allocation150_spill]] %s16461_s4 }
   0x4   :  { %13 = vsyncpa [#allocation4], 0 }
   0x5   :  { %15 = vsyncpa [#allocation4 + $0x1], 0 }
   0x6   :  { %16 = vsyncpa [#allocation7], 0 }
   0x7   :  { %18 = vsyncpa [#allocation7 + $0x1], 0 }
   0x8   :  { %19 = vsyncpa [#allocation10], 0 }
   0x9   :  { %20 = vsyncpa [#allocation5], 0 }
   0xa   :  { %22 = vsyncpa [#allocation5 + $0x1], 0  ;;  %s11593_s27 = smov 0   ;;  %s11595_s28 = smov 0  }
   0xb   :  { %s11597_s29 = smov 0   ;;  %s11599_s30 = smov 0  }
   0xc LB: > { %16631 = sst [smem:[#allocation17_spill]] %s11533_s29  ;;  %s11614_s9 = sadd.s32 4294967295, %s11537_s30   ;;  %s11537_s30 = sphi %s11599_s30, %s17320_s30   ;;  %s11533_s29 = sphi %s11597_s29, %s17317_s29   ;;  %s11529_s28 = sphi %s11595_s28, %s17319_s28   ;;  %s11525_s27 = sphi %s11593_s27, %s17318_s27  }
   0xd   : > { %s8788_s10 = sadd.s32 4294967294, %s11537_s30   ;;  %p48_p0 = scmp.ne.s32.totalorder %s11529_s28, %s11525_s27 }
   0xe   : > { %p16471_p1 = scmp.eq.s32.totalorder %s11614_s9, 0  ;;  %p234_p2 = scmp.eq.s32.totalorder %s11614_s9, 1 }
   0xf   : > { %p240_p3 = scmp.eq.s32.totalorder %s8788_s10, 1  ;;  %p8789_p5 = scmp.ge.s32.totalorder %s11537_s30, 1 }
  0x10   : > { %p11623_p4 = por %p16471_p1, %p48_p0  ;;  %p247_p7 = scmp.lt.s32.totalorder %s11537_s30, 3 }
  0x11   : > { %p11628_p6 = por %p240_p3, %p48_p0  ;;  %s11539_s14 = smov [#allocation8]  }
  0x12   : > { %s16632_s11 = scalar_select %p11623_p4, 1, 0 }
  0x13   : > { %s16633_s12 = scalar_select %p11628_p6, 1, 0 }
  0x14   : > { %p11633_p8 = pnand %p8789_p5, %p247_p7  ;;  %s259_s15 = sshll.u32 %s11539_s14, 4  ;;  %s260_s15 = int_to_ptr.vmem [resolvable:$true] %s259_s15 }
  0x15   : > { %s11540_s17 = smov [#allocation9]   ;;  %s11364_s19 = scalar_lea.vmem %s260_s15, 9216 }
  0x16   : > { %p11279_p9 = pneg %p11633_p8  ;;  %s275_s18 = sshll.u32 %s11540_s17, 4  ;;  %s276_s18 = int_to_ptr.vmem [resolvable:$true] %s275_s18 }
  0x17   : > { %p11365_p13 = scmp.ne.s32.totalorder %s260_s15, %s11364_s19  ;;  %p11372_p5 = scmp.lt.s32.totalorder %s260_s15, %s260_s15 }
  0x18   : > { %p11642_p11 = pnand %p11279_p9, %p16471_p1  ;;  %p11373_p7 = scmp.lt.s32.totalorder %s11364_s19, %s11364_s19 }
  0x1a   : > { %p11355_p12 = pneg %p11642_p11  ;;  %p11374_p10 = por %p11373_p7, %p11372_p5 }
  0x1c   : > { %p11367_p0 = pnand %p11365_p13, %p11355_p12 }
  0x1e   : > { %p11368_p3 = pneg %p11367_p0 }
  0x20   : > { %p11375_p9 = pnand %p11374_p10, %p11368_p3 }
  0x22   : > { %11378 = shalt.err (!%p11375_p9)
}
  0x23   : > { %s16466_s20 = smov 128   ;;  %s16468_s21 = smov 8  }
  0x24   : > { %s16636_s2 = sld [smem:[#allocation149_spill]]  ;;  %s11390_s24 = scalar_lea.vmem %s276_s18, 9216 }
  0x25   : > { %p11391_p13 = scmp.ne.s32.totalorder %s276_s18, %s11390_s24  ;;  %p11398_p10 = scmp.lt.s32.totalorder %s276_s18, %s276_s18 }
  0x26   : > { %p11399_p3 = scmp.lt.s32.totalorder %s11390_s24, %s11390_s24 }
  0x27   : > { %p11393_p0 = pnand %p11391_p13, %p11355_p12 }
  0x28   : > { %p11400_p7 = por %p11399_p3, %p11398_p10 }
  0x29   : > { %p11394_p5 = pneg %p11393_p0 }
  0x2a   : > { %11282 = dma.hbm_to_vmem [thread:$0]  (!%p11642_p11), %s16636_s2, 9216, %s260_s15, [#allocation7], %s16466_s20, %s16466_s20, %s16468_s21  }
  0x2b   : > { %p11401_p9 = pnand %p11400_p7, %p11394_p5 }
  0x2d   : > { %11404 = shalt.err (!%p11401_p9)
}
  0x2e   : > { %s16637_s4 = sld [smem:[#allocation150_spill]]  ;;  %s11671_s10 = sadd.s32 1, %s11537_s30  }
  0x2f   : > { %s35_s14 = sadd.s32 1, %s11533_s29  ;;  %s32_s15 = ssub.s32 %s11537_s30, %s11671_s10 }
  0x30   : > { %p42_p12 = scmp.ne.s32.totalorder %s11533_s29, %s11529_s28  ;;  %p33_p13 = scmp.eq.s32.totalorder %s32_s15, 0 }
  0x31   : > { %p43_p0 = scmp.eq.s32.totalorder %s11537_s30, 0  ;;  %p11299_p10 = scmp.lt.s32.totalorder %s11537_s30, 2 }
  0x32   : > { %p11681_p5 = por %p234_p2, %p42_p12  ;;  %s292_s19 = sand.u32 1, %s11533_s29  }
  0x33   : > { %s11687_s17 = scalar_select %p33_p13, %s11533_s29, %s35_s14  }
  0x34   : > { %11285 = dma.hbm_to_vmem [thread:$0]  (!%p11642_p11), %s16637_s4, 9216, %s276_s18, [#allocation10], %s16466_s20, %s16466_s20, %s16468_s21  }
  0x35   : > { %s16638_s16 = scalar_select %p11681_p5, 1, 0 }
  0x36   : > { %16639 = sst [smem:[#allocation18_spill]] %s11687_s17  ;;  %p44_p3 = por %p43_p0, %p42_p12 }
  0x37   : > { %s8793_s22 = sshll.u32 %s292_s19, 8  ;;  %s9390_s18 = sshll.u32 %s11537_s30, 12 }
  0x38   : > { %s16640_s0 = sld [smem:[#allocation148_spill]]  ;;  %s296_s26 = scalar_lea.vmem [#allocation3], %s8793_s22 }
  0x39   : > { %s303_s15 = sshll.u32 %s296_s26, 4  ;;  %p11698_p2 = pnand %p11299_p10, %p44_p3  ;;  %s11696_s15 = int_to_ptr.vmem [resolvable:$true] %s303_s15 }
  0x3a   : > { %s11705_s2 = scalar_lea.hbm %s16458_s1, %s9390_s18  ;;  %s317_s23 = scalar_lea.vmem [#allocation6], %s8793_s22 }
  0x3b   : > { %s11707_s24 = sshll.u32 %s317_s23, 4  ;;  %s11709_s4 = scalar_lea.sflag [#allocation4], %s292_s19  ;;  %s11740_s24 = int_to_ptr.vmem [resolvable:$true] %s11707_s24 }
  0x3c   : > { %p11407_p7 = pneg %p11698_p2 }
  0x3e   : > { %s11694_s25 = scalar_lea.hbm %s16640_s0, %s9390_s18  ;;  %s11410_s21 = scalar_lea.hbm %s16640_s0, 8192 }
  0x3f   : > { %s11405_s17 = scalar_lea.hbm %s11694_s25, 4096  ;;  %p11411_p13 = scmp.lt.s32.totalorder %s11694_s25, %s16640_s0 }
  0x40   : > { %p11406_p11 = scmp.ne.s32.totalorder %s11694_s25, %s11405_s17  ;;  %p11412_p0 = scmp.lt.s32.totalorder %s11410_s21, %s11405_s17 }
  0x42   : > { %p11408_p9 = pnand %p11407_p7, %p11406_p11  ;;  %p11413_p10 = por %p11412_p0, %p11411_p13 }
  0x44   : > { %p11409_p12 = pneg %p11408_p9 }
  0x46   : > { %p11414_p3 = pnand %p11413_p10, %p11409_p12 }
  0x48   : > { %11417 = shalt.err (!%p11414_p3)
}
  0x49   : > { %s11418_s19 = scalar_lea.vmem %s11696_s15, 4096  ;;  %s11543_s29 = smov [#allocation3]  }
  0x4a   : > { %p11419_p1 = scmp.ne.s32.totalorder %s11696_s15, %s11418_s19  ;;  %s11423_s22 = sshll.u32 %s11543_s29, 4  ;;  %s11424_s22 = int_to_ptr.vmem [resolvable:$false] %s11423_s22 }
  0x4b   : > { %s11425_s23 = scalar_lea.vmem %s11424_s22, 8192  ;;  %p11426_p6 = scmp.lt.s32.totalorder %s11696_s15, %s11424_s22 }
  0x4c   : > { %p11421_p11 = pnand %p11419_p1, %p11407_p7  ;;  %p11427_p5 = scmp.lt.s32.totalorder %s11425_s23, %s11418_s19 }
  0x4e   : > { %p11422_p9 = pneg %p11421_p11  ;;  %p11428_p4 = por %p11427_p5, %p11426_p6 }
  0x50   : > { %p11429_p13 = pnand %p11428_p4, %p11422_p9 }
  0x52   : > { %11432 = shalt.err (!%p11429_p13)
}
  0x53   : > { %s16642_s17 = smov 8   ;;  %s16643_s26 = smov 128  }
  0x54   : > { %11289 = dma.hbm_to_vmem [thread:$0]  (!%p11698_p2), %s11694_s25, 4096, %s11696_s15, %s11709_s4, %s16643_s26, %s16643_s26, %s16642_s17  }
  0x55   : > { %s313_s21 = sand.u32 1, %s11537_s30   ;;  %s11433_s18 = scalar_lea.hbm %s11705_s2, 4096 }
  0x56   : > { %s314_s14 = scalar_lea.sflag [#allocation7], %s313_s21  ;;  %p11434_p1 = scmp.ne.s32.totalorder %s11705_s2, %s11433_s18 }
  0x57   : > { %s11438_s22 = scalar_lea.hbm %s16458_s1, 8192  ;;  %p11439_p5 = scmp.lt.s32.totalorder %s11705_s2, %s16458_s1 }
  0x58   : > { %p11436_p4 = pnand %p11434_p1, %p11407_p7  ;;  %p11440_p12 = scmp.lt.s32.totalorder %s11438_s22, %s11433_s18 }
  0x5a   : > { %p11437_p6 = pneg %p11436_p4  ;;  %p11441_p0 = por %p11440_p12, %p11439_p5 }
  0x5c   : > { %p11442_p10 = pnand %p11441_p0, %p11437_p6 }
  0x5e   : > { %11445 = shalt.err (!%p11442_p10)
}
  0x5f   : > { %s11446_s4 = scalar_lea.vmem %s11740_s24, 4096  ;;  %s11544_s25 = smov [#allocation6]  }
  0x60   : > { %p11447_p3 = scmp.ne.s32.totalorder %s11740_s24, %s11446_s4  ;;  %s11451_s15 = sshll.u32 %s11544_s25, 4  ;;  %s11452_s15 = int_to_ptr.vmem [resolvable:$false] %s11451_s15 }
  0x61   : > { %s11453_s21 = scalar_lea.vmem %s11452_s15, 8192  ;;  %p11454_p13 = scmp.lt.s32.totalorder %s11740_s24, %s11452_s15 }
  0x62   : > { %p11449_p11 = pnand %p11447_p3, %p11407_p7  ;;  %p11455_p1 = scmp.lt.s32.totalorder %s11453_s21, %s11446_s4 }
  0x64   : > { %p11450_p9 = pneg %p11449_p11  ;;  %p11456_p4 = por %p11455_p1, %p11454_p13 }
  0x66   : > { %p11457_p5 = pnand %p11456_p4, %p11450_p9 }
  0x68   : > { %11460 = shalt.err (!%p11457_p5)
}
  0x69   : > { %11292 = dma.hbm_to_vmem [thread:$0]  (!%p11698_p2), %s11705_s2, 4096, %s11740_s24, %s314_s14, %s16643_s26, %s16643_s26, %s16642_s17  }
  0x6a   : > { %348 = sbr.rel (%p11633_p8) target bundleno = 1322 (0x52a), region = 52 }
  0x6f   : > { %s11771_s0 = sand.u32 1, %s11529_s28   ;;  %p16644_p7 = scmp.ne.s32.totalorder %s16632_s11, 0 }
  0x70   : > { %s11774_s18 = sshll.u32 %s11771_s0, 8  ;;  %s351_s19 = scalar_lea.sflag [#allocation4], %s11771_s0 }
  0x71   : > { %s11778_s20 = scalar_lea.vmem [#allocation3], %s11774_s18 }
  0x72   : > { %11504 = dma.done.wait (%p16644_p7), %s351_s19, 4096  }
  0x73   : > { %11506 = vsyncadd (%p16644_p7), %s351_s19, 4294963200  ;;  %s359_s2 = sand.u32 1, %s11614_s9   ;;  %s11786_s24 = scalar_lea.vmem [#allocation6], %s11774_s18 }
  0x74   : > { %s360_s13 = scalar_lea.sflag [#allocation7], %s359_s2 }
  0x75   : > { %11508 = dma.done.wait (%p16644_p7), %s360_s13, 4096  }
  0x76   : > { %11510 = vsyncadd (%p16644_p7), %s360_s13, 4294963200  ;;  %p16645_p8 = scmp.eq.s32.totalorder %s11614_s9, 0 }
  0x78   : > { %11512 = dma.done.wait (%p16645_p8), [#allocation7], 9216   ;;  %p16646_p2 = pmov %p16645_p8 }
  0x7a   : > { %11514 = vsyncadd (%p16646_p2), [#allocation7], 4294958080  ;;  %p16647_p6 = pmov %p16646_p2 }
  0x7b   : > { %p16648_p12 = pmov %p16646_p2 }
  0x7c   : > { %11516 = dma.done.wait (%p16647_p6), [#allocation10], 9216  }
  0x7d   : > { %11518 = vsyncadd (%p16648_p12), [#allocation10], 4294958080  ;;  %v1272_v0 = vld [vmem:[#allocation8 + $0x78] sm:$0xff]  ;;  %v1271_v1 = vld [vmem:[#allocation8 + $0x70] sm:$0xff]  ;;  %vm485_vm0 = vcmask 523264   ;;  %vm1137_vm3 = vcmask 516096  }
  0x7e   : > { %10113 = vmatprep.subr.mxu0 %v1272_v0  ;;  %v1231_v2 = vld [vmem:[#allocation8 + $0x38] sm:$0xff]  ;;  %v1270_v3 = vld [vmem:[#allocation8 + $0x68] sm:$0xff]  ;;  %v1230_v4 = vld [vmem:[#allocation8 + $0x30] sm:$0xff]  ;;  %p415_p0 = scmp.lt.s32.totalorder %s11614_s9, 1  ;;  %s16111_s19 = scalar_lea.vmem [#allocation11], %s11774_s18 }
  0x7f   : > { %10114 = vmatpush3.msra.mxu0 %v1272_v0  ;;  %10177 = vmatprep.subr.mxu1 %v1231_v2  ;;  %v1269_v5 = vld [vmem:[#allocation8 + $0x60] sm:$0xff]  ;;  %v1229_v6 = vld [vmem:[#allocation8 + $0x28] sm:$0xff]  ;;  %v1268_v8 = vld [vmem:[#allocation8 + $0x58] sm:$0xff]  ;;  %s9392_s18 = sshll.u32 %s11614_s9, 12  ;;  %p17313_p3 = scmp.ne.s32.totalorder %s16638_s16, 0 }
  0x80   : > { %10115 = vmatprep.subr.mxu0 %v1271_v1  ;;  %10178 = vmatpush3.msra.mxu1 %v1231_v2  ;;  %v1228_v7 = vld [vmem:[#allocation8 + $0x20] sm:$0xff]  ;;  %v11804_v10 = vld [vmem:[%s11778_s20 + $0x8] sm:$0xff]  ;;  %v11807_v11 = vld [vmem:[%s11778_s20 + $0x10] sm:$0xff]  ;;  %s14014_s11 = scalar_select %p415_p0, %s11614_s9, 1 }
  0x81   : > { %10116 = vmatpush3.msra.mxu0 %v1271_v1  ;;  %10179 = vmatprep.subr.mxu1 %v1230_v4  ;;  %v11801_v9 = vld [vmem:[%s11778_s20] sm:$0xff]  ;;  %v11810_v12 = vld [vmem:[%s11778_s20 + $0x18] sm:$0xff]  ;;  %v11816_v14 = vld [vmem:[%s11778_s20 + $0x28] sm:$0xff]  ;;  %v487_v16 = vsel %vm485_vm0, %v11807_v11, 0.0  ;;  %v517_v17 = vsel %vm485_vm0, %v11804_v10, 0.0  ;;  %s8642_s9 = scalar_lea.sflag [#allocation5], %s11771_s0 }
  0x82   : > { %10117 = vmatprep.subr.mxu0 %v1270_v3  ;;  %10180 = vmatpush3.msra.mxu1 %v1230_v4  ;;  %v11813_v13 = vld [vmem:[%s11778_s20 + $0x20] sm:$0xff]  ;;  %v486_v15 = vsel %vm485_vm0, %v11801_v9, 0.0  ;;  %v11825_v18 = vld [vmem:[%s11778_s20 + $0x30] sm:$0xff]  ;;  %v11828_v19 = vld [vmem:[%s11778_s20 + $0x38] sm:$0xff]  ;;  %v518_v23 = vsel %vm485_vm0, %v11810_v12, 0.0  ;;  %v520_v24 = vsel %vm485_vm0, %v11816_v14, 0.0  ;;  %s14044_s14 = scalar_lea.vmem %s16464_s7, %s14014_s11  ;;  %s14260_s23 = scalar_lea.vmem %s16463_s6, %s14014_s11 }
  0x83   : > { %10118 = vmatpush3.msra.mxu0 %v1270_v3  ;;  %10181 = vmatprep.subr.mxu1 %v1229_v6  ;;  %v11831_v20 = vld [vmem:[%s11778_s20 + $0x40] sm:$0xff]  ;;  %v488_v21 = vadd.f32 %v487_v16, %v486_v15  ;;  %v489_v22 = vsel %vm485_vm0, %v11813_v13, 0.0  ;;  %v11840_v25 = vld [vmem:[%s11778_s20 + $0x48] sm:$0xff]  ;;  %v491_v26 = vsel %vm485_vm0, %v11825_v18, 0.0  ;;  %v519_v27 = vadd.f32 %v518_v23, %v517_v17  ;;  %v1267_v28 = vld [vmem:[#allocation8 + $0x50] sm:$0xff]  ;;  %s11545_s17 = smov [#allocation11]  }
  0x84   : > { %16649 = vst [vmem:[#allocation19_spill] sm:$0xff] %v11831_v20  ;;  %10119 = vmatprep.subr.mxu0 %v1269_v5  ;;  %10182 = vmatpush3.msra.mxu1 %v1229_v6  ;;  %16650 = vst [vmem:[#allocation20_spill] sm:$0xff] %v11840_v25  ;;  %v11845_v29 = vld [vmem:[%s11778_s20 + $0x50] sm:$0xff]  ;;  %v522_v31 = vsel %vm485_vm0, %v11828_v19, 0.0  ;;  %v11850_v32 = vld [vmem:[%s11778_s20 + $0x58] sm:$0xff]  ;;  %v493_v33 = vsel %vm485_vm0, %v11831_v20, 0.0 }
  0x85   : > { %10120 = vmatpush3.msra.mxu0 %v1269_v5  ;;  %10183 = vmatprep.subr.mxu1 %v1228_v7  ;;  %v490_v30 = vadd.f32 %v489_v22, %v488_v21  ;;  %v521_v34 = vadd.f32 %v520_v24, %v519_v27  ;;  %v1266_v35 = vld [vmem:[#allocation8 + $0x48] sm:$0xff]  ;;  %v11855_v36 = vld [vmem:[%s11778_s20 + $0x60] sm:$0xff]  ;;  %v524_v38 = vsel %vm485_vm0, %v11840_v25, 0.0  ;;  %v495_v40 = vsel %vm485_vm0, %v11845_v29, 0.0  ;;  %v11865_v43 = vld [vmem:[%s11778_s20 + $0x70] sm:$0xff]  ;;  %s11465_s26 = sshll.u32 %s11545_s17, 4  ;;  %s11466_s26 = int_to_ptr.vmem [resolvable:$false] %s11465_s26 }
  0x86   : > { %10121 = vmatprep.subr.mxu0 %v1268_v8  ;;  %10184 = vmatpush3.msra.mxu1 %v1228_v7  ;;  %v11860_v39 = vld [vmem:[%s11778_s20 + $0x68] sm:$0xff]  ;;  %v1265_v42 = vld [vmem:[#allocation8 + $0x40] sm:$0xff]  ;;  %16652 = vst [vmem:[#allocation22_spill] sm:$0xff] %v11865_v43  ;;  %v526_v45 = vsel %vm485_vm0, %v11850_v32, 0.0  ;;  %v497_v46 = vsel %vm485_vm0, %v11855_v36, 0.0  ;;  %v11874_v50 = vld [vmem:[%s11778_s20 + $0x78] sm:$0xff]  ;;  %v557_v7 = vmul.f32 %v11801_v9, %v11801_v9 }
  0x87   : > { %10122 = vmatpush3.msra.mxu0 %v1268_v8  ;;  %v492_v37 = vadd.f32 %v491_v26, %v490_v30  ;;  %16651 = vst [vmem:[#allocation21_spill] sm:$0xff] %v11860_v39  ;;  %v523_v41 = vadd.f32 %v522_v31, %v521_v34  ;;  %v528_v49 = vsel %vm485_vm0, %v11860_v39, 0.0  ;;  %16653 = vst [vmem:[#allocation23_spill] sm:$0xff] %v11874_v50  ;;  %v499_v51 = vsel %vm485_vm0, %v11865_v43, 0.0  ;;  %v11879_v53 = vld [vmem:[%s11778_s20 + $0x80] sm:$0xff]  ;;  %v11882_v55 = vld [vmem:[%s11778_s20 + $0x88] sm:$0xff] }
  0x88   : > { %10123 = vmatprep.subr.mxu0 %v1267_v28  ;;  %16654 = vst [vmem:[#allocation24_spill] sm:$0xff] %v11879_v53  ;;  %16655 = vst [vmem:[#allocation25_spill] sm:$0xff] %v11882_v55  ;;  %v11885_v56 = vld [vmem:[%s11778_s20 + $0x90] sm:$0xff]  ;;  %v11888_v58 = vld [vmem:[%s11778_s20 + $0x98] sm:$0xff]  ;;  %v530_v62 = vsel %vm485_vm0, %v11874_v50, 0.0  ;;  %v501_v1 = vsel %vm485_vm0, %v11879_v53, 0.0  ;;  %v559_v30 = vmul.f32 %v11807_v11, %v11807_v11  ;;  %v561_v31 = vmul.f32 %v11813_v13, %v11813_v13 }
  0x89   : > { %10124 = vmatpush3.msra.mxu0 %v1267_v28  ;;  %v494_v44 = vadd.f32 %v493_v33, %v492_v37  ;;  %v525_v47 = vadd.f32 %v524_v38, %v523_v41  ;;  %v11891_v59 = vld [vmem:[%s11778_s20 + $0xa0] sm:$0xff]  ;;  %v11894_v60 = vld [vmem:[%s11778_s20 + $0xb0] sm:$0xff]  ;;  %v11899_v63 = vld [vmem:[%s11778_s20 + $0xa8] sm:$0xff]  ;;  %v503_v5 = vsel %vm485_vm0, %v11885_v56, 0.0  ;;  %v532_v6 = vsel %vm485_vm0, %v11882_v55, 0.0 }
  0x8a   : > { %10125 = vmatprep.subr.mxu0 %v1266_v35  ;;  %16656 = vst [vmem:[#allocation26_spill] sm:$0xff] %v11891_v59  ;;  %16657 = vst [vmem:[#allocation27_spill] sm:$0xff] %v11894_v60  ;;  %v11902_v0 = vld [vmem:[%s11778_s20 + $0xb8] sm:$0xff]  ;;  %v11907_v2 = vld [vmem:[%s11778_s20 + $0xc0] sm:$0xff]  ;;  %v505_v17 = vsel %vm485_vm0, %v11891_v59, 0.0  ;;  %v507_v21 = vsel %vm485_vm0, %v11894_v60, 0.0 }
  0x8b   : > { %10126 = vmatpush3.msra.mxu0 %v1266_v35  ;;  %v496_v48 = vadd.f32 %v495_v40, %v494_v44  ;;  %v527_v52 = vadd.f32 %v526_v45, %v525_v47  ;;  %16658 = vst [vmem:[#allocation28_spill] sm:$0xff] %v11899_v63  ;;  %16659 = vst [vmem:[#allocation29_spill] sm:$0xff] %v11902_v0  ;;  %v11910_v3 = vld [vmem:[%s11778_s20 + $0xc8] sm:$0xff]  ;;  %v11913_v4 = vld [vmem:[%s11778_s20 + $0xd0] sm:$0xff]  ;;  %v534_v23 = vsel %vm485_vm0, %v11888_v58, 0.0  ;;  %v536_v28 = vsel %vm485_vm0, %v11899_v63, 0.0 }
  0x8c   : > { %10127 = vmatprep.subr.mxu0 %v1265_v42  ;;  %16660 = vst [vmem:[#allocation30_spill] sm:$0xff] %v11907_v2  ;;  %16661 = vst [vmem:[#allocation31_spill] sm:$0xff] %v11910_v3  ;;  %v11922_v8 = vld [vmem:[%s11778_s20 + $0xd8] sm:$0xff]  ;;  %v11925_v15 = vld [vmem:[%s11778_s20 + $0xe0] sm:$0xff]  ;;  %v11950_v33 = vsel %vm485_vm0, %v11907_v2, 0.0  ;;  %v11954_v34 = vsel %vm485_vm0, %v11913_v4, 0.0  ;;  %v565_v47 = vmul.f32 %v11831_v20, %v11831_v20 }
  0x8d   : > { %10128 = vmatpush3.msra.mxu0 %v1265_v42  ;;  %v498_v54 = vadd.f32 %v497_v46, %v496_v48  ;;  %v529_v57 = vadd.f32 %v528_v49, %v527_v52  ;;  %16662 = vst [vmem:[#allocation32_spill] sm:$0xff] %v11913_v4  ;;  %16663 = vst [vmem:[#allocation33_spill] sm:$0xff] %v11922_v8  ;;  %v11928_v16 = vld [vmem:[%s11778_s20 + $0xe8] sm:$0xff]  ;;  %v11937_v24 = vld [vmem:[%s11778_s20 + $0xf0] sm:$0xff]  ;;  %v538_v35 = vsel %vm485_vm0, %v11902_v0, 0.0  ;;  %v11960_v37 = vsel %vm485_vm0, %v11910_v3, 0.0 }
  0x8e   : > { %16664 = vst [vmem:[#allocation34_spill] sm:$0xff] %v11925_v15  ;;  %16665 = vst [vmem:[#allocation35_spill] sm:$0xff] %v11928_v16  ;;  %v11940_v26 = vld [vmem:[%s11778_s20 + $0xf8] sm:$0xff]  ;;  %v11964_v38 = vsel %vm485_vm0, %v11925_v15, 0.0  ;;  %v11968_v40 = vsel %vm485_vm0, %v11922_v8, 0.0  ;;  %v11972_v41 = vsel %vm485_vm0, %v11928_v16, 0.0  ;;  %v563_v42 = vmul.f32 %v11825_v18, %v11825_v18 }
  0x8f   : > { %v500_v61 = vadd.f32 %v499_v51, %v498_v54  ;;  %v531_v22 = vadd.f32 %v530_v62, %v529_v57  ;;  %16666 = vst [vmem:[#allocation36_spill] sm:$0xff] %v11937_v24  ;;  %v11978_v44 = vsel %vm485_vm0, %v11937_v24, 0.0  ;;  %v11982_v46 = vsel %vm485_vm0, %v11940_v26, 0.0 }
  0x90   : > { %v589_v49 = vsel %vm485_vm0, %v557_v7, 0.0  ;;  %v590_v51 = vsel %vm485_vm0, %v559_v30, 0.0  ;;  %v592_v52 = vsel %vm485_vm0, %v561_v31, 0.0  ;;  %v558_v54 = vmul.f32 %v11804_v10, %v11804_v10 }
  0x91   : > { %v502_v27 = vadd.f32 %v501_v1, %v500_v61  ;;  %v533_v45 = vadd.f32 %v532_v6, %v531_v22  ;;  %v560_v57 = vmul.f32 %v11810_v12, %v11810_v12  ;;  %v562_v61 = vmul.f32 %v11816_v14, %v11816_v14 }
  0x92   : > { %v591_v62 = vadd.f32 %v590_v51, %v589_v49  ;;  %v564_v1 = vmul.f32 %v11828_v19, %v11828_v19  ;;  %v567_v6 = vmul.f32 %v11845_v29, %v11845_v29  ;;  %v594_v7 = vsel %vm485_vm0, %v563_v42, 0.0 }
  0x93   : > { %v504_v48 = vadd.f32 %v503_v5, %v502_v27  ;;  %v566_v5 = vmul.f32 %v11840_v25, %v11840_v25  ;;  %v535_v22 = vadd.f32 %v534_v23, %v533_v45  ;;  %v568_v27 = vmul.f32 %v11850_v32, %v11850_v32 }
  0x94   : > { %v569_v30 = vmul.f32 %v11855_v36, %v11855_v36  ;;  %v593_v31 = vadd.f32 %v592_v52, %v591_v62  ;;  %v570_v51 = vmul.f32 %v11860_v39, %v11860_v39  ;;  %v571_v25 = vmul.f32 %v11865_v43, %v11865_v43 }
  0x95   : > { %v506_v49 = vadd.f32 %v505_v17, %v504_v48  ;;  %v596_v20 = vsel %vm485_vm0, %v565_v47, 0.0  ;;  %v572_v42 = vmul.f32 %v11874_v50, %v11874_v50  ;;  %v573_v23 = vmul.f32 %v11879_v53, %v11879_v53 }
  0x96   : > { %v12017_v45 = vmul.f32 %v11882_v55, %v11882_v55  ;;  %v595_v52 = vadd.f32 %v594_v7, %v593_v31  ;;  %v575_v17 = vmul.f32 %v11885_v56, %v11885_v56  ;;  %v598_v48 = vsel %vm485_vm0, %v567_v6, 0.0 }
  0x97   : > { %v620_v47 = vsel %vm485_vm0, %v558_v54, 0.0  ;;  %v621_v62 = vsel %vm485_vm0, %v560_v57, 0.0  ;;  %v537_v50 = vadd.f32 %v536_v28, %v535_v22  ;;  %v623_v53 = vsel %vm485_vm0, %v562_v61, 0.0  ;;  %v12038_v22 = vld [vmem:[%s11786_s24] sm:$0xff] }
  0x98   : > { %v597_v43 = vadd.f32 %v596_v20, %v595_v52  ;;  %v622_v39 = vadd.f32 %v621_v62, %v620_v47  ;;  %v508_v55 = vadd.f32 %v507_v21, %v506_v49  ;;  %v12027_v7 = vmul.f32 %v11888_v58, %v11888_v58  ;;  %v12041_v21 = vld [vmem:[%s11786_s24 + $0x10] sm:$0xff]  ;;  %v12052_v52 = vld [vmem:[%s11786_s24 + $0x20] sm:$0xff]  ;;  %v12056_v47 = vld [vmem:[#allocation8 + $0xb8] sm:$0xff] }
  0x99   : > { %v600_v31 = vsel %vm485_vm0, %v569_v30, 0.0  ;;  %v625_v6 = vsel %vm485_vm0, %v564_v1, 0.0  ;;  %v577_v54 = vmul.f32 %v11891_v59, %v11891_v59  ;;  %v12035_v28 = vmul.f32 %v11899_v63, %v11899_v63  ;;  %16667 = vst [vmem:[#allocation37_spill] sm:$0xff] %v12056_v47  ;;  %v1227_v62 = vld [vmem:[#allocation8 + $0x18] sm:$0xff]  ;;  %10241 = vmatprep.subr.mxu0 %v12056_v47  ;;  %v12082_v47 = vld [vmem:[%s11786_s24 + $0x40] sm:$0xff] }
  0x9a   : > { %v599_v20 = vadd.f32 %v598_v48, %v597_v43  ;;  %v624_v57 = vadd.f32 %v623_v53, %v622_v39  ;;  %v579_v61 = vmul.f32 %v11894_v60, %v11894_v60  ;;  %v12047_v30 = vmul.f32 %v11902_v0, %v11902_v0  ;;  %10185 = vmatprep.subr.mxu1 %v1227_v62 }
  0x9b   : > { %v602_v1 = vsel %vm485_vm0, %v571_v25, 0.0  ;;  %v627_v49 = vsel %vm485_vm0, %v566_v5, 0.0  ;;  %v539_v43 = vadd.f32 %v538_v35, %v537_v50  ;;  %v581_v39 = vmul.f32 %v11907_v2, %v11907_v2  ;;  %v12067_v50 = vld [vmem:[%s11786_s24 + $0x30] sm:$0xff]  ;;  %10186 = vmatpush3.msra.mxu1 %v1227_v62 }
  0x9c   : > { %v601_v53 = vadd.f32 %v600_v31, %v599_v20  ;;  %v626_v48 = vadd.f32 %v625_v6, %v624_v57  ;;  %v510_v60 = vadd.f32 %v11950_v33, %v508_v55  ;;  %v12061_v0 = vmul.f32 %v11910_v3, %v11910_v3  ;;  %v1226_v6 = vld [vmem:[#allocation8 + $0x10] sm:$0xff] }
  0x9d   : > { %v604_v25 = vsel %vm485_vm0, %v573_v23, 0.0  ;;  %v629_v5 = vsel %vm485_vm0, %v568_v27, 0.0  ;;  %v12071_v35 = vmul.f32 %v11913_v4, %v11913_v4  ;;  %v606_v55 = vsel %vm485_vm0, %v575_v17, 0.0  ;;  %10187 = vmatprep.subr.mxu1 %v1226_v6 }
  0x9e   : > { %v603_v31 = vadd.f32 %v602_v1, %v601_v53  ;;  %v628_v33 = vadd.f32 %v627_v49, %v626_v48  ;;  %v631_v23 = vsel %vm485_vm0, %v570_v51, 0.0  ;;  %v666_v27 = vsel %vm485_vm0, %v12038_v22, 0.0  ;;  %10188 = vmatpush3.msra.mxu1 %v1226_v6  ;;  %v1225_v51 = vld [vmem:[#allocation8 + $0x8] sm:$0xff] }
  0x9f   : > { %v667_v20 = vsel %vm485_vm0, %v12041_v21, 0.0  ;;  %v669_v57 = vsel %vm485_vm0, %v12052_v52, 0.0  ;;  %v541_v17 = vadd.f32 %v11960_v37, %v539_v43  ;;  %v512_v48 = vadd.f32 %v11954_v34, %v510_v60  ;;  %10189 = vmatprep.subr.mxu1 %v1225_v51  ;;  %v1224_v37 = vld [vmem:[#allocation8] sm:$0xff]  ;;  %v12091_v43 = vld [vmem:[%s11786_s24 + $0x50] sm:$0xff] }
  0xa0   : > { %v605_v1 = vadd.f32 %v604_v25, %v603_v31  ;;  %v630_v49 = vadd.f32 %v629_v5, %v628_v33  ;;  %v668_v53 = vadd.f32 %v667_v20, %v666_v27  ;;  %v608_v62 = vsel %vm485_vm0, %v577_v54, 0.0  ;;  %10190 = vmatpush3.msra.mxu1 %v1225_v51  ;;  %v12096_v34 = vld [vmem:[%s11786_s24 + $0x60] sm:$0xff]  ;;  %v12114_v27 = vld [vmem:[%s11786_s24 + $0x28] sm:$0xff] }
  0xa1   : > { %v633_v4 = vsel %vm485_vm0, %v572_v42, 0.0  ;;  %v671_v3 = vsel %vm485_vm0, %v12067_v50, 0.0  ;;  %v584_v25 = vmul.f32 %v11922_v8, %v11922_v8  ;;  %v12100_v42 = vmul.f32 %v11925_v15, %v11925_v15  ;;  %10191 = vmatprep.subr.mxu1 %v1224_v37  ;;  %v12124_v15 = vld [vmem:[%s11786_s24 + $0x38] sm:$0xff]  ;;  %v12127_v8 = vld [vmem:[%s11786_s24 + $0x70] sm:$0xff] }
  0xa2   : > { %v607_v5 = vadd.f32 %v606_v55, %v605_v1  ;;  %v632_v31 = vadd.f32 %v631_v23, %v630_v49  ;;  %v670_v60 = vadd.f32 %v669_v57, %v668_v53  ;;  %v610_v54 = vsel %vm485_vm0, %v579_v61, 0.0  ;;  %v12108_v55 = vld [vmem:[%s11786_s24 + $0x8] sm:$0xff]  ;;  %v12111_v23 = vld [vmem:[%s11786_s24 + $0x18] sm:$0xff]  ;;  %10192 = vmatpush3.msra.mxu1 %v1224_v37  ;;  %v12143_v37 = vld [vmem:[%s11786_s24 + $0x80] sm:$0xff] }
  0xa3   : > { %v635_v33 = vsel %vm485_vm0, %v12017_v45, 0.0  ;;  %v673_v6 = vsel %vm485_vm0, %v12082_v47, 0.0  ;;  %v543_v20 = vadd.f32 %v11968_v40, %v541_v17  ;;  %v514_v45 = vadd.f32 %v11964_v38, %v512_v48 }
  0xa4   : > { %v609_v57 = vadd.f32 %v608_v62, %v607_v5  ;;  %v634_v1 = vadd.f32 %v633_v4, %v632_v31  ;;  %v672_v61 = vadd.f32 %v671_v3, %v670_v60  ;;  %v612_v49 = vsel %vm485_vm0, %v581_v39, 0.0  ;;  %v12140_v62 = vld [vmem:[%s11786_s24 + $0x48] sm:$0xff] }
  0xa5   : > { %v637_v53 = vsel %vm485_vm0, %v12027_v7, 0.0  ;;  %v675_v51 = vsel %vm485_vm0, %v12091_v43, 0.0  ;;  %v639_v3 = vsel %vm485_vm0, %v12035_v28, 0.0  ;;  %v677_v38 = vsel %vm485_vm0, %v12096_v34, 0.0 }
  0xa6   : > { %v636_v40 = vadd.f32 %v635_v33, %v634_v1  ;;  %v674_v4 = vadd.f32 %v673_v6, %v672_v61  ;;  %v611_v39 = vadd.f32 %v610_v54, %v609_v57  ;;  %v697_v7 = vsel %vm485_vm0, %v12108_v55, 0.0  ;;  %v12155_v1 = vld [vmem:[%s11786_s24 + $0x58] sm:$0xff]  ;;  %v12158_v61 = vld [vmem:[%s11786_s24 + $0x90] sm:$0xff] }
  0xa7   : > { %v698_v17 = vsel %vm485_vm0, %v12111_v23, 0.0  ;;  %v700_v48 = vsel %vm485_vm0, %v12114_v27, 0.0  ;;  %v545_v28 = vadd.f32 %v11972_v41, %v543_v20  ;;  %v614_v54 = vsel %vm485_vm0, %v12071_v35, 0.0 }
  0xa8   : > { %v638_v5 = vadd.f32 %v637_v53, %v636_v40  ;;  %v676_v31 = vadd.f32 %v675_v51, %v674_v4  ;;  %v699_v60 = vadd.f32 %v698_v17, %v697_v7  ;;  %v641_v33 = vsel %vm485_vm0, %v12047_v30, 0.0  ;;  %v12168_v7 = vld [vmem:[%s11786_s24 + $0x68] sm:$0xff] }
  0xa9   : > { %v679_v6 = vsel %vm485_vm0, %v12127_v8, 0.0  ;;  %v702_v57 = vsel %vm485_vm0, %v12124_v15, 0.0  ;;  %v516_v41 = vadd.f32 %v11978_v44, %v514_v45  ;;  %v613_v51 = vadd.f32 %v612_v49, %v611_v39 }
  0xaa   : > { %v640_v20 = vadd.f32 %v639_v3, %v638_v5  ;;  %v678_v53 = vadd.f32 %v677_v38, %v676_v31  ;;  %v701_v35 = vadd.f32 %v700_v48, %v699_v60  ;;  %v643_v30 = vsel %vm485_vm0, %v12061_v0, 0.0  ;;  %v12179_v48 = vld [vmem:[%s11786_s24 + $0x78] sm:$0xff]  ;;  %v12182_v5 = vld [vmem:[%s11786_s24 + $0xa0] sm:$0xff] }
  0xab   : > { %v681_v40 = vsel %vm485_vm0, %v12143_v37, 0.0  ;;  %v704_v4 = vsel %vm485_vm0, %v12140_v62, 0.0  ;;  %v547_v17 = vadd.f32 %v11982_v46, %v545_v28  ;;  %v586_v49 = vmul.f32 %v11928_v16, %v11928_v16 }
  0xac   : > { %v642_v44 = vadd.f32 %v641_v33, %v640_v20  ;;  %v680_v45 = vadd.f32 %v679_v6, %v678_v53  ;;  %v703_v3 = vadd.f32 %v702_v57, %v701_v35  ;;  %v645_v38 = vsel %vm485_vm0, %v584_v25, 0.0  ;;  %v12192_v20 = vld [vmem:[%s11786_s24 + $0x88] sm:$0xff] }
  0xad   : > { %v683_v0 = vsel %vm485_vm0, %v12158_v61, 0.0  ;;  %v706_v39 = vsel %vm485_vm0, %v12155_v1, 0.0  ;;  %v587_v46 = vmul.f32 %v11937_v24, %v11937_v24  ;;  %v548_v25 = vsel %vm485_vm0, %v516_v41, 0.0 }
  0xae   : > { %v644_v28 = vadd.f32 %v643_v30, %v642_v44  ;;  %v682_v31 = vadd.f32 %v681_v40, %v680_v45  ;;  %v705_v60 = vadd.f32 %v704_v4, %v703_v3  ;;  %v615_v33 = vadd.f32 %v614_v54, %v613_v51  ;;  %v12203_v51 = vld [vmem:[%s11786_s24 + $0x98] sm:$0xff]  ;;  %v12206_v4 = vld [vmem:[%s11786_s24 + $0xb0] sm:$0xff] }
  0xaf   : > { %v616_v6 = vsel %vm485_vm0, %v12100_v42, 0.0  ;;  %v708_v57 = vsel %vm485_vm0, %v12168_v7, 0.0  ;;  %v549_v53 = vsel %vm485_vm0, %v547_v17, 0.0  ;;  %v588_v40 = vmul.f32 %v11940_v26, %v11940_v26 }
  0xb0   : > { %v646_v35 = vadd.f32 %v645_v38, %v644_v28  ;;  %v684_v30 = vadd.f32 %v683_v0, %v682_v31  ;;  %v707_v44 = vadd.f32 %v706_v39, %v705_v60  ;;  %v647_v41 = vsel %vm485_vm0, %v586_v49, 0.0  ;;  %v12211_v49 = vld [vmem:[%s11786_s24 + $0xa8] sm:$0xff] }
  0xb1   : > { %v685_v54 = vsel %vm485_vm0, %v12182_v5, 0.0  ;;  %v710_v42 = vsel %vm485_vm0, %v12179_v48, 0.0  ;;  %v550_v45 = vadd.f32 %v549_v53, %v548_v25  ;;  %v617_v3 = vadd.f32 %v616_v6, %v615_v33  ;;  %v12220_v33 = vld [vmem:[%s11786_s24 + $0xb8] sm:$0xff]  ;;  %v12223_v6 = vld [vmem:[%s11786_s24 + $0xc0] sm:$0xff] }
  0xb2   : > { %v709_v17 = vadd.f32 %v708_v57, %v707_v44  ;;  %v712_v26 = vsel %vm485_vm0, %v12192_v20, 0.0  ;;  %v618_v38 = vsel %vm485_vm0, %v587_v46, 0.0  ;;  %v648_v0 = vadd.f32 %v647_v41, %v646_v35 }
  0xb3   : > { %v686_v39 = vadd.f32 %v685_v54, %v684_v30  ;;  %v649_v31 = vsel %vm485_vm0, %v588_v40, 0.0  ;;  %v687_v60 = vsel %vm485_vm0, %v12206_v4, 0.0  ;;  %v714_v25 = vsel %vm485_vm0, %v12203_v51, 0.0  ;;  %v12228_v30 = vld [vmem:[%s11786_s24 + $0xc8] sm:$0xff] }
  0xb4   : > { %v711_v28 = vadd.f32 %v710_v42, %v709_v17  ;;  %v551_v46 = vrot.slane %v550_v45, 4  ;;  %v619_v53 = vadd.f32 %v618_v38, %v617_v3  ;;  %v716_v35 = vsel %vm485_vm0, %v12211_v49, 0.0  ;;  %v12240_v3 = vld [vmem:[%s11786_s24 + $0xd8] sm:$0xff]  ;;  %v12243_v38 = vld [vmem:[%s11786_s24 + $0xe0] sm:$0xff] }
  0xb5   : > { %v650_v44 = vadd.f32 %v649_v31, %v648_v0  ;;  %v688_v40 = vadd.f32 %v687_v60, %v686_v39  ;;  %v689_v54 = vsel %vm485_vm0, %v12223_v6, 0.0  ;;  %v718_v42 = vsel %vm485_vm0, %v12220_v33, 0.0 }
  0xb6   : > { %v713_v57 = vadd.f32 %v712_v26, %v711_v28  ;;  %v737_v17 = vmul.f32 %v12038_v22, %v12038_v22  ;;  %v12237_v26 = vld [vmem:[%s11786_s24 + $0xd0] sm:$0xff]  ;;  %v739_v0 = vmul.f32 %v12041_v21, %v12041_v21  ;;  %v741_v39 = vmul.f32 %v12052_v52, %v12052_v52 }
  0xb7   : > { %v12249_v31 = vadd.f32 %v551_v46, %v550_v45  ;;  %v651_v60 = vsel %vm485_vm0, %v619_v53, 0.0  ;;  %v720_v22 = vsel %vm485_vm0, %v12228_v30, 0.0  ;;  %v690_v24 = vadd.f32 %v689_v54, %v688_v40  ;;  %v12275_v54 = vld [vmem:[%s11786_s24 + $0xf8] sm:$0xff] }
  0xb8   : > { %v715_v41 = vadd.f32 %v714_v25, %v713_v57  ;;  %v12255_v25 = vld [vmem:[%s11786_s24 + $0xf0] sm:$0xff]  ;;  %v652_v57 = vsel %vm485_vm0, %v650_v44, 0.0  ;;  %v743_v21 = vmul.f32 %v12067_v50, %v12067_v50  ;;  %v691_v52 = vsel %vm485_vm0, %v12237_v26, 0.0 }
  0xb9   : > { %v693_v45 = vsel %vm485_vm0, %v12243_v38, 0.0  ;;  %v722_v46 = vsel %vm485_vm0, %v12240_v3, 0.0  ;;  %v769_v53 = vsel %vm485_vm0, %v737_v17, 0.0  ;;  %v745_v44 = vmul.f32 %v12082_v47, %v12082_v47 }
  0xba   : > { %v717_v28 = vadd.f32 %v716_v35, %v715_v41  ;;  %v12268_v41 = vld [vmem:[%s11786_s24 + $0xe8] sm:$0xff]  ;;  %v770_v40 = vsel %vm485_vm0, %v739_v0, 0.0  ;;  %v772_v50 = vsel %vm485_vm0, %v741_v39, 0.0  ;;  %v738_v2 = vmul.f32 %v12108_v55, %v12108_v55  ;;  %s16407_s24 = scalar_lea.hbm %s16465_s8, %s9392_s18 }
  0xbb   : > { %v771_v17 = vadd.f32 %v770_v40, %v769_v53  ;;  %v692_v63 = vadd.f32 %v691_v52, %v690_v24  ;;  %v747_v47 = vmul.f32 %v12091_v43, %v12091_v43  ;;  %v774_v0 = vsel %vm485_vm0, %v743_v21, 0.0 }
  0xbc   : > { %v719_v35 = vadd.f32 %v718_v42, %v717_v28  ;;  %v653_v42 = vadd.f32 %v652_v57, %v651_v60  ;;  %v695_v28 = vsel %vm485_vm0, %v12255_v25, 0.0  ;;  %v724_v60 = vsel %vm485_vm0, %v12268_v41, 0.0 }
  0xbd   : > { %v742_v57 = vmul.f32 %v12114_v27, %v12114_v27  ;;  %v726_v55 = vsel %vm485_vm0, %v12275_v54, 0.0  ;;  %v744_v24 = vmul.f32 %v12124_v15, %v12124_v15  ;;  %v776_v43 = vsel %vm485_vm0, %v745_v44, 0.0 }
  0xbe   : > { %v721_v16 = vadd.f32 %v720_v22, %v719_v35  ;;  %v740_v22 = vmul.f32 %v12111_v23, %v12111_v23  ;;  %v773_v35 = vadd.f32 %v772_v50, %v771_v17  ;;  %v749_v23 = vmul.f32 %v12096_v34, %v12096_v34 }
  0xbf   : > { %v654_v21 = vrot.slane %v653_v42, 4  ;;  %v751_v52 = vmul.f32 %v12127_v8, %v12127_v8  ;;  %v778_v53 = vsel %vm485_vm0, %v747_v47, 0.0  ;;  %v800_v40 = vsel %vm485_vm0, %v738_v2, 0.0 }
  0xc0   : > { %v723_v39 = vadd.f32 %v722_v46, %v721_v16  ;;  %v746_v16 = vmul.f32 %v12140_v62, %v12140_v62  ;;  %v775_v27 = vadd.f32 %v774_v0, %v773_v35  ;;  %v694_v46 = vadd.f32 %v693_v45, %v692_v63 }
  0xc1   : > { %v801_v15 = vsel %vm485_vm0, %v740_v22, 0.0  ;;  %v803_v44 = vsel %vm485_vm0, %v742_v57, 0.0  ;;  %v748_v59 = vmul.f32 %v12155_v1, %v12155_v1  ;;  %v753_v62 = vmul.f32 %v12143_v37, %v12143_v37 }
  0xc2   : > { %v725_v50 = vadd.f32 %v724_v60, %v723_v39  ;;  %v777_v17 = vadd.f32 %v776_v43, %v775_v27  ;;  %v802_v34 = vadd.f32 %v801_v15, %v800_v40  ;;  %v780_v8 = vsel %vm485_vm0, %v749_v23, 0.0 }
  0xc3   : > { %v805_v63 = vsel %vm485_vm0, %v744_v24, 0.0  ;;  %v553_v45 = vrot.slane %v12249_v31, 2  ;;  %v750_v2 = vmul.f32 %v12168_v7, %v12168_v7  ;;  %v655_v0 = vadd.f32 %v654_v21, %v653_v42 }
  0xc4   : > { %v779_v22 = vadd.f32 %v778_v53, %v777_v17  ;;  %v804_v47 = vadd.f32 %v803_v44, %v802_v34  ;;  %v755_v39 = vmul.f32 %v12158_v61, %v12158_v61  ;;  %v782_v1 = vsel %vm485_vm0, %v751_v52, 0.0 }
  0xc5   : > { %v807_v60 = vsel %vm485_vm0, %v746_v16, 0.0  ;;  %v696_v37 = vadd.f32 %v695_v28, %v694_v46  ;;  %v727_v57 = vadd.f32 %v726_v55, %v725_v50  ;;  %v752_v24 = vmul.f32 %v12179_v48, %v12179_v48 }
  0xc6   : > { %v781_v35 = vadd.f32 %v780_v8, %v779_v22  ;;  %v806_v23 = vadd.f32 %v805_v63, %v804_v47  ;;  %v757_v7 = vmul.f32 %v12182_v5, %v12182_v5  ;;  %v784_v43 = vsel %vm485_vm0, %v753_v62, 0.0 }
  0xc7   : > { %v809_v42 = vsel %vm485_vm0, %v748_v59, 0.0  ;;  %v554_v61 = vadd.f32 %v553_v45, %v12249_v31  ;;  %v754_v21 = vmul.f32 %v12192_v20, %v12192_v20  ;;  %v656_v55 = vrot.slane %v655_v0, 2 }
  0xc8   : > { %v783_v16 = vadd.f32 %v782_v1, %v781_v35  ;;  %v808_v28 = vadd.f32 %v807_v60, %v806_v23  ;;  %v759_v52 = vmul.f32 %v12206_v4, %v12206_v4  ;;  %v786_v48 = vsel %vm485_vm0, %v755_v39, 0.0 }
  0xc9   : > { %v811_v27 = vsel %vm485_vm0, %v750_v2, 0.0  ;;  %v728_v5 = vsel %vm485_vm0, %v696_v37, 0.0  ;;  %v729_v46 = vsel %vm485_vm0, %v727_v57, 0.0  ;;  %v756_v31 = vmul.f32 %v12203_v51, %v12203_v51 }
  0xca   : > { %v785_v59 = vadd.f32 %v784_v43, %v783_v16  ;;  %v810_v53 = vadd.f32 %v809_v42, %v808_v28  ;;  %v761_v20 = vmul.f32 %v12223_v6, %v12223_v6  ;;  %v788_v40 = vsel %vm485_vm0, %v757_v7, 0.0 }
  0xcb   : > { %v813_v4 = vsel %vm485_vm0, %v752_v24, 0.0  ;;  %v758_v15 = vmul.f32 %v12211_v49, %v12211_v49  ;;  %v730_v34 = vadd.f32 %v729_v46, %v728_v5  ;;  %v763_v44 = vmul.f32 %v12237_v26, %v12237_v26  ;;  %v12355_v24 = vld [vmem:[#allocation8 + $0xf8] sm:$0xff] }
  0xcc   : > { %v787_v50 = vadd.f32 %v786_v48, %v785_v59  ;;  %v812_v17 = vadd.f32 %v811_v27, %v810_v53  ;;  %v790_v62 = vsel %vm485_vm0, %v759_v52, 0.0  ;;  %v815_v51 = vsel %vm485_vm0, %v754_v21, 0.0  ;;  %16668 = vst [vmem:[#allocation38_spill] sm:$0xff] %v12355_v24  ;;  %10305 = vmatprep.subr.mxu1 %v12355_v24 }
  0xcd   : > { %v555_v8 = vrot.slane %v554_v61, 1  ;;  %v657_v63 = vadd.f32 %v656_v55, %v655_v0  ;;  %v760_v2 = vmul.f32 %v12220_v33, %v12220_v33  ;;  %v765_v49 = vmul.f32 %v12243_v38, %v12243_v38 }
  0xce   : > { %v789_v6 = vadd.f32 %v788_v40, %v787_v50  ;;  %v814_v45 = vadd.f32 %v813_v4, %v812_v17  ;;  %v792_v22 = vsel %vm485_vm0, %v761_v20, 0.0  ;;  %v817_v47 = vsel %vm485_vm0, %v756_v31, 0.0 }
  0xcf   : > { %v731_v1 = vrot.slane %v730_v34, 4  ;;  %v762_v60 = vmul.f32 %v12228_v30, %v12228_v30  ;;  %v794_v0 = vsel %vm485_vm0, %v763_v44, 0.0  ;;  %v819_v37 = vsel %vm485_vm0, %v758_v15, 0.0 }
  0xd0   : > { %v791_v39 = vadd.f32 %v790_v62, %v789_v6  ;;  %v816_v26 = vadd.f32 %v815_v51, %v814_v45  ;;  %v556_v57 = vadd.f32 %v555_v8, %v554_v61  ;;  %v658_v35 = vrot.slane %v657_v63, 1 }
  0xd1   : > { %v764_v38 = vmul.f32 %v12240_v3, %v12240_v3  ;;  %v767_v7 = vmul.f32 %v12255_v25, %v12255_v25  ;;  %v796_v43 = vsel %vm485_vm0, %v765_v49, 0.0  ;;  %v821_v30 = vsel %vm485_vm0, %v760_v2, 0.0 }
  0xd2   : > { %v793_v33 = vadd.f32 %v792_v22, %v791_v39  ;;  %v818_v23 = vadd.f32 %v817_v47, %v816_v26  ;;  %v732_v61 = vadd.f32 %v731_v1, %v730_v34  ;;  %v766_v16 = vmul.f32 %v12268_v41, %v12268_v41 }
  0xd3   : > { %v823_v28 = vsel %vm485_vm0, %v762_v60, 0.0  ;;  %v659_v55 = vadd.f32 %v658_v35, %v657_v63  ;;  %v12367_v52 = vmul.f32 0.00390625, %v556_v57  ;;  %v768_v25 = vmul.f32 %v12275_v54, %v12275_v54 }
  0xd4   : > { %v795_v42 = vadd.f32 %v794_v0, %v793_v33  ;;  %v820_v21 = vadd.f32 %v819_v37, %v818_v23  ;;  %v798_v27 = vsel %vm485_vm0, %v767_v7, 0.0  ;;  %v825_v5 = vsel %vm485_vm0, %v764_v38, 0.0 }
  0xd5   : > { %16669 = vst [vmem:[#allocation39_spill] sm:$0xff] %v12367_v52  ;;  %v733_v59 = vrot.slane %v732_v61, 2  ;;  %v827_v53 = vsel %vm485_vm0, %v766_v16, 0.0  ;;  %v662_v31 = vmul.f32 0.00390625, %v659_v55  ;;  %v663_v41 = vmul.f32 %v12367_v52, %v12367_v52 }
  0xd6   : > { %v797_v3 = vadd.f32 %v796_v43, %v795_v42  ;;  %v822_v48 = vadd.f32 %v821_v30, %v820_v21  ;;  %v829_v4 = vsel %vm485_vm0, %v768_v25, 0.0  ;;  %v847_v0 = vsub.f32 %v11807_v11, %v12367_v52 }
  0xd7   : > { %v734_v50 = vadd.f32 %v733_v59, %v732_v61  ;;  %v664_v17 = vsub.f32 %v662_v31, %v663_v41  ;;  %v12386_v37 = vmul.f32 0.25, %v11807_v11  ;;  %v848_v57 = vsub.f32 %v11810_v12, %v12367_v52  ;;  %v16673_v31 = vld [vmem:[#allocation21_spill] sm:$0xff] }
  0xd8   : > { %v824_v46 = vadd.f32 %v823_v28, %v822_v48  ;;  %v799_v20 = vadd.f32 %v798_v27, %v797_v3  ;;  %v12391_v33 = vmul.f32 0.25, %v11810_v12  ;;  %v845_v23 = vsub.f32 %v11801_v9, %v12367_v52  ;;  %v16671_v3 = vld [vmem:[#allocation20_spill] sm:$0xff] }
  0xd9   : > { %v735_v62 = vrot.slane %v734_v50, 1  ;;  %v665_v8 = vmax.f32 %v664_v17, 0.0  ;;  %v12396_v38 = vmul.f32 0.25, %v11801_v9  ;;  %v846_v7 = vsub.f32 %v11804_v10, %v12367_v52 }
  0xda   : > { %v826_v40 = vadd.f32 %v825_v5, %v824_v46  ;;  %v831_v34 = vsel %vm485_vm0, %v799_v20, 0.0  ;;  %v12401_v43 = vmul.f32 0.25, %v11804_v10  ;;  %v849_v11 = vsub.f32 %v11813_v13, %v12367_v52  ;;  %v16674_v20 = vld [vmem:[#allocation22_spill] sm:$0xff] }
  0xdb   : > { %v736_v6 = vadd.f32 %v735_v62, %v734_v50  ;;  %v877_v2 = vadd.f32 1e-05, %v665_v8  ;;  %v12406_v30 = vmul.f32 0.25, %v11813_v13  ;;  %v850_v42 = vsub.f32 %v11816_v14, %v12367_v52  ;;  %v16670_v13 = vld [vmem:[#allocation19_spill] sm:$0xff] }
  0xdc   : > { %v828_v15 = vadd.f32 %v827_v53, %v826_v40  ;;  %v12411_v21 = vmul.f32 0.25, %v11816_v14  ;;  %v851_v9 = vsub.f32 %v11825_v18, %v12367_v52  ;;  %v12416_v61 = vmul.f32 0.25, %v11825_v18 }
  0xdd   : > { %v12379_v47 = vmul.f32 0.00390625, %v736_v6  ;;  %11341 = vrsqrt.f32 %v877_v2  ;;  %v852_v10 = vsub.f32 %v11828_v19, %v12367_v52  ;;  %v12421_v16 = vmul.f32 0.25, %v11828_v19 }
  0xde   : > { %v830_v54 = vadd.f32 %v829_v4, %v828_v15  ;;  %v853_v28 = vsub.f32 %v16670_v13, %v12367_v52  ;;  %v12428_v14 = vmul.f32 0.25, %v16670_v13  ;;  %v854_v48 = vsub.f32 %v16671_v3, %v12367_v52  ;;  %v16675_v4 = vld [vmem:[#allocation23_spill] sm:$0xff] }
  0xdf   : > { %v842_v1 = vmul.f32 %v12379_v47, %v12379_v47  ;;  %v12433_v18 = vmul.f32 0.25, %v16671_v3  ;;  %v855_v25 = vsub.f32 %v11845_v29, %v12367_v52  ;;  %v12438_v19 = vmul.f32 0.25, %v11845_v29 }
  0xe0   : > { %v832_v44 = vsel %vm485_vm0, %v830_v54, 0.0  ;;  %v856_v27 = vsub.f32 %v11850_v32, %v12367_v52  ;;  %v12443_v5 = vmul.f32 0.25, %v11850_v32  ;;  %v857_v59 = vsub.f32 %v11855_v36, %v12367_v52 }
  0xe1   : > { %v833_v51 = vadd.f32 %v832_v44, %v831_v34  ;;  %v12451_v53 = vmul.f32 0.25, %v11855_v36  ;;  %v858_v29 = vsub.f32 %v16673_v31, %v12367_v52  ;;  %v12456_v41 = vmul.f32 0.25, %v16673_v31  ;;  %v16676_v36 = vld [vmem:[#allocation24_spill] sm:$0xff]  ;;  %v16678_v34 = vld [vmem:[#allocation25_spill] sm:$0xff] }
  0xe2   : > { %v859_v32 = vsub.f32 %v16674_v20, %v12367_v52  ;;  %v12461_v40 = vmul.f32 0.25, %v16674_v20  ;;  %v860_v15 = vsub.f32 %v16675_v4, %v12367_v52  ;;  %v12466_v50 = vmul.f32 0.25, %v16675_v4 }
  0xe3   : > { %v834_v63 = vrot.slane %v833_v51, 4  ;;  %v861_v17 = vsub.f32 %v16676_v36, %v12367_v52  ;;  %v12471_v54 = vmul.f32 0.25, %v16676_v36  ;;  %v862_v44 = vsub.f32 %v16678_v34, %v12367_v52 }
  0xe4   : > { %v863_v8 = vsub.f32 %v11885_v56, %v12367_v52 }
  0xe5   : > { %v835_v45 = vadd.f32 %v834_v63, %v833_v51  ;;  %16677 = vst [vmem:[#allocation20_spill] sm:$0xff] %v12471_v54  ;;  %v12477_v51 = vmul.f32 0.25, %v16678_v34  ;;  %v12482_v63 = vmul.f32 0.25, %v11885_v56 }
  0xe7   : > { %v836_v49 = vrot.slane %v835_v45, 2  ;;  %16679 = vst [vmem:[#allocation21_spill] sm:$0xff] %v12477_v51  ;;  %16680 = vst [vmem:[#allocation22_spill] sm:$0xff] %v12482_v63 }
  0xe9   : > { %v837_v22 = vadd.f32 %v836_v49, %v835_v45 }
  0xea   : > { %v12445_v46 = vpop.eup %11341 }
  0xeb   : > { %v838_v39 = vrot.slane %v837_v22, 1  ;;  %16672 = vst [vmem:[#allocation19_spill] sm:$0xff] %v12445_v46  ;;  %v881_v62 = vmul.f32 %v12445_v46, %v847_v0  ;;  %v882_v6 = vmul.f32 %v12445_v46, %v848_v57  ;;  %v879_v45 = vmul.f32 %v12445_v46, %v845_v23  ;;  %v16681_v0 = vld [vmem:[#allocation26_spill] sm:$0xff] }
  0xec   : > { %v880_v2 = vmul.f32 %v12445_v46, %v846_v7  ;;  %v883_v49 = vmul.f32 %v12445_v46, %v849_v11  ;;  %v12495_v56 = vmul.f32 %v12445_v46, %v854_v48  ;;  %v865_v57 = vsub.f32 %v16681_v0, %v12367_v52 }
  0xed   : > { %v839_v26 = vadd.f32 %v838_v39, %v837_v22  ;;  %v884_v22 = vmul.f32 %v12445_v46, %v850_v42  ;;  %v885_v39 = vmul.f32 %v12445_v46, %v851_v9  ;;  %v12504_v7 = vmul.f32 %v12445_v46, %v855_v25  ;;  %v16683_v42 = vld [vmem:[#allocation27_spill] sm:$0xff] }
  0xee   : > { %v12507_v11 = vmul.f32 %v12445_v46, %v856_v27  ;;  %v867_v9 = vsub.f32 %v16683_v42, %v12367_v52  ;;  %v12518_v13 = vmul.f32 %v12445_v46, %v859_v32  ;;  %v12524_v3 = vmul.f32 %v12445_v46, %v861_v17  ;;  %v16689_v17 = vld [vmem:[#allocation30_spill] sm:$0xff] }
  0xef   : > { %v841_v60 = vmul.f32 0.00390625, %v839_v26  ;;  %v886_v26 = vmul.f32 %v12445_v46, %v852_v10  ;;  %v12515_v10 = vmul.f32 %v12445_v46, %v858_v29  ;;  %v12527_v48 = vmul.f32 %v12445_v46, %v862_v44  ;;  %v16690_v44 = vld [vmem:[#allocation31_spill] sm:$0xff] }
  0xf0   : > { %v12530_v25 = vmul.f32 %v12445_v46, %v863_v8  ;;  %v12533_v27 = vmul.f32 0.25, %v11888_v58  ;;  %v12542_v29 = vmul.f32 %v12445_v46, %v865_v57  ;;  %v12551_v4 = vmul.f32 %v12445_v46, %v867_v9  ;;  %v16692_v57 = vld [vmem:[#allocation33_spill] sm:$0xff] }
  0xf1   : > { %v843_v35 = vsub.f32 %v841_v60, %v842_v1  ;;  %v12492_v1 = vmul.f32 %v12445_v46, %v853_v28  ;;  %v864_v60 = vsub.f32 %v11888_v58, %v12367_v52  ;;  %v12521_v28 = vmul.f32 %v12445_v46, %v860_v15  ;;  %v16688_v15 = vld [vmem:[#allocation29_spill] sm:$0xff] }
  0xf2   : > { %16684 = vst [vmem:[#allocation23_spill] sm:$0xff] %v12533_v27  ;;  %v12554_v58 = vmul.f32 0.25, %v16683_v42  ;;  %v868_v36 = vsub.f32 %v16688_v15, %v12367_v52  ;;  %v869_v34 = vsub.f32 %v16689_v17, %v12367_v52  ;;  %v870_v8 = vsub.f32 %v16690_v44, %v12367_v52 }
  0xf3   : > { %v844_v12 = vmax.f32 %v843_v35, 0.0  ;;  %v16682_v35 = vld [vmem:[#allocation28_spill] sm:$0xff]  ;;  %v12539_v31 = vmul.f32 %v12445_v46, %v864_v60 }
  0xf4   : > { %v866_v23 = vsub.f32 %v16682_v35, %v12367_v52  ;;  %v12548_v32 = vmul.f32 0.25, %v16682_v35  ;;  %16687 = vst [vmem:[#allocation26_spill] sm:$0xff] %v12554_v58  ;;  %v16691_v60 = vld [vmem:[#allocation32_spill] sm:$0xff]  ;;  %v872_v35 = vsub.f32 %v16692_v57, %v12367_v52  ;;  %v16694_v58 = vld [vmem:[#allocation35_spill] sm:$0xff]  ;;  %v12577_v57 = vmul.f32 0.25, %v16688_v15 }
  0xf5   : > { %v12425_v55 = vadd.f32 1e-05, %v844_v12  ;;  %v12510_v12 = vmul.f32 %v12445_v46, %v857_v59  ;;  %v12536_v59 = vmul.f32 0.25, %v16681_v0  ;;  %v871_v0 = vsub.f32 %v16691_v60, %v12367_v52 }
  0xf6   : > { %v12545_v20 = vmul.f32 %v12445_v46, %v866_v23  ;;  %16686 = vst [vmem:[#allocation25_spill] sm:$0xff] %v12548_v32  ;;  %v16693_v23 = vld [vmem:[#allocation34_spill] sm:$0xff]  ;;  %v874_v32 = vsub.f32 %v16694_v58, %v12367_v52  ;;  %v12583_v51 = vmul.f32 %v12445_v46, %v868_v36  ;;  %v12586_v54 = vmul.f32 %v12445_v46, %v869_v34 }
  0xf7   : > { %11343 = vrsqrt.f32 %v12425_v55  ;;  %16685 = vst [vmem:[#allocation24_spill] sm:$0xff] %v12536_v59  ;;  %v873_v9 = vsub.f32 %v16693_v23, %v12367_v52  ;;  %vm914_vm1 = vcmp.eq.f32.partialorder %v12425_v55, inf  ;;  %v917_v24 = vand.u32 2147483648, %v12425_v55  ;;  %v16695_v59 = vld [vmem:[#allocation36_spill] sm:$0xff] }
  0xf8   : > { %v875_v27 = vsub.f32 %v16695_v59, %v12367_v52  ;;  %vm916_vm2 = vcmp.eq.f32.partialorder %v12425_v55, 0.0  ;;  %v12580_v23 = vmul.f32 0.25, %v16689_v17  ;;  %v12589_v58 = vmul.f32 0.25, %v16690_v44 }
  0xf9   : > { %v12592_v59 = vmul.f32 0.25, %v16691_v60  ;;  %v12596_v15 = vmul.f32 %v12445_v46, %v870_v8  ;;  %v12599_v17 = vmul.f32 %v12445_v46, %v871_v0  ;;  %v12602_v36 = vmul.f32 %v12445_v46, %v872_v35 }
  0xfa   : > { %16696 = vst [vmem:[#allocation28_spill] sm:$0xff] %v12580_v23  ;;  %16697 = vst [vmem:[#allocation27_spill] sm:$0xff] %v12589_v58  ;;  %v12607_v34 = vmul.f32 %v12445_v46, %v873_v9  ;;  %v12610_v44 = vmul.f32 %v12445_v46, %v874_v32  ;;  %v12613_v60 = vmul.f32 %v12445_v46, %v875_v27 }
  0xfb   : > { %16698 = vst [vmem:[#allocation29_spill] sm:$0xff] %v12592_v59 }
 0x104   : > { %v11344_v42 = vpop.eup %11343 }
 0x105   : > { %v913_v63 = vmul.f32 %v11344_v42, %v12425_v55 }
 0x107   : > { %v915_v42 = vsel %vm914_vm1, %v12425_v55, %v913_v63 }
 0x108   : > { %v12604_v52 = vsel %vm916_vm2, %v917_v24, %v915_v42 }
 0x109   : > { %v921_v55 = vmul.f32 %v12604_v52, %v881_v62  ;;  %v922_v63 = vmul.f32 %v12604_v52, %v882_v6  ;;  %v919_v8 = vmul.f32 %v12604_v52, %v879_v45  ;;  %v920_v0 = vmul.f32 %v12604_v52, %v880_v2 }
 0x10a   : > { %v923_v24 = vmul.f32 %v12604_v52, %v883_v49  ;;  %v924_v35 = vmul.f32 %v12604_v52, %v884_v22  ;;  %v925_v9 = vmul.f32 %v12604_v52, %v885_v39  ;;  %v926_v32 = vmul.f32 %v12604_v52, %v886_v26 }
 0x10b   : > { %v953_v42 = vadd.f32 %v921_v55, %v12379_v47  ;;  %v954_v27 = vadd.f32 %v922_v63, %v12379_v47  ;;  %v951_v62 = vadd.f32 %v919_v8, %v12379_v47  ;;  %v952_v6 = vadd.f32 %v920_v0, %v12379_v47 }
 0x10c   : > { %v955_v45 = vadd.f32 %v923_v24, %v12379_v47  ;;  %v956_v2 = vadd.f32 %v924_v35, %v12379_v47  ;;  %v957_v49 = vadd.f32 %v925_v9, %v12379_v47  ;;  %v958_v22 = vadd.f32 %v926_v32, %v12379_v47 }
 0x10d   : > { %v985_v46 = vmul.f32 0.75, %v953_v42  ;;  %v986_v39 = vmul.f32 0.75, %v954_v27  ;;  %v983_v59 = vmul.f32 0.75, %v951_v62  ;;  %v984_v26 = vmul.f32 0.75, %v952_v6 }
 0x10e   : > { %v987_v58 = vmul.f32 0.75, %v955_v45  ;;  %v988_v55 = vmul.f32 0.75, %v956_v2  ;;  %v989_v23 = vmul.f32 0.75, %v957_v49  ;;  %v990_v63 = vmul.f32 0.75, %v958_v22 }
 0x10f   : > { %v12632_v8 = vadd.f32 %v12386_v37, %v985_v46  ;;  %v12635_v0 = vadd.f32 %v12391_v33, %v986_v39  ;;  %v12638_v24 = vadd.f32 %v12396_v38, %v983_v59  ;;  %v12641_v35 = vadd.f32 %v12401_v43, %v984_v26 }
 0x110   : > { %v12644_v9 = vadd.f32 %v12406_v30, %v987_v58  ;;  %v12647_v32 = vadd.f32 %v12411_v21, %v988_v55  ;;  %v12650_v42 = vadd.f32 %v12416_v61, %v989_v23  ;;  %v12653_v37 = vadd.f32 %v12421_v16, %v990_v63 }
 0x111   : > { %16699 = vst [vmem:[#allocation30_spill] sm:$0xff] %v12632_v8  ;;  %16700 = vst [vmem:[#allocation31_spill] sm:$0xff] %v12635_v0  ;;  %v927_v33 = vmul.f32 %v12604_v52, %v12492_v1  ;;  %v928_v38 = vmul.f32 %v12604_v52, %v12495_v56  ;;  %v929_v43 = vmul.f32 %v12604_v52, %v12504_v7 }
 0x112   : > { %16701 = vst [vmem:[#allocation32_spill] sm:$0xff] %v12638_v24  ;;  %16702 = vst [vmem:[#allocation33_spill] sm:$0xff] %v12641_v35  ;;  %v930_v30 = vmul.f32 %v12604_v52, %v12507_v11  ;;  %v931_v21 = vmul.f32 %v12604_v52, %v12510_v12  ;;  %v932_v61 = vmul.f32 %v12604_v52, %v12515_v10 }
 0x113   : > { %16703 = vst [vmem:[#allocation34_spill] sm:$0xff] %v12644_v9  ;;  %16704 = vst [vmem:[#allocation35_spill] sm:$0xff] %v12647_v32  ;;  %v933_v16 = vmul.f32 %v12604_v52, %v12518_v13  ;;  %v934_v46 = vmul.f32 %v12604_v52, %v12521_v28  ;;  %v959_v1 = vadd.f32 %v927_v33, %v12379_v47 }
 0x114   : > { %16705 = vst [vmem:[#allocation36_spill] sm:$0xff] %v12650_v42  ;;  %16706 = vst [vmem:[#allocation40_spill] sm:$0xff] %v12653_v37  ;;  %v960_v56 = vadd.f32 %v928_v38, %v12379_v47  ;;  %v961_v7 = vadd.f32 %v929_v43, %v12379_v47  ;;  %v962_v11 = vadd.f32 %v930_v30, %v12379_v47  ;;  %v16715_v30 = vld [vmem:[#allocation37_spill] sm:$0xff] }
 0x115   : > { %1114 = vst.msk [vmem:[#allocation2 + $0x8] sm:$0xff] %vm485_vm0, %v12632_v8  ;;  %1084 = vst.msk [vmem:[#allocation2 + $0x48] sm:$0xff] %vm485_vm0, %v12632_v8  ;;  %v963_v23 = vadd.f32 %v931_v21, %v12379_v47  ;;  %v964_v12 = vadd.f32 %v932_v61, %v12379_v47  ;;  %v965_v10 = vadd.f32 %v933_v16, %v12379_v47  ;;  %v991_v13 = vmul.f32 0.75, %v959_v1  ;;  %v1953_v16 = vld [vmem:[#allocation8 + $0xa8] sm:$0xff] }
 0x116   : > { %1115 = vst.msk [vmem:[#allocation2 + $0x10] sm:$0xff] %vm485_vm0, %v12635_v0  ;;  %1085 = vst.msk [vmem:[#allocation2 + $0x50] sm:$0xff] %vm485_vm0, %v12635_v0  ;;  %v966_v58 = vadd.f32 %v934_v46, %v12379_v47  ;;  %v992_v59 = vmul.f32 0.75, %v960_v56  ;;  %v993_v27 = vmul.f32 0.75, %v961_v7  ;;  %v994_v28 = vmul.f32 0.75, %v962_v11 }
 0x117   : > { %1082 = vst.msk [vmem:[#allocation2 + $0x28] sm:$0xff] %vm485_vm0, %v12638_v24  ;;  %1083 = vst.msk [vmem:[#allocation2 + $0x30] sm:$0xff] %vm485_vm0, %v12641_v35  ;;  %v995_v62 = vmul.f32 0.75, %v963_v23  ;;  %v996_v6 = vmul.f32 0.75, %v964_v12  ;;  %v997_v45 = vmul.f32 0.75, %v965_v10  ;;  %v12700_v49 = vadd.f32 %v12428_v14, %v991_v13 }
 0x118   : > { %1086 = vst.msk [vmem:[#allocation2 + $0x68] sm:$0xff] %vm485_vm0, %v12644_v9  ;;  %1087 = vst.msk [vmem:[#allocation2 + $0x70] sm:$0xff] %vm485_vm0, %v12647_v32  ;;  %v998_v2 = vmul.f32 0.75, %v966_v58  ;;  %v12703_v22 = vadd.f32 %v12433_v18, %v992_v59  ;;  %v12706_v39 = vadd.f32 %v12438_v19, %v993_v27  ;;  %v12709_v26 = vadd.f32 %v12443_v5, %v994_v28  ;;  %v1954_v5 = vld [vmem:[#allocation8 + $0xb0] sm:$0xff]  ;;  %v1952_v58 = vld [vmem:[#allocation8 + $0xa0] sm:$0xff] }
 0x119   : > { %1088 = vst.msk [vmem:[#allocation2 + $0x88] sm:$0xff] %vm485_vm0, %v12650_v42  ;;  %1089 = vst.msk [vmem:[#allocation2 + $0x90] sm:$0xff] %vm485_vm0, %v12653_v37  ;;  %v12712_v38 = vadd.f32 %v12451_v53, %v995_v62  ;;  %v12715_v43 = vadd.f32 %v12456_v41, %v996_v6  ;;  %v12718_v14 = vadd.f32 %v12461_v40, %v997_v45  ;;  %v3923_v42 = vld [vmem:[#allocation8 + $0x1e0] sm:$0xff] }
 0x11a   : > { %16707 = vst [vmem:[#allocation41_spill] sm:$0xff] %v12700_v49  ;;  %16708 = vst [vmem:[#allocation42_spill] sm:$0xff] %v12703_v22  ;;  %v12721_v18 = vadd.f32 %v12466_v50, %v998_v2  ;;  %v935_v53 = vmul.f32 %v12604_v52, %v12524_v3  ;;  %v936_v41 = vmul.f32 %v12604_v52, %v12527_v48 }
 0x11b   : > { %16709 = vst [vmem:[#allocation43_spill] sm:$0xff] %v12706_v39  ;;  %16710 = vst [vmem:[#allocation44_spill] sm:$0xff] %v12709_v26  ;;  %v937_v40 = vmul.f32 %v12604_v52, %v12530_v25  ;;  %v938_v50 = vmul.f32 %v12604_v52, %v12539_v31  ;;  %v939_v3 = vmul.f32 %v12604_v52, %v12542_v29 }
 0x11c   : > { %v1232_v55 = vld [vmem:[#allocation2 + $0x8] sm:$0xff]  ;;  %16711 = vst [vmem:[#allocation45_spill] sm:$0xff] %v12712_v38  ;;  %16712 = vst [vmem:[#allocation46_spill] sm:$0xff] %v12715_v43  ;;  %v940_v48 = vmul.f32 %v12604_v52, %v12545_v20  ;;  %v941_v25 = vmul.f32 %v12604_v52, %v12551_v4  ;;  %v942_v31 = vmul.f32 %v12604_v52, %v12583_v51  ;;  %v11345_v20 = vld [vmem:[%s11778_s20 + $0xd8] sm:$0xff] }
 0x11d   : > { %v1233_v63 = vld [vmem:[#allocation2 + $0x10] sm:$0xff]  ;;  %16713 = vst [vmem:[#allocation47_spill] sm:$0xff] %v12718_v14  ;;  %16714 = vst [vmem:[#allocation48_spill] sm:$0xff] %v12721_v18  ;;  %10129 = vmatprep.mubr.msk.f32.mxu0 %vm485_vm0, %v1232_v55  ;;  %v1119_v19 = vld [vmem:[#allocation2 + $0x9] sm:$0x1]  ;;  %v967_v46 = vadd.f32 %v935_v53, %v12379_v47  ;;  %v968_v29 = vadd.f32 %v936_v41, %v12379_v47  ;;  %v969_v1 = vadd.f32 %v937_v40, %v12379_v47 }
 0x11e   : > { %v1234_v33 = vld [vmem:[#allocation2 + $0x28] sm:$0xff]  ;;  %1090 = vst.msk [vmem:[#allocation2 + $0xa8] sm:$0xff] %vm485_vm0, %v12700_v49  ;;  %1091 = vst.msk [vmem:[#allocation2 + $0xb0] sm:$0xff] %vm485_vm0, %v12703_v22  ;;  %10130 = vmatmul.mubr.msk.f32.vlgmr.msra.gmra.mxu0 %vm485_vm0, %v1233_v63  ;;  %v1235_v21 = vld [vmem:[#allocation2 + $0x30] sm:$0xff]  ;;  %v12764_v56 = vmul.f32 0.25, %v11345_v20  ;;  %v970_v7 = vadd.f32 %v938_v50, %v12379_v47  ;;  %v971_v11 = vadd.f32 %v939_v3, %v12379_v47 }
 0x11f   : > { %1092 = vst.msk [vmem:[#allocation2 + $0xc8] sm:$0xff] %vm485_vm0, %v12706_v39  ;;  %1093 = vst.msk [vmem:[#allocation2 + $0xd0] sm:$0xff] %vm485_vm0, %v12709_v26  ;;  %10242 = vmatpush3.msra.mxu0 %v16715_v30  ;;  %10132 = vmatprep.mubr.msk.f32.mxu0 %vm485_vm0, %v1234_v33  ;;  %v1120_v61 = vld [vmem:[#allocation2 + $0x29] sm:$0x1]  ;;  %v972_v23 = vadd.f32 %v940_v48, %v12379_v47  ;;  %v973_v12 = vadd.f32 %v941_v25, %v12379_v47  ;;  %v999_v13 = vmul.f32 0.75, %v967_v46  ;;  %v1237_v63 = vld [vmem:[#allocation2 + $0x50] sm:$0xff] }
 0x120   : > { %1138 = vst.msk [vmem:[#allocation2 + $0x7] sm:$0x1] %vm1137_vm3, %v1119_v19  ;;  %v1236_v4 = vld [vmem:[#allocation2 + $0x48] sm:$0xff]  ;;  %10243 = vmatprep.subr.mxu0 %v1954_v5  ;;  %1139 = vst.msk [vmem:[#allocation2 + $0x27] sm:$0x1] %vm1137_vm3, %v1120_v61  ;;  %v1000_v59 = vmul.f32 0.75, %v968_v29  ;;  %v974_v27 = vadd.f32 %v942_v31, %v12379_v47  ;;  %v943_v28 = vmul.f32 %v12604_v52, %v12586_v54 }
 0x121   : > { %1094 = vst.msk [vmem:[#allocation2 + $0xe8] sm:$0xff] %vm485_vm0, %v12712_v38  ;;  %1095 = vst.msk [vmem:[#allocation2 + $0xf0] sm:$0xff] %vm485_vm0, %v12715_v43  ;;  %v1121_v51 = vld [vmem:[#allocation2 + $0x49] sm:$0x1]  ;;  %10244 = vmatpush3.msra.mxu0 %v1954_v5  ;;  %v1001_v6 = vmul.f32 0.75, %v969_v1  ;;  %v1002_v45 = vmul.f32 0.75, %v970_v7  ;;  %v944_v55 = vmul.f32 %v12604_v52, %v12596_v15 }
 0x122   : > { %1096 = vst.msk [vmem:[#allocation2 + $0x108] sm:$0xff] %vm485_vm0, %v12718_v14  ;;  %1097 = vst.msk [vmem:[#allocation2 + $0x110] sm:$0xff] %vm485_vm0, %v12721_v18  ;;  %v1122_v10 = vld [vmem:[#allocation2 + $0x69] sm:$0x1]  ;;  %10133 = vmatmul.mubr.msk.f32.gmra.mxu0 %vm485_vm0, %v1235_v21  ;;  %10245 = vmatprep.subr.mxu0 %v1953_v16  ;;  %v1003_v2 = vmul.f32 0.75, %v971_v11  ;;  %v16718_v19 = vld [vmem:[#allocation21_spill] sm:$0xff] }
 0x123   : > { %1140 = vst.msk [vmem:[#allocation2 + $0x47] sm:$0x1] %vm1137_vm3, %v1121_v51  ;;  %1141 = vst.msk [vmem:[#allocation2 + $0x67] sm:$0x1] %vm1137_vm3, %v1122_v10  ;;  %v1123_v62 = vld [vmem:[#allocation2 + $0x89] sm:$0x1]  ;;  %10135 = vmatprep.mubr.msk.f32.mxu0 %vm485_vm0, %v1236_v4  ;;  %10246 = vmatpush3.msra.mxu0 %v1953_v16  ;;  %v12785_v5 = vadd.f32 %v16718_v19, %v1000_v59  ;;  %v975_v51 = vadd.f32 %v943_v28, %v12379_v47 }
 0x124   : > { %1142 = vst.msk [vmem:[#allocation2 + $0x87] sm:$0x1] %vm1137_vm3, %v1123_v62  ;;  %v16716_v33 = vld [vmem:[#allocation20_spill] sm:$0xff]  ;;  %v1004_v53 = vmul.f32 0.75, %v972_v23  ;;  %v1005_v41 = vmul.f32 0.75, %v973_v12  ;;  %10247 = vmatprep.subr.mxu0 %v1952_v58  ;;  %v16720_v48 = vld [vmem:[#allocation22_spill] sm:$0xff]  ;;  %v976_v7 = vadd.f32 %v944_v55, %v12379_v47  ;;  %v945_v10 = vmul.f32 %v12604_v52, %v12599_v17 }
 0x125   : > { %v12782_v54 = vadd.f32 %v16716_v33, %v999_v13  ;;  %16719 = vst [vmem:[#allocation20_spill] sm:$0xff] %v12785_v5  ;;  %v1156_v40 = vld [vmem:[#allocation2 + $0x16] sm:$0x1]  ;;  %v1238_v3 = vld [vmem:[#allocation2 + $0x68] sm:$0xff]  ;;  %v12788_v15 = vadd.f32 %v16720_v48, %v1001_v6  ;;  %v16722_v25 = vld [vmem:[#allocation23_spill] sm:$0xff]  ;;  %v1006_v61 = vmul.f32 0.75, %v974_v27  ;;  %10248 = vmatpush3.msra.mxu0 %v1952_v58  ;;  %v946_v58 = vmul.f32 %v12604_v52, %v12602_v36 }
 0x126   : > { %v1193_v50 = vld [vmem:[#allocation2 + $0xf] sm:$0xff]  ;;  %v12791_v31 = vadd.f32 %v16722_v25, %v1002_v45  ;;  %1174 = vst.msk [vmem:[#allocation2 + $0x18] sm:$0x1] %vm1137_vm3, %v1156_v40  ;;  %v1951_v46 = vld [vmem:[#allocation8 + $0x98] sm:$0xff]  ;;  %10136 = vmatmul.mubr.msk.f32.gmra.mxu0 %vm485_vm0, %v1237_v63  ;;  %v1124_v11 = vld [vmem:[#allocation2 + $0xa9] sm:$0x1]  ;;  %v947_v62 = vmul.f32 %v12604_v52, %v12607_v34  ;;  %v948_v6 = vmul.f32 %v12604_v52, %v12610_v44 }
 0x127   : > { %16717 = vst [vmem:[#allocation37_spill] sm:$0xff] %v12782_v54  ;;  %16721 = vst [vmem:[#allocation21_spill] sm:$0xff] %v12788_v15  ;;  %v16724_v30 = vld [vmem:[#allocation24_spill] sm:$0xff]  ;;  %v16726_v29 = vld [vmem:[#allocation25_spill] sm:$0xff]  ;;  %v12818_v12 = vadd.f32 %v12577_v57, %v1006_v61  ;;  %10138 = vmatprep.mubr.msk.f32.mxu0 %vm485_vm0, %v1238_v3  ;;  %v1007_v17 = vmul.f32 0.75, %v975_v51  ;;  %v1008_v36 = vmul.f32 0.75, %v976_v7  ;;  %10249 = vmatprep.subr.mxu0 %v1951_v46 }
 0x128   : > { %16723 = vst [vmem:[#allocation22_spill] sm:$0xff] %v12791_v31  ;;  %v12794_v21 = vadd.f32 %v16724_v30, %v1003_v2  ;;  %v1192_v16 = vld [vmem:[#allocation2 + $0x7] sm:$0xff]  ;;  %1098 = vst.msk [vmem:[#allocation2 + $0x128] sm:$0xff] %vm485_vm0, %v12782_v54  ;;  %v12802_v1 = vadd.f32 %v16726_v29, %v1004_v53  ;;  %v16728_v20 = vld [vmem:[#allocation26_spill] sm:$0xff]  ;;  %v977_v55 = vadd.f32 %v945_v10, %v12379_v47  ;;  %10250 = vmatpush3.msra.mxu0 %v1951_v46 }
 0x129   : > { %1099 = vst.msk [vmem:[#allocation2 + $0x130] sm:$0xff] %vm485_vm0, %v12785_v5  ;;  %v12805_v4 = vadd.f32 %v16728_v20, %v1005_v41  ;;  %10193 = vmatprep.mubr.msk.f32.mxu1 %vm485_vm0, %v1192_v16  ;;  %1100 = vst.msk [vmem:[#allocation2 + $0x148] sm:$0xff] %vm485_vm0, %v12788_v15  ;;  %v1950_v23 = vld [vmem:[#allocation8 + $0x90] sm:$0xff]  ;;  %v11346_v13 = vld [vmem:[%s11778_s20 + $0xe0] sm:$0xff]  ;;  %v978_v34 = vadd.f32 %v946_v58, %v12379_v47  ;;  %v949_v44 = vmul.f32 %v12604_v52, %v12613_v60 }
 0x12a   : > { %16725 = vst [vmem:[#allocation23_spill] sm:$0xff] %v12794_v21  ;;  %16727 = vst [vmem:[#allocation24_spill] sm:$0xff] %v12802_v1  ;;  %v12825_v59 = vmul.f32 0.25, %v11346_v13  ;;  %10194 = vmatmul.mubr.msk.f32.vlgmr.msra.gmra.mxu1 %vm485_vm0, %v1193_v50  ;;  %v12829_v27 = vld [vmem:[#allocation2 + $0x27] sm:$0xff]  ;;  %v1239_v28 = vld [vmem:[#allocation2 + $0x70] sm:$0xff]  ;;  %v979_v25 = vadd.f32 %v947_v62, %v12379_v47  ;;  %10251 = vmatprep.subr.mxu0 %v1950_v23  ;;  %v1009_v46 = vmul.f32 0.75, %v977_v55 }
 0x12b   : > { %16729 = vst [vmem:[#allocation25_spill] sm:$0xff] %v12805_v4  ;;  %1101 = vst.msk [vmem:[#allocation2 + $0x150] sm:$0xff] %vm485_vm0, %v12791_v31  ;;  %v1125_v57 = vld [vmem:[#allocation2 + $0xc9] sm:$0x1]  ;;  %10196 = vmatprep.mubr.msk.f32.mxu1 %vm485_vm0, %v12829_v27  ;;  %v12842_v45 = vld [vmem:[#allocation2 + $0x2f] sm:$0xff]  ;;  %10139 = vmatmul.mubr.msk.f32.gmra.mxu0 %vm485_vm0, %v1239_v28  ;;  %v1010_v29 = vmul.f32 0.75, %v978_v34  ;;  %v980_v51 = vadd.f32 %v948_v6, %v12379_v47  ;;  %v981_v7 = vadd.f32 %v949_v44, %v12379_v47 }
 0x12c   : > { %1102 = vst.msk [vmem:[#allocation2 + $0x168] sm:$0xff] %vm485_vm0, %v12794_v21  ;;  %16730 = vst [vmem:[#allocation26_spill] sm:$0xff] %v12818_v12  ;;  %v1240_v2 = vld [vmem:[#allocation2 + $0x88] sm:$0xff]  ;;  %v16733_v50 = vld [vmem:[#allocation27_spill] sm:$0xff]  ;;  %v1011_v10 = vmul.f32 0.75, %v979_v25  ;;  %10252 = vmatpush3.msra.mxu0 %v1950_v23 }
 0x12d   : > { %1143 = vst.msk [vmem:[#allocation2 + $0xa7] sm:$0x1] %vm1137_vm3, %v1124_v11  ;;  %1144 = vst.msk [vmem:[#allocation2 + $0xc7] sm:$0x1] %vm1137_vm3, %v1125_v57  ;;  %v11347_v63 = vld [vmem:[%s11778_s20 + $0xe8] sm:$0xff]  ;;  %v12858_v3 = vadd.f32 %v16733_v50, %v1008_v36  ;;  %v16735_v48 = vld [vmem:[#allocation38_spill] sm:$0xff]  ;;  %10141 = vmatprep.mubr.msk.f32.mxu0 %vm485_vm0, %v1240_v2  ;;  %v12885_v55 = vadd.f32 %v12764_v56, %v1010_v29 }
 0x12e   : > { %1103 = vst.msk [vmem:[#allocation2 + $0x170] sm:$0xff] %vm485_vm0, %v12802_v1  ;;  %1104 = vst.msk [vmem:[#allocation2 + $0x188] sm:$0xff] %vm485_vm0, %v12805_v4  ;;  %v1044_v33 = vmul.f32 0.25, %v11347_v63  ;;  %v12852_v19 = vld [vmem:[#allocation2 + $0x47] sm:$0xff]  ;;  %10306 = vmatpush3.msra.mxu1 %v16735_v48  ;;  %v11348_v30 = vld [vmem:[%s11778_s20 + $0xf0] sm:$0xff]  ;;  %v1012_v34 = vmul.f32 0.75, %v980_v51 }
 0x12f   : > { %1105 = vst.msk [vmem:[#allocation2 + $0x190] sm:$0xff] %vm485_vm0, %v12818_v12  ;;  %v1126_v53 = vld [vmem:[#allocation2 + $0xe9] sm:$0x1]  ;;  %16734 = vst [vmem:[#allocation27_spill] sm:$0xff] %v12858_v3  ;;  %v1045_v61 = vmul.f32 0.25, %v11348_v30  ;;  %v2348_v20 = vld [vmem:[#allocation8 + $0xf0] sm:$0xff]  ;;  %10197 = vmatmul.mubr.msk.f32.gmra.mxu1 %vm485_vm0, %v12842_v45 }
 0x130   : > { %v16731_v41 = vld [vmem:[#allocation28_spill] sm:$0xff]  ;;  %1145 = vst.msk [vmem:[#allocation2 + $0xe7] sm:$0x1] %vm1137_vm3, %v1126_v53  ;;  %v1241_v11 = vld [vmem:[#allocation2 + $0x90] sm:$0xff]  ;;  %v11349_v13 = vld [vmem:[%s11778_s20 + $0xf8] sm:$0xff]  ;;  %10199 = vmatprep.mubr.msk.f32.mxu1 %vm485_vm0, %v12852_v19  ;;  %v1013_v63 = vmul.f32 0.75, %v981_v7  ;;  %10307 = vmatprep.subr.mxu1 %v2348_v20  ;;  %v12892_v53 = vadd.f32 %v12825_v59, %v1011_v10  ;;  %v12900_v50 = vadd.f32 %v1044_v33, %v1012_v34 }
 0x131   : > { %v12855_v40 = vadd.f32 %v16731_v41, %v1007_v17  ;;  %v1127_v60 = vld [vmem:[#allocation2 + $0x109] sm:$0x1]  ;;  %1107 = vst.msk [vmem:[#allocation2 + $0x1b0] sm:$0xff] %vm485_vm0, %v12858_v3  ;;  %v1157_v58 = vld [vmem:[#allocation2 + $0x36] sm:$0x1]  ;;  %v16736_v28 = vld [vmem:[#allocation39_spill] sm:$0xff]  ;;  %10142 = vmatmul.mubr.msk.f32.gmra.mxu0 %vm485_vm0, %v1241_v11  ;;  %10308 = vmatpush3.msra.mxu1 %v2348_v20 }
 0x132   : > { %v1949_v16 = vld [vmem:[#allocation8 + $0x88] sm:$0xff]  ;;  %1146 = vst.msk [vmem:[#allocation2 + $0x107] sm:$0x1] %vm1137_vm3, %v1127_v60  ;;  %v876_v57 = vsub.f32 %v11349_v13, %v16736_v28  ;;  %v16737_v6 = vld [vmem:[#allocation29_spill] sm:$0xff]  ;;  %16739 = vst [vmem:[#allocation39_spill] sm:$0xff] %v12885_v55  ;;  %v12902_v25 = vadd.f32 %v1045_v61, %v1013_v63  ;;  %s8655_s20 = sshll.u32 %s16111_s19, 4  ;;  %s16409_s20 = int_to_ptr.vmem [resolvable:$true] %s8655_s20 }
 0x133   : > { %16732 = vst [vmem:[#allocation28_spill] sm:$0xff] %v12855_v40  ;;  %1106 = vst.msk [vmem:[#allocation2 + $0x1a8] sm:$0xff] %vm485_vm0, %v12855_v40  ;;  %v12879_v17 = vld [vmem:[#allocation2 + $0x4f] sm:$0xff]  ;;  %v1128_v62 = vld [vmem:[#allocation2 + $0x129] sm:$0x1]  ;;  %v12882_v2 = vadd.f32 %v16737_v6, %v1009_v46  ;;  %10253 = vmatprep.subr.mxu0 %v1949_v16  ;;  %s11461_s11 = scalar_lea.vmem %s16409_s20, 4096  ;;  %p11468_p13 = scmp.lt.s32.totalorder %s16409_s20, %s11466_s26 }
 0x134   : > { %v1242_v36 = vld [vmem:[#allocation2 + $0xa8] sm:$0xff]  ;;  %1175 = vst.msk [vmem:[#allocation2 + $0x38] sm:$0x1] %vm1137_vm3, %v1157_v58  ;;  %1147 = vst.msk [vmem:[#allocation2 + $0x127] sm:$0x1] %vm1137_vm3, %v1128_v62  ;;  %v16741_v23 = vld [vmem:[#allocation19_spill] sm:$0xff]  ;;  %10200 = vmatmul.mubr.msk.f32.gmra.mxu1 %vm485_vm0, %v12879_v17  ;;  %10254 = vmatpush3.msra.mxu0 %v1949_v16  ;;  %p11462_p10 = scmp.ne.s32.totalorder %s16409_s20, %s11461_s11 }
 0x135   : > { %16738 = vst [vmem:[#allocation38_spill] sm:$0xff] %v12882_v2  ;;  %v12888_v44 = vld [vmem:[#allocation2 + $0x67] sm:$0xff]  ;;  %16740 = vst [vmem:[#allocation29_spill] sm:$0xff] %v12892_v53  ;;  %v910_v41 = vmul.f32 %v16741_v23, %v876_v57  ;;  %10144 = vmatprep.mubr.msk.f32.mxu0 %vm485_vm0, %v1242_v36  ;;  %v1243_v59 = vld [vmem:[#allocation2 + $0xb0] sm:$0xff]  ;;  %v1046_v16 = vmul.f32 0.25, %v11349_v13 }
 0x136   : > { %1108 = vst.msk [vmem:[#allocation2 + $0x1c8] sm:$0xff] %vm485_vm0, %v12882_v2  ;;  %v1948_v56 = vld [vmem:[#allocation8 + $0x80] sm:$0xff]  ;;  %1109 = vst.msk [vmem:[#allocation2 + $0x1d0] sm:$0xff] %vm485_vm0, %v12885_v55  ;;  %v2347_v48 = vld [vmem:[#allocation8 + $0xe8] sm:$0xff]  ;;  %10202 = vmatprep.mubr.msk.f32.mxu1 %vm485_vm0, %v12888_v44  ;;  %10145 = vmatmul.mubr.msk.f32.gmra.mxu0 %vm485_vm0, %v1243_v59  ;;  %p11463_p11 = pnand %p11462_p10, %p17313_p3 }
 0x137   : > { %16742 = vst [vmem:[#allocation19_spill] sm:$0xff] %v12900_v50  ;;  %16743 = vst [vmem:[#allocation49_spill] sm:$0xff] %v12902_v25  ;;  %v1129_v30 = vld [vmem:[#allocation2 + $0x149] sm:$0x1]  ;;  %v950_v60 = vmul.f32 %v12604_v52, %v910_v41  ;;  %v12914_v33 = vld [vmem:[#allocation2 + $0x6f] sm:$0xff]  ;;  %10255 = vmatprep.subr.mxu0 %v1948_v56  ;;  %10309 = vmatprep.subr.mxu1 %v2347_v48 }
 0x138   : > { %1110 = vst.msk [vmem:[#allocation2 + $0x1e8] sm:$0xff] %vm485_vm0, %v12892_v53  ;;  %1117 = vst.msk [vmem:[#allocation2 + $0x228] sm:$0xff] %vm485_vm0, %v12892_v53  ;;  %v1244_v61 = vld [vmem:[#allocation2 + $0xc8] sm:$0xff]  ;;  %10310 = vmatpush3.msra.mxu1 %v2347_v48  ;;  %v2346_v51 = vld [vmem:[#allocation8 + $0xe0] sm:$0xff]  ;;  %10256 = vmatpush3.msra.mxu0 %v1948_v56  ;;  %p11464_p9 = pneg %p11463_p11 }
 0x139   : > { %1148 = vst.msk [vmem:[#allocation2 + $0x147] sm:$0x1] %vm1137_vm3, %v1129_v30  ;;  %v1130_v46 = vld [vmem:[#allocation2 + $0x169] sm:$0x1]  ;;  %v982_v20 = vadd.f32 %v950_v60, %v12379_v47  ;;  %v12929_v7 = vld [vmem:[#allocation8 + $0x138] sm:$0xff]  ;;  %10203 = vmatmul.mubr.msk.f32.gmra.mxu1 %vm485_vm0, %v12914_v33  ;;  %10147 = vmatprep.mubr.msk.f32.mxu0 %vm485_vm0, %v1244_v61  ;;  %v1245_v11 = vld [vmem:[#allocation2 + $0xd0] sm:$0xff] }
 0x13a   : > { %1111 = vst.msk [vmem:[#allocation2 + $0x1f0] sm:$0xff] %vm485_vm0, %v12900_v50  ;;  %1118 = vst.msk [vmem:[#allocation2 + $0x230] sm:$0xff] %vm485_vm0, %v12900_v50  ;;  %v12923_v52 = vld [vmem:[#allocation2 + $0x87] sm:$0xff]  ;;  %v12936_v47 = vld [vmem:[#allocation2 + $0x8f] sm:$0xff]  ;;  %10311 = vmatprep.subr.mxu1 %v2346_v51  ;;  %10369 = vmatprep.subr.mxu0 %v12929_v7 }
 0x13b   : > { %1112 = vst.msk [vmem:[#allocation2 + $0x208] sm:$0xff] %vm485_vm0, %v12902_v25  ;;  %v1131_v29 = vld [vmem:[#allocation2 + $0x189] sm:$0x1]  ;;  %v1014_v58 = vmul.f32 0.75, %v982_v20  ;;  %10205 = vmatprep.mubr.msk.f32.mxu1 %vm485_vm0, %v12923_v52  ;;  %v1158_v28 = vld [vmem:[#allocation2 + $0x56] sm:$0x1]  ;;  %10148 = vmatmul.mubr.msk.f32.gmra.mxu0 %vm485_vm0, %v1245_v11 }
 0x13c   : > { %1149 = vst.msk [vmem:[#allocation2 + $0x167] sm:$0x1] %vm1137_vm3, %v1130_v46  ;;  %1150 = vst.msk [vmem:[#allocation2 + $0x187] sm:$0x1] %vm1137_vm3, %v1131_v29  ;;  %v1132_v10 = vld [vmem:[#allocation2 + $0x1a9] sm:$0x1]  ;;  %10312 = vmatpush3.msra.mxu1 %v2346_v51 }
 0x13d   : > { %v1246_v13 = vld [vmem:[#allocation2 + $0xe8] sm:$0xff]  ;;  %1151 = vst.msk [vmem:[#allocation2 + $0x1a7] sm:$0x1] %vm1137_vm3, %v1132_v10  ;;  %v2345_v62 = vld [vmem:[#allocation8 + $0xd8] sm:$0xff]  ;;  %1176 = vst.msk [vmem:[#allocation2 + $0x58] sm:$0x1] %vm1137_vm3, %v1158_v28  ;;  %v12943_v6 = vadd.f32 %v1046_v16, %v1014_v58  ;;  %10206 = vmatmul.mubr.msk.f32.gmra.mxu1 %vm485_vm0, %v12936_v47 }
 0x13e   : > { %v12939_v57 = vld [vmem:[#allocation2 + $0xa7] sm:$0xff]  ;;  %10150 = vmatprep.mubr.msk.f32.mxu0 %vm485_vm0, %v1246_v13  ;;  %v1247_v63 = vld [vmem:[#allocation2 + $0xf0] sm:$0xff]  ;;  %10313 = vmatprep.subr.mxu1 %v2345_v62  ;;  %v12976_v28 = vld [vmem:[#allocation8 + $0x178] sm:$0xff] }
 0x13f   : > { %v1133_v36 = vld [vmem:[#allocation2 + $0x1c9] sm:$0x1]  ;;  %16744 = vst [vmem:[#allocation50_spill] sm:$0xff] %v12943_v6  ;;  %v2344_v23 = vld [vmem:[#allocation8 + $0xd0] sm:$0xff]  ;;  %1113 = vst.msk [vmem:[#allocation2 + $0x210] sm:$0xff] %vm485_vm0, %v12943_v6  ;;  %10208 = vmatprep.mubr.msk.f32.mxu1 %vm485_vm0, %v12939_v57  ;;  %10314 = vmatpush3.msra.mxu1 %v2345_v62 }
 0x140   : > { %1152 = vst.msk [vmem:[#allocation2 + $0x1c7] sm:$0x1] %vm1137_vm3, %v1133_v36  ;;  %v1134_v34 = vld [vmem:[#allocation2 + $0x1e9] sm:$0x1]  ;;  %v12955_v41 = vld [vmem:[#allocation2 + $0xaf] sm:$0xff]  ;;  %10151 = vmatmul.mubr.msk.f32.gmra.mxu0 %vm485_vm0, %v1247_v63  ;;  %10315 = vmatprep.subr.mxu1 %v2344_v23  ;;  %v2342_v10 = vld [vmem:[#allocation8 + $0xc0] sm:$0xff] }
 0x141   : > { %1153 = vst.msk [vmem:[#allocation2 + $0x1e7] sm:$0x1] %vm1137_vm3, %v1134_v34  ;;  %v1248_v56 = vld [vmem:[#allocation2 + $0x108] sm:$0xff]  ;;  %v1159_v48 = vld [vmem:[#allocation2 + $0x76] sm:$0x1]  ;;  %10209 = vmatmul.mubr.msk.f32.gmra.mxu1 %vm485_vm0, %v12955_v41  ;;  %v2740_v43 = vld [vmem:[#allocation8 + $0x120] sm:$0xff] }
 0x142   : > { %v12957_v59 = vld [vmem:[#allocation2 + $0xc7] sm:$0xff]  ;;  %1177 = vst.msk [vmem:[#allocation2 + $0x78] sm:$0x1] %vm1137_vm3, %v1159_v48  ;;  %v1160_v30 = vld [vmem:[#allocation2 + $0x96] sm:$0x1]  ;;  %10153 = vmatprep.mubr.msk.f32.mxu0 %vm485_vm0, %v1248_v56  ;;  %10316 = vmatpush3.msra.mxu1 %v2344_v23 }
 0x143   : > { %v2343_v60 = vld [vmem:[#allocation8 + $0xc8] sm:$0xff]  ;;  %1178 = vst.msk [vmem:[#allocation2 + $0x98] sm:$0x1] %vm1137_vm3, %v1160_v30  ;;  %v1161_v61 = vld [vmem:[#allocation2 + $0xb6] sm:$0x1]  ;;  %10211 = vmatprep.mubr.msk.f32.mxu1 %vm485_vm0, %v12957_v59  ;;  %v3134_v49 = vld [vmem:[#allocation8 + $0x160] sm:$0xff] }
 0x144   : > { %v1249_v46 = vld [vmem:[#allocation2 + $0x110] sm:$0xff]  ;;  %1179 = vst.msk [vmem:[#allocation2 + $0xb8] sm:$0x1] %vm1137_vm3, %v1161_v61  ;;  %v1250_v16 = vld [vmem:[#allocation2 + $0x128] sm:$0xff]  ;;  %10317 = vmatprep.subr.mxu1 %v2343_v60 }
 0x145   : > { %v1162_v29 = vld [vmem:[#allocation2 + $0xd6] sm:$0x1]  ;;  %v12971_v11 = vld [vmem:[#allocation2 + $0xe7] sm:$0xff]  ;;  %10154 = vmatmul.mubr.msk.f32.gmra.mxu0 %vm485_vm0, %v1249_v46  ;;  %10318 = vmatpush3.msra.mxu1 %v2343_v60 }
 0x146   : > { %v12968_v20 = vld [vmem:[#allocation2 + $0xcf] sm:$0xff]  ;;  %1180 = vst.msk [vmem:[#allocation2 + $0xd8] sm:$0x1] %vm1137_vm3, %v1162_v29  ;;  %10156 = vmatprep.mubr.msk.f32.mxu0 %vm485_vm0, %v1250_v16  ;;  %10319 = vmatprep.subr.mxu1 %v2342_v10  ;;  %v12992_v48 = vld [vmem:[#allocation2 + $0x107] sm:$0xff] }
 0x147   : > { %v1163_v51 = vld [vmem:[#allocation2 + $0xf6] sm:$0x1]  ;;  %10212 = vmatmul.mubr.msk.f32.gmra.mxu1 %vm485_vm0, %v12968_v20  ;;  %v12988_v23 = vld [vmem:[#allocation2 + $0x148] sm:$0xff] }
 0x148   : > { %1181 = vst.msk [vmem:[#allocation2 + $0xf8] sm:$0x1] %vm1137_vm3, %v1163_v51  ;;  %v1164_v58 = vld [vmem:[#allocation2 + $0x116] sm:$0x1]  ;;  %10214 = vmatprep.mubr.msk.f32.mxu1 %vm485_vm0, %v12971_v11  ;;  %10320 = vmatpush3.msra.mxu1 %v2342_v10  ;;  %v13010_v16 = vld [vmem:[#allocation2 + $0x168] sm:$0xff] }
 0x149   : > { %1182 = vst.msk [vmem:[#allocation2 + $0x118] sm:$0x1] %vm1137_vm3, %v1164_v58  ;;  %v1165_v13 = vld [vmem:[#allocation2 + $0x136] sm:$0x1]  ;;  %10433 = vmatprep.subr.mxu1 %v12976_v28  ;;  %v13013_v51 = vld [vmem:[#allocation2 + $0x127] sm:$0xff] }
 0x14a   : > { %v12981_v36 = vld [vmem:[#allocation2 + $0x130] sm:$0xff]  ;;  %1183 = vst.msk [vmem:[#allocation2 + $0x138] sm:$0x1] %vm1137_vm3, %v1165_v13  ;;  %v1135_v10 = vld [vmem:[#allocation2 + $0x209] sm:$0x1] }
 0x14b   : > { %v1166_v62 = vld [vmem:[#allocation2 + $0x156] sm:$0x1]  ;;  %10157 = vmatmul.mubr.msk.f32.gmra.mxu0 %vm485_vm0, %v12981_v36  ;;  %1154 = vst.msk [vmem:[#allocation2 + $0x207] sm:$0x1] %vm1137_vm3, %v1135_v10  ;;  %v13060_v6 = vld [vmem:[#allocation2 + $0x1c8] sm:$0xff] }
 0x14c   : > { %v1167_v34 = vld [vmem:[#allocation2 + $0x176] sm:$0x1]  ;;  %1184 = vst.msk [vmem:[#allocation2 + $0x158] sm:$0x1] %vm1137_vm3, %v1166_v62  ;;  %10159 = vmatprep.mubr.msk.f32.mxu0 %vm485_vm0, %v12988_v23  ;;  %v13028_v62 = vld [vmem:[#allocation2 + $0x188] sm:$0xff] }
 0x14d   : > { %v12986_v63 = vld [vmem:[#allocation2 + $0xef] sm:$0xff]  ;;  %1185 = vst.msk [vmem:[#allocation2 + $0x178] sm:$0x1] %vm1137_vm3, %v1167_v34  ;;  %v13030_v34 = vld [vmem:[#allocation2 + $0x147] sm:$0xff] }
 0x14e   : > { %v1168_v56 = vld [vmem:[#allocation2 + $0x196] sm:$0x1]  ;;  %10215 = vmatmul.mubr.msk.f32.gmra.mxu1 %vm485_vm0, %v12986_v63  ;;  %v13062_v53 = vld [vmem:[#allocation2 + $0x187] sm:$0xff] }
 0x14f   : > { %1186 = vst.msk [vmem:[#allocation2 + $0x198] sm:$0x1] %vm1137_vm3, %v1168_v56  ;;  %v1169_v30 = vld [vmem:[#allocation2 + $0x1b6] sm:$0x1]  ;;  %10217 = vmatprep.mubr.msk.f32.mxu1 %vm485_vm0, %v12992_v48  ;;  %v13076_v55 = vld [vmem:[#allocation2 + $0x1e8] sm:$0xff] }
 0x150   : > { %1187 = vst.msk [vmem:[#allocation2 + $0x1b8] sm:$0x1] %vm1137_vm3, %v1169_v30  ;;  %v1170_v60 = vld [vmem:[#allocation2 + $0x1d6] sm:$0x1]  ;;  %v13078_v40 = vld [vmem:[#allocation2 + $0x1a7] sm:$0xff] }
 0x151   : > { %v13003_v61 = vld [vmem:[#allocation2 + $0x150] sm:$0xff]  ;;  %1188 = vst.msk [vmem:[#allocation2 + $0x1d8] sm:$0x1] %vm1137_vm3, %v1170_v60  ;;  %v13044_v60 = vld [vmem:[#allocation2 + $0x1a8] sm:$0xff] }
 0x152   : > { %v1171_v46 = vld [vmem:[#allocation2 + $0x1f6] sm:$0x1]  ;;  %10160 = vmatmul.mubr.msk.f32.gmra.mxu0 %vm485_vm0, %v13003_v61  ;;  %v1915_v12 = vld [vmem:[#allocation2 + $0x9] sm:$0xff] }
 0x153   : > { %v13008_v29 = vld [vmem:[#allocation2 + $0x10f] sm:$0xff]  ;;  %1189 = vst.msk [vmem:[#allocation2 + $0x1f8] sm:$0x1] %vm1137_vm3, %v1171_v46  ;;  %10162 = vmatprep.mubr.msk.f32.mxu0 %vm485_vm0, %v13010_v16  ;;  %v13046_v46 = vld [vmem:[#allocation2 + $0x167] sm:$0xff] }
 0x154   : > { %10218 = vmatmul.mubr.msk.f32.gmra.mxu1 %vm485_vm0, %v13008_v29  ;;  %v13021_v58 = vld [vmem:[#allocation2 + $0x170] sm:$0xff]  ;;  %v13092_v21 = vld [vmem:[#allocation2 + $0x1c7] sm:$0xff] }
 0x155   : > { %10220 = vmatprep.mubr.msk.f32.mxu1 %vm485_vm0, %v13013_v51  ;;  %v13026_v13 = vld [vmem:[#allocation2 + $0x12f] sm:$0xff]  ;;  %v13104_v54 = vld [vmem:[#allocation2 + $0x1e7] sm:$0xff] }
 0x156   : > { %10163 = vmatmul.mubr.msk.f32.gmra.mxu0 %vm485_vm0, %v13021_v58  ;;  %v13038_v56 = vld [vmem:[#allocation2 + $0x190] sm:$0xff] }
 0x157   : > { %10165 = vmatprep.mubr.msk.f32.mxu0 %vm485_vm0, %v13028_v62  ;;  %v13042_v30 = vld [vmem:[#allocation2 + $0x14f] sm:$0xff] }
 0x158   : > { %10221 = vmatmul.mubr.msk.f32.gmra.mxu1 %vm485_vm0, %v13026_v13  ;;  %v13054_v10 = vld [vmem:[#allocation2 + $0x1b0] sm:$0xff] }
 0x159   : > { %10223 = vmatprep.mubr.msk.f32.mxu1 %vm485_vm0, %v13030_v34  ;;  %v13058_v25 = vld [vmem:[#allocation2 + $0x16f] sm:$0xff] }
 0x15a   : > { %10166 = vmatmul.mubr.msk.f32.gmra.mxu0 %vm485_vm0, %v13038_v56  ;;  %v13070_v50 = vld [vmem:[#allocation2 + $0x1d0] sm:$0xff] }
 0x15b   : > { %10168 = vmatprep.mubr.msk.f32.mxu0 %vm485_vm0, %v13044_v60  ;;  %v13074_v2 = vld [vmem:[#allocation2 + $0x18f] sm:$0xff] }
 0x15c   : > { %10224 = vmatmul.mubr.msk.f32.gmra.mxu1 %vm485_vm0, %v13042_v30  ;;  %v13086_v3 = vld [vmem:[#allocation2 + $0x1f0] sm:$0xff] }
 0x15d   : > { %10226 = vmatprep.mubr.msk.f32.mxu1 %vm485_vm0, %v13046_v46  ;;  %v13090_v4 = vld [vmem:[#allocation2 + $0x1af] sm:$0xff] }
 0x15e   : > { %10169 = vmatmul.mubr.msk.f32.gmra.mxu0 %vm485_vm0, %v13054_v10  ;;  %v1172_v1 = vld [vmem:[#allocation2 + $0x216] sm:$0x1]  ;;  %v13106_v5 = vld [vmem:[#allocation2 + $0x29] sm:$0xff] }
 0x15f   : > { %10171 = vmatprep.mubr.msk.f32.mxu0 %vm485_vm0, %v13060_v6  ;;  %v1916_v15 = vld [vmem:[#allocation2 + $0x11] sm:$0xff]  ;;  %1190 = vst.msk [vmem:[#allocation2 + $0x218] sm:$0x1] %vm1137_vm3, %v1172_v1  ;;  %v13120_v18 = vld [vmem:[#allocation2 + $0x49] sm:$0xff] }
 0x160   : > { %10227 = vmatmul.mubr.msk.f32.gmra.mxu1 %vm485_vm0, %v13058_v25  ;;  %v13102_v31 = vld [vmem:[#allocation2 + $0x1cf] sm:$0xff] }
 0x161   : > { %10229 = vmatprep.mubr.msk.f32.mxu1 %vm485_vm0, %v13062_v53  ;;  %v2742_v14 = vld [vmem:[#allocation8 + $0x130] sm:$0xff] }
 0x162   : > { %10172 = vmatmul.mubr.msk.f32.gmra.mxu0 %vm485_vm0, %v13070_v50  ;;  %v13118_v1 = vld [vmem:[#allocation2 + $0x1ef] sm:$0xff] }
 0x163   : > { %10174 = vmatprep.mubr.msk.f32.mxu0 %vm485_vm0, %v13076_v55  ;;  %v13132_v38 = vld [vmem:[#allocation2 + $0x69] sm:$0xff]  ;;  %v13140_v39 = vld [vmem:[#allocation2 + $0x71] sm:$0xff] }
 0x164   : > { %10230 = vmatmul.mubr.msk.f32.gmra.mxu1 %vm485_vm0, %v13074_v2  ;;  %v3136_v26 = vld [vmem:[#allocation8 + $0x170] sm:$0xff] }
 0x165   : > { %10232 = vmatprep.mubr.msk.f32.mxu1 %vm485_vm0, %v13078_v40  ;;  %v3925_v22 = vld [vmem:[#allocation8 + $0x1f0] sm:$0xff] }
 0x166   : > { %10175 = vmatmul.mubr.msk.f32.gmra.mxu0 %vm485_vm0, %v13086_v3 }
 0x167   : > { %10257 = vmatprep.mubr.msk.f32.mxu0 %vm485_vm0, %v1915_v12  ;;  %v13112_v12 = vld [vmem:[#allocation2 + $0x31] sm:$0xff] }
 0x168   : > { %10233 = vmatmul.mubr.msk.f32.gmra.mxu1 %vm485_vm0, %v13090_v4 }
 0x169   : > { %10235 = vmatprep.mubr.msk.f32.mxu1 %vm485_vm0, %v13092_v21 }
 0x16a   : > { %10258 = vmatmul.mubr.msk.f32.vlgmr.msra.gmra.mxu0 %vm485_vm0, %v1916_v15  ;;  %v2741_v15 = vld [vmem:[#allocation8 + $0x128] sm:$0xff] }
 0x16b   : > { %10370 = vmatpush3.msra.mxu0 %v12929_v7  ;;  %10260 = vmatprep.mubr.msk.f32.mxu0 %vm485_vm0, %v13106_v5  ;;  %v13128_v7 = vld [vmem:[#allocation2 + $0x51] sm:$0xff] }
 0x16c   : > { %10236 = vmatmul.mubr.msk.f32.gmra.mxu1 %vm485_vm0, %v13102_v31  ;;  %10371 = vmatprep.subr.mxu0 %v2742_v14 }
 0x16d   : > { %10238 = vmatprep.mubr.msk.f32.mxu1 %vm485_vm0, %v13104_v54  ;;  %10372 = vmatpush3.msra.mxu0 %v2742_v14  ;;  %v13144_v14 = vld [vmem:[#allocation2 + $0x89] sm:$0xff] }
 0x16e   : > { %10261 = vmatmul.mubr.msk.f32.gmra.mxu0 %vm485_vm0, %v13112_v12  ;;  %10373 = vmatprep.subr.mxu0 %v2741_v15 }
 0x16f   : > { %10263 = vmatprep.mubr.msk.f32.mxu0 %vm485_vm0, %v13120_v18  ;;  %10374 = vmatpush3.msra.mxu0 %v2741_v15  ;;  %v13157_v15 = vld [vmem:[#allocation2 + $0xa9] sm:$0xff] }
 0x170   : > { %10239 = vmatmul.mubr.msk.f32.gmra.mxu1 %vm485_vm0, %v13118_v1  ;;  %10375 = vmatprep.subr.mxu0 %v2740_v43 }
 0x171   : > { %10321 = vmatprep.mubr.msk.f32.mxu1 %vm485_vm0, %v12829_v27  ;;  %v2739_v27 = vld [vmem:[#allocation8 + $0x118] sm:$0xff]  ;;  %10376 = vmatpush3.msra.mxu0 %v2740_v43  ;;  %v13169_v43 = vld [vmem:[#allocation2 + $0xc9] sm:$0xff] }
 0x172   : > { %10264 = vmatmul.mubr.msk.f32.gmra.mxu0 %vm485_vm0, %v13128_v7  ;;  %10377 = vmatprep.subr.mxu0 %v2739_v27 }
 0x173   : > { %10266 = vmatprep.mubr.msk.f32.mxu0 %vm485_vm0, %v13132_v38  ;;  %10378 = vmatpush3.msra.mxu0 %v2739_v27  ;;  %v2736_v27 = vld [vmem:[#allocation8 + $0x100] sm:$0xff] }
 0x174   : > { %10322 = vmatmul.mubr.msk.f32.vlgmr.msra.gmra.mxu1 %vm485_vm0, %v12842_v45  ;;  %v13153_v45 = vld [vmem:[#allocation2 + $0x91] sm:$0xff] }
 0x175   : > { %10324 = vmatprep.mubr.msk.f32.mxu1 %vm485_vm0, %v12852_v19  ;;  %10434 = vmatpush3.msra.mxu1 %v12976_v28  ;;  %v3135_v19 = vld [vmem:[#allocation8 + $0x168] sm:$0xff]  ;;  %v2738_v28 = vld [vmem:[#allocation8 + $0x110] sm:$0xff] }
 0x176   : > { %10267 = vmatmul.mubr.msk.f32.gmra.mxu0 %vm485_vm0, %v13140_v39  ;;  %10435 = vmatprep.subr.mxu1 %v3136_v26 }
 0x177   : > { %10269 = vmatprep.mubr.msk.f32.mxu0 %vm485_vm0, %v13144_v14  ;;  %10436 = vmatpush3.msra.mxu1 %v3136_v26  ;;  %v2737_v26 = vld [vmem:[#allocation8 + $0x108] sm:$0xff] }
 0x178   : > { %10325 = vmatmul.mubr.msk.f32.gmra.mxu1 %vm485_vm0, %v12879_v17  ;;  %10437 = vmatprep.subr.mxu1 %v3135_v19  ;;  %v13165_v17 = vld [vmem:[#allocation2 + $0xb1] sm:$0xff] }
 0x179   : > { %10327 = vmatprep.mubr.msk.f32.mxu1 %vm485_vm0, %v12888_v44  ;;  %10379 = vmatprep.subr.mxu0 %v2738_v28  ;;  %v13177_v44 = vld [vmem:[#allocation2 + $0xd1] sm:$0xff] }
 0x17a   : > { %10270 = vmatmul.mubr.msk.f32.gmra.mxu0 %vm485_vm0, %v13153_v45  ;;  %10438 = vmatpush3.msra.mxu1 %v3135_v19  ;;  %v3132_v19 = vld [vmem:[#allocation8 + $0x150] sm:$0xff] }
 0x17b   : > { %10272 = vmatprep.mubr.msk.f32.mxu0 %vm485_vm0, %v13157_v15  ;;  %10439 = vmatprep.subr.mxu1 %v3134_v49 }
 0x17c   : > { %10328 = vmatmul.mubr.msk.f32.gmra.mxu1 %vm485_vm0, %v12914_v33  ;;  %v3133_v33 = vld [vmem:[#allocation8 + $0x158] sm:$0xff]  ;;  %10380 = vmatpush3.msra.mxu0 %v2738_v28  ;;  %v13207_v28 = vld [vmem:[#allocation2 + $0x129] sm:$0xff] }
 0x17d   : > { %10330 = vmatprep.mubr.msk.f32.mxu1 %vm485_vm0, %v12923_v52  ;;  %v13181_v52 = vld [vmem:[#allocation2 + $0xe9] sm:$0xff]  ;;  %10381 = vmatprep.subr.mxu0 %v2737_v26 }
 0x17e   : > { %10273 = vmatmul.mubr.msk.f32.gmra.mxu0 %vm485_vm0, %v13165_v17  ;;  %10440 = vmatpush3.msra.mxu1 %v3134_v49  ;;  %v13197_v49 = vld [vmem:[#allocation8 + $0x1b8] sm:$0xff] }
 0x17f   : > { %10275 = vmatprep.mubr.msk.f32.mxu0 %vm485_vm0, %v13169_v43  ;;  %10441 = vmatprep.subr.mxu1 %v3133_v33 }
 0x180   : > { %10331 = vmatmul.mubr.msk.f32.gmra.mxu1 %vm485_vm0, %v12936_v47  ;;  %v13189_v47 = vld [vmem:[#allocation2 + $0xf1] sm:$0xff]  ;;  %10382 = vmatpush3.msra.mxu0 %v2737_v26 }
 0x181   : > { %10333 = vmatprep.mubr.msk.f32.mxu1 %vm485_vm0, %v12939_v57  ;;  %v13193_v57 = vld [vmem:[#allocation2 + $0x109] sm:$0xff]  ;;  %10383 = vmatprep.subr.mxu0 %v2736_v27  ;;  %v13216_v26 = vld [vmem:[#allocation2 + $0x131] sm:$0xff] }
 0x182   : > { %10276 = vmatmul.mubr.msk.f32.gmra.mxu0 %vm485_vm0, %v13177_v44  ;;  %10442 = vmatpush3.msra.mxu1 %v3133_v33  ;;  %v13222_v33 = vld [vmem:[#allocation8 + $0x1f8] sm:$0xff] }
 0x183   : > { %10278 = vmatprep.mubr.msk.f32.mxu0 %vm485_vm0, %v13181_v52  ;;  %10443 = vmatprep.subr.mxu1 %v3132_v19 }
 0x184   : > { %10334 = vmatmul.mubr.msk.f32.gmra.mxu1 %vm485_vm0, %v12955_v41  ;;  %v13203_v41 = vld [vmem:[#allocation2 + $0x111] sm:$0xff]  ;;  %10384 = vmatpush3.msra.mxu0 %v2736_v27  ;;  %v13247_v27 = vld [vmem:[#allocation2 + $0x189] sm:$0xff] }
 0x185   : > { %10336 = vmatprep.mubr.msk.f32.mxu1 %vm485_vm0, %v12957_v59  ;;  %v3131_v59 = vld [vmem:[#allocation8 + $0x148] sm:$0xff]  ;;  %10497 = vmatprep.subr.mxu0 %v13197_v49 }
 0x186   : > { %10279 = vmatmul.mubr.msk.f32.gmra.mxu0 %vm485_vm0, %v13189_v47  ;;  %10444 = vmatpush3.msra.mxu1 %v3132_v19  ;;  %v1136_v19 = vld [vmem:[#allocation2 + $0x229] sm:$0x1] }
 0x187   : > { %10281 = vmatprep.mubr.msk.f32.mxu0 %vm485_vm0, %v13193_v57  ;;  %10445 = vmatprep.subr.mxu1 %v3131_v59  ;;  %1155 = vst.msk [vmem:[#allocation2 + $0x227] sm:$0x1] %vm1137_vm3, %v1136_v19  ;;  %v3530_v19 = vld [vmem:[#allocation8 + $0x1a8] sm:$0xff] }
 0x188   : > { %10337 = vmatmul.mubr.msk.f32.gmra.mxu1 %vm485_vm0, %v12968_v20  ;;  %v3130_v20 = vld [vmem:[#allocation8 + $0x140] sm:$0xff] }
 0x189   : > { %10339 = vmatprep.mubr.msk.f32.mxu1 %vm485_vm0, %v12971_v11  ;;  %v13220_v11 = vld [vmem:[#allocation2 + $0x149] sm:$0xff]  ;;  %10446 = vmatpush3.msra.mxu1 %v3131_v59 }
 0x18a   : > { %10282 = vmatmul.mubr.msk.f32.gmra.mxu0 %vm485_vm0, %v13203_v41  ;;  %10447 = vmatprep.subr.mxu1 %v3130_v20  ;;  %v13305_v59 = vld [vmem:[#allocation2 + $0x48] sm:$0xff] }
 0x18b   : > { %10284 = vmatprep.mubr.msk.f32.mxu0 %vm485_vm0, %v13207_v28  ;;  %10448 = vmatpush3.msra.mxu1 %v3130_v20  ;;  %v13311_v20 = vld [vmem:[#allocation2 + $0x50] sm:$0xff] }
 0x18c   : > { %10340 = vmatmul.mubr.msk.f32.gmra.mxu1 %vm485_vm0, %v12986_v63  ;;  %v13230_v63 = vld [vmem:[#allocation2 + $0x151] sm:$0xff]  ;;  %10561 = vmatprep.subr.mxu1 %v13222_v33 }
 0x18d   : > { %10342 = vmatprep.mubr.msk.f32.mxu1 %vm485_vm0, %v12992_v48  ;;  %v13234_v48 = vld [vmem:[#allocation2 + $0x169] sm:$0xff] }
 0x18e   : > { %10285 = vmatmul.mubr.msk.f32.gmra.mxu0 %vm485_vm0, %v13216_v26 }
 0x18f   : > { %10287 = vmatprep.mubr.msk.f32.mxu0 %vm485_vm0, %v13220_v11 }
 0x190   : > { %10343 = vmatmul.mubr.msk.f32.gmra.mxu1 %vm485_vm0, %v13008_v29  ;;  %v13243_v29 = vld [vmem:[#allocation2 + $0x171] sm:$0xff] }
 0x191   : > { %10345 = vmatprep.mubr.msk.f32.mxu1 %vm485_vm0, %v13013_v51  ;;  %v13255_v51 = vld [vmem:[#allocation2 + $0x191] sm:$0xff] }
 0x192   : > { %10288 = vmatmul.mubr.msk.f32.gmra.mxu0 %vm485_vm0, %v13230_v63 }
 0x193   : > { %10290 = vmatprep.mubr.msk.f32.mxu0 %vm485_vm0, %v13234_v48 }
 0x194   : > { %10346 = vmatmul.mubr.msk.f32.gmra.mxu1 %vm485_vm0, %v13026_v13  ;;  %v13259_v13 = vld [vmem:[#allocation2 + $0x1a9] sm:$0xff] }
 0x195   : > { %10348 = vmatprep.mubr.msk.f32.mxu1 %vm485_vm0, %v13030_v34  ;;  %v13267_v34 = vld [vmem:[#allocation2 + $0x1b1] sm:$0xff] }
 0x196   : > { %10291 = vmatmul.mubr.msk.f32.gmra.mxu0 %vm485_vm0, %v13243_v29 }
 0x197   : > { %10293 = vmatprep.mubr.msk.f32.mxu0 %vm485_vm0, %v13247_v27 }
 0x198   : > { %10349 = vmatmul.mubr.msk.f32.gmra.mxu1 %vm485_vm0, %v13042_v30  ;;  %v13271_v30 = vld [vmem:[#allocation2 + $0x1c9] sm:$0xff] }
 0x199   : > { %10351 = vmatprep.mubr.msk.f32.mxu1 %vm485_vm0, %v13046_v46  ;;  %v2703_v46 = vld [vmem:[#allocation2 + $0x28] sm:$0xff] }
 0x19a   : > { %10294 = vmatmul.mubr.msk.f32.gmra.mxu0 %vm485_vm0, %v13255_v51 }
 0x19b   : > { %10296 = vmatprep.mubr.msk.f32.mxu0 %vm485_vm0, %v13259_v13 }
 0x19c   : > { %10352 = vmatmul.mubr.msk.f32.gmra.mxu1 %vm485_vm0, %v13058_v25  ;;  %v13280_v25 = vld [vmem:[#allocation2 + $0x1d1] sm:$0xff] }
 0x19d   : > { %10354 = vmatprep.mubr.msk.f32.mxu1 %vm485_vm0, %v13062_v53  ;;  %v13284_v53 = vld [vmem:[#allocation2 + $0x1e9] sm:$0xff] }
 0x19e   : > { %10297 = vmatmul.mubr.msk.f32.gmra.mxu0 %vm485_vm0, %v13267_v34 }
 0x19f   : > { %10299 = vmatprep.mubr.msk.f32.mxu0 %vm485_vm0, %v13271_v30 }
 0x1a0   : > { %10355 = vmatmul.mubr.msk.f32.gmra.mxu1 %vm485_vm0, %v13074_v2  ;;  %v13292_v2 = vld [vmem:[#allocation2 + $0x1f1] sm:$0xff] }
 0x1a1   : > { %10357 = vmatprep.mubr.msk.f32.mxu1 %vm485_vm0, %v13078_v40  ;;  %v2704_v40 = vld [vmem:[#allocation2 + $0x30] sm:$0xff] }
 0x1a2   : > { %10300 = vmatmul.mubr.msk.f32.gmra.mxu0 %vm485_vm0, %v13280_v25 }
 0x1a3   : > { %10302 = vmatprep.mubr.msk.f32.mxu0 %vm485_vm0, %v13284_v53 }
 0x1a4   : > { %10358 = vmatmul.mubr.msk.f32.gmra.mxu1 %vm485_vm0, %v13090_v4  ;;  %v13303_v4 = vld [vmem:[#allocation2 + $0x207] sm:$0xff] }
 0x1a5   : > { %10360 = vmatprep.mubr.msk.f32.mxu1 %vm485_vm0, %v13092_v21  ;;  %v3531_v21 = vld [vmem:[#allocation8 + $0x1b0] sm:$0xff] }
 0x1a6   : > { %10303 = vmatmul.mubr.msk.f32.gmra.mxu0 %vm485_vm0, %v13292_v2 }
 0x1a7   : > { %10385 = vmatprep.mubr.msk.f32.mxu0 %vm485_vm0, %v2703_v46  ;;  %v3529_v46 = vld [vmem:[#allocation8 + $0x1a0] sm:$0xff] }
 0x1a8   : > { %10361 = vmatmul.mubr.msk.f32.gmra.mxu1 %vm485_vm0, %v13102_v31  ;;  %v13319_v31 = vld [vmem:[#allocation2 + $0x68] sm:$0xff] }
 0x1a9   : > { %10363 = vmatprep.mubr.msk.f32.mxu1 %vm485_vm0, %v13104_v54  ;;  %v13317_v54 = vld [vmem:[#allocation2 + $0x20f] sm:$0xff] }
 0x1aa   : > { %10386 = vmatmul.mubr.msk.f32.vlgmr.msra.gmra.mxu0 %vm485_vm0, %v2704_v40  ;;  %v13339_v40 = vld [vmem:[#allocation2 + $0x90] sm:$0xff] }
 0x1ab   : > { %10498 = vmatpush3.msra.mxu0 %v13197_v49  ;;  %10388 = vmatprep.mubr.msk.f32.mxu0 %vm485_vm0, %v13305_v59  ;;  %v13331_v49 = vld [vmem:[#allocation2 + $0x88] sm:$0xff] }
 0x1ac   : > { %10364 = vmatmul.mubr.msk.f32.gmra.mxu1 %vm485_vm0, %v13118_v1  ;;  %10499 = vmatprep.subr.mxu0 %v3531_v21  ;;  %v13327_v1 = vld [vmem:[#allocation2 + $0x70] sm:$0xff] }
 0x1ad   : > { %10366 = vmatprep.mubr.msk.f32.mxu1 %vm485_vm0, %v13303_v4  ;;  %10500 = vmatpush3.msra.mxu0 %v3531_v21  ;;  %v3528_v21 = vld [vmem:[#allocation8 + $0x198] sm:$0xff] }
 0x1ae   : > { %10389 = vmatmul.mubr.msk.f32.gmra.mxu0 %vm485_vm0, %v13311_v20  ;;  %10501 = vmatprep.subr.mxu0 %v3530_v19 }
 0x1af   : > { %10391 = vmatprep.mubr.msk.f32.mxu0 %vm485_vm0, %v13319_v31  ;;  %10502 = vmatpush3.msra.mxu0 %v3530_v19  ;;  %v13356_v19 = vld [vmem:[#allocation2 + $0xc8] sm:$0xff] }
 0x1b0   : > { %10367 = vmatmul.mubr.msk.f32.gmra.mxu1 %vm485_vm0, %v13317_v54  ;;  %10503 = vmatprep.subr.mxu0 %v3529_v46 }
 0x1b1   : > { %10449 = vmatprep.mubr.msk.f32.mxu1 %vm485_vm0, %v13106_v5  ;;  %v13343_v5 = vld [vmem:[#allocation2 + $0xa8] sm:$0xff]  ;;  %10504 = vmatpush3.msra.mxu0 %v3529_v46  ;;  %v3922_v46 = vld [vmem:[#allocation8 + $0x1d8] sm:$0xff] }
 0x1b2   : > { %10392 = vmatmul.mubr.msk.f32.gmra.mxu0 %vm485_vm0, %v13327_v1  ;;  %10505 = vmatprep.subr.mxu0 %v3528_v21 }
 0x1b3   : > { %10394 = vmatprep.mubr.msk.f32.mxu0 %vm485_vm0, %v13331_v49  ;;  %10506 = vmatpush3.msra.mxu0 %v3528_v21  ;;  %v3525_v21 = vld [vmem:[#allocation8 + $0x180] sm:$0xff] }
 0x1b4   : > { %10450 = vmatmul.mubr.msk.f32.vlgmr.msra.gmra.mxu1 %vm485_vm0, %v13112_v12  ;;  %v13352_v12 = vld [vmem:[#allocation2 + $0xb0] sm:$0xff] }
 0x1b5   : > { %10452 = vmatprep.mubr.msk.f32.mxu1 %vm485_vm0, %v13120_v18  ;;  %10562 = vmatpush3.msra.mxu1 %v13222_v33  ;;  %v3924_v18 = vld [vmem:[#allocation8 + $0x1e8] sm:$0xff]  ;;  %v3527_v33 = vld [vmem:[#allocation8 + $0x190] sm:$0xff] }
 0x1b6   : > { %10395 = vmatmul.mubr.msk.f32.gmra.mxu0 %vm485_vm0, %v13339_v40  ;;  %10563 = vmatprep.subr.mxu1 %v3925_v22 }
 0x1b7   : > { %10397 = vmatprep.mubr.msk.f32.mxu0 %vm485_vm0, %v13343_v5  ;;  %10564 = vmatpush3.msra.mxu1 %v3925_v22  ;;  %v3526_v22 = vld [vmem:[#allocation8 + $0x188] sm:$0xff] }
 0x1b8   : > { %10453 = vmatmul.mubr.msk.f32.gmra.mxu1 %vm485_vm0, %v13128_v7  ;;  %10565 = vmatprep.subr.mxu1 %v3924_v18  ;;  %v13364_v7 = vld [vmem:[#allocation2 + $0xd0] sm:$0xff] }
 0x1b9   : > { %10455 = vmatprep.mubr.msk.f32.mxu1 %vm485_vm0, %v13132_v38  ;;  %v13368_v38 = vld [vmem:[#allocation2 + $0xe8] sm:$0xff]  ;;  %10507 = vmatprep.subr.mxu0 %v3527_v33 }
 0x1ba   : > { %10398 = vmatmul.mubr.msk.f32.gmra.mxu0 %vm485_vm0, %v13352_v12  ;;  %10566 = vmatpush3.msra.mxu1 %v3924_v18  ;;  %v3921_v18 = vld [vmem:[#allocation8 + $0x1d0] sm:$0xff] }
 0x1bb   : > { %10400 = vmatprep.mubr.msk.f32.mxu0 %vm485_vm0, %v13356_v19  ;;  %10567 = vmatprep.subr.mxu1 %v3923_v42 }
 0x1bc   : > { %10456 = vmatmul.mubr.msk.f32.gmra.mxu1 %vm485_vm0, %v13140_v39  ;;  %v13376_v39 = vld [vmem:[#allocation2 + $0xf0] sm:$0xff]  ;;  %10508 = vmatpush3.msra.mxu0 %v3527_v33 }
 0x1bd   : > { %10458 = vmatprep.mubr.msk.f32.mxu1 %vm485_vm0, %v13144_v14  ;;  %v13380_v14 = vld [vmem:[#allocation2 + $0x108] sm:$0xff]  ;;  %10509 = vmatprep.subr.mxu0 %v3526_v22 }
 0x1be   : > { %10401 = vmatmul.mubr.msk.f32.gmra.mxu0 %vm485_vm0, %v13364_v7  ;;  %10568 = vmatpush3.msra.mxu1 %v3923_v42  ;;  %v4320_v42 = vld [vmem:[#allocation8 + $0x238] sm:$0xff] }
 0x1bf   : > { %10403 = vmatprep.mubr.msk.f32.mxu0 %vm485_vm0, %v13368_v38  ;;  %10569 = vmatprep.subr.mxu1 %v3922_v46 }
 0x1c0   : > { %10459 = vmatmul.mubr.msk.f32.gmra.mxu1 %vm485_vm0, %v13153_v45  ;;  %v13388_v45 = vld [vmem:[#allocation2 + $0x110] sm:$0xff]  ;;  %10510 = vmatpush3.msra.mxu0 %v3526_v22 }
 0x1c1   : > { %10461 = vmatprep.mubr.msk.f32.mxu1 %vm485_vm0, %v13157_v15  ;;  %v13392_v15 = vld [vmem:[#allocation2 + $0x128] sm:$0xff]  ;;  %10511 = vmatprep.subr.mxu0 %v3525_v21 }
 0x1c2   : > { %10404 = vmatmul.mubr.msk.f32.gmra.mxu0 %vm485_vm0, %v13376_v39  ;;  %10570 = vmatpush3.msra.mxu1 %v3922_v46  ;;  %v4315_v46 = vld [vmem:[#allocation8 + $0x210] sm:$0xff] }
 0x1c3   : > { %10406 = vmatprep.mubr.msk.f32.mxu0 %vm485_vm0, %v13380_v14  ;;  %10571 = vmatprep.subr.mxu1 %v3921_v18 }
 0x1c4   : > { %10462 = vmatmul.mubr.msk.f32.gmra.mxu1 %vm485_vm0, %v13165_v17  ;;  %v3920_v17 = vld [vmem:[#allocation8 + $0x1c8] sm:$0xff]  ;;  %10512 = vmatpush3.msra.mxu0 %v3525_v21 }
 0x1c5   : > { %10464 = vmatprep.mubr.msk.f32.mxu1 %vm485_vm0, %v13169_v43  ;;  %10625 = vmatprep.subr.mxu0 %v4320_v42  ;;  %v3919_v43 = vld [vmem:[#allocation8 + $0x1c0] sm:$0xff]  ;;  %v3503_v21 = vld [vmem:[#allocation2 + $0xef] sm:$0xff] }
 0x1c6   : > { %10407 = vmatmul.mubr.msk.f32.gmra.mxu0 %vm485_vm0, %v13388_v45  ;;  %10572 = vmatpush3.msra.mxu1 %v3921_v18 }
 0x1c7   : > { %10409 = vmatprep.mubr.msk.f32.mxu0 %vm485_vm0, %v13392_v15  ;;  %10573 = vmatprep.subr.mxu1 %v3920_v17 }
 0x1c8   : > { %10465 = vmatmul.mubr.msk.f32.gmra.mxu1 %vm485_vm0, %v13177_v44 }
 0x1c9   : > { %10467 = vmatprep.mubr.msk.f32.mxu1 %vm485_vm0, %v13181_v52  ;;  %10574 = vmatpush3.msra.mxu1 %v3920_v17  ;;  %v4318_v52 = vld [vmem:[#allocation8 + $0x228] sm:$0xff] }
 0x1ca   : > { %10410 = vmatmul.mubr.msk.f32.gmra.mxu0 %vm485_vm0, %v12981_v36  ;;  %10575 = vmatprep.subr.mxu1 %v3919_v43  ;;  %v1173_v36 = vld [vmem:[#allocation2 + $0x236] sm:$0x1] }
 0x1cb   : > { %10412 = vmatprep.mubr.msk.f32.mxu0 %vm485_vm0, %v12988_v23  ;;  %10576 = vmatpush3.msra.mxu1 %v3919_v43  ;;  %1191 = vst.msk [vmem:[#allocation2 + $0x238] sm:$0x1] %vm1137_vm3, %v1173_v36  ;;  %v13451_v23 = vld [vmem:[#allocation2 + $0x208] sm:$0xff] }
 0x1cc   : > { %10468 = vmatmul.mubr.msk.f32.gmra.mxu1 %vm485_vm0, %v13189_v47  ;;  %v3497_v47 = vld [vmem:[#allocation2 + $0x8f] sm:$0xff] }
 0x1cd   : > { %10470 = vmatprep.mubr.msk.f32.mxu1 %vm485_vm0, %v13193_v57 }
 0x1ce   : > { %10413 = vmatmul.mubr.msk.f32.gmra.mxu0 %vm485_vm0, %v13003_v61  ;;  %v3494_v61 = vld [vmem:[#allocation2 + $0x67] sm:$0xff] }
 0x1cf   : > { %10415 = vmatprep.mubr.msk.f32.mxu0 %vm485_vm0, %v13010_v16 }
 0x1d0   : > { %10471 = vmatmul.mubr.msk.f32.gmra.mxu1 %vm485_vm0, %v13203_v41  ;;  %v3498_v41 = vld [vmem:[#allocation2 + $0xa7] sm:$0xff] }
 0x1d1   : > { %10473 = vmatprep.mubr.msk.f32.mxu1 %vm485_vm0, %v13207_v28 }
 0x1d2   : > { %10416 = vmatmul.mubr.msk.f32.gmra.mxu0 %vm485_vm0, %v13021_v58  ;;  %v4319_v58 = vld [vmem:[#allocation8 + $0x230] sm:$0xff] }
 0x1d3   : > { %10418 = vmatprep.mubr.msk.f32.mxu0 %vm485_vm0, %v13028_v62  ;;  %v3495_v62 = vld [vmem:[#allocation2 + $0x6f] sm:$0xff] }
 0x1d4   : > { %10474 = vmatmul.mubr.msk.f32.gmra.mxu1 %vm485_vm0, %v13216_v26  ;;  %v4317_v26 = vld [vmem:[#allocation8 + $0x220] sm:$0xff] }
 0x1d5   : > { %10476 = vmatprep.mubr.msk.f32.mxu1 %vm485_vm0, %v13220_v11 }
 0x1d6   : > { %10419 = vmatmul.mubr.msk.f32.gmra.mxu0 %vm485_vm0, %v13038_v56 }
 0x1d7   : > { %10421 = vmatprep.mubr.msk.f32.mxu0 %vm485_vm0, %v13044_v60  ;;  %v13478_v60 = vld [vmem:[#allocation2 + $0x211] sm:$0xff] }
 0x1d8   : > { %10477 = vmatmul.mubr.msk.f32.gmra.mxu1 %vm485_vm0, %v13230_v63  ;;  %v3499_v63 = vld [vmem:[#allocation2 + $0xaf] sm:$0xff] }
 0x1d9   : > { %10479 = vmatprep.mubr.msk.f32.mxu1 %vm485_vm0, %v13234_v48 }
 0x1da   : > { %10422 = vmatmul.mubr.msk.f32.gmra.mxu0 %vm485_vm0, %v13054_v10  ;;  %v3496_v10 = vld [vmem:[#allocation2 + $0x87] sm:$0xff] }
 0x1db   : > { %10424 = vmatprep.mubr.msk.f32.mxu0 %vm485_vm0, %v13060_v6  ;;  %v13470_v6 = vld [vmem:[#allocation2 + $0x209] sm:$0xff] }
 0x1dc   : > { %10480 = vmatmul.mubr.msk.f32.gmra.mxu1 %vm485_vm0, %v13243_v29 }
 0x1dd   : > { %10482 = vmatprep.mubr.msk.f32.mxu1 %vm485_vm0, %v13247_v27  ;;  %v3500_v27 = vld [vmem:[#allocation2 + $0xc7] sm:$0xff] }
 0x1de   : > { %10425 = vmatmul.mubr.msk.f32.gmra.mxu0 %vm485_vm0, %v13070_v50  ;;  %v13459_v50 = vld [vmem:[#allocation2 + $0x210] sm:$0xff]  ;;  %v10131_v16 = vpop.f32.mrf.mxu0 }
 0x1df   : > { %10427 = vmatprep.mubr.msk.f32.mxu0 %vm485_vm0, %v13076_v55  ;;  %v3492_v55 = vld [vmem:[#allocation2 + $0x47] sm:$0xff] }
 0x1e0   : > { %10483 = vmatmul.mubr.msk.f32.gmra.mxu1 %vm485_vm0, %v13255_v51  ;;  %v1435_v56 = vpop.f32.mrf.mxu0 }
 0x1e1   : > { %10485 = vmatprep.mubr.msk.f32.mxu1 %vm485_vm0, %v13259_v13 }
 0x1e2   : > { %10428 = vmatmul.mubr.msk.f32.gmra.mxu0 %vm485_vm0, %v13086_v3  ;;  %v3493_v3 = vld [vmem:[#allocation2 + $0x4f] sm:$0xff]  ;;  %v10134_v44 = vpop.f32.mrf.mxu0 }
 0x1e3   : > { %10430 = vmatprep.mubr.msk.f32.mxu0 %vm485_vm0, %v13451_v23 }
 0x1e4   : > { %10486 = vmatmul.mubr.msk.f32.gmra.mxu1 %vm485_vm0, %v13267_v34  ;;  %v1445_v57 = vpop.f32.mrf.mxu0 }
 0x1e5   : > { %10488 = vmatprep.mubr.msk.f32.mxu1 %vm485_vm0, %v13271_v30  ;;  %v4316_v30 = vld [vmem:[#allocation8 + $0x218] sm:$0xff] }
 0x1e6   : > { %10431 = vmatmul.mubr.msk.f32.gmra.mxu0 %vm485_vm0, %v13459_v50  ;;  %v10137_v28 = vpop.f32.mrf.mxu0 }
 0x1e7   : > { %10513 = vmatprep.mubr.msk.f32.mxu0 %vm485_vm0, %v3492_v55  ;;  %v4314_v55 = vld [vmem:[#allocation8 + $0x208] sm:$0xff] }
 0x1e8   : > { %10489 = vmatmul.mubr.msk.f32.gmra.mxu1 %vm485_vm0, %v13280_v25  ;;  %v1455_v29 = vpop.f32.mrf.mxu0 }
 0x1e9   : > { %10491 = vmatprep.mubr.msk.f32.mxu1 %vm485_vm0, %v13284_v53  ;;  %v3501_v53 = vld [vmem:[#allocation2 + $0xcf] sm:$0xff] }
 0x1ea   : > { %10514 = vmatmul.mubr.msk.f32.vlgmr.msra.gmra.mxu0 %vm485_vm0, %v3493_v3  ;;  %v10195_v11 = vpop.f32.mrf.mxu1  ;;  %v3505_v3 = vld [vmem:[#allocation2 + $0x10f] sm:$0xff] }
 0x1eb   : > { %10626 = vmatpush3.msra.mxu0 %v4320_v42  ;;  %10516 = vmatprep.mubr.msk.f32.mxu0 %vm485_vm0, %v3494_v61  ;;  %v13490_v48 = vadd.f32 %v10195_v11, %v10131_v16  ;;  %v10140_v34 = vpop.f32.mrf.mxu0  ;;  %v3504_v42 = vld [vmem:[#allocation2 + $0x107] sm:$0xff] }
 0x1ec   : > { %10492 = vmatmul.mubr.msk.f32.gmra.mxu1 %vm485_vm0, %v13292_v2  ;;  %10627 = vmatprep.subr.mxu0 %v4319_v58  ;;  %v1756_v51 = vpop.f32.mrf.mxu1  ;;  %v3506_v16 = vld [vmem:[#allocation2 + $0x127] sm:$0xff] }
 0x1ed   : > { %10494 = vmatprep.mubr.msk.f32.mxu1 %vm485_vm0, %v13470_v6  ;;  %10628 = vmatpush3.msra.mxu0 %v4319_v58  ;;  %v13494_v13 = vadd.f32 %v1756_v51, %v1435_v56 }
 0x1ee   : > { %10517 = vmatmul.mubr.msk.f32.gmra.mxu0 %vm485_vm0, %v3495_v62  ;;  %10629 = vmatprep.subr.mxu0 %v4318_v52 }
 0x1ef   : > { %10519 = vmatprep.mubr.msk.f32.mxu0 %vm485_vm0, %v3496_v10  ;;  %10630 = vmatpush3.msra.mxu0 %v4318_v52  ;;  %v10198_v25 = vpop.f32.mrf.mxu1  ;;  %v4313_v10 = vld [vmem:[#allocation8 + $0x200] sm:$0xff] }
 0x1f0   : > { %10495 = vmatmul.mubr.msk.f32.gmra.mxu1 %vm485_vm0, %v13478_v60  ;;  %10631 = vmatprep.subr.mxu0 %v4317_v26  ;;  %v13500_v2 = vadd.f32 %v10198_v25, %v10134_v44  ;;  %v3507_v44 = vld [vmem:[#allocation2 + $0x12f] sm:$0xff] }
 0x1f1   : > { %10577 = vmatprep.mubr.msk.f32.mxu1 %vm485_vm0, %v13305_v59  ;;  %v1465_v59 = vpop.f32.mrf.mxu0  ;;  %10632 = vmatpush3.msra.mxu0 %v4317_v26 }
 0x1f2   : > { %10520 = vmatmul.mubr.msk.f32.gmra.mxu0 %vm485_vm0, %v3497_v47  ;;  %10633 = vmatprep.subr.mxu0 %v4316_v30  ;;  %v3508_v47 = vld [vmem:[#allocation2 + $0x147] sm:$0xff] }
 0x1f3   : > { %10522 = vmatprep.mubr.msk.f32.mxu0 %vm485_vm0, %v3498_v41  ;;  %v10143_v22 = vpop.f32.mrf.mxu0  ;;  %10634 = vmatpush3.msra.mxu0 %v4316_v30 }
 0x1f4   : > { %10578 = vmatmul.mubr.msk.f32.vlgmr.msra.gmra.mxu1 %vm485_vm0, %v13311_v20  ;;  %v3502_v20 = vld [vmem:[#allocation2 + $0xe7] sm:$0xff]  ;;  %10635 = vmatprep.subr.mxu0 %v4315_v46 }
 0x1f5   : > { %10580 = vmatprep.mubr.msk.f32.mxu1 %vm485_vm0, %v13319_v31  ;;  %v1766_v31 = vpop.f32.mrf.mxu1  ;;  %10636 = vmatpush3.msra.mxu0 %v4315_v46  ;;  %v3513_v46 = vld [vmem:[#allocation2 + $0x18f] sm:$0xff] }
 0x1f6   : > { %10523 = vmatmul.mubr.msk.f32.gmra.mxu0 %vm485_vm0, %v3499_v63  ;;  %v13504_v33 = vadd.f32 %v1766_v31, %v1445_v57  ;;  %10637 = vmatprep.subr.mxu0 %v4314_v55 }
 0x1f7   : > { %10525 = vmatprep.mubr.msk.f32.mxu0 %vm485_vm0, %v3500_v27  ;;  %10638 = vmatpush3.msra.mxu0 %v4314_v55 }
 0x1f8   : > { %10581 = vmatmul.mubr.msk.f32.gmra.mxu1 %vm485_vm0, %v13327_v1  ;;  %v10201_v1 = vpop.f32.mrf.mxu1  ;;  %10639 = vmatprep.subr.mxu0 %v4313_v10 }
 0x1f9   : > { %10583 = vmatprep.mubr.msk.f32.mxu1 %vm485_vm0, %v13331_v49  ;;  %v13510_v18 = vadd.f32 %v10201_v1, %v10137_v28  ;;  %v1475_v49 = vpop.f32.mrf.mxu0  ;;  %10640 = vmatpush3.msra.mxu0 %v4313_v10 }
 0x1fa   : > { %10526 = vmatmul.mubr.msk.f32.gmra.mxu0 %vm485_vm0, %v3501_v53  ;;  %v1776_v17 = vpop.f32.mrf.mxu1  ;;  %v3512_v53 = vld [vmem:[#allocation2 + $0x187] sm:$0xff] }
 0x1fb   : > { %10528 = vmatprep.mubr.msk.f32.mxu0 %vm485_vm0, %v3502_v20  ;;  %v13514_v43 = vadd.f32 %v1776_v17, %v1455_v29  ;;  %v10146_v36 = vpop.f32.mrf.mxu0  ;;  %v3902_v20 = vld [vmem:[#allocation2 + $0x148] sm:$0xff] }
 0x1fc   : > { %10584 = vmatmul.mubr.msk.f32.gmra.mxu1 %vm485_vm0, %v13339_v40  ;;  %v10204_v40 = vpop.f32.mrf.mxu1  ;;  %v3904_v17 = vld [vmem:[#allocation2 + $0x168] sm:$0xff] }
 0x1fd   : > { %10586 = vmatprep.mubr.msk.f32.mxu1 %vm485_vm0, %v13343_v5  ;;  %v13520_v61 = vadd.f32 %v10204_v40, %v10140_v34  ;;  %v1485_v5 = vpop.f32.mrf.mxu0 }
 0x1fe   : > { %10529 = vmatmul.mubr.msk.f32.gmra.mxu0 %vm485_vm0, %v3503_v21  ;;  %v1786_v58 = vpop.f32.mrf.mxu1 }
 0x1ff   : > { %10531 = vmatprep.mubr.msk.f32.mxu0 %vm485_vm0, %v3504_v42  ;;  %v13524_v62 = vadd.f32 %v1786_v58, %v1465_v59  ;;  %v10149_v56 = vpop.f32.mrf.mxu0  ;;  %v3905_v58 = vld [vmem:[#allocation2 + $0x170] sm:$0xff] }
 0x200   : > { %10587 = vmatmul.mubr.msk.f32.gmra.mxu1 %vm485_vm0, %v13352_v12  ;;  %v10207_v12 = vpop.f32.mrf.mxu1 }
 0x201   : > { %10589 = vmatprep.mubr.msk.f32.mxu1 %vm485_vm0, %v13356_v19  ;;  %v13530_v52 = vadd.f32 %v10207_v12, %v10143_v22  ;;  %v1495_v19 = vpop.f32.mrf.mxu0  ;;  %v3906_v12 = vld [vmem:[#allocation2 + $0x188] sm:$0xff] }
 0x202   : > { %10532 = vmatmul.mubr.msk.f32.gmra.mxu0 %vm485_vm0, %v3505_v3  ;;  %v1796_v57 = vpop.f32.mrf.mxu1  ;;  %v3515_v3 = vld [vmem:[#allocation2 + $0x1af] sm:$0xff] }
 0x203   : > { %10534 = vmatprep.mubr.msk.f32.mxu0 %vm485_vm0, %v3506_v16  ;;  %v13534_v41 = vadd.f32 %v1796_v57, %v1475_v49  ;;  %v10152_v28 = vpop.f32.mrf.mxu0  ;;  %v3514_v49 = vld [vmem:[#allocation2 + $0x1a7] sm:$0xff] }
 0x204   : > { %10590 = vmatmul.mubr.msk.f32.gmra.mxu1 %vm485_vm0, %v13364_v7  ;;  %v10210_v26 = vpop.f32.mrf.mxu1  ;;  %v3509_v7 = vld [vmem:[#allocation2 + $0x14f] sm:$0xff] }
 0x205   : > { %10592 = vmatprep.mubr.msk.f32.mxu1 %vm485_vm0, %v13368_v38  ;;  %v13540_v11 = vadd.f32 %v10210_v26, %v10146_v36  ;;  %v1505_v63 = vpop.f32.mrf.mxu0  ;;  %v3510_v38 = vld [vmem:[#allocation2 + $0x167] sm:$0xff]  ;;  %v3907_v26 = vld [vmem:[#allocation2 + $0x190] sm:$0xff] }
 0x206   : > { %10535 = vmatmul.mubr.msk.f32.gmra.mxu0 %vm485_vm0, %v3507_v44  ;;  %v1806_v29 = vpop.f32.mrf.mxu1 }
 0x207   : > { %10537 = vmatprep.mubr.msk.f32.mxu0 %vm485_vm0, %v3508_v47  ;;  %v13544_v27 = vadd.f32 %v1806_v29, %v1485_v5  ;;  %v10155_v51 = vpop.f32.mrf.mxu0  ;;  %v3517_v47 = vld [vmem:[#allocation2 + $0x1cf] sm:$0xff] }
 0x208   : > { %10593 = vmatmul.mubr.msk.f32.gmra.mxu1 %vm485_vm0, %v13376_v39  ;;  %v10213_v34 = vpop.f32.mrf.mxu1  ;;  %v3511_v39 = vld [vmem:[#allocation2 + $0x16f] sm:$0xff] }
 0x209   : > { %10595 = vmatprep.mubr.msk.f32.mxu1 %vm485_vm0, %v13380_v14  ;;  %v13550_v30 = vadd.f32 %v10213_v34, %v10149_v56  ;;  %v13552_v25 = vpop.f32.mrf.mxu0  ;;  %v3901_v14 = vld [vmem:[#allocation2 + $0x130] sm:$0xff]  ;;  %v3516_v56 = vld [vmem:[#allocation2 + $0x1c7] sm:$0xff] }
 0x20a   : > { %10538 = vmatmul.mubr.msk.f32.gmra.mxu0 %vm485_vm0, %v3509_v7  ;;  %v1816_v59 = vpop.f32.mrf.mxu1  ;;  %v3518_v7 = vld [vmem:[#allocation2 + $0x1e7] sm:$0xff]  ;;  %v3519_v34 = vld [vmem:[#allocation2 + $0x1ef] sm:$0xff] }
 0x20b   : > { %10540 = vmatprep.mubr.msk.f32.mxu0 %vm485_vm0, %v3510_v38  ;;  %v13556_v31 = vadd.f32 %v1816_v59, %v1495_v19  ;;  %v10158_v22 = vpop.f32.mrf.mxu0  ;;  %v3908_v38 = vld [vmem:[#allocation2 + $0x1a8] sm:$0xff] }
 0x20c   : > { %10596 = vmatmul.mubr.msk.f32.gmra.mxu1 %vm485_vm0, %v13388_v45 }
 0x20d   : > { %10598 = vmatprep.mubr.msk.f32.mxu1 %vm485_vm0, %v13392_v15  ;;  %v13563_v21 = vpop.f32.mrf.mxu0  ;;  %v3903_v15 = vld [vmem:[#allocation2 + $0x150] sm:$0xff] }
 0x20e   : > { %10541 = vmatmul.mubr.msk.f32.gmra.mxu0 %vm485_vm0, %v3511_v39  ;;  %v10216_v45 = vpop.f32.mrf.mxu1 }
 0x20f   : > { %10543 = vmatprep.mubr.msk.f32.mxu0 %vm485_vm0, %v3512_v53  ;;  %v13561_v1 = vadd.f32 %v10216_v45, %v10152_v28  ;;  %v3909_v53 = vld [vmem:[#allocation2 + $0x1b0] sm:$0xff] }
 0x210   : > { %10599 = vmatmul.mubr.msk.f32.gmra.mxu1 %vm485_vm0, %v3901_v14  ;;  %v1826_v42 = vpop.f32.mrf.mxu1 }
 0x211   : > { %10601 = vmatprep.mubr.msk.f32.mxu1 %vm485_vm0, %v3902_v20  ;;  %v13566_v36 = vadd.f32 %v1826_v42, %v1505_v63  ;;  %v3910_v20 = vld [vmem:[#allocation2 + $0x1c8] sm:$0xff] }
 0x212   : > { %v10161_v55 = vpop.f32.mrf.mxu0  ;;  %10544 = vmatmul.mubr.msk.f32.gmra.mxu0 %vm485_vm0, %v3513_v46  ;;  %v3522_v42 = vld [vmem:[#allocation2 + $0x227] sm:$0xff] }
 0x213   : > { %10546 = vmatprep.mubr.msk.f32.mxu0 %vm485_vm0, %v3514_v49  ;;  %v3911_v49 = vld [vmem:[#allocation2 + $0x1d0] sm:$0xff] }
 0x214   : > { %v10219_v40 = vpop.f32.mrf.mxu1  ;;  %10602 = vmatmul.mubr.msk.f32.gmra.mxu1 %vm485_vm0, %v3903_v15  ;;  %v13573_v16 = vpop.f32.mrf.mxu0 }
 0x215   : > { %v13571_v5 = vadd.f32 %v10219_v40, %v10155_v51  ;;  %10604 = vmatprep.mubr.msk.f32.mxu1 %vm485_vm0, %v3904_v17 }
 0x216   : > { %v13576_v10 = vpop.f32.mrf.mxu1  ;;  %v10164_v44 = vpop.f32.mrf.mxu0  ;;  %10547 = vmatmul.mubr.msk.f32.gmra.mxu0 %vm485_vm0, %v3515_v3 }
 0x217   : > { %10549 = vmatprep.mubr.msk.f32.mxu0 %vm485_vm0, %v3516_v56 }
 0x218   : > { %v10222_v19 = vpop.f32.mrf.mxu1  ;;  %10605 = vmatmul.mubr.msk.f32.gmra.mxu1 %vm485_vm0, %v3905_v58  ;;  %v13583_v28 = vpop.f32.mrf.mxu0 }
 0x219   : > { %v13581_v57 = vadd.f32 %v10222_v19, %v10158_v22  ;;  %10607 = vmatprep.mubr.msk.f32.mxu1 %vm485_vm0, %v3906_v12  ;;  %v3913_v12 = vld [vmem:[#allocation2 + $0x1f0] sm:$0xff] }
 0x21a   : > { %v13586_v63 = vpop.f32.mrf.mxu1  ;;  %v10167_v29 = vpop.f32.mrf.mxu0  ;;  %10550 = vmatmul.mubr.msk.f32.gmra.mxu0 %vm485_vm0, %v3517_v47 }
 0x21b   : > { %10552 = vmatprep.mubr.msk.f32.mxu0 %vm485_vm0, %v3518_v7 }
 0x21c   : > { %v10225_v51 = vpop.f32.mrf.mxu1  ;;  %10608 = vmatmul.mubr.msk.f32.gmra.mxu1 %vm485_vm0, %v3907_v26  ;;  %v13593_v14 = vpop.f32.mrf.mxu0  ;;  %v4281_v26 = vld [vmem:[#allocation2 + $0x51] sm:$0xff] }
 0x21d   : > { %v13591_v39 = vadd.f32 %v10225_v51, %v10161_v55  ;;  %10610 = vmatprep.mubr.msk.f32.mxu1 %vm485_vm0, %v3908_v38  ;;  %v3912_v55 = vld [vmem:[#allocation2 + $0x1e8] sm:$0xff] }
 0x21e   : > { %v13596_v59 = vpop.f32.mrf.mxu1  ;;  %v10170_v22 = vpop.f32.mrf.mxu0  ;;  %10553 = vmatmul.mubr.msk.f32.gmra.mxu0 %vm485_vm0, %v3519_v34  ;;  %v3916_v34 = vld [vmem:[#allocation2 + $0x228] sm:$0xff] }
 0x21f   : > { %10555 = vmatprep.mubr.msk.f32.mxu0 %vm485_vm0, %v13303_v4  ;;  %v3523_v4 = vld [vmem:[#allocation2 + $0x22f] sm:$0xff] }
 0x220   : > { %v10228_v45 = vpop.f32.mrf.mxu1  ;;  %10611 = vmatmul.mubr.msk.f32.gmra.mxu1 %vm485_vm0, %v3909_v53  ;;  %v13604_v15 = vpop.f32.mrf.mxu0 }
 0x221   : > { %v13602_v46 = vadd.f32 %v10228_v45, %v10164_v44  ;;  %10613 = vmatprep.mubr.msk.f32.mxu1 %vm485_vm0, %v3910_v20  ;;  %v4280_v44 = vld [vmem:[#allocation2 + $0x49] sm:$0xff] }
 0x222   : > { %v13607_v17 = vpop.f32.mrf.mxu1  ;;  %v10173_v40 = vpop.f32.mrf.mxu0  ;;  %10556 = vmatmul.mubr.msk.f32.gmra.mxu0 %vm485_vm0, %v13317_v54 }
 0x223   : > { %10558 = vmatprep.mubr.msk.f32.mxu0 %vm485_vm0, %v3522_v42 }
 0x224   : > { %v10231_v3 = vpop.f32.mrf.mxu1  ;;  %10614 = vmatmul.mubr.msk.f32.gmra.mxu1 %vm485_vm0, %v3911_v49  ;;  %v13615_v56 = vpop.f32.mrf.mxu0 }
 0x225   : > { %v13613_v58 = vadd.f32 %v10231_v3, %v10167_v29  ;;  %10616 = vmatprep.mubr.msk.f32.mxu1 %vm485_vm0, %v3912_v55  ;;  %v4282_v29 = vld [vmem:[#allocation2 + $0x69] sm:$0xff] }
 0x226   : > { %v13618_v19 = vpop.f32.mrf.mxu1  ;;  %v10176_v47 = vpop.f32.mrf.mxu0  ;;  %10559 = vmatmul.mubr.msk.f32.gmra.mxu0 %vm485_vm0, %v3523_v4  ;;  %v4284_v55 = vld [vmem:[#allocation2 + $0x89] sm:$0xff] }
 0x227   : > { %10641 = vmatprep.mubr.msk.f32.mxu0 %vm485_vm0, %v4280_v44 }
 0x228   : > { %v10234_v54 = vpop.f32.mrf.mxu1  ;;  %10617 = vmatmul.mubr.msk.f32.gmra.mxu1 %vm485_vm0, %v3913_v12  ;;  %v13625_v38 = vpop.f32.mrf.mxu0 }
 0x229   : > { %v13623_v7 = vadd.f32 %v10234_v54, %v10170_v22  ;;  %10619 = vmatprep.mubr.msk.f32.mxu1 %vm485_vm0, %v13451_v23  ;;  %v4283_v22 = vld [vmem:[#allocation2 + $0x71] sm:$0xff] }
 0x22a   : > { %v13629_v51 = vpop.f32.mrf.mxu1  ;;  %v10259_v53 = vpop.f32.mrf.mxu0  ;;  %10642 = vmatmul.mubr.msk.f32.vlgmr.msra.gmra.mxu0 %vm485_vm0, %v4281_v26  ;;  %v3917_v23 = vld [vmem:[#allocation2 + $0x230] sm:$0xff] }
 0x22b   : > { %v2278_v45 = vadd.f32 %v10259_v53, %v13490_v48  ;;  %10644 = vmatprep.mubr.msk.f32.mxu0 %vm485_vm0, %v4282_v29  ;;  %v4286_v26 = vld [vmem:[#allocation2 + $0xa9] sm:$0xff] }
 0x22c   : > { %v10237_v20 = vpop.f32.mrf.mxu1  ;;  %10620 = vmatmul.mubr.msk.f32.gmra.mxu1 %vm485_vm0, %v13459_v50  ;;  %v2118_v42 = vpop.f32.mrf.mxu0 }
 0x22d   : > { %v13636_v49 = vadd.f32 %v10237_v20, %v10173_v40  ;;  %10622 = vmatprep.mubr.msk.f32.mxu1 %vm485_vm0, %v3916_v34  ;;  %v13642_v4 = vadd.f32 %v2118_v42, %v13494_v13  ;;  %v4285_v40 = vld [vmem:[#allocation2 + $0x91] sm:$0xff]  ;;  %v4288_v42 = vld [vmem:[#allocation2 + $0xc9] sm:$0xff] }
 0x22e   : > { %v13639_v3 = vpop.f32.mrf.mxu1  ;;  %v10262_v12 = vpop.f32.mrf.mxu0  ;;  %10645 = vmatmul.mubr.msk.f32.gmra.mxu0 %vm485_vm0, %v4283_v22  ;;  %v4287_v20 = vld [vmem:[#allocation2 + $0xb1] sm:$0xff] }
 0x22f   : > { %v2280_v50 = vadd.f32 %v10262_v12, %v13500_v2  ;;  %10647 = vmatprep.mubr.msk.f32.mxu0 %vm485_vm0, %v4284_v55 }
 0x230   : > { %v10240_v48 = vpop.f32.mrf.mxu1  ;;  %10623 = vmatmul.mubr.msk.f32.gmra.mxu1 %vm485_vm0, %v3917_v23  ;;  %v2128_v54 = vpop.f32.mrf.mxu0 }
 0x231   : > { %v13648_v44 = vadd.f32 %v10240_v48, %v10176_v47  ;;  %v13653_v13 = vadd.f32 %v2128_v54, %v13504_v33  ;;  %v4290_v54 = vld [vmem:[#allocation2 + $0xe9] sm:$0xff] }
 0x232   : > { %v13650_v29 = vpop.f32.mrf.mxu1  ;;  %v10265_v34 = vpop.f32.mrf.mxu0  ;;  %10648 = vmatmul.mubr.msk.f32.gmra.mxu0 %vm485_vm0, %v4285_v40 }
 0x233   : > { %v2282_v53 = vadd.f32 %v10265_v34, %v13510_v18  ;;  %10650 = vmatprep.mubr.msk.f32.mxu0 %vm485_vm0, %v4286_v26  ;;  %v4289_v18 = vld [vmem:[#allocation2 + $0xd1] sm:$0xff] }
 0x234   : > { %v10323_v2 = vpop.f32.mrf.mxu1  ;;  %v2138_v47 = vpop.f32.mrf.mxu0 }
 0x235   : > { %v13658_v22 = vadd.f32 %v10323_v2, %v2278_v45  ;;  %v13661_v23 = vadd.f32 %v2138_v47, %v13514_v43 }
 0x236   : > { %v13663_v55 = vpop.f32.mrf.mxu1  ;;  %v10268_v33 = vpop.f32.mrf.mxu0  ;;  %10651 = vmatmul.mubr.msk.f32.gmra.mxu0 %vm485_vm0, %v4287_v20 }
 0x237   : > { %v2284_v12 = vadd.f32 %v10268_v33, %v13520_v61  ;;  %10653 = vmatprep.mubr.msk.f32.mxu0 %vm485_vm0, %v4288_v42  ;;  %v4291_v61 = vld [vmem:[#allocation2 + $0xf1] sm:$0xff]  ;;  %v4292_v42 = vld [vmem:[#allocation2 + $0x109] sm:$0xff] }
 0x238   : > { %v10326_v48 = vpop.f32.mrf.mxu1  ;;  %v2148_v45 = vpop.f32.mrf.mxu0 }
 0x239   : > { %v13668_v40 = vadd.f32 %v10326_v48, %v2280_v50  ;;  %v13671_v26 = vadd.f32 %v2148_v45, %v13524_v62 }
 0x23a   : > { %v13673_v43 = vpop.f32.mrf.mxu1  ;;  %v10271_v34 = vpop.f32.mrf.mxu0  ;;  %10654 = vmatmul.mubr.msk.f32.gmra.mxu0 %vm485_vm0, %v4289_v18 }
 0x23b   : > { %v2286_v2 = vadd.f32 %v10271_v34, %v13530_v52  ;;  %10656 = vmatprep.mubr.msk.f32.mxu0 %vm485_vm0, %v4290_v54  ;;  %v4293_v52 = vld [vmem:[#allocation2 + $0x111] sm:$0xff]  ;;  %v4294_v34 = vld [vmem:[#allocation2 + $0x129] sm:$0xff] }
 0x23c   : > { %v10329_v20 = vpop.f32.mrf.mxu1  ;;  %v2158_v50 = vpop.f32.mrf.mxu0 }
 0x23d   : > { %v13678_v47 = vadd.f32 %v10329_v20, %v2282_v53  ;;  %v13681_v33 = vadd.f32 %v2158_v50, %v13534_v41 }
 0x23e   : > { %v13683_v62 = vpop.f32.mrf.mxu1  ;;  %v10274_v48 = vpop.f32.mrf.mxu0  ;;  %10657 = vmatmul.mubr.msk.f32.gmra.mxu0 %vm485_vm0, %v4291_v61 }
 0x23f   : > { %v2288_v18 = vadd.f32 %v10274_v48, %v13540_v11  ;;  %10659 = vmatprep.mubr.msk.f32.mxu0 %vm485_vm0, %v4292_v42  ;;  %v4295_v11 = vld [vmem:[#allocation2 + $0x131] sm:$0xff]  ;;  %v4296_v48 = vld [vmem:[#allocation2 + $0x149] sm:$0xff] }
 0x240   : > { %v10332_v45 = vpop.f32.mrf.mxu1  ;;  %v2168_v53 = vpop.f32.mrf.mxu0 }
 0x241   : > { %v13688_v54 = vadd.f32 %v10332_v45, %v2284_v12  ;;  %v13691_v20 = vadd.f32 %v2168_v53, %v13544_v27  ;;  %v5041_v45 = vld [vmem:[#allocation9 + $0x78] sm:$0xff] }
 0x242   : > { %v13693_v41 = vpop.f32.mrf.mxu1  ;;  %v10277_v50 = vpop.f32.mrf.mxu0  ;;  %10660 = vmatmul.mubr.msk.f32.gmra.mxu0 %vm485_vm0, %v4293_v52  ;;  %10689 = vmatprep.subr.mxu1 %v5041_v45 }
 0x243   : > { %v2290_v61 = vadd.f32 %v10277_v50, %v13550_v30  ;;  %10662 = vmatprep.mubr.msk.f32.mxu0 %vm485_vm0, %v4294_v34  ;;  %10690 = vmatpush3.msra.mxu1 %v5041_v45  ;;  %v4298_v50 = vld [vmem:[#allocation2 + $0x169] sm:$0xff] }
 0x244   : > { %v10335_v37 = vpop.f32.mrf.mxu1  ;;  %v2178_v12 = vpop.f32.mrf.mxu0 }
 0x245   : > { %v13698_v42 = vadd.f32 %v10335_v37, %v2286_v2  ;;  %v13701_v9 = vadd.f32 %v2178_v12, %v13556_v31  ;;  %v4297_v37 = vld [vmem:[#allocation2 + $0x151] sm:$0xff] }
 0x246   : > { %v13703_v27 = vpop.f32.mrf.mxu1  ;;  %v10280_v53 = vpop.f32.mrf.mxu0  ;;  %10663 = vmatmul.mubr.msk.f32.gmra.mxu0 %vm485_vm0, %v4295_v11 }
 0x247   : > { %v2292_v30 = vadd.f32 %v10280_v53, %v13561_v1  ;;  %10665 = vmatprep.mubr.msk.f32.mxu0 %vm485_vm0, %v4296_v48  ;;  %v4299_v1 = vld [vmem:[#allocation2 + $0x171] sm:$0xff]  ;;  %v4300_v53 = vld [vmem:[#allocation2 + $0x189] sm:$0xff] }
 0x248   : > { %v10338_v52 = vpop.f32.mrf.mxu1  ;;  %v2188_v34 = vpop.f32.mrf.mxu0 }
 0x249   : > { %v13708_v2 = vadd.f32 %v10338_v52, %v2288_v18  ;;  %v13711_v31 = vadd.f32 %v2188_v34, %v13566_v36  ;;  %v5040_v52 = vld [vmem:[#allocation9 + $0x70] sm:$0xff] }
 0x24a   : > { %v13713_v12 = vpop.f32.mrf.mxu1  ;;  %v10283_v32 = vpop.f32.mrf.mxu0  ;;  %10666 = vmatmul.mubr.msk.f32.gmra.mxu0 %vm485_vm0, %v4297_v37  ;;  %10691 = vmatprep.subr.mxu1 %v5040_v52 }
 0x24b   : > { %v2294_v11 = vadd.f32 %v10283_v32, %v13571_v5  ;;  %10668 = vmatprep.mubr.msk.f32.mxu0 %vm485_vm0, %v4298_v50  ;;  %10692 = vmatpush3.msra.mxu1 %v5040_v52  ;;  %v4301_v5 = vld [vmem:[#allocation2 + $0x191] sm:$0xff]  ;;  %v4302_v50 = vld [vmem:[#allocation2 + $0x1a9] sm:$0xff] }
 0x24c   : > { %v10341_v45 = vpop.f32.mrf.mxu1  ;;  %v13720_v18 = vpop.f32.mrf.mxu0 }
 0x24d   : > { %v13718_v48 = vadd.f32 %v10341_v45, %v2290_v61 }
 0x24e   : > { %v13722_v8 = vpop.f32.mrf.mxu1  ;;  %v10286_v36 = vpop.f32.mrf.mxu0  ;;  %10669 = vmatmul.mubr.msk.f32.gmra.mxu0 %vm485_vm0, %v4299_v1 }
 0x24f   : > { %v2296_v37 = vadd.f32 %v10286_v36, %v13581_v57  ;;  %10671 = vmatprep.mubr.msk.f32.mxu0 %vm485_vm0, %v4300_v53  ;;  %v4303_v57 = vld [vmem:[#allocation2 + $0x1b1] sm:$0xff]  ;;  %v5039_v36 = vld [vmem:[#allocation9 + $0x68] sm:$0xff] }
 0x250   : > { %v10344_v32 = vpop.f32.mrf.mxu1  ;;  %v13729_v61 = vpop.f32.mrf.mxu0  ;;  %10693 = vmatprep.subr.mxu1 %v5039_v36 }
 0x251   : > { %v13727_v34 = vadd.f32 %v10344_v32, %v2292_v30  ;;  %v4304_v30 = vld [vmem:[#allocation2 + $0x1c9] sm:$0xff]  ;;  %10694 = vmatpush3.msra.mxu1 %v5039_v36 }
 0x252   : > { %v13731_v45 = vpop.f32.mrf.mxu1  ;;  %v10289_v0 = vpop.f32.mrf.mxu0  ;;  %10672 = vmatmul.mubr.msk.f32.gmra.mxu0 %vm485_vm0, %v4301_v5 }
 0x253   : > { %16745 = vst [vmem:[#allocation51_spill] sm:$0xff] %v13731_v45  ;;  %v2298_v24 = vadd.f32 %v10289_v0, %v13591_v39  ;;  %10674 = vmatprep.mubr.msk.f32.mxu0 %vm485_vm0, %v4302_v50  ;;  %v4305_v39 = vld [vmem:[#allocation2 + $0x1d1] sm:$0xff] }
 0x254   : > { %v10347_v1 = vpop.f32.mrf.mxu1  ;;  %v13738_v53 = vpop.f32.mrf.mxu0 }
 0x255   : > { %v13736_v52 = vadd.f32 %v10347_v1, %v2294_v11  ;;  %16746 = vst [vmem:[#allocation52_spill] sm:$0xff] %v13738_v53  ;;  %v4306_v1 = vld [vmem:[#allocation2 + $0x1e9] sm:$0xff] }
 0x256   : > { %v13740_v32 = vpop.f32.mrf.mxu1  ;;  %v10292_v35 = vpop.f32.mrf.mxu0  ;;  %10675 = vmatmul.mubr.msk.f32.gmra.mxu0 %vm485_vm0, %v4303_v57 }
 0x257   : > { %16747 = vst [vmem:[#allocation53_spill] sm:$0xff] %v13740_v32  ;;  %v2300_v5 = vadd.f32 %v10292_v35, %v13602_v46  ;;  %10677 = vmatprep.mubr.msk.f32.mxu0 %vm485_vm0, %v4304_v30  ;;  %v4307_v35 = vld [vmem:[#allocation2 + $0x1f1] sm:$0xff] }
 0x258   : > { %v10350_v0 = vpop.f32.mrf.mxu1  ;;  %v13747_v11 = vpop.f32.mrf.mxu0 }
 0x259   : > { %v13745_v50 = vadd.f32 %v10350_v0, %v2296_v37  ;;  %v5038_v37 = vld [vmem:[#allocation9 + $0x60] sm:$0xff] }
 0x25a   : > { %v13749_v53 = vpop.f32.mrf.mxu1  ;;  %v10295_v45 = vpop.f32.mrf.mxu0  ;;  %10678 = vmatmul.mubr.msk.f32.gmra.mxu0 %vm485_vm0, %v4305_v39  ;;  %10695 = vmatprep.subr.mxu1 %v5038_v37 }
 0x25b   : > { %16748 = vst [vmem:[#allocation54_spill] sm:$0xff] %v13749_v53  ;;  %v2302_v32 = vadd.f32 %v10295_v45, %v13613_v58  ;;  %10680 = vmatprep.mubr.msk.f32.mxu0 %vm485_vm0, %v4306_v1  ;;  %10696 = vmatpush3.msra.mxu1 %v5038_v37  ;;  %v4310_v45 = vld [vmem:[#allocation2 + $0x229] sm:$0xff] }
 0x25c   : > { %v10353_v57 = vpop.f32.mrf.mxu1  ;;  %v13756_v30 = vpop.f32.mrf.mxu0 }
 0x25d   : > { %v13754_v46 = vadd.f32 %v10353_v57, %v2298_v24 }
 0x25e   : > { %v13758_v36 = vpop.f32.mrf.mxu1  ;;  %v10298_v0 = vpop.f32.mrf.mxu0  ;;  %10681 = vmatmul.mubr.msk.f32.gmra.mxu0 %vm485_vm0, %v4307_v35 }
 0x25f   : > { %16749 = vst [vmem:[#allocation55_spill] sm:$0xff] %v13758_v36  ;;  %v2304_v39 = vadd.f32 %v10298_v0, %v13623_v7  ;;  %10683 = vmatprep.mubr.msk.f32.mxu0 %vm485_vm0, %v13470_v6  ;;  %v4311_v7 = vld [vmem:[#allocation2 + $0x231] sm:$0xff] }
 0x260   : > { %v10356_v53 = vpop.f32.mrf.mxu1  ;;  %v13766_v24 = vpop.f32.mrf.mxu0 }
 0x261   : > { %v13764_v58 = vadd.f32 %v10356_v53, %v2300_v5  ;;  %16750 = vst [vmem:[#allocation56_spill] sm:$0xff] %v13766_v24  ;;  %v5037_v53 = vld [vmem:[#allocation9 + $0x58] sm:$0xff] }
 0x262   : > { %v13768_v1 = vpop.f32.mrf.mxu1  ;;  %v10301_v57 = vpop.f32.mrf.mxu0  ;;  %10684 = vmatmul.mubr.msk.f32.gmra.mxu0 %vm485_vm0, %v13478_v60  ;;  %10697 = vmatprep.subr.mxu1 %v5037_v53 }
 0x263   : > { %16751 = vst [vmem:[#allocation57_spill] sm:$0xff] %v13768_v1  ;;  %v2306_v35 = vadd.f32 %v10301_v57, %v13636_v49  ;;  %10686 = vmatprep.mubr.msk.f32.mxu0 %vm485_vm0, %v4310_v45  ;;  %10698 = vmatpush3.msra.mxu1 %v5037_v53 }
 0x264   : > { %v10359_v37 = vpop.f32.mrf.mxu1  ;;  %v13776_v6 = vpop.f32.mrf.mxu0 }
 0x265   : > { %v13774_v0 = vadd.f32 %v10359_v37, %v2302_v32  ;;  %16752 = vst [vmem:[#allocation58_spill] sm:$0xff] %v13776_v6 }
 0x266   : > { %v13778_v5 = vpop.f32.mrf.mxu1  ;;  %v10304_v36 = vpop.f32.mrf.mxu0  ;;  %10687 = vmatmul.mubr.msk.f32.gmra.mxu0 %vm485_vm0, %v4311_v7 }
 0x267   : > { %16753 = vst [vmem:[#allocation59_spill] sm:$0xff] %v13778_v5  ;;  %v2308_v60 = vadd.f32 %v10304_v36, %v13648_v44 }
 0x268   : > { %v10362_v1 = vpop.f32.mrf.mxu1  ;;  %v13784_v57 = vpop.f32.mrf.mxu0 }
 0x269   : > { %v13782_v49 = vadd.f32 %v10362_v1, %v2304_v39  ;;  %16754 = vst [vmem:[#allocation60_spill] sm:$0xff] %v13784_v57 }
 0x26a   : > { %v13786_v45 = vpop.f32.mrf.mxu1  ;;  %v10387_v32 = vpop.f32.mrf.mxu0 }
 0x26b   : > { %16755 = vst [vmem:[#allocation61_spill] sm:$0xff] %v13786_v45  ;;  %v13789_v6 = vadd.f32 %v10387_v32, %v13658_v22 }
 0x26c   : > { %v10365_v37 = vpop.f32.mrf.mxu1  ;;  %v13793_v24 = vpop.f32.mrf.mxu0 }
 0x26d   : > { %16756 = vst [vmem:[#allocation62_spill] sm:$0xff] %v13789_v6  ;;  %v13791_v5 = vadd.f32 %v10365_v37, %v2306_v35  ;;  %16757 = vst [vmem:[#allocation63_spill] sm:$0xff] %v13793_v24  ;;  %v5036_v6 = vld [vmem:[#allocation9 + $0x50] sm:$0xff] }
 0x26e   : > { %v13795_v7 = vpop.f32.mrf.mxu1  ;;  %v10390_v53 = vpop.f32.mrf.mxu0  ;;  %10699 = vmatprep.subr.mxu1 %v5036_v6 }
 0x26f   : > { %v13798_v36 = vadd.f32 %v10390_v53, %v13668_v40  ;;  %10700 = vmatpush3.msra.mxu1 %v5036_v6  ;;  %v4999_v6 = vld [vmem:[#allocation9 + $0x30] sm:$0xff] }
 0x270   : > { %v10368_v44 = vpop.f32.mrf.mxu1  ;;  %v13802_v1 = vpop.f32.mrf.mxu0 }
 0x271   : > { %16758 = vst [vmem:[#allocation64_spill] sm:$0xff] %v13798_v36  ;;  %v13800_v39 = vadd.f32 %v10368_v44, %v2308_v60 }
 0x272   : > { %v13804_v45 = vpop.f32.mrf.mxu1  ;;  %v10393_v57 = vpop.f32.mrf.mxu0 }
 0x273   : > { %v13807_v22 = vadd.f32 %v10393_v57, %v13678_v47 }
 0x274   : > { %v13809_v35 = vpop.f32.mrf.mxu1  ;;  %v13811_v32 = vpop.f32.mrf.mxu0 }
 0x275   : > { %16759 = vst [vmem:[#allocation65_spill] sm:$0xff] %v13807_v22  ;;  %16760 = vst [vmem:[#allocation66_spill] sm:$0xff] %v13811_v32 }
 0x276   : > { %v13813_v37 = vpop.f32.mrf.mxu1  ;;  %v10396_v24 = vpop.f32.mrf.mxu0 }
 0x277   : > { %16761 = vst [vmem:[#allocation67_spill] sm:$0xff] %v13813_v37  ;;  %v13816_v40 = vadd.f32 %v10396_v24, %v13688_v54  ;;  %v5000_v37 = vld [vmem:[#allocation9 + $0x38] sm:$0xff]  ;;  %v5035_v24 = vld [vmem:[#allocation9 + $0x48] sm:$0xff] }
 0x278   : > { %v13818_v60 = vpop.f32.mrf.mxu1  ;;  %v13820_v53 = vpop.f32.mrf.mxu0  ;;  %10753 = vmatprep.subr.mxu0 %v5000_v37  ;;  %10701 = vmatprep.subr.mxu1 %v5035_v24 }
 0x279   : > { %16762 = vst [vmem:[#allocation68_spill] sm:$0xff] %v13816_v40  ;;  %10754 = vmatpush3.msra.mxu0 %v5000_v37  ;;  %10702 = vmatpush3.msra.mxu1 %v5035_v24  ;;  %v4997_v37 = vld [vmem:[#allocation9 + $0x20] sm:$0xff]  ;;  %v4996_v24 = vld [vmem:[#allocation9 + $0x18] sm:$0xff] }
 0x27a   : > { %v13822_v44 = vpop.f32.mrf.mxu1  ;;  %v10399_v47 = vpop.f32.mrf.mxu0  ;;  %10755 = vmatprep.subr.mxu0 %v4999_v6 }
 0x27b   : > { %16763 = vst [vmem:[#allocation69_spill] sm:$0xff] %v13822_v44  ;;  %v13825_v57 = vadd.f32 %v10399_v47, %v13698_v42  ;;  %10756 = vmatpush3.msra.mxu0 %v4999_v6  ;;  %v4998_v47 = vld [vmem:[#allocation9 + $0x28] sm:$0xff] }
 0x27c   : > { %v13827_v22 = vpop.f32.mrf.mxu1  ;;  %v13829_v36 = vpop.f32.mrf.mxu0  ;;  %10757 = vmatprep.subr.mxu0 %v4998_v47 }
 0x27d   : > { %16764 = vst [vmem:[#allocation70_spill] sm:$0xff] %v13825_v57  ;;  %16765 = vst [vmem:[#allocation71_spill] sm:$0xff] %v13827_v22  ;;  %10758 = vmatpush3.msra.mxu0 %v4998_v47 }
 0x27e   : > { %16766 = vst [vmem:[#allocation72_spill] sm:$0xff] %v13829_v36  ;;  %v13831_v32 = vpop.f32.mrf.mxu1  ;;  %v10402_v54 = vpop.f32.mrf.mxu0  ;;  %v5034_v36 = vld [vmem:[#allocation9 + $0x40] sm:$0xff]  ;;  %10759 = vmatprep.subr.mxu0 %v4997_v37 }
 0x27f   : > { %16767 = vst [vmem:[#allocation73_spill] sm:$0xff] %v13831_v32  ;;  %v13834_v40 = vadd.f32 %v10402_v54, %v13708_v2  ;;  %10703 = vmatprep.subr.mxu1 %v5034_v36  ;;  %10760 = vmatpush3.msra.mxu0 %v4997_v37  ;;  %v4993_v37 = vld [vmem:[#allocation9] sm:$0xff] }
 0x280   : > { %v13836_v44 = vpop.f32.mrf.mxu1  ;;  %v13838_v42 = vpop.f32.mrf.mxu0  ;;  %10704 = vmatpush3.msra.mxu1 %v5034_v36  ;;  %10761 = vmatprep.subr.mxu0 %v4996_v24 }
 0x281   : > { %16768 = vst [vmem:[#allocation74_spill] sm:$0xff] %v13834_v40  ;;  %10762 = vmatpush3.msra.mxu0 %v4996_v24 }
 0x282   : > { %v13840_v57 = vpop.f32.mrf.mxu1  ;;  %v10405_v32 = vpop.f32.mrf.mxu0 }
 0x283   : > { %16769 = vst [vmem:[#allocation75_spill] sm:$0xff] %v13840_v57  ;;  %v13843_v22 = vadd.f32 %v10405_v32, %v13718_v48  ;;  %v4995_v57 = vld [vmem:[#allocation9 + $0x10] sm:$0xff] }
 0x284   : > { %v13845_v2 = vpop.f32.mrf.mxu1  ;;  %v13847_v54 = vpop.f32.mrf.mxu0  ;;  %10763 = vmatprep.subr.mxu0 %v4995_v57 }
 0x285   : > { %16770 = vst [vmem:[#allocation76_spill] sm:$0xff] %v13843_v22  ;;  %16771 = vst [vmem:[#allocation77_spill] sm:$0xff] %v13847_v54  ;;  %10764 = vmatpush3.msra.mxu0 %v4995_v57  ;;  %v4994_v22 = vld [vmem:[#allocation9 + $0x8] sm:$0xff] }
 0x286   : > { %v13849_v6 = vpop.f32.mrf.mxu1  ;;  %v10408_v40 = vpop.f32.mrf.mxu0  ;;  %10765 = vmatprep.subr.mxu0 %v4994_v22 }
 0x287   : > { %16772 = vst [vmem:[#allocation78_spill] sm:$0xff] %v13849_v6  ;;  %v13852_v47 = vadd.f32 %v10408_v40, %v13727_v34  ;;  %10766 = vmatpush3.msra.mxu0 %v4994_v22 }
 0x288   : > { %v13854_v48 = vpop.f32.mrf.mxu1  ;;  %v13856_v32 = vpop.f32.mrf.mxu0  ;;  %10767 = vmatprep.subr.mxu0 %v4993_v37 }
 0x289   : > { %16773 = vst [vmem:[#allocation79_spill] sm:$0xff] %v13852_v47  ;;  %10768 = vmatpush3.msra.mxu0 %v4993_v37  ;;  %v13869_v47 = vld [vmem:[#allocation9 + $0xb8] sm:$0xff] }
 0x28a   : > { %v13858_v54 = vpop.f32.mrf.mxu1  ;;  %v10411_v36 = vpop.f32.mrf.mxu0  ;;  %16779 = vst [vmem:[#allocation85_spill] sm:$0xff] %v13869_v47  ;;  %10817 = vmatprep.subr.mxu1 %v13869_v47 }
 0x28b   : > { %16774 = vst [vmem:[#allocation80_spill] sm:$0xff] %v13858_v54  ;;  %v13861_v6 = vadd.f32 %v10411_v36, %v13736_v52 }
 0x28c   : > { %v13863_v24 = vpop.f32.mrf.mxu1  ;;  %v13865_v34 = vpop.f32.mrf.mxu0 }
 0x28d   : > { %16775 = vst [vmem:[#allocation81_spill] sm:$0xff] %v13861_v6  ;;  %16776 = vst [vmem:[#allocation82_spill] sm:$0xff] %v13863_v24 }
 0x28e   : > { %16777 = vst [vmem:[#allocation83_spill] sm:$0xff] %v13865_v34  ;;  %v13867_v40 = vpop.f32.mrf.mxu1  ;;  %v10414_v57 = vpop.f32.mrf.mxu0 }
 0x28f   : > { %16778 = vst [vmem:[#allocation84_spill] sm:$0xff] %v13867_v40  ;;  %v13873_v54 = vadd.f32 %v10414_v57, %v13745_v50 }
 0x290   : > { %v13875_v22 = vpop.f32.mrf.mxu1  ;;  %v13877_v52 = vpop.f32.mrf.mxu0 }
 0x291   : > { %16780 = vst [vmem:[#allocation86_spill] sm:$0xff] %v13873_v54  ;;  %16781 = vst [vmem:[#allocation87_spill] sm:$0xff] %v13877_v52 }
 0x292   : > { %v13879_v36 = vpop.f32.mrf.mxu1  ;;  %v10417_v6 = vpop.f32.mrf.mxu0 }
 0x293   : > { %16782 = vst [vmem:[#allocation88_spill] sm:$0xff] %v13879_v36  ;;  %v13882_v34 = vadd.f32 %v10417_v6, %v13754_v46 }
 0x294   : > { %v13884_v37 = vpop.f32.mrf.mxu1  ;;  %v13886_v40 = vpop.f32.mrf.mxu0 }
 0x295   : > { %16783 = vst [vmem:[#allocation89_spill] sm:$0xff] %v13882_v34  ;;  %16784 = vst [vmem:[#allocation90_spill] sm:$0xff] %v13886_v40 }
 0x296   : > { %v13888_v24 = vpop.f32.mrf.mxu1  ;;  %v10420_v47 = vpop.f32.mrf.mxu0 }
 0x297   : > { %16785 = vst [vmem:[#allocation91_spill] sm:$0xff] %v13888_v24  ;;  %v13891_v50 = vadd.f32 %v10420_v47, %v13764_v58 }
 0x298   : > { %v13893_v57 = vpop.f32.mrf.mxu1  ;;  %v13895_v54 = vpop.f32.mrf.mxu0 }
 0x299   : > { %16786 = vst [vmem:[#allocation92_spill] sm:$0xff] %v13891_v50  ;;  %16787 = vst [vmem:[#allocation93_spill] sm:$0xff] %v13895_v54 }
 0x29a   : > { %v13897_v52 = vpop.f32.mrf.mxu1  ;;  %v10423_v36 = vpop.f32.mrf.mxu0 }
 0x29b   : > { %16788 = vst [vmem:[#allocation94_spill] sm:$0xff] %v13897_v52  ;;  %v13900_v46 = vadd.f32 %v10423_v36, %v13774_v0 }
 0x29c   : > { %v13902_v6 = vpop.f32.mrf.mxu1  ;;  %v13904_v34 = vpop.f32.mrf.mxu0 }
 0x29d   : > { %16789 = vst [vmem:[#allocation95_spill] sm:$0xff] %v13900_v46  ;;  %16790 = vst [vmem:[#allocation96_spill] sm:$0xff] %v13902_v6 }
 0x29e   : > { %16791 = vst [vmem:[#allocation97_spill] sm:$0xff] %v13904_v34  ;;  %v13906_v40 = vpop.f32.mrf.mxu1  ;;  %v10426_v24 = vpop.f32.mrf.mxu0 }
 0x29f   : > { %16792 = vst [vmem:[#allocation98_spill] sm:$0xff] %v13906_v40  ;;  %v13909_v58 = vadd.f32 %v10426_v24, %v13782_v49 }
 0x2a0   : > { %v13911_v47 = vpop.f32.mrf.mxu1  ;;  %v13913_v50 = vpop.f32.mrf.mxu0 }
 0x2a1   : > { %16793 = vst [vmem:[#allocation99_spill] sm:$0xff] %v13909_v58  ;;  %16794 = vst [vmem:[#allocation100_spill] sm:$0xff] %v13911_v47 }
 0x2a2   : > { %16795 = vst [vmem:[#allocation101_spill] sm:$0xff] %v13913_v50  ;;  %v13915_v54 = vpop.f32.mrf.mxu1  ;;  %v10429_v52 = vpop.f32.mrf.mxu0 }
 0x2a3   : > { %16796 = vst [vmem:[#allocation102_spill] sm:$0xff] %v13915_v54  ;;  %v13918_v0 = vadd.f32 %v10429_v52, %v13791_v5 }
 0x2a4   : > { %v13920_v36 = vpop.f32.mrf.mxu1  ;;  %v13922_v46 = vpop.f32.mrf.mxu0 }
 0x2a5   : > { %16797 = vst [vmem:[#allocation103_spill] sm:$0xff] %v13918_v0  ;;  %16798 = vst [vmem:[#allocation104_spill] sm:$0xff] %v13920_v36 }
 0x2a6   : > { %16799 = vst [vmem:[#allocation105_spill] sm:$0xff] %v13922_v46  ;;  %v13924_v34 = vpop.f32.mrf.mxu1  ;;  %v10432_v40 = vpop.f32.mrf.mxu0 }
 0x2a7   : > { %16800 = vst [vmem:[#allocation106_spill] sm:$0xff] %v13924_v34  ;;  %v13927_v49 = vadd.f32 %v10432_v40, %v13800_v39 }
 0x2a8   : > { %v13929_v24 = vpop.f32.mrf.mxu1  ;;  %v13931_v58 = vpop.f32.mrf.mxu0 }
 0x2a9   : > { %16801 = vst [vmem:[#allocation107_spill] sm:$0xff] %v13927_v49  ;;  %16802 = vst [vmem:[#allocation108_spill] sm:$0xff] %v13929_v24 }
 0x2aa   : > { %16803 = vst [vmem:[#allocation109_spill] sm:$0xff] %v13931_v58  ;;  %v13933_v50 = vpop.f32.mrf.mxu1  ;;  %v13935_v54 = vpop.f32.mrf.mxu0 }
 0x2ab   : > { %16804 = vst [vmem:[#allocation110_spill] sm:$0xff] %v13933_v50 }
 0x2ac   : > { %v13937_v5 = vpop.f32.mrf.mxu1  ;;  %v13939_v52 = vpop.f32.mrf.mxu0 }
 0x2ad   : > { %16805 = vst [vmem:[#allocation111_spill] sm:$0xff] %v13937_v5 }
 0x2ae   : > { %v13941_v0 = vpop.f32.mrf.mxu1  ;;  %v13943_v46 = vpop.f32.mrf.mxu0 }
 0x2af   : > { %16806 = vst [vmem:[#allocation112_spill] sm:$0xff] %v13941_v0 }
 0x2b0   : > { %v13945_v34 = vpop.f32.mrf.mxu1  ;;  %v13947_v39 = vpop.f32.mrf.mxu0 }
 0x2b1   : > { %16807 = vst [vmem:[#allocation113_spill] sm:$0xff] %v13945_v34  ;;  %16808 = vst [vmem:[#allocation114_spill] sm:$0xff] %v13947_v39 }
 0x2b2   : > { %v13949_v40 = vpop.f32.mrf.mxu1  ;;  %v13951_v49 = vpop.f32.mrf.mxu0 }
 0x2b3   : > { %16809 = vst [vmem:[#allocation115_spill] sm:$0xff] %v13949_v40  ;;  %16810 = vst [vmem:[#allocation116_spill] sm:$0xff] %v13951_v49  ;;  %v13973_v49 = vld [vmem:[#allocation9 + $0xf8] sm:$0xff] }
 0x2b4   : > { %v13953_v58 = vpop.f32.mrf.mxu1  ;;  %v13955_v50 = vpop.f32.mrf.mxu0  ;;  %16820 = vst [vmem:[#allocation126_spill] sm:$0xff] %v13973_v49  ;;  %10881 = vmatprep.subr.mxu0 %v13973_v49 }
 0x2b5   : > { %16811 = vst [vmem:[#allocation117_spill] sm:$0xff] %v13955_v50 }
 0x2b6   : > { %v13957_v24 = vpop.f32.mrf.mxu1  ;;  %v13959_v5 = vpop.f32.mrf.mxu0 }
 0x2b7   : > { %16812 = vst [vmem:[#allocation118_spill] sm:$0xff] %v13957_v24  ;;  %16813 = vst [vmem:[#allocation119_spill] sm:$0xff] %v13959_v5 }
 0x2b8   : > { %v13961_v36 = vpop.f32.mrf.mxu1  ;;  %v13963_v0 = vpop.f32.mrf.mxu0 }
 0x2b9   : > { %16814 = vst [vmem:[#allocation120_spill] sm:$0xff] %v13961_v36  ;;  %16815 = vst [vmem:[#allocation121_spill] sm:$0xff] %v13963_v0 }
 0x2ba   : > { %v13965_v47 = vpop.f32.mrf.mxu1  ;;  %v13967_v34 = vpop.f32.mrf.mxu0 }
 0x2bb   : > { %16816 = vst [vmem:[#allocation122_spill] sm:$0xff] %v13965_v47  ;;  %16817 = vst [vmem:[#allocation123_spill] sm:$0xff] %v13967_v34 }
 0x2bc   : > { %v13969_v39 = vpop.f32.mrf.mxu1  ;;  %v13971_v40 = vpop.f32.mrf.mxu0 }
 0x2bd   : > { %16818 = vst [vmem:[#allocation124_spill] sm:$0xff] %v13969_v39  ;;  %16819 = vst [vmem:[#allocation125_spill] sm:$0xff] %v13971_v40 }
 0x2be   : > { %v13975_v6 = vpop.f32.mrf.mxu1  ;;  %v13978_v5 = vpop.f32.mrf.mxu0 }
 0x2bf   : > { %16821 = vst [vmem:[#allocation127_spill] sm:$0xff] %v13975_v6  ;;  %16822 = vst [vmem:[#allocation128_spill] sm:$0xff] %v13978_v5 }
 0x2c0   : > { %v13980_v50 = vpop.f32.mrf.mxu1  ;;  %v13982_v0 = vpop.f32.mrf.mxu0 }
 0x2c1   : > { %16823 = vst [vmem:[#allocation129_spill] sm:$0xff] %v13980_v50  ;;  %16824 = vst [vmem:[#allocation130_spill] sm:$0xff] %v13982_v0 }
 0x2c2   : > { %v13984_v47 = vpop.f32.mrf.mxu0  ;;  %v13986_v34 = vpop.f32.mrf.mxu1 }
 0x2c3   : > { %16825 = vst [vmem:[#allocation131_spill] sm:$0xff] %v13984_v47 }
 0x2c4   : > { %v13988_v39 = vpop.f32.mrf.mxu0  ;;  %v13992_v36 = vpop.f32.mrf.mxu1 }
 0x2c5   : > { %16826 = vst [vmem:[#allocation132_spill] sm:$0xff] %v13988_v39 }
 0x2c6   : > { %v13990_v40 = vpop.f32.mrf.mxu0  ;;  %v13998_v5 = vpop.f32.mrf.mxu1 }
 0x2c7   : > { %16827 = vst [vmem:[#allocation133_spill] sm:$0xff] %v13990_v40 }
 0x2c8   : > { %v13994_v6 = vpop.f32.mrf.mxu0  ;;  %v14004_v24 = vpop.f32.mrf.mxu1 }
 0x2c9   : > { %16828 = vst [vmem:[#allocation134_spill] sm:$0xff] %v13994_v6 }
 0x2ca   : > { %v13996_v49 = vpop.f32.mrf.mxu0  ;;  %v14011_v40 = vpop.f32.mrf.mxu1 }
 0x2cb   : > { %16829 = vst [vmem:[#allocation135_spill] sm:$0xff] %v13996_v49  ;;  %16834 = vst [vmem:[#allocation140_spill] sm:$0xff] %v14011_v40  ;;  %v1837_v49 = vadd.f32 %v13576_v10, %v13552_v25  ;;  %v1897_v25 = vadd.f32 %v13639_v3, %v13615_v56 }
 0x2cc   : > { %v14000_v50 = vpop.f32.mrf.mxu0  ;;  %v14038_v10 = vpop.f32.mrf.mxu1 }
 0x2cd   : > { %16830 = vst [vmem:[#allocation136_spill] sm:$0xff] %v14000_v50  ;;  %v1857_v50 = vadd.f32 %v13596_v59, %v13573_v16  ;;  %v2671_v16 = vadd.f32 %v13663_v55, %v13642_v4  ;;  %v2679_v59 = vadd.f32 %v13703_v27, %v13681_v33  ;;  %v2293_v56 = vadd.f32 %v13720_v18, %v1837_v49  ;;  %v16839_v4 = vld [vmem:[#allocation52_spill] sm:$0xff] }
 0x2ce   : > { %v14002_v0 = vpop.f32.mrf.mxu0 }
 0x2cf   : > { %16831 = vst [vmem:[#allocation137_spill] sm:$0xff] %v14002_v0  ;;  %v1847_v0 = vadd.f32 %v13586_v63, %v13563_v21  ;;  %v1907_v21 = vadd.f32 %v13650_v29, %v13625_v38  ;;  %v2675_v63 = vadd.f32 %v13683_v62, %v13661_v23  ;;  %v2297_v29 = vadd.f32 %v16839_v4, %v1857_v50  ;;  %v16842_v62 = vld [vmem:[#allocation54_spill] sm:$0xff] }
 0x2d0   : > { %v14007_v47 = vpop.f32.mrf.mxu0 }
 0x2d1   : > { %16832 = vst [vmem:[#allocation138_spill] sm:$0xff] %v14007_v47  ;;  %v1867_v47 = vadd.f32 %v13607_v17, %v13583_v28  ;;  %v2673_v28 = vadd.f32 %v13673_v43, %v13653_v13  ;;  %v2681_v17 = vadd.f32 %v13713_v12, %v13691_v20  ;;  %v2295_v38 = vadd.f32 %v13729_v61, %v1847_v0  ;;  %v16841_v43 = vld [vmem:[#allocation53_spill] sm:$0xff]  ;;  %v14076_v12 = vpop.f32.mrf.mxu1 }
 0x2d2   : > { %v14009_v39 = vpop.f32.mrf.mxu0  ;;  %v2687_v33 = vadd.f32 %v16841_v43, %v2293_v56  ;;  %v16846_v61 = vld [vmem:[#allocation57_spill] sm:$0xff] }
 0x2d3   : > { %16833 = vst [vmem:[#allocation139_spill] sm:$0xff] %v14009_v39  ;;  %v1877_v39 = vadd.f32 %v13618_v19, %v13593_v14  ;;  %v2677_v14 = vadd.f32 %v13693_v41, %v13671_v26  ;;  %v2683_v19 = vadd.f32 %v13722_v8, %v13701_v9  ;;  %v2299_v13 = vadd.f32 %v13747_v11, %v1867_v47  ;;  %v14070_v26 = vld [vmem:[%s14044_s14] ss:$0 sm:$0xff]  ;;  %v16843_v8 = vld [vmem:[#allocation56_spill] sm:$0xff]  ;;  %v16844_v41 = vld [vmem:[#allocation58_spill] sm:$0xff] }
 0x2d4   : > { %v14016_v6 = vpop.f32.mrf.mxu0  ;;  %v2689_v20 = vadd.f32 %v16842_v62, %v2295_v38  ;;  %v2305_v27 = vadd.f32 %v16844_v41, %v1897_v25  ;;  %v16848_v47 = vld [vmem:[#allocation60_spill] sm:$0xff]  ;;  %v16851_v25 = vld [vmem:[#allocation63_spill] sm:$0xff] }
 0x2d5   : > { %16835 = vst [vmem:[#allocation141_spill] sm:$0xff] %v14016_v6  ;;  %v1887_v6 = vadd.f32 %v13629_v51, %v13604_v15  ;;  %v16838_v51 = vld [vmem:[#allocation51_spill] sm:$0xff]  ;;  %v2301_v23 = vadd.f32 %v13756_v30, %v1877_v39  ;;  %v14082_v11 = vadd.f32 %v16846_v61, %v2299_v13  ;;  %v2307_v0 = vadd.f32 %v16848_v47, %v1907_v21  ;;  %v16850_v39 = vld [vmem:[#allocation61_spill] sm:$0xff]  ;;  %v16853_v21 = vld [vmem:[#allocation62_spill] sm:$0xff] }
 0x2d6   : > { %v14028_v40 = vpop.f32.mrf.mxu0  ;;  %v2685_v3 = vadd.f32 %v16838_v51, %v13711_v31  ;;  %v16845_v31 = vld [vmem:[#allocation55_spill] sm:$0xff]  ;;  %v3065_v38 = vadd.f32 %v16851_v25, %v2671_v16  ;;  %v16852_v51 = vld [vmem:[#allocation33_spill] sm:$0xff]  ;;  %v3067_v13 = vadd.f32 %v13802_v1, %v2673_v28  ;;  %v16855_v62 = vld [vmem:[#allocation32_spill] sm:$0xff] }
 0x2d7   : > { %16836 = vst [vmem:[#allocation142_spill] sm:$0xff] %v14028_v40  ;;  %v2303_v9 = vadd.f32 %v16843_v8, %v1887_v6  ;;  %v14079_v18 = vadd.f32 %v16845_v31, %v2297_v29  ;;  %v16847_v30 = vld [vmem:[#allocation59_spill] sm:$0xff]  ;;  %v14094_v6 = vadd.f32 %v13795_v7, %v2305_v27  ;;  %v14099_v4 = vmul.f32 %v14070_v26, %v16852_v51  ;;  %v16856_v8 = vld [vmem:[#allocation66_spill] sm:$0xff]  ;;  %v14115_v27 = vpop.f32.mrf.mxu1  ;;  %v16861_v47 = vld [vmem:[#allocation69_spill] sm:$0xff] }
 0x2d8   : > { %v14054_v15 = vpop.f32.mrf.mxu0  ;;  %v14085_v50 = vadd.f32 %v16847_v30, %v2301_v23  ;;  %v14102_v29 = vadd.f32 %v13804_v45, %v2307_v0  ;;  %v3460_v23 = vadd.f32 %v13809_v35, %v16853_v21  ;;  %v14111_v7 = vmul.f32 %v14070_v26, %v16855_v62  ;;  %v16858_v31 = vld [vmem:[#allocation31_spill] sm:$0xff]  ;;  %v16859_v1 = vld [vmem:[#allocation30_spill] sm:$0xff]  ;;  %v16860_v35 = vld [vmem:[#allocation64_spill] sm:$0xff] }
 0x2d9   : > { %16837 = vst [vmem:[#allocation143_spill] sm:$0xff] %v14054_v15  ;;  %v14091_v56 = vadd.f32 %v16850_v39, %v2303_v9  ;;  %v3069_v16 = vadd.f32 %v16856_v8, %v2675_v63  ;;  %v16857_v9 = vld [vmem:[#allocation67_spill] sm:$0xff]  ;;  %v14119_v45 = vmul.f32 %v14070_v26, %v16858_v31  ;;  %v14123_v28 = vmul.f32 %v14070_v26, %v16859_v1  ;;  %v16867_v31 = vld [vmem:[#allocation34_spill] sm:$0xff] }
 0x2da   : > { %v14067_v55 = vpop.f32.mrf.mxu0  ;;  %v3459_v41 = vadd.f32 %v16857_v9, %v3065_v38  ;;  %v3462_v61 = vadd.f32 %v13818_v60, %v16860_v35  ;;  %v3071_v30 = vadd.f32 %v13820_v53, %v2677_v14  ;;  %v14129_v0 = vadd.f32 %v16861_v47, %v3067_v13  ;;  %v16863_v39 = vld [vmem:[#allocation35_spill] sm:$0xff]  ;;  %v16864_v38 = vld [vmem:[#allocation65_spill] sm:$0xff]  ;;  %v16866_v9 = vld [vmem:[#allocation72_spill] sm:$0xff] }
 0x2db   : > { %16840 = vst [vmem:[#allocation51_spill] sm:$0xff] %v14067_v55  ;;  %v14135_v25 = vmul.f32 %v14070_v26, %v16863_v39  ;;  %v16865_v21 = vld [vmem:[#allocation71_spill] sm:$0xff]  ;;  %v3073_v1 = vadd.f32 %v16866_v9, %v2679_v59  ;;  %v14144_v60 = vmul.f32 %v14070_v26, %v16867_v31  ;;  %v16868_v53 = vld [vmem:[#allocation40_spill] sm:$0xff]  ;;  %v16869_v13 = vld [vmem:[#allocation73_spill] sm:$0xff] }
 0x2dc   : > { %v14088_v49 = vpop.f32.mrf.mxu0  ;;  %v14139_v8 = vadd.f32 %v16865_v21, %v16864_v38  ;;  %v14148_v14 = vmul.f32 %v14070_v26, %v16868_v53  ;;  %v14151_v35 = vadd.f32 %v16869_v13, %v3069_v16  ;;  %v16870_v47 = vld [vmem:[#allocation68_spill] sm:$0xff]  ;;  %v16873_v21 = vld [vmem:[#allocation42_spill] sm:$0xff]  ;;  %v3075_v53 = vadd.f32 %v13838_v42, %v2681_v17  ;;  %v16874_v31 = vld [vmem:[#allocation75_spill] sm:$0xff] }
 0x2dd   : > { %16849 = vst [vmem:[#allocation52_spill] sm:$0xff] %v14088_v49  ;;  %v14155_v39 = vadd.f32 %v13836_v44, %v16870_v47  ;;  %v16872_v38 = vld [vmem:[#allocation36_spill] sm:$0xff]  ;;  %v14165_v9 = vmul.f32 %v14070_v26, %v16873_v21  ;;  %v14169_v51 = vadd.f32 %v16874_v31, %v3071_v30  ;;  %v16875_v16 = vld [vmem:[#allocation70_spill] sm:$0xff]  ;;  %v14175_v44 = vpop.f32.mrf.mxu1  ;;  %v16876_v47 = vld [vmem:[#allocation41_spill] sm:$0xff] }
 0x2de   : > { %v14107_v43 = vpop.f32.mrf.mxu0  ;;  %v14161_v59 = vmul.f32 %v14070_v26, %v16872_v38  ;;  %v14173_v13 = vadd.f32 %v13845_v2, %v16875_v16  ;;  %v16877_v38 = vld [vmem:[#allocation77_spill] sm:$0xff]  ;;  %v16880_v42 = vld [vmem:[#allocation44_spill] sm:$0xff]  ;;  %v16881_v31 = vld [vmem:[#allocation43_spill] sm:$0xff] }
 0x2df   : > { %16854 = vst [vmem:[#allocation53_spill] sm:$0xff] %v14107_v43  ;;  %v16878_v43 = vld [vmem:[#allocation78_spill] sm:$0xff]  ;;  %v14189_v17 = vmul.f32 %v14070_v26, %v16880_v42  ;;  %v14193_v2 = vmul.f32 %v14070_v26, %v16881_v31  ;;  %v16888_v15 = vld [vmem:[#allocation83_spill] sm:$0xff] }
 0x2e0   : > { %v14131_v63 = vpop.f32.mrf.mxu0  ;;  %v14183_v21 = vadd.f32 %v16878_v43, %v3073_v1  ;;  %v16883_v30 = vld [vmem:[#allocation74_spill] sm:$0xff]  ;;  %v3081_v31 = vadd.f32 %v16888_v15, %v2687_v33  ;;  %v3855_v15 = vadd.f32 %v13935_v54, %v3460_v23  ;;  %v14230_v33 = vpop.f32.mrf.mxu1  ;;  %v16905_v23 = vld [vmem:[#allocation81_spill] sm:$0xff] }
 0x2e1   : > { %16862 = vst [vmem:[#allocation54_spill] sm:$0xff] %v14131_v63  ;;  %v3077_v63 = vadd.f32 %v16877_v38, %v2683_v19  ;;  %16882 = vst [vmem:[#allocation55_spill] sm:$0xff] %v14193_v2  ;;  %v14197_v16 = vadd.f32 %v13854_v48, %v16883_v30  ;;  %v16884_v19 = vld [vmem:[#allocation80_spill] sm:$0xff]  ;;  %v16885_v43 = vld [vmem:[#allocation46_spill] sm:$0xff] }
 0x2e2   : > { %v14157_v62 = vpop.f32.mrf.mxu0  ;;  %v14201_v38 = vadd.f32 %v16884_v19, %v3075_v53  ;;  %v14205_v1 = vmul.f32 %v14070_v26, %v16885_v43  ;;  %v16887_v42 = vld [vmem:[#allocation82_spill] sm:$0xff]  ;;  %v16890_v2 = vld [vmem:[#allocation45_spill] sm:$0xff]  ;;  %v16894_v53 = vld [vmem:[#allocation84_spill] sm:$0xff] }
 0x2e3   : > { %16871 = vst [vmem:[#allocation56_spill] sm:$0xff] %v14157_v62  ;;  %v14179_v62 = vmul.f32 %v14070_v26, %v16876_v47  ;;  %v3079_v47 = vadd.f32 %v13856_v32, %v2685_v3  ;;  %v14216_v48 = vmul.f32 %v14070_v26, %v16890_v2  ;;  %v16892_v32 = vld [vmem:[#allocation48_spill] sm:$0xff]  ;;  %v14223_v30 = vadd.f32 %v16894_v53, %v3077_v63  ;;  %v16895_v19 = vld [vmem:[#allocation79_spill] sm:$0xff] }
 0x2e4   : > { %v14185_v49 = vpop.f32.mrf.mxu0  ;;  %v14220_v3 = vmul.f32 %v14070_v26, %v16892_v32  ;;  %v16898_v2 = vld [vmem:[#allocation87_spill] sm:$0xff]  ;;  %v16901_v63 = vld [vmem:[#allocation20_spill] sm:$0xff] }
 0x2e5   : > { %16879 = vst [vmem:[#allocation58_spill] sm:$0xff] %v14185_v49  ;;  %v16886_v49 = vld [vmem:[#allocation76_spill] sm:$0xff]  ;;  %16891 = vst [vmem:[#allocation59_spill] sm:$0xff] %v14216_v48  ;;  %v14244_v53 = vmul.f32 %v14070_v26, %v16901_v63  ;;  %v16909_v63 = vld [vmem:[#allocation91_spill] sm:$0xff] }
 0x2e6   : > { %v14209_v55 = vadd.f32 %v16887_v42, %v16886_v49  ;;  %v14212_v40 = vpop.f32.mrf.mxu0  ;;  %16893 = vst [vmem:[#allocation60_spill] sm:$0xff] %v14220_v3  ;;  %v14227_v49 = vadd.f32 %v13875_v22, %v16895_v19  ;;  %v16896_v42 = vld [vmem:[#allocation47_spill] sm:$0xff]  ;;  %v16899_v48 = vld [vmem:[#allocation88_spill] sm:$0xff]  ;;  %v16903_v22 = vld [vmem:[#allocation37_spill] sm:$0xff]  ;;  %v14252_v19 = vadd.f32 %v13884_v37, %v16905_v23  ;;  %v14269_v37 = vadd.f32 %v16909_v63, %v3081_v31  ;;  %v14286_v31 = vpop.f32.mrf.mxu1 }
 0x2e7   : > { %16889 = vst [vmem:[#allocation57_spill] sm:$0xff] %v14212_v40  ;;  %v14234_v43 = vmul.f32 %v14070_v26, %v16896_v42  ;;  %v3083_v40 = vadd.f32 %v16898_v2, %v2689_v20  ;;  %v14238_v32 = vadd.f32 %v16899_v48, %v3079_v47  ;;  %16902 = vst [vmem:[#allocation62_spill] sm:$0xff] %v14244_v53  ;;  %v16906_v47 = vld [vmem:[#allocation22_spill] sm:$0xff] }
 0x2e8   : > { %v14240_v3 = vpop.f32.mrf.mxu0  ;;  %v14248_v54 = vmul.f32 %v14070_v26, %v16903_v22  ;;  %v3854_v42 = vadd.f32 %v13939_v52, %v3459_v41  ;;  %v4249_v20 = vadd.f32 %v13953_v58, %v3855_v15  ;;  %v14264_v2 = vmul.f32 %v14070_v26, %v16906_v47  ;;  %v16908_v48 = vld [vmem:[#allocation90_spill] sm:$0xff]  ;;  %v14278_v41 = vld [vmem:[%s16460_s3] ss:$0 sm:$0xff]  ;;  %v16912_v15 = vld [vmem:[#allocation21_spill] sm:$0xff] }
 0x2e9   : > { %16897 = vst [vmem:[#allocation61_spill] sm:$0xff] %v14234_v43  ;;  %16900 = vst [vmem:[#allocation63_spill] sm:$0xff] %v14240_v3  ;;  %v3085_v22 = vadd.f32 %v16908_v48, %v14079_v18  ;;  %v16910_v23 = vld [vmem:[#allocation86_spill] sm:$0xff]  ;;  %v14282_v47 = vmul.f32 %v14070_v26, %v16912_v15  ;;  %v3857_v3 = vadd.f32 %v13943_v46, %v3462_v61  ;;  %v16921_v15 = vld [vmem:[#allocation96_spill] sm:$0xff] }
 0x2ea   : > { %16904 = vst [vmem:[#allocation66_spill] sm:$0xff] %v14248_v54  ;;  %16907 = vst [vmem:[#allocation67_spill] sm:$0xff] %v14264_v2  ;;  %v14273_v52 = vadd.f32 %v13893_v57, %v16910_v23  ;;  %v10643_v58 = vpop.f32.mrf.mxu0  ;;  %v16914_v18 = vld [vmem:[#allocation118_spill] sm:$0xff]  ;;  %v16915_v2 = vld [vmem:[#allocation24_spill] sm:$0xff] }
 0x2eb   : > { %16913 = vst [vmem:[#allocation69_spill] sm:$0xff] %v14282_v47  ;;  %v4248_v48 = vadd.f32 %v16914_v18, %v3854_v42  ;;  %v4643_v63 = vadd.f32 %v10643_v58, %v4249_v20  ;;  %v14290_v57 = vmul.f32 %v14070_v26, %v16915_v2  ;;  %v16917_v23 = vld [vmem:[#allocation93_spill] sm:$0xff]  ;;  %v16918_v53 = vld [vmem:[#allocation94_spill] sm:$0xff]  ;;  %v14302_v46 = vld [vmem:[%s14260_s23] ss:$0 sm:$0xff] }
 0x2ec   : > { %16911 = vst [vmem:[#allocation64_spill] sm:$0xff] %v14273_v52  ;;  %v3087_v54 = vadd.f32 %v16917_v23, %v14082_v11  ;;  %v14295_v43 = vadd.f32 %v16918_v53, %v3083_v40  ;;  %v16920_v52 = vld [vmem:[#allocation89_spill] sm:$0xff]  ;;  %v4483_v61 = vpop.f32.mrf.mxu0  ;;  %v16923_v42 = vld [vmem:[#allocation23_spill] sm:$0xff]  ;;  %v16925_v58 = vld [vmem:[#allocation114_spill] sm:$0xff] }
 0x2ed   : > { %16916 = vst [vmem:[#allocation65_spill] sm:$0xff] %v14290_v57  ;;  %v14299_v47 = vadd.f32 %v16921_v15, %v16920_v52  ;;  %v14306_v20 = vmul.f32 %v14070_v26, %v16923_v42  ;;  %v3856_v18 = vadd.f32 %v16925_v58, %v14129_v0  ;;  %v16926_v2 = vld [vmem:[#allocation120_spill] sm:$0xff]  ;;  %v4682_v11 = vadd.f32 %v14278_v41, %v4643_v63  ;;  %v16927_v53 = vld [vmem:[#allocation97_spill] sm:$0xff]  ;;  %v16928_v52 = vld [vmem:[#allocation98_spill] sm:$0xff]  ;;  %v14328_v63 = vpop.f32.mrf.mxu1 }
 0x2ee   : > { %16919 = vst [vmem:[#allocation71_spill] sm:$0xff] %v14295_v43  ;;  %v4251_v57 = vadd.f32 %v16926_v2, %v3857_v3  ;;  %v4642_v40 = vadd.f32 %v4483_v61, %v4248_v48  ;;  %v14314_v23 = vadd.f32 %v16927_v53, %v14085_v50  ;;  %v14317_v15 = vadd.f32 %v16928_v52, %v3085_v22  ;;  %v16930_v43 = vld [vmem:[#allocation26_spill] sm:$0xff]  ;;  %v16935_v22 = vld [vmem:[#allocation92_spill] sm:$0xff] }
 0x2ef   : > { %16922 = vst [vmem:[#allocation72_spill] sm:$0xff] %v14299_v47  ;;  %16924 = vst [vmem:[#allocation73_spill] sm:$0xff] %v14306_v20  ;;  %v10646_v47 = vpop.f32.mrf.mxu0  ;;  %v14321_v42 = vmul.f32 %v14070_v26, %v16930_v43  ;;  %v16932_v20 = vld [vmem:[#allocation25_spill] sm:$0xff]  ;;  %v16934_v3 = vld [vmem:[#allocation122_spill] sm:$0xff]  ;;  %v4720_v48 = vmul.f32 %v14302_v46, %v4682_v11 }
 0x2f0   : > { %16929 = vst [vmem:[#allocation68_spill] sm:$0xff] %v14317_v15  ;;  %v14325_v0 = vmul.f32 %v14070_v26, %v16932_v20  ;;  %v4250_v2 = vadd.f32 %v16934_v3, %v3856_v18  ;;  %v4681_v50 = vadd.f32 %v14278_v41, %v4642_v40  ;;  %v4645_v61 = vadd.f32 %v10646_v47, %v4251_v57  ;;  %v16936_v58 = vld [vmem:[#allocation100_spill] sm:$0xff]  ;;  %v16940_v15 = vld [vmem:[#allocation27_spill] sm:$0xff]  ;;  %v16943_v3 = vld [vmem:[#allocation101_spill] sm:$0xff] }
 0x2f1   : > { %16931 = vst [vmem:[#allocation75_spill] sm:$0xff] %v14321_v42  ;;  %v14334_v53 = vadd.f32 %v16936_v58, %v16935_v22  ;;  %v16938_v52 = vld [vmem:[#allocation116_spill] sm:$0xff]  ;;  %v16939_v42 = vld [vmem:[#allocation117_spill] sm:$0xff]  ;;  %v14342_v18 = vmul.f32 %v14070_v26, %v16940_v15  ;;  %v14345_v11 = vadd.f32 %v14099_v4, %v4720_v48  ;;  %v14351_v22 = vadd.f32 %v16943_v3, %v14091_v56 }
 0x2f2   : > { %16933 = vst [vmem:[#allocation70_spill] sm:$0xff] %v14325_v0  ;;  %v3859_v43 = vadd.f32 %v16938_v52, %v14139_v8  ;;  %v3858_v20 = vadd.f32 %v16939_v42, %v14151_v35  ;;  %v4493_v0 = vpop.f32.mrf.mxu0  ;;  %v4719_v47 = vmul.f32 %v14302_v46, %v4681_v50  ;;  %v4684_v57 = vadd.f32 %v14278_v41, %v4645_v61  ;;  %v16944_v8 = vld [vmem:[#allocation119_spill] sm:$0xff]  ;;  %v16945_v42 = vld [vmem:[#allocation124_spill] sm:$0xff]  ;;  %v16950_v61 = vld [vmem:[#allocation129_spill] sm:$0xff] }
 0x2f3   : > { %16937 = vst [vmem:[#allocation77_spill] sm:$0xff] %v14334_v53  ;;  %16941 = vst [vmem:[#allocation78_spill] sm:$0xff] %v14342_v18  ;;  %v4644_v40 = vadd.f32 %v4493_v0, %v4250_v2  ;;  %v3861_v35 = vadd.f32 %v16944_v8, %v14155_v39  ;;  %v16946_v52 = vld [vmem:[#allocation127_spill] sm:$0xff]  ;;  %v14357_v53 = vpop.f32.mrf.mxu1  ;;  %v16586_v4 = vmax.f32 %v14345_v11, 0.0  ;;  %v16948_v2 = vld [vmem:[#allocation102_spill] sm:$0xff] }
 0x2f4   : > { %16942 = vst [vmem:[#allocation74_spill] sm:$0xff] %v14345_v11  ;;  %v4253_v58 = vadd.f32 %v16945_v42, %v3859_v43  ;;  %v4252_v15 = vadd.f32 %v16946_v52, %v3858_v20  ;;  %v10649_v18 = vpop.f32.mrf.mxu0  ;;  %v14361_v48 = vadd.f32 %v14111_v7, %v4719_v47  ;;  %v4722_v0 = vmul.f32 %v14302_v46, %v4684_v57  ;;  %v16949_v39 = vld [vmem:[#allocation121_spill] sm:$0xff] }
 0x2f5   : > { %v4683_v56 = vadd.f32 %v14278_v41, %v4644_v40  ;;  %v14366_v50 = vadd.f32 %v16948_v2, %v3087_v54  ;;  %v3860_v43 = vadd.f32 %v16949_v39, %v14169_v51  ;;  %v4255_v20 = vadd.f32 %v16950_v61, %v3861_v35  ;;  %4854 = vst.msk [vmem:[#allocation2 + $0x30] sm:$0xff] %vm485_vm0, %v16586_v4  ;;  %v16951_v54 = vld [vmem:[#allocation123_spill] sm:$0xff]  ;;  %v14385_v2 = vpop.f32.mrf.mxu1  ;;  %v6905_v11 = vld [vmem:[#allocation9 + $0x170] sm:$0xff] }
 0x2f6   : > { %16947 = vst [vmem:[#allocation80_spill] sm:$0xff] %v14361_v48  ;;  %v4647_v3 = vadd.f32 %v10649_v18, %v4253_v58  ;;  %v4503_v8 = vpop.f32.mrf.mxu0  ;;  %v16576_v7 = vmax.f32 %v14361_v48, 0.0  ;;  %v4792_v47 = vadd.f32 %v14119_v45, %v4722_v0  ;;  %v3863_v42 = vadd.f32 %v16951_v54, %v14173_v13  ;;  %v16952_v58 = vld [vmem:[#allocation28_spill] sm:$0xff]  ;;  %v16954_v0 = vld [vmem:[#allocation95_spill] sm:$0xff] }
 0x2f7   : > { %v4721_v57 = vmul.f32 %v14302_v46, %v4683_v56  ;;  %v4646_v40 = vadd.f32 %v4503_v8, %v4252_v15  ;;  %v4254_v51 = vadd.f32 %v13986_v34, %v3860_v43  ;;  %v14383_v52 = vmul.f32 %v14070_v26, %v16952_v58  ;;  %v16955_v56 = vld [vmem:[#allocation104_spill] sm:$0xff]  ;;  %v16956_v8 = vld [vmem:[#allocation39_spill] sm:$0xff] }
 0x2f8   : > { %v4686_v35 = vadd.f32 %v14278_v41, %v4647_v3  ;;  %v10652_v18 = vpop.f32.mrf.mxu0  ;;  %4853 = vst.msk [vmem:[#allocation2 + $0x28] sm:$0xff] %vm485_vm0, %v16576_v7  ;;  %v14390_v45 = vmax.f32 %v4792_v47, 0.0  ;;  %v14396_v39 = vadd.f32 %v16955_v56, %v16954_v0  ;;  %v4257_v43 = vadd.f32 %v13992_v36, %v3863_v42  ;;  %v16959_v42 = vld [vmem:[#allocation125_spill] sm:$0xff]  ;;  %v14423_v7 = vpop.f32.mrf.mxu1  ;;  %v17017_v58 = vld [vmem:[#allocation51_spill] sm:$0xff] }
 0x2f9   : > { %v4791_v15 = vadd.f32 %v14123_v28, %v4721_v57  ;;  %v4685_v13 = vadd.f32 %v14278_v41, %v4646_v40  ;;  %v4649_v34 = vadd.f32 %v10652_v18, %v4255_v20  ;;  %v14402_v54 = vmul.f32 %v14070_v26, %v16956_v8  ;;  %v16958_v57 = vld [vmem:[#allocation105_spill] sm:$0xff]  ;;  %v16960_v18 = vld [vmem:[#allocation128_spill] sm:$0xff]  ;;  %v17011_v8 = vld [vmem:[#allocation143_spill] sm:$0xff] }
 0x2fa   : > { %16953 = vst [vmem:[#allocation76_spill] sm:$0xff] %v14390_v45  ;;  %v4724_v61 = vmul.f32 %v14302_v46, %v4686_v35  ;;  %v4513_v3 = vpop.f32.mrf.mxu0  ;;  %4856 = vst.msk [vmem:[#allocation2 + $0x50] sm:$0xff] %vm485_vm0, %v14390_v45  ;;  %v14414_v40 = vadd.f32 %v16958_v57, %v14094_v6  ;;  %v3862_v35 = vadd.f32 %v16959_v42, %v14183_v21 }
 0x2fb   : > { %4886 = vst.msk [vmem:[#allocation2 + $0x10] sm:$0xff] %vm485_vm0, %v14390_v45  ;;  %v14408_v28 = vmax.f32 %v4791_v15, 0.0  ;;  %v4723_v20 = vmul.f32 %v14302_v46, %v4685_v13  ;;  %v4688_v47 = vadd.f32 %v14278_v41, %v4649_v34  ;;  %v4648_v36 = vadd.f32 %v4513_v3, %v4254_v51 }
 0x2fc   : > { %v3865_v0 = vadd.f32 %v16960_v18, %v14197_v16  ;;  %v14421_v56 = vadd.f32 %v14135_v25, %v4724_v61  ;;  %v10655_v15 = vpop.f32.mrf.mxu0  ;;  %v16963_v25 = vld [vmem:[#allocation130_spill] sm:$0xff]  ;;  %v4256_v34 = vadd.f32 %v13998_v5, %v3862_v35  ;;  %v4926_v42 = vld [vmem:[#allocation2 + $0x36] sm:$0x1] }
 0x2fd   : > { %16957 = vst [vmem:[#allocation82_spill] sm:$0xff] %v14408_v28  ;;  %4855 = vst.msk [vmem:[#allocation2 + $0x48] sm:$0xff] %vm485_vm0, %v14408_v28  ;;  %v14430_v6 = vadd.f32 %v14144_v60, %v4723_v20  ;;  %v4726_v21 = vmul.f32 %v14302_v46, %v4688_v47  ;;  %v4687_v51 = vadd.f32 %v14278_v41, %v4648_v36  ;;  %v16967_v36 = vld [vmem:[#allocation140_spill] sm:$0xff] }
 0x2fe   : > { %16961 = vst [vmem:[#allocation83_spill] sm:$0xff] %v14421_v56  ;;  %4885 = vst.msk [vmem:[#allocation2 + $0x8] sm:$0xff] %vm485_vm0, %v14408_v28  ;;  %v4651_v16 = vadd.f32 %v10655_v15, %v4257_v43  ;;  %v3864_v13 = vadd.f32 %v16963_v25, %v14201_v38  ;;  %v4259_v61 = vadd.f32 %v14004_v24, %v3865_v0  ;;  %v16579_v3 = vmax.f32 %v14421_v56, 0.0  ;;  %v4523_v57 = vpop.f32.mrf.mxu0  ;;  %v16965_v38 = vld [vmem:[#allocation106_spill] sm:$0xff]  ;;  %v16966_v24 = vld [vmem:[#allocation131_spill] sm:$0xff] }
 0x2ff   : > { %16962 = vst [vmem:[#allocation84_spill] sm:$0xff] %v14430_v6  ;;  %v16578_v18 = vmax.f32 %v14430_v6, 0.0  ;;  %v14441_v60 = vadd.f32 %v14148_v14, %v4726_v21  ;;  %v4725_v20 = vmul.f32 %v14302_v46, %v4687_v51  ;;  %4944 = vst.msk [vmem:[#allocation2 + $0x38] sm:$0x1] %vm1137_vm3, %v4926_v42  ;;  %v14448_v5 = vadd.f32 %v16965_v38, %v14314_v23  ;;  %v4890_v15 = vld [vmem:[#allocation2 + $0x29] sm:$0x1]  ;;  %v14456_v21 = vpop.f32.mrf.mxu1 }
 0x300   : > { %v4690_v43 = vadd.f32 %v14278_v41, %v4651_v16  ;;  %v3867_v47 = vadd.f32 %v16966_v24, %v14209_v55  ;;  %v4258_v35 = vadd.f32 %v16967_v36, %v3864_v13  ;;  %4858 = vst.msk [vmem:[#allocation2 + $0x70] sm:$0xff] %vm485_vm0, %v16579_v3  ;;  %v4650_v14 = vadd.f32 %v4523_v57, %v4256_v34  ;;  %v10658_v0 = vpop.f32.mrf.mxu0  ;;  %v16969_v25 = vld [vmem:[#allocation132_spill] sm:$0xff]  ;;  %v16970_v38 = vld [vmem:[#allocation38_spill] sm:$0xff]  ;;  %v16974_v3 = vld [vmem:[#allocation19_spill] sm:$0xff] }
 0x301   : > { %16964 = vst [vmem:[#allocation79_spill] sm:$0xff] %v14441_v60  ;;  %4857 = vst.msk [vmem:[#allocation2 + $0x68] sm:$0xff] %vm485_vm0, %v16578_v18  ;;  %v16577_v23 = vmax.f32 %v14441_v60, 0.0  ;;  %v14463_v51 = vadd.f32 %v14161_v59, %v4725_v20  ;;  %v4653_v16 = vadd.f32 %v10658_v0, %v4259_v61  ;;  %v3866_v13 = vadd.f32 %v16969_v25, %v14223_v30  ;;  %v4927_v20 = vld [vmem:[#allocation2 + $0x56] sm:$0x1] }
 0x302   : > { %v4728_v55 = vmul.f32 %v14302_v46, %v4690_v43  ;;  %4908 = vst.msk [vmem:[#allocation2 + $0x27] sm:$0x1] %vm1137_vm3, %v4890_v15  ;;  %v4261_v34 = vadd.f32 %v14038_v10, %v3867_v47  ;;  %v4689_v57 = vadd.f32 %v14278_v41, %v4650_v14  ;;  %v4533_v42 = vpop.f32.mrf.mxu0  ;;  %v14473_v24 = vmul.f32 %v14070_v26, %v16970_v38  ;;  %v4925_v36 = vld [vmem:[#allocation2 + $0x16] sm:$0x1]  ;;  %v16972_v43 = vld [vmem:[#allocation99_spill] sm:$0xff]  ;;  %v16973_v47 = vld [vmem:[#allocation108_spill] sm:$0xff] }
 0x303   : > { %16968 = vst [vmem:[#allocation87_spill] sm:$0xff] %v14463_v51  ;;  %4860 = vst.msk [vmem:[#allocation2 + $0x90] sm:$0xff] %vm485_vm0, %v16577_v23  ;;  %v16580_v59 = vmax.f32 %v14463_v51, 0.0  ;;  %v4692_v30 = vadd.f32 %v14278_v41, %v4653_v16  ;;  %v4652_v10 = vadd.f32 %v4533_v42, %v4258_v35  ;;  %v14486_v14 = vadd.f32 %v16973_v47, %v16972_v43  ;;  %v14495_v35 = vpop.f32.mrf.mxu1  ;;  %v16976_v43 = vld [vmem:[#allocation133_spill] sm:$0xff] }
 0x304   : > { %v14480_v61 = vadd.f32 %v14165_v9, %v4728_v55  ;;  %4943 = vst.msk [vmem:[#allocation2 + $0x18] sm:$0x1] %vm1137_vm3, %v4925_v36  ;;  %v4260_v0 = vadd.f32 %v14076_v12, %v3866_v13  ;;  %v4727_v15 = vmul.f32 %v14302_v46, %v4689_v57  ;;  %v10661_v25 = vpop.f32.mrf.mxu0  ;;  %v14492_v9 = vmul.f32 %v14070_v26, %v16974_v3  ;;  %v5002_v57 = vld [vmem:[#allocation2 + $0x10] sm:$0xff]  ;;  %v4891_v42 = vld [vmem:[#allocation2 + $0x49] sm:$0x1] }
 0x305   : > { %v5001_v23 = vld [vmem:[#allocation2 + $0x8] sm:$0xff]  ;;  %4945 = vst.msk [vmem:[#allocation2 + $0x58] sm:$0x1] %vm1137_vm3, %v4927_v20  ;;  %v4730_v12 = vmul.f32 %v14302_v46, %v4692_v30  ;;  %v4691_v16 = vadd.f32 %v14278_v41, %v4652_v10  ;;  %v4655_v13 = vadd.f32 %v10661_v25, %v4261_v34  ;;  %v5723_v26 = vld [vmem:[#allocation9 + $0xb0] sm:$0xff]  ;;  %v3869_v47 = vadd.f32 %v16976_v43, %v14227_v49  ;;  %v16981_v25 = vld [vmem:[#allocation135_spill] sm:$0xff] }
 0x306   : > { %16971 = vst [vmem:[#allocation88_spill] sm:$0xff] %v14480_v61  ;;  %v4889_v18 = vld [vmem:[#allocation2 + $0x9] sm:$0x1]  ;;  %4859 = vst.msk [vmem:[#allocation2 + $0x88] sm:$0xff] %vm485_vm0, %v16580_v59  ;;  %v16585_v55 = vmax.f32 %v14480_v61, 0.0  ;;  %10705 = vmatprep.mubr.msk.f32.mxu1 %vm485_vm0, %v5001_v23  ;;  %v16975_v36 = vld [vmem:[#allocation109_spill] sm:$0xff]  ;;  %v14514_v10 = vadd.f32 %v14179_v62, %v4727_v15  ;;  %v4543_v34 = vpop.f32.mrf.mxu0 }
 0x307   : > { %4907 = vst.msk [vmem:[#allocation2 + $0x7] sm:$0x1] %vm1137_vm3, %v4889_v18  ;;  %v14507_v20 = vadd.f32 %v16975_v36, %v14102_v29  ;;  %v16977_v59 = vld [vmem:[#allocation134_spill] sm:$0xff]  ;;  %10706 = vmatmul.mubr.msk.f32.vlgmr.msra.gmra.mxu1 %vm485_vm0, %v5002_v57  ;;  %4909 = vst.msk [vmem:[#allocation2 + $0x47] sm:$0x1] %vm1137_vm3, %v4891_v42  ;;  %v14522_v29 = vadd.f32 %v14189_v17, %v4730_v12  ;;  %v4729_v49 = vmul.f32 %v14302_v46, %v4691_v16  ;;  %v16980_v23 = vld [vmem:[#allocation85_spill] sm:$0xff] }
 0x308   : > { %v3868_v30 = vadd.f32 %v16977_v59, %v14238_v32  ;;  %16978 = vst [vmem:[#allocation81_spill] sm:$0xff] %v14514_v10  ;;  %4862 = vst.msk [vmem:[#allocation2 + $0xb0] sm:$0xff] %vm485_vm0, %v16585_v55  ;;  %v4694_v18 = vadd.f32 %v14278_v41, %v4655_v13  ;;  %v4654_v32 = vadd.f32 %v4543_v34, %v4260_v0  ;;  %10818 = vmatpush3.msra.mxu1 %v16980_v23  ;;  %v5003_v62 = vld [vmem:[#allocation2 + $0x28] sm:$0xff]  ;;  %v4928_v15 = vld [vmem:[#allocation2 + $0x76] sm:$0x1]  ;;  %v10664_v12 = vpop.f32.mrf.mxu0  ;;  %v14534_v0 = vpop.f32.mrf.mxu1 }
 0x309   : > { %16979 = vst [vmem:[#allocation90_spill] sm:$0xff] %v14522_v29  ;;  %v5722_v59 = vld [vmem:[#allocation9 + $0xa8] sm:$0xff]  ;;  %v3871_v57 = vadd.f32 %v16981_v25, %v14252_v19  ;;  %v4263_v42 = vadd.f32 %v14115_v27, %v3869_v47  ;;  %v16584_v17 = vmax.f32 %v14514_v10, 0.0  ;;  %10708 = vmatprep.mubr.msk.f32.mxu1 %vm485_vm0, %v5003_v62  ;;  %10819 = vmatprep.subr.mxu1 %v5723_v26  ;;  %4946 = vst.msk [vmem:[#allocation2 + $0x78] sm:$0x1] %vm1137_vm3, %v4928_v15  ;;  %v16982_v43 = vld [vmem:[#allocation55_spill] sm:$0xff] }
 0x30a   : > { %v4262_v36 = vadd.f32 %v14175_v44, %v3868_v30  ;;  %v4892_v16 = vld [vmem:[#allocation2 + $0x69] sm:$0x1]  ;;  %v16583_v13 = vmax.f32 %v14522_v29, 0.0  ;;  %v14538_v34 = vadd.f32 %v16982_v43, %v4729_v49  ;;  %v4732_v27 = vmul.f32 %v14302_v46, %v4694_v18  ;;  %v5004_v19 = vld [vmem:[#allocation2 + $0x30] sm:$0xff]  ;;  %10820 = vmatpush3.msra.mxu1 %v5723_v26  ;;  %v5721_v47 = vld [vmem:[#allocation9 + $0xa0] sm:$0xff]  ;;  %v4553_v15 = vpop.f32.mrf.mxu0 }
 0x30b   : > { %v4693_v44 = vadd.f32 %v14278_v41, %v4654_v32  ;;  %4910 = vst.msk [vmem:[#allocation2 + $0x67] sm:$0x1] %vm1137_vm3, %v4892_v16  ;;  %v16984_v30 = vld [vmem:[#allocation136_spill] sm:$0xff]  ;;  %v4265_v62 = vadd.f32 %v14230_v33, %v3871_v57  ;;  %v4657_v49 = vadd.f32 %v10664_v12, %v4263_v42  ;;  %10709 = vmatmul.mubr.msk.f32.gmra.mxu1 %vm485_vm0, %v5004_v19  ;;  %v4929_v32 = vld [vmem:[#allocation2 + $0x96] sm:$0x1]  ;;  %v16986_v57 = vld [vmem:[#allocation110_spill] sm:$0xff] }
 0x30c   : > { %16983 = vst [vmem:[#allocation91_spill] sm:$0xff] %v14538_v34  ;;  %v3870_v23 = vadd.f32 %v16984_v30, %v14269_v37  ;;  %4861 = vst.msk [vmem:[#allocation2 + $0xa8] sm:$0xff] %vm485_vm0, %v16584_v17  ;;  %v5005_v18 = vld [vmem:[#allocation2 + $0x48] sm:$0xff]  ;;  %10821 = vmatprep.subr.mxu1 %v5722_v59  ;;  %v16581_v26 = vmax.f32 %v14538_v34, 0.0  ;;  %v14555_v37 = vadd.f32 %v14205_v1, %v4732_v27  ;;  %v16988_v16 = vld [vmem:[#allocation137_spill] sm:$0xff]  ;;  %v10667_v27 = vpop.f32.mrf.mxu0 }
 0x30d   : > { %4864 = vst.msk [vmem:[#allocation2 + $0xd0] sm:$0xff] %vm485_vm0, %v16583_v13  ;;  %v4731_v33 = vmul.f32 %v14302_v46, %v4693_v44  ;;  %v4656_v25 = vadd.f32 %v4553_v15, %v4262_v36  ;;  %10711 = vmatprep.mubr.msk.f32.mxu1 %vm485_vm0, %v5005_v18  ;;  %10822 = vmatpush3.msra.mxu1 %v5722_v59  ;;  %v16987_v12 = vld [vmem:[#allocation64_spill] sm:$0xff]  ;;  %v14568_v36 = vpop.f32.mrf.mxu1  ;;  %v16989_v59 = vld [vmem:[#allocation59_spill] sm:$0xff]  ;;  %v17003_v55 = vld [vmem:[#allocation141_spill] sm:$0xff] }
 0x30e   : > { %16985 = vst [vmem:[#allocation86_spill] sm:$0xff] %v14555_v37  ;;  %4947 = vst.msk [vmem:[#allocation2 + $0x98] sm:$0x1] %vm1137_vm3, %v4929_v32  ;;  %v14562_v42 = vadd.f32 %v16986_v57, %v14351_v22  ;;  %v3873_v43 = vadd.f32 %v16988_v16, %v16987_v12  ;;  %v4264_v19 = vadd.f32 %v14286_v31, %v3870_v23  ;;  %v4961_v30 = vld [vmem:[#allocation2 + $0x7] sm:$0xff]  ;;  %10823 = vmatprep.subr.mxu1 %v5721_v47  ;;  %v5006_v23 = vld [vmem:[#allocation2 + $0x50] sm:$0xff] }
 0x30f   : > { %v4696_v1 = vadd.f32 %v14278_v41, %v4657_v49  ;;  %v4893_v44 = vld [vmem:[#allocation2 + $0x89] sm:$0x1]  ;;  %4863 = vst.msk [vmem:[#allocation2 + $0xc8] sm:$0xff] %vm485_vm0, %v16581_v26  ;;  %v16582_v22 = vmax.f32 %v14555_v37, 0.0  ;;  %v14575_v15 = vadd.f32 %v16989_v59, %v4731_v33  ;;  %v4695_v18 = vadd.f32 %v14278_v41, %v4656_v25  ;;  %10769 = vmatprep.mubr.msk.f32.mxu0 %vm485_vm0, %v4961_v30  ;;  %v4962_v49 = vld [vmem:[#allocation2 + $0xf] sm:$0xff]  ;;  %v5720_v32 = vld [vmem:[#allocation9 + $0x98] sm:$0xff]  ;;  %v4563_v59 = vpop.f32.mrf.mxu0 }
 0x310   : > { %v4659_v31 = vadd.f32 %v10667_v27, %v4265_v62  ;;  %4911 = vst.msk [vmem:[#allocation2 + $0x87] sm:$0x1] %vm1137_vm3, %v4893_v44  ;;  %10824 = vmatpush3.msra.mxu1 %v5721_v47  ;;  %v16991_v57 = vld [vmem:[#allocation103_spill] sm:$0xff]  ;;  %v4267_v26 = vadd.f32 %v14328_v63, %v3873_v43  ;;  %10770 = vmatmul.mubr.msk.f32.vlgmr.msra.gmra.mxu0 %vm485_vm0, %v4962_v49  ;;  %v5007_v62 = vld [vmem:[#allocation2 + $0x68] sm:$0xff]  ;;  %v4930_v27 = vld [vmem:[#allocation2 + $0xb6] sm:$0x1] }
 0x311   : > { %16990 = vst [vmem:[#allocation118_spill] sm:$0xff] %v14575_v15  ;;  %v16992_v12 = vld [vmem:[#allocation111_spill] sm:$0xff]  ;;  %v4734_v33 = vmul.f32 %v14302_v46, %v4696_v1  ;;  %10712 = vmatmul.mubr.msk.f32.gmra.mxu1 %vm485_vm0, %v5006_v23  ;;  %4866 = vst.msk [vmem:[#allocation2 + $0xf0] sm:$0xff] %vm485_vm0, %v16582_v22  ;;  %v16587_v47 = vmax.f32 %v14575_v15, 0.0  ;;  %v4733_v30 = vmul.f32 %v14302_v46, %v4695_v18  ;;  %v16994_v44 = vld [vmem:[#allocation138_spill] sm:$0xff]  ;;  %v10670_v18 = vpop.f32.mrf.mxu0  ;;  %10825 = vmatprep.subr.mxu1 %v5720_v32 }
 0x312   : > { %v14582_v16 = vadd.f32 %v16992_v12, %v16991_v57  ;;  %v14588_v25 = vld [vmem:[#allocation2 + $0x27] sm:$0xff]  ;;  %v4698_v63 = vadd.f32 %v14278_v41, %v4659_v31  ;;  %v4658_v43 = vadd.f32 %v4563_v59, %v4264_v19  ;;  %10714 = vmatprep.mubr.msk.f32.mxu1 %vm485_vm0, %v5007_v62  ;;  %4948 = vst.msk [vmem:[#allocation2 + $0xb8] sm:$0x1] %vm1137_vm3, %v4930_v27  ;;  %v5719_v31 = vld [vmem:[#allocation9 + $0x90] sm:$0xff]  ;;  %v16999_v19 = vld [vmem:[#allocation126_spill] sm:$0xff]  ;;  %v14608_v62 = vpop.f32.mrf.mxu1 }
 0x313   : > { %10772 = vmatprep.mubr.msk.f32.mxu0 %vm485_vm0, %v14588_v25  ;;  %v16993_v1 = vld [vmem:[#allocation71_spill] sm:$0xff]  ;;  %v16995_v49 = vld [vmem:[#allocation72_spill] sm:$0xff]  ;;  %10882 = vmatpush3.msra.mxu0 %v16999_v19  ;;  %v6117_v59 = vld [vmem:[#allocation9 + $0xf0] sm:$0xff]  ;;  %4865 = vst.msk [vmem:[#allocation2 + $0xe8] sm:$0xff] %vm485_vm0, %v16587_v47 }
 0x314   : > { %v3872_v23 = vadd.f32 %v16994_v44, %v16993_v1  ;;  %v16996_v57 = vld [vmem:[#allocation139_spill] sm:$0xff]  ;;  %v16997_v22 = vld [vmem:[#allocation60_spill] sm:$0xff]  ;;  %v17000_v27 = vld [vmem:[#allocation61_spill] sm:$0xff]  ;;  %v4736_v44 = vmul.f32 %v14302_v46, %v4698_v63  ;;  %10826 = vmatpush3.msra.mxu1 %v5720_v32  ;;  %10883 = vmatprep.subr.mxu0 %v6117_v59 }
 0x315   : > { %v3875_v12 = vadd.f32 %v16996_v57, %v16995_v49  ;;  %v14605_v13 = vadd.f32 %v16997_v22, %v4734_v33  ;;  %v14614_v1 = vadd.f32 %v17000_v27, %v4733_v30  ;;  %v4697_v22 = vadd.f32 %v14278_v41, %v4658_v43  ;;  %v14618_v49 = vld [vmem:[#allocation2 + $0x70] sm:$0xff]  ;;  %v4894_v19 = vld [vmem:[#allocation2 + $0xa9] sm:$0x1]  ;;  %v4573_v27 = vpop.f32.mrf.mxu0  ;;  %10827 = vmatprep.subr.mxu1 %v5719_v31 }
 0x316   : > { %v4661_v33 = vadd.f32 %v10670_v18, %v4267_v26  ;;  %v14620_v57 = vld [vmem:[#allocation2 + $0x2f] sm:$0xff]  ;;  %v4266_v3 = vadd.f32 %v14357_v53, %v3872_v23  ;;  %10715 = vmatmul.mubr.msk.f32.gmra.mxu1 %vm485_vm0, %v14618_v49  ;;  %v14633_v63 = vld [vmem:[#allocation2 + $0x47] sm:$0xff]  ;;  %4912 = vst.msk [vmem:[#allocation2 + $0xa7] sm:$0x1] %vm1137_vm3, %v4894_v19  ;;  %v17004_v53 = vld [vmem:[#allocation62_spill] sm:$0xff]  ;;  %10884 = vmatpush3.msra.mxu0 %v6117_v59 }
 0x317   : > { %16998 = vst [vmem:[#allocation93_spill] sm:$0xff] %v14605_v13  ;;  %17001 = vst [vmem:[#allocation94_spill] sm:$0xff] %v14614_v1  ;;  %v17002_v17 = vld [vmem:[#allocation68_spill] sm:$0xff]  ;;  %v4269_v47 = vadd.f32 %v14385_v2, %v3875_v12  ;;  %v16588_v30 = vmax.f32 %v14605_v13, 0.0  ;;  %10773 = vmatmul.mubr.msk.f32.gmra.mxu0 %vm485_vm0, %v14620_v57  ;;  %v4735_v2 = vmul.f32 %v14302_v46, %v4697_v22  ;;  %v4931_v43 = vld [vmem:[#allocation2 + $0xd6] sm:$0x1]  ;;  %v10673_v22 = vpop.f32.mrf.mxu0  ;;  %10828 = vmatpush3.msra.mxu1 %v5719_v31 }
 0x318   : > { %v3874_v4 = vadd.f32 %v17003_v55, %v17002_v17  ;;  %v14631_v26 = vld [vmem:[#allocation2 + $0x88] sm:$0xff]  ;;  %v14638_v17 = vadd.f32 %v17004_v53, %v4736_v44  ;;  %v4700_v32 = vadd.f32 %v14278_v41, %v4661_v33  ;;  %10775 = vmatprep.mubr.msk.f32.mxu0 %vm485_vm0, %v14633_v63  ;;  %v17006_v23 = vld [vmem:[#allocation77_spill] sm:$0xff]  ;;  %v17007_v12 = vld [vmem:[#allocation142_spill] sm:$0xff]  ;;  %v4660_v44 = vadd.f32 %v4573_v27, %v4266_v3  ;;  %v14653_v55 = vpop.f32.mrf.mxu1 }
 0x319   : > { %10717 = vmatprep.mubr.msk.f32.mxu1 %vm485_vm0, %v14631_v26  ;;  %v3877_v18 = vadd.f32 %v17007_v12, %v17006_v23  ;;  %4868 = vst.msk [vmem:[#allocation2 + $0x110] sm:$0xff] %vm485_vm0, %v16588_v30  ;;  %v4895_v53 = vld [vmem:[#allocation2 + $0xc9] sm:$0x1]  ;;  %v17008_v38 = vmax.f32 %v14614_v1, 0.0  ;;  %v4663_v27 = vadd.f32 %v10673_v22, %v4269_v47  ;;  %v14663_v12 = vld [vmem:[#allocation2 + $0x90] sm:$0xff] }
 0x31a   : > { %17005 = vst [vmem:[#allocation89_spill] sm:$0xff] %v14638_v17  ;;  %v4268_v19 = vadd.f32 %v14423_v7, %v3874_v4  ;;  %v5718_v33 = vld [vmem:[#allocation9 + $0x88] sm:$0xff]  ;;  %4949 = vst.msk [vmem:[#allocation2 + $0xd8] sm:$0x1] %vm1137_vm3, %v4931_v43  ;;  %v17009_v7 = vld [vmem:[#allocation66_spill] sm:$0xff]  ;;  %v4738_v3 = vmul.f32 %v14302_v46, %v4700_v32  ;;  %10718 = vmatmul.mubr.msk.f32.gmra.mxu1 %vm485_vm0, %v14663_v12  ;;  %v17012_v59 = vmax.f32 %v14638_v17, 0.0 }
 0x31b   : > { %4867 = vst.msk [vmem:[#allocation2 + $0x108] sm:$0xff] %vm485_vm0, %v17008_v38  ;;  %v14660_v23 = vadd.f32 %v17009_v7, %v4735_v2  ;;  %v14665_v30 = vld [vmem:[#allocation2 + $0x4f] sm:$0xff]  ;;  %v3876_v38 = vadd.f32 %v17011_v8, %v14366_v50  ;;  %v4271_v4 = vadd.f32 %v14456_v21, %v3877_v18  ;;  %v4699_v2 = vadd.f32 %v14278_v41, %v4660_v44  ;;  %v4583_v7 = vpop.f32.mrf.mxu0  ;;  %v14678_v32 = vld [vmem:[#allocation2 + $0x67] sm:$0xff] }
 0x31c   : > { %4913 = vst.msk [vmem:[#allocation2 + $0xc7] sm:$0x1] %vm1137_vm3, %v4895_v53  ;;  %v6116_v43 = vld [vmem:[#allocation9 + $0xe8] sm:$0xff]  ;;  %10776 = vmatmul.mubr.msk.f32.gmra.mxu0 %vm485_vm0, %v14665_v30  ;;  %v4932_v31 = vld [vmem:[#allocation2 + $0xf6] sm:$0x1]  ;;  %v17013_v8 = vld [vmem:[#allocation67_spill] sm:$0xff]  ;;  %v4702_v18 = vadd.f32 %v14278_v41, %v4663_v27  ;;  %v4662_v44 = vadd.f32 %v4583_v7, %v4268_v19  ;;  %10829 = vmatprep.subr.mxu1 %v5718_v33  ;;  %v14699_v19 = vpop.f32.mrf.mxu1 }
 0x31d   : > { %17010 = vst [vmem:[#allocation96_spill] sm:$0xff] %v14660_v23  ;;  %v14676_v47 = vld [vmem:[#allocation2 + $0xa8] sm:$0xff]  ;;  %4870 = vst.msk [vmem:[#allocation2 + $0x130] sm:$0xff] %vm485_vm0, %v17012_v59  ;;  %v14685_v21 = vadd.f32 %v17013_v8, %v4738_v3  ;;  %10778 = vmatprep.mubr.msk.f32.mxu0 %vm485_vm0, %v14678_v32  ;;  %v4270_v59 = vadd.f32 %v14495_v35, %v3876_v38  ;;  %v4737_v3 = vmul.f32 %v14302_v46, %v4699_v2  ;;  %v10676_v8 = vpop.f32.mrf.mxu0  ;;  %v14707_v35 = vld [vmem:[#allocation2 + $0xb0] sm:$0xff] }
 0x31e   : > { %10720 = vmatprep.mubr.msk.f32.mxu1 %vm485_vm0, %v14676_v47  ;;  %4950 = vst.msk [vmem:[#allocation2 + $0xf8] sm:$0x1] %vm1137_vm3, %v4932_v31  ;;  %v17015_v22 = vld [vmem:[#allocation112_spill] sm:$0xff]  ;;  %10885 = vmatprep.subr.mxu0 %v6116_v43  ;;  %v17016_v27 = vmax.f32 %v14660_v23, 0.0  ;;  %v4740_v31 = vmul.f32 %v14302_v46, %v4702_v18  ;;  %v5717_v2 = vld [vmem:[#allocation9 + $0x80] sm:$0xff]  ;;  %v3879_v23 = vadd.f32 %v17017_v58, %v14396_v39  ;;  %v17019_v17 = vld [vmem:[#allocation69_spill] sm:$0xff] }
 0x31f   : > { %17014 = vst [vmem:[#allocation114_spill] sm:$0xff] %v14685_v21  ;;  %v14695_v53 = vadd.f32 %v17015_v22, %v14414_v40  ;;  %v4896_v50 = vld [vmem:[#allocation2 + $0xe9] sm:$0x1]  ;;  %v4701_v40 = vadd.f32 %v14278_v41, %v4662_v44  ;;  %v4665_v22 = vadd.f32 %v10676_v8, %v4271_v4  ;;  %v14709_v38 = vld [vmem:[#allocation2 + $0x6f] sm:$0xff]  ;;  %10830 = vmatpush3.msra.mxu1 %v5718_v33  ;;  %v4593_v44 = vpop.f32.mrf.mxu0  ;;  %v6115_v33 = vld [vmem:[#allocation9 + $0xe0] sm:$0xff] }
 0x320   : > { %4869 = vst.msk [vmem:[#allocation2 + $0x128] sm:$0xff] %vm485_vm0, %v17016_v27  ;;  %10886 = vmatpush3.msra.mxu0 %v6116_v43  ;;  %v17018_v27 = vld [vmem:[#allocation52_spill] sm:$0xff]  ;;  %v14717_v18 = vadd.f32 %v17019_v17, %v4737_v3  ;;  %10721 = vmatmul.mubr.msk.f32.gmra.mxu1 %vm485_vm0, %v14707_v35  ;;  %v17021_v43 = vmax.f32 %v14685_v21, 0.0  ;;  %v17022_v58 = vld [vmem:[#allocation65_spill] sm:$0xff]  ;;  %v4273_v21 = vadd.f32 %v14534_v0, %v3879_v23 }
 0x321   : > { %4914 = vst.msk [vmem:[#allocation2 + $0xe7] sm:$0x1] %vm1137_vm3, %v4896_v50  ;;  %v3878_v7 = vadd.f32 %v17018_v27, %v14448_v5  ;;  %10779 = vmatmul.mubr.msk.f32.gmra.mxu0 %vm485_vm0, %v14709_v38  ;;  %v14723_v4 = vld [vmem:[#allocation2 + $0xc8] sm:$0xff]  ;;  %v14729_v39 = vadd.f32 %v17022_v58, %v4740_v31  ;;  %v4739_v5 = vmul.f32 %v14302_v46, %v4701_v40  ;;  %v4933_v8 = vld [vmem:[#allocation2 + $0x116] sm:$0x1]  ;;  %v10679_v40 = vpop.f32.mrf.mxu0  ;;  %v17027_v31 = vld [vmem:[#allocation54_spill] sm:$0xff] }
 0x322   : > { %17020 = vst [vmem:[#allocation120_spill] sm:$0xff] %v14717_v18  ;;  %4872 = vst.msk [vmem:[#allocation2 + $0x150] sm:$0xff] %vm485_vm0, %v17021_v43  ;;  %v4704_v17 = vadd.f32 %v14278_v41, %v4665_v22  ;;  %v4664_v50 = vadd.f32 %v4593_v44, %v4270_v59  ;;  %10723 = vmatprep.mubr.msk.f32.mxu1 %vm485_vm0, %v14723_v4  ;;  %v14735_v3 = vld [vmem:[#allocation2 + $0x87] sm:$0xff]  ;;  %v17024_v27 = vld [vmem:[#allocation53_spill] sm:$0xff]  ;;  %10831 = vmatprep.subr.mxu1 %v5717_v2  ;;  %v14747_v44 = vpop.f32.mrf.mxu1 }
 0x323   : > { %17023 = vst [vmem:[#allocation97_spill] sm:$0xff] %v14729_v39  ;;  %v3881_v1 = vadd.f32 %v17024_v27, %v14486_v14  ;;  %v4272_v43 = vadd.f32 %v14568_v36, %v3878_v7  ;;  %10781 = vmatprep.mubr.msk.f32.mxu0 %vm485_vm0, %v14735_v3  ;;  %v4897_v59 = vld [vmem:[#allocation2 + $0x109] sm:$0x1]  ;;  %v14744_v22 = vld [vmem:[#allocation9 + $0x138] sm:$0xff]  ;;  %4951 = vst.msk [vmem:[#allocation2 + $0x118] sm:$0x1] %vm1137_vm3, %v4933_v8  ;;  %10832 = vmatpush3.msra.mxu1 %v5717_v2 }
 0x324   : > { %v17025_v58 = vld [vmem:[#allocation73_spill] sm:$0xff]  ;;  %v4742_v36 = vmul.f32 %v14302_v46, %v4704_v17  ;;  %v4703_v23 = vadd.f32 %v14278_v41, %v4664_v50  ;;  %4915 = vst.msk [vmem:[#allocation2 + $0x107] sm:$0x1] %vm1137_vm3, %v4897_v59  ;;  %10887 = vmatprep.subr.mxu0 %v6115_v33  ;;  %v6114_v8 = vld [vmem:[#allocation9 + $0xd8] sm:$0xff]  ;;  %v3880_v13 = vadd.f32 %v17027_v31, %v14562_v42  ;;  %v4603_v50 = vpop.f32.mrf.mxu0  ;;  %v14770_v2 = vld [vmem:[#allocation2 + $0xe8] sm:$0xff]  ;;  %v17029_v42 = vmax.f32 %v14729_v39, 0.0 }
 0x325   : > { %v14751_v0 = vadd.f32 %v17025_v58, %v4739_v5  ;;  %v14755_v7 = vld [vmem:[#allocation2 + $0xd0] sm:$0xff]  ;;  %v4275_v14 = vadd.f32 %v14608_v62, %v3881_v1  ;;  %v17028_v5 = vmax.f32 %v14717_v18, 0.0  ;;  %v4667_v17 = vadd.f32 %v10679_v40, %v4273_v21  ;;  %v14772_v59 = vld [vmem:[#allocation2 + $0xa7] sm:$0xff]  ;;  %10888 = vmatpush3.msra.mxu0 %v6115_v33  ;;  %10945 = vmatprep.subr.mxu1 %v14744_v22 }
 0x326   : > { %v14757_v27 = vld [vmem:[#allocation2 + $0x8f] sm:$0xff]  ;;  %10724 = vmatmul.mubr.msk.f32.gmra.mxu1 %vm485_vm0, %v14755_v7  ;;  %4874 = vst.msk [vmem:[#allocation2 + $0x170] sm:$0xff] %vm485_vm0, %v17029_v42  ;;  %v17030_v1 = vld [vmem:[#allocation75_spill] sm:$0xff]  ;;  %v4741_v31 = vmul.f32 %v14302_v46, %v4703_v23  ;;  %v4666_v40 = vadd.f32 %v4603_v50, %v4272_v43  ;;  %v4274_v42 = vadd.f32 %v14653_v55, %v3880_v13  ;;  %v10624_v43 = vpop.f32.mrf.mxu1 }
 0x327   : > { %17026 = vst [vmem:[#allocation98_spill] sm:$0xff] %v14751_v0  ;;  %4871 = vst.msk [vmem:[#allocation2 + $0x148] sm:$0xff] %vm485_vm0, %v17028_v5  ;;  %10782 = vmatmul.mubr.msk.f32.gmra.mxu0 %vm485_vm0, %v14757_v27  ;;  %v4934_v58 = vld [vmem:[#allocation2 + $0x136] sm:$0x1]  ;;  %v14779_v21 = vadd.f32 %v17030_v1, %v4742_v36  ;;  %10726 = vmatprep.mubr.msk.f32.mxu1 %vm485_vm0, %v14770_v2  ;;  %v17032_v5 = vld [vmem:[#allocation56_spill] sm:$0xff]  ;;  %v4706_v62 = vadd.f32 %v14278_v41, %v4667_v17  ;;  %v10682_v36 = vpop.f32.mrf.mxu0  ;;  %v17033_v23 = vmax.f32 %v14751_v0, 0.0 }
 0x328   : > { %10784 = vmatprep.mubr.msk.f32.mxu0 %vm485_vm0, %v14772_v59  ;;  %4952 = vst.msk [vmem:[#allocation2 + $0x138] sm:$0x1] %vm1137_vm3, %v4934_v58  ;;  %v3883_v39 = vadd.f32 %v17032_v5, %v14582_v16  ;;  %v4898_v1 = vld [vmem:[#allocation2 + $0x129] sm:$0x1]  ;;  %v17034_v58 = vld [vmem:[#allocation70_spill] sm:$0xff]  ;;  %v4705_v16 = vadd.f32 %v14278_v41, %v4666_v40  ;;  %v4669_v13 = vadd.f32 %v10682_v36, %v4275_v14  ;;  %v14800_v55 = vld [vmem:[#allocation2 + $0xf0] sm:$0xff] }
 0x329   : > { %17031 = vst [vmem:[#allocation122_spill] sm:$0xff] %v14779_v21  ;;  %4873 = vst.msk [vmem:[#allocation2 + $0x168] sm:$0xff] %vm485_vm0, %v17033_v23  ;;  %v14797_v18 = vadd.f32 %v17034_v58, %v4741_v31  ;;  %v14802_v17 = vld [vmem:[#allocation2 + $0xaf] sm:$0xff]  ;;  %10889 = vmatprep.subr.mxu0 %v6114_v8  ;;  %v17036_v5 = vld [vmem:[#allocation107_spill] sm:$0xff]  ;;  %v4744_v50 = vmul.f32 %v14302_v46, %v4706_v62  ;;  %v4613_v31 = vpop.f32.mrf.mxu0 }
 0x32a   : > { %4916 = vst.msk [vmem:[#allocation2 + $0x127] sm:$0x1] %vm1137_vm3, %v4898_v1  ;;  %v6113_v33 = vld [vmem:[#allocation9 + $0xd0] sm:$0xff]  ;;  %v4277_v23 = vadd.f32 %v14699_v19, %v3883_v39  ;;  %10727 = vmatmul.mubr.msk.f32.gmra.mxu1 %vm485_vm0, %v14800_v55  ;;  %v14813_v14 = vld [vmem:[#allocation2 + $0x108] sm:$0xff]  ;;  %v17038_v1 = vmax.f32 %v14779_v21, 0.0  ;;  %v4743_v39 = vmul.f32 %v14302_v46, %v4705_v16  ;;  %v4668_v62 = vadd.f32 %v4613_v31, %v4274_v42  ;;  %v17039_v58 = vld [vmem:[#allocation115_spill] sm:$0xff] }
 0x32b   : > { %17035 = vst [vmem:[#allocation92_spill] sm:$0xff] %v14797_v18  ;;  %v17037_v0 = vld [vmem:[#allocation113_spill] sm:$0xff]  ;;  %10785 = vmatmul.mubr.msk.f32.gmra.mxu0 %vm485_vm0, %v14802_v17  ;;  %v14815_v40 = vld [vmem:[#allocation2 + $0xc7] sm:$0xff]  ;;  %10729 = vmatprep.mubr.msk.f32.mxu1 %vm485_vm0, %v14813_v14  ;;  %v17042_v16 = vld [vmem:[#allocation78_spill] sm:$0xff]  ;;  %v10685_v42 = vpop.f32.mrf.mxu0  ;;  %v17044_v31 = vmax.f32 %v14797_v18, 0.0 }
 0x32c   : > { %v3490_v15 = vadd.f32 %v17037_v0, %v17036_v5  ;;  %v4935_v36 = vld [vmem:[#allocation2 + $0x156] sm:$0x1]  ;;  %4876 = vst.msk [vmem:[#allocation2 + $0x190] sm:$0xff] %vm485_vm0, %v17038_v1  ;;  %v4708_v0 = vadd.f32 %v14278_v41, %v4669_v13  ;;  %10787 = vmatprep.mubr.msk.f32.mxu0 %vm485_vm0, %v14815_v40  ;;  %v3489_v5 = vadd.f32 %v17039_v58, %v14507_v20  ;;  %v17040_v1 = vld [vmem:[#allocation58_spill] sm:$0xff]  ;;  %v4239_v13 = vpop.f32.mrf.mxu1  ;;  %v5684_v10 = vld [vmem:[#allocation2 + $0x9] sm:$0xff] }
 0x32d   : > { %4953 = vst.msk [vmem:[#allocation2 + $0x158] sm:$0x1] %vm1137_vm3, %v4935_v36  ;;  %v3882_v21 = vadd.f32 %v17040_v1, %v14695_v53  ;;  %v17041_v19 = vld [vmem:[#allocation57_spill] sm:$0xff]  ;;  %v14834_v34 = vadd.f32 %v17042_v16, %v4744_v50  ;;  %10890 = vmatpush3.msra.mxu0 %v6114_v8  ;;  %v14840_v36 = vadd.f32 %v14383_v52, %v4743_v39  ;;  %v17046_v8 = vld [vmem:[#allocation63_spill] sm:$0xff]  ;;  %v4623_v52 = vpop.f32.mrf.mxu0 }
 0x32e   : > { %v3885_v37 = vadd.f32 %v17041_v19, %v3490_v15  ;;  %4875 = vst.msk [vmem:[#allocation2 + $0x188] sm:$0xff] %vm485_vm0, %v17044_v31  ;;  %v4746_v20 = vmul.f32 %v14302_v46, %v4708_v0  ;;  %v4707_v58 = vadd.f32 %v14278_v41, %v4668_v62  ;;  %v4671_v53 = vadd.f32 %v10685_v42, %v4277_v23  ;;  %v14844_v1 = vld [vmem:[#allocation2 + $0x110] sm:$0xff]  ;;  %v4899_v50 = vld [vmem:[#allocation2 + $0x149] sm:$0x1] }
 0x32f   : > { %17043 = vst [vmem:[#allocation100_spill] sm:$0xff] %v14834_v34  ;;  %17045 = vst [vmem:[#allocation116_spill] sm:$0xff] %v14840_v36  ;;  %v14846_v15 = vld [vmem:[#allocation2 + $0xcf] sm:$0xff]  ;;  %10891 = vmatprep.subr.mxu0 %v6113_v33  ;;  %v3884_v19 = vadd.f32 %v17046_v8, %v3489_v5  ;;  %v4276_v16 = vadd.f32 %v14747_v44, %v3882_v21  ;;  %v16603_v31 = vmax.f32 %v14834_v34, 0.0  ;;  %10730 = vmatmul.mubr.msk.f32.gmra.mxu1 %vm485_vm0, %v14844_v1  ;;  %v14857_v39 = vld [vmem:[#allocation2 + $0xe7] sm:$0xff] }
 0x330   : > { %v4279_v18 = vadd.f32 %v10624_v43, %v3885_v37  ;;  %10788 = vmatmul.mubr.msk.f32.gmra.mxu0 %vm485_vm0, %v14846_v15  ;;  %v14855_v23 = vld [vmem:[#allocation2 + $0x128] sm:$0xff]  ;;  %4917 = vst.msk [vmem:[#allocation2 + $0x147] sm:$0x1] %vm1137_vm3, %v4899_v50  ;;  %v16602_v62 = vmax.f32 %v14840_v36, 0.0  ;;  %v14862_v37 = vadd.f32 %v14402_v54, %v4746_v20  ;;  %v4745_v44 = vmul.f32 %v14302_v46, %v4707_v58  ;;  %v4936_v43 = vld [vmem:[#allocation2 + $0x176] sm:$0x1]  ;;  %v10688_v54 = vpop.f32.mrf.mxu0 }
 0x331   : > { %v6112_v0 = vld [vmem:[#allocation9 + $0xc8] sm:$0xff]  ;;  %v4710_v21 = vadd.f32 %v14278_v41, %v4671_v53  ;;  %10732 = vmatprep.mubr.msk.f32.mxu1 %vm485_vm0, %v14855_v23  ;;  %10790 = vmatprep.mubr.msk.f32.mxu0 %vm485_vm0, %v14857_v39  ;;  %v4278_v5 = vadd.f32 %v4239_v13, %v3884_v19  ;;  %4878 = vst.msk [vmem:[#allocation2 + $0x1b0] sm:$0xff] %vm485_vm0, %v16603_v31  ;;  %v14882_v8 = vld [vmem:[#allocation2 + $0x130] sm:$0xff]  ;;  %v17050_v31 = vld [vmem:[#allocation50_spill] sm:$0xff] }
 0x332   : > { %17047 = vst [vmem:[#allocation117_spill] sm:$0xff] %v14862_v37  ;;  %v4670_v42 = vadd.f32 %v4623_v52, %v4276_v16  ;;  %v4900_v20 = vld [vmem:[#allocation2 + $0x169] sm:$0x1]  ;;  %10892 = vmatpush3.msra.mxu0 %v6113_v33  ;;  %4954 = vst.msk [vmem:[#allocation2 + $0x178] sm:$0x1] %vm1137_vm3, %v4936_v43  ;;  %v14879_v53 = vadd.f32 %v14473_v24, %v4745_v44  ;;  %v4673_v50 = vadd.f32 %v10688_v54, %v4279_v18  ;;  %v14884_v19 = vld [vmem:[#allocation2 + $0xef] sm:$0xff]  ;;  %v4633_v24 = vpop.f32.mrf.mxu0 }
 0x333   : > { %4877 = vst.msk [vmem:[#allocation2 + $0x1a8] sm:$0xff] %vm485_vm0, %v16602_v62  ;;  %v4748_v13 = vmul.f32 %v14302_v46, %v4710_v21  ;;  %10893 = vmatprep.subr.mxu0 %v6112_v0  ;;  %v6111_v33 = vld [vmem:[#allocation9 + $0xc0] sm:$0xff]  ;;  %v17049_v43 = vld [vmem:[#allocation29_spill] sm:$0xff]  ;;  %10733 = vmatmul.mubr.msk.f32.gmra.mxu1 %vm485_vm0, %v14882_v8  ;;  %v14895_v18 = vld [vmem:[#allocation2 + $0x148] sm:$0xff]  ;;  %v17051_v54 = vmax.f32 %v14862_v37, 0.0 }
 0x334   : > { %17048 = vst [vmem:[#allocation101_spill] sm:$0xff] %v14879_v53  ;;  %4918 = vst.msk [vmem:[#allocation2 + $0x167] sm:$0x1] %vm1137_vm3, %v4900_v20  ;;  %v4709_v16 = vadd.f32 %v14278_v41, %v4670_v42  ;;  %v11350_v52 = vld [vmem:[%s14044_s14] ss:$0 sm:$0xff]  ;;  %10791 = vmatmul.mubr.msk.f32.gmra.mxu0 %vm485_vm0, %v14884_v19  ;;  %v14897_v44 = vld [vmem:[#allocation2 + $0x107] sm:$0xff]  ;;  %10735 = vmatprep.mubr.msk.f32.mxu1 %vm485_vm0, %v14895_v18 }
 0x335   : > { %v4785_v62 = vmul.f32 %v11350_v52, %v17049_v43  ;;  %v4788_v58 = vmul.f32 %v11350_v52, %v17050_v31  ;;  %v4937_v21 = vld [vmem:[#allocation2 + $0x196] sm:$0x1]  ;;  %4880 = vst.msk [vmem:[#allocation2 + $0x1d0] sm:$0xff] %vm485_vm0, %v17051_v54  ;;  %v16609_v42 = vmax.f32 %v14879_v53, 0.0  ;;  %v4818_v20 = vadd.f32 %v14492_v9, %v4748_v13  ;;  %10793 = vmatprep.mubr.msk.f32.mxu0 %vm485_vm0, %v14897_v44  ;;  %v4901_v37 = vld [vmem:[#allocation2 + $0x189] sm:$0x1] }
 0x336   : > { %v4712_v31 = vadd.f32 %v14278_v41, %v4673_v50  ;;  %v4672_v43 = vadd.f32 %v4633_v24, %v4278_v5  ;;  %4955 = vst.msk [vmem:[#allocation2 + $0x198] sm:$0x1] %vm1137_vm3, %v4937_v21  ;;  %v4747_v36 = vmul.f32 %v14302_v46, %v4709_v16  ;;  %10894 = vmatpush3.msra.mxu0 %v6112_v0  ;;  %v17053_v50 = vld [vmem:[#allocation49_spill] sm:$0xff]  ;;  %4919 = vst.msk [vmem:[#allocation2 + $0x187] sm:$0x1] %vm1137_vm3, %v4901_v37  ;;  %v14928_v16 = vld [vmem:[#allocation2 + $0x168] sm:$0xff] }
 0x337   : > { %4879 = vst.msk [vmem:[#allocation2 + $0x1c8] sm:$0xff] %vm485_vm0, %v16609_v42  ;;  %v14914_v9 = vmax.f32 %v4818_v20, 0.0  ;;  %v4787_v24 = vmul.f32 %v11350_v52, %v17053_v50  ;;  %v14919_v54 = vld [vmem:[#allocation2 + $0x150] sm:$0xff]  ;;  %10895 = vmatprep.subr.mxu0 %v6111_v33 }
 0x338   : > { %v4750_v5 = vmul.f32 %v14302_v46, %v4712_v31  ;;  %v4711_v13 = vadd.f32 %v14278_v41, %v4672_v43  ;;  %v14921_v34 = vld [vmem:[#allocation2 + $0x10f] sm:$0xff]  ;;  %v4817_v0 = vadd.f32 %v4785_v62, %v4747_v36  ;;  %10736 = vmatmul.mubr.msk.f32.gmra.mxu1 %vm485_vm0, %v14919_v54  ;;  %v14930_v31 = vld [vmem:[#allocation2 + $0x127] sm:$0xff]  ;;  %v14932_v41 = vld [vmem:[#allocation9 + $0x178] sm:$0xff]  ;;  %10896 = vmatpush3.msra.mxu0 %v6111_v33 }
 0x339   : > { %17052 = vst [vmem:[#allocation119_spill] sm:$0xff] %v14914_v9  ;;  %10794 = vmatmul.mubr.msk.f32.gmra.mxu0 %vm485_vm0, %v14921_v34  ;;  %4882 = vst.msk [vmem:[#allocation2 + $0x1f0] sm:$0xff] %vm485_vm0, %v14914_v9  ;;  %10738 = vmatprep.mubr.msk.f32.mxu1 %vm485_vm0, %v14928_v16  ;;  %v4938_v62 = vld [vmem:[#allocation2 + $0x1b6] sm:$0x1]  ;;  %v14965_v33 = vld [vmem:[#allocation2 + $0x188] sm:$0xff] }
 0x33a   : > { %4888 = vst.msk [vmem:[#allocation2 + $0x230] sm:$0xff] %vm485_vm0, %v14914_v9  ;;  %v14938_v37 = vadd.f32 %v4788_v58, %v4750_v5  ;;  %v4749_v36 = vmul.f32 %v14302_v46, %v4711_v13  ;;  %10796 = vmatprep.mubr.msk.f32.mxu0 %vm485_vm0, %v14930_v31  ;;  %v14945_v52 = vmax.f32 %v4817_v0, 0.0  ;;  %v4902_v43 = vld [vmem:[#allocation2 + $0x1a9] sm:$0x1]  ;;  %v14951_v58 = vld [vmem:[#allocation2 + $0x170] sm:$0xff]  ;;  %11009 = vmatprep.subr.mxu0 %v14932_v41 }
 0x33b   : > { %4956 = vst.msk [vmem:[#allocation2 + $0x1b8] sm:$0x1] %vm1137_vm3, %v4938_v62  ;;  %v14953_v46 = vld [vmem:[#allocation2 + $0x12f] sm:$0xff]  ;;  %4920 = vst.msk [vmem:[#allocation2 + $0x1a7] sm:$0x1] %vm1137_vm3, %v4902_v43  ;;  %v14967_v5 = vld [vmem:[#allocation2 + $0x147] sm:$0xff] }
 0x33c   : > { %17054 = vst [vmem:[#allocation124_spill] sm:$0xff] %v14938_v37  ;;  %17055 = vst [vmem:[#allocation127_spill] sm:$0xff] %v14945_v52  ;;  %v16607_v21 = vmax.f32 %v14938_v37, 0.0  ;;  %v14949_v20 = vadd.f32 %v4787_v24, %v4749_v36  ;;  %10739 = vmatmul.mubr.msk.f32.gmra.mxu1 %vm485_vm0, %v14951_v58  ;;  %v4939_v13 = vld [vmem:[#allocation2 + $0x1d6] sm:$0x1]  ;;  %v14990_v43 = vld [vmem:[#allocation2 + $0x1a8] sm:$0xff] }
 0x33d   : > { %4881 = vst.msk [vmem:[#allocation2 + $0x1e8] sm:$0xff] %vm485_vm0, %v14945_v52  ;;  %4887 = vst.msk [vmem:[#allocation2 + $0x228] sm:$0xff] %vm485_vm0, %v14945_v52  ;;  %10797 = vmatmul.mubr.msk.f32.gmra.mxu0 %vm485_vm0, %v14953_v46  ;;  %10741 = vmatprep.mubr.msk.f32.mxu1 %vm485_vm0, %v14965_v33  ;;  %v14981_v36 = vld [vmem:[#allocation2 + $0x190] sm:$0xff] }
 0x33e   : > { %17056 = vst [vmem:[#allocation102_spill] sm:$0xff] %v14949_v20  ;;  %4884 = vst.msk [vmem:[#allocation2 + $0x210] sm:$0xff] %vm485_vm0, %v16607_v21  ;;  %v16608_v24 = vmax.f32 %v14949_v20, 0.0  ;;  %10799 = vmatprep.mubr.msk.f32.mxu0 %vm485_vm0, %v14967_v5  ;;  %v4903_v0 = vld [vmem:[#allocation2 + $0x1c9] sm:$0x1]  ;;  %v14983_v62 = vld [vmem:[#allocation2 + $0x14f] sm:$0xff] }
 0x33f   : > { %4957 = vst.msk [vmem:[#allocation2 + $0x1d8] sm:$0x1] %vm1137_vm3, %v4939_v13  ;;  %4921 = vst.msk [vmem:[#allocation2 + $0x1c7] sm:$0x1] %vm1137_vm3, %v4903_v0  ;;  %v14992_v13 = vld [vmem:[#allocation2 + $0x167] sm:$0xff]  ;;  %v14999_v0 = vld [vmem:[#allocation2 + $0x1b0] sm:$0xff] }
 0x340   : > { %4883 = vst.msk [vmem:[#allocation2 + $0x208] sm:$0xff] %vm485_vm0, %v16608_v24  ;;  %10742 = vmatmul.mubr.msk.f32.gmra.mxu1 %vm485_vm0, %v14981_v36  ;;  %v4940_v21 = vld [vmem:[#allocation2 + $0x1f6] sm:$0x1]  ;;  %v15007_v50 = vld [vmem:[#allocation2 + $0x1c8] sm:$0xff] }
 0x341   : > { %10800 = vmatmul.mubr.msk.f32.gmra.mxu0 %vm485_vm0, %v14983_v62  ;;  %10744 = vmatprep.mubr.msk.f32.mxu1 %vm485_vm0, %v14990_v43  ;;  %4958 = vst.msk [vmem:[#allocation2 + $0x1f8] sm:$0x1] %vm1137_vm3, %v4940_v21  ;;  %v15001_v24 = vld [vmem:[#allocation2 + $0x16f] sm:$0xff]  ;;  %v15009_v20 = vld [vmem:[#allocation2 + $0x187] sm:$0xff] }
 0x342   : > { %10802 = vmatprep.mubr.msk.f32.mxu0 %vm485_vm0, %v14992_v13  ;;  %v15017_v52 = vld [vmem:[#allocation2 + $0x1d0] sm:$0xff]  ;;  %v15028_v53 = vld [vmem:[#allocation2 + $0x1a7] sm:$0xff] }
 0x343   : > { %v15019_v9 = vld [vmem:[#allocation2 + $0x18f] sm:$0xff] }
 0x344   : > { %v4904_v42 = vld [vmem:[#allocation2 + $0x1e9] sm:$0x1]  ;;  %10745 = vmatmul.mubr.msk.f32.gmra.mxu1 %vm485_vm0, %v14999_v0  ;;  %v15036_v29 = vld [vmem:[#allocation2 + $0x1af] sm:$0xff] }
 0x345   : > { %10803 = vmatmul.mubr.msk.f32.gmra.mxu0 %vm485_vm0, %v15001_v24  ;;  %4922 = vst.msk [vmem:[#allocation2 + $0x1e7] sm:$0x1] %vm1137_vm3, %v4904_v42  ;;  %10747 = vmatprep.mubr.msk.f32.mxu1 %vm485_vm0, %v15007_v50  ;;  %v4941_v21 = vld [vmem:[#allocation2 + $0x216] sm:$0x1]  ;;  %v15026_v42 = vld [vmem:[#allocation2 + $0x1e8] sm:$0xff] }
 0x346   : > { %10805 = vmatprep.mubr.msk.f32.mxu0 %vm485_vm0, %v15009_v20  ;;  %4959 = vst.msk [vmem:[#allocation2 + $0x218] sm:$0x1] %vm1137_vm3, %v4941_v21  ;;  %17057 = vst [vmem:[#allocation121_spill] sm:$0xff] %v15026_v42  ;;  %v15034_v21 = vld [vmem:[#allocation2 + $0x1f0] sm:$0xff]  ;;  %v4906_v6 = vld [vmem:[#allocation2 + $0x229] sm:$0x1] }
 0x347   : > { %v4905_v37 = vld [vmem:[#allocation2 + $0x209] sm:$0x1]  ;;  %17058 = vst [vmem:[#allocation129_spill] sm:$0xff] %v15034_v21  ;;  %v6511_v61 = vld [vmem:[#allocation9 + $0x130] sm:$0xff]  ;;  %4924 = vst.msk [vmem:[#allocation2 + $0x227] sm:$0x1] %vm1137_vm3, %v4906_v6 }
 0x348   : > { %4923 = vst.msk [vmem:[#allocation2 + $0x207] sm:$0x1] %vm1137_vm3, %v4905_v37  ;;  %10748 = vmatmul.mubr.msk.f32.gmra.mxu1 %vm485_vm0, %v15017_v52  ;;  %v15042_v37 = vld [vmem:[#allocation2 + $0x1c7] sm:$0xff]  ;;  %v15047_v51 = vld [vmem:[#allocation2 + $0x1cf] sm:$0xff] }
 0x349   : > { %10806 = vmatmul.mubr.msk.f32.gmra.mxu0 %vm485_vm0, %v15019_v9  ;;  %10750 = vmatprep.mubr.msk.f32.mxu1 %vm485_vm0, %v15026_v42  ;;  %v5685_v60 = vld [vmem:[#allocation2 + $0x11] sm:$0xff]  ;;  %v15070_v6 = vld [vmem:[#allocation2 + $0x49] sm:$0xff]  ;;  %v6903_v42 = vld [vmem:[#allocation9 + $0x160] sm:$0xff] }
 0x34a   : > { %10808 = vmatprep.mubr.msk.f32.mxu0 %vm485_vm0, %v15028_v53  ;;  %v15062_v28 = vld [vmem:[#allocation2 + $0x1ef] sm:$0xff] }
 0x34b   : > { %v15064_v45 = vld [vmem:[#allocation2 + $0x31] sm:$0xff]  ;;  %v15082_v48 = vld [vmem:[#allocation2 + $0x69] sm:$0xff] }
 0x34c   : > { %10751 = vmatmul.mubr.msk.f32.gmra.mxu1 %vm485_vm0, %v15034_v21  ;;  %v15052_v56 = vld [vmem:[#allocation2 + $0x1e7] sm:$0xff] }
 0x34d   : > { %10809 = vmatmul.mubr.msk.f32.gmra.mxu0 %vm485_vm0, %v15036_v29  ;;  %10833 = vmatprep.mubr.msk.f32.mxu1 %vm485_vm0, %v5684_v10  ;;  %v15058_v10 = vld [vmem:[#allocation2 + $0x29] sm:$0xff] }
 0x34e   : > { %10811 = vmatprep.mubr.msk.f32.mxu0 %vm485_vm0, %v15042_v37  ;;  %v6904_v21 = vld [vmem:[#allocation9 + $0x168] sm:$0xff] }
 0x350   : > { %10834 = vmatmul.mubr.msk.f32.vlgmr.msra.gmra.mxu1 %vm485_vm0, %v5685_v60  ;;  %v6510_v60 = vld [vmem:[#allocation9 + $0x128] sm:$0xff] }
 0x351   : > { %10812 = vmatmul.mubr.msk.f32.gmra.mxu0 %vm485_vm0, %v15047_v51  ;;  %10946 = vmatpush3.msra.mxu1 %v14744_v22  ;;  %v15076_v22 = vld [vmem:[#allocation2 + $0x51] sm:$0xff] }
 0x352   : > { %10814 = vmatprep.mubr.msk.f32.mxu0 %vm485_vm0, %v15052_v56  ;;  %10836 = vmatprep.mubr.msk.f32.mxu1 %vm485_vm0, %v15058_v10 }
 0x353   : > { %10947 = vmatprep.subr.mxu1 %v6511_v61 }
 0x354   : > { %10948 = vmatpush3.msra.mxu1 %v6511_v61  ;;  %v6509_v61 = vld [vmem:[#allocation9 + $0x120] sm:$0xff] }
 0x355   : > { %10815 = vmatmul.mubr.msk.f32.gmra.mxu0 %vm485_vm0, %v15062_v28  ;;  %10837 = vmatmul.mubr.msk.f32.gmra.mxu1 %vm485_vm0, %v15064_v45 }
 0x356   : > { %10839 = vmatprep.mubr.msk.f32.mxu1 %vm485_vm0, %v15070_v6  ;;  %10897 = vmatprep.mubr.msk.f32.mxu0 %vm485_vm0, %v14588_v25  ;;  %v15089_v25 = vld [vmem:[#allocation2 + $0x71] sm:$0xff] }
 0x357   : > { %10949 = vmatprep.subr.mxu1 %v6510_v60 }
 0x358   : > { %10950 = vmatpush3.msra.mxu1 %v6510_v60  ;;  %v6508_v60 = vld [vmem:[#allocation9 + $0x118] sm:$0xff] }
 0x359   : > { %10840 = vmatmul.mubr.msk.f32.gmra.mxu1 %vm485_vm0, %v15076_v22  ;;  %10898 = vmatmul.mubr.msk.f32.vlgmr.msra.gmra.mxu0 %vm485_vm0, %v14620_v57  ;;  %v15095_v57 = vld [vmem:[#allocation2 + $0x89] sm:$0xff] }
 0x35a   : > { %10842 = vmatprep.mubr.msk.f32.mxu1 %vm485_vm0, %v15082_v48  ;;  %10900 = vmatprep.mubr.msk.f32.mxu0 %vm485_vm0, %v14633_v63  ;;  %v4942_v63 = vld [vmem:[#allocation2 + $0x236] sm:$0x1] }
 0x35b   : > { %10951 = vmatprep.subr.mxu1 %v6509_v61  ;;  %11010 = vmatpush3.msra.mxu0 %v14932_v41  ;;  %4960 = vst.msk [vmem:[#allocation2 + $0x238] sm:$0x1] %vm1137_vm3, %v4942_v63  ;;  %v15102_v41 = vld [vmem:[#allocation2 + $0x91] sm:$0xff] }
 0x35c   : > { %10952 = vmatpush3.msra.mxu1 %v6509_v61  ;;  %11011 = vmatprep.subr.mxu0 %v6905_v11  ;;  %v6507_v61 = vld [vmem:[#allocation9 + $0x110] sm:$0xff] }
 0x35d   : > { %10843 = vmatmul.mubr.msk.f32.gmra.mxu1 %vm485_vm0, %v15089_v25  ;;  %10901 = vmatmul.mubr.msk.f32.gmra.mxu0 %vm485_vm0, %v14665_v30  ;;  %v15108_v30 = vld [vmem:[#allocation2 + $0xa9] sm:$0xff] }
 0x35e   : > { %10845 = vmatprep.mubr.msk.f32.mxu1 %vm485_vm0, %v15095_v57  ;;  %10903 = vmatprep.mubr.msk.f32.mxu0 %vm485_vm0, %v14678_v32  ;;  %v6506_v32 = vld [vmem:[#allocation9 + $0x108] sm:$0xff]  ;;  %v6901_v63 = vld [vmem:[#allocation9 + $0x150] sm:$0xff] }
 0x35f   : > { %10953 = vmatprep.subr.mxu1 %v6508_v60  ;;  %11012 = vmatpush3.msra.mxu0 %v6905_v11  ;;  %v15114_v11 = vld [vmem:[#allocation2 + $0xb1] sm:$0xff] }
 0x360   : > { %10954 = vmatpush3.msra.mxu1 %v6508_v60  ;;  %11013 = vmatprep.subr.mxu0 %v6904_v21  ;;  %v6902_v60 = vld [vmem:[#allocation9 + $0x158] sm:$0xff] }
 0x361   : > { %10846 = vmatmul.mubr.msk.f32.gmra.mxu1 %vm485_vm0, %v15102_v41  ;;  %10904 = vmatmul.mubr.msk.f32.gmra.mxu0 %vm485_vm0, %v14709_v38  ;;  %v15120_v38 = vld [vmem:[#allocation2 + $0xc9] sm:$0xff] }
 0x362   : > { %10848 = vmatprep.mubr.msk.f32.mxu1 %vm485_vm0, %v15108_v30  ;;  %10906 = vmatprep.mubr.msk.f32.mxu0 %vm485_vm0, %v14735_v3  ;;  %v15126_v3 = vld [vmem:[#allocation2 + $0xd1] sm:$0xff] }
 0x363   : > { %10955 = vmatprep.subr.mxu1 %v6507_v61  ;;  %11014 = vmatpush3.msra.mxu0 %v6904_v21  ;;  %v6505_v21 = vld [vmem:[#allocation9 + $0x100] sm:$0xff] }
 0x364   : > { %10956 = vmatpush3.msra.mxu1 %v6507_v61  ;;  %11015 = vmatprep.subr.mxu0 %v6903_v42  ;;  %v6900_v61 = vld [vmem:[#allocation9 + $0x148] sm:$0xff] }
 0x365   : > { %10849 = vmatmul.mubr.msk.f32.gmra.mxu1 %vm485_vm0, %v15114_v11  ;;  %10907 = vmatmul.mubr.msk.f32.gmra.mxu0 %vm485_vm0, %v14757_v27  ;;  %v15132_v27 = vld [vmem:[#allocation2 + $0xe9] sm:$0xff] }
 0x366   : > { %10851 = vmatprep.mubr.msk.f32.mxu1 %vm485_vm0, %v15120_v38  ;;  %10909 = vmatprep.mubr.msk.f32.mxu0 %vm485_vm0, %v14772_v59  ;;  %v15138_v59 = vld [vmem:[#allocation2 + $0xf1] sm:$0xff] }
 0x367   : > { %10957 = vmatprep.subr.mxu1 %v6506_v32  ;;  %11016 = vmatpush3.msra.mxu0 %v6903_v42  ;;  %v15140_v42 = vld [vmem:[#allocation9 + $0x1b8] sm:$0xff] }
 0x368   : > { %10958 = vmatpush3.msra.mxu1 %v6506_v32  ;;  %11017 = vmatprep.subr.mxu0 %v6902_v60  ;;  %v6899_v32 = vld [vmem:[#allocation9 + $0x140] sm:$0xff] }
 0x369   : > { %10852 = vmatmul.mubr.msk.f32.gmra.mxu1 %vm485_vm0, %v15126_v3  ;;  %10910 = vmatmul.mubr.msk.f32.gmra.mxu0 %vm485_vm0, %v14802_v17  ;;  %v15146_v17 = vld [vmem:[#allocation2 + $0x109] sm:$0xff] }
 0x36a   : > { %10854 = vmatprep.mubr.msk.f32.mxu1 %vm485_vm0, %v15132_v27  ;;  %10912 = vmatprep.mubr.msk.f32.mxu0 %vm485_vm0, %v14815_v40  ;;  %v15153_v40 = vld [vmem:[#allocation2 + $0x111] sm:$0xff] }
 0x36b   : > { %10959 = vmatprep.subr.mxu1 %v6505_v21  ;;  %11018 = vmatpush3.msra.mxu0 %v6902_v60  ;;  %v15173_v60 = vld [vmem:[#allocation9 + $0x1f8] sm:$0xff] }
 0x36c   : > { %10960 = vmatpush3.msra.mxu1 %v6505_v21  ;;  %11019 = vmatprep.subr.mxu0 %v6901_v63  ;;  %v15198_v21 = vld [vmem:[#allocation2 + $0x189] sm:$0xff] }
 0x36d   : > { %10855 = vmatmul.mubr.msk.f32.gmra.mxu1 %vm485_vm0, %v15138_v59  ;;  %10913 = vmatmul.mubr.msk.f32.gmra.mxu0 %vm485_vm0, %v14846_v15  ;;  %v15159_v15 = vld [vmem:[#allocation2 + $0x129] sm:$0xff] }
 0x36e   : > { %10857 = vmatprep.mubr.msk.f32.mxu1 %vm485_vm0, %v15146_v17  ;;  %10915 = vmatprep.mubr.msk.f32.mxu0 %vm485_vm0, %v14857_v39  ;;  %v15165_v39 = vld [vmem:[#allocation2 + $0x131] sm:$0xff] }
 0x36f   : > { %11073 = vmatprep.subr.mxu1 %v15140_v42  ;;  %11020 = vmatpush3.msra.mxu0 %v6901_v63  ;;  %v7299_v63 = vld [vmem:[#allocation9 + $0x1b0] sm:$0xff] }
 0x370   : > { %11021 = vmatprep.subr.mxu0 %v6900_v61 }
 0x371   : > { %10858 = vmatmul.mubr.msk.f32.gmra.mxu1 %vm485_vm0, %v15153_v40  ;;  %10916 = vmatmul.mubr.msk.f32.gmra.mxu0 %vm485_vm0, %v14884_v19  ;;  %v15171_v19 = vld [vmem:[#allocation2 + $0x149] sm:$0xff] }
 0x372   : > { %10860 = vmatprep.mubr.msk.f32.mxu1 %vm485_vm0, %v15159_v15  ;;  %10918 = vmatprep.mubr.msk.f32.mxu0 %vm485_vm0, %v14897_v44  ;;  %v15179_v44 = vld [vmem:[#allocation2 + $0x151] sm:$0xff] }
 0x373   : > { %11022 = vmatpush3.msra.mxu0 %v6900_v61  ;;  %v15263_v61 = vld [vmem:[#allocation2 + $0x50] sm:$0xff] }
 0x374   : > { %11023 = vmatprep.subr.mxu0 %v6899_v32 }
 0x375   : > { %10861 = vmatmul.mubr.msk.f32.gmra.mxu1 %vm485_vm0, %v15165_v39  ;;  %10919 = vmatmul.mubr.msk.f32.gmra.mxu0 %vm485_vm0, %v14921_v34  ;;  %v15186_v34 = vld [vmem:[#allocation2 + $0x169] sm:$0xff] }
 0x376   : > { %10863 = vmatprep.mubr.msk.f32.mxu1 %vm485_vm0, %v15171_v19  ;;  %10921 = vmatprep.mubr.msk.f32.mxu0 %vm485_vm0, %v14930_v31  ;;  %v15192_v31 = vld [vmem:[#allocation2 + $0x171] sm:$0xff] }
 0x377   : > { %11024 = vmatpush3.msra.mxu0 %v6899_v32  ;;  %v7297_v32 = vld [vmem:[#allocation9 + $0x1a0] sm:$0xff] }
 0x378   : > { %11137 = vmatprep.subr.mxu0 %v15173_v60 }
 0x379   : > { %10864 = vmatmul.mubr.msk.f32.gmra.mxu1 %vm485_vm0, %v15179_v44  ;;  %10922 = vmatmul.mubr.msk.f32.gmra.mxu0 %vm485_vm0, %v14953_v46  ;;  %v15204_v46 = vld [vmem:[#allocation2 + $0x191] sm:$0xff] }
 0x37a   : > { %10866 = vmatprep.mubr.msk.f32.mxu1 %vm485_vm0, %v15186_v34  ;;  %10924 = vmatprep.mubr.msk.f32.mxu0 %vm485_vm0, %v14967_v5  ;;  %v15210_v5 = vld [vmem:[#allocation2 + $0x1a9] sm:$0xff] }
 0x37d   : > { %10867 = vmatmul.mubr.msk.f32.gmra.mxu1 %vm485_vm0, %v15192_v31  ;;  %10925 = vmatmul.mubr.msk.f32.gmra.mxu0 %vm485_vm0, %v14983_v62  ;;  %v15216_v62 = vld [vmem:[#allocation2 + $0x1b1] sm:$0xff] }
 0x37e   : > { %10869 = vmatprep.mubr.msk.f32.mxu1 %vm485_vm0, %v15198_v21  ;;  %10927 = vmatprep.mubr.msk.f32.mxu0 %vm485_vm0, %v14992_v13  ;;  %v15222_v13 = vld [vmem:[#allocation2 + $0x1c9] sm:$0xff] }
 0x381   : > { %10870 = vmatmul.mubr.msk.f32.gmra.mxu1 %vm485_vm0, %v15204_v46  ;;  %10928 = vmatmul.mubr.msk.f32.gmra.mxu0 %vm485_vm0, %v15001_v24  ;;  %v15228_v24 = vld [vmem:[#allocation2 + $0x1d1] sm:$0xff] }
 0x382   : > { %10872 = vmatprep.mubr.msk.f32.mxu1 %vm485_vm0, %v15210_v5  ;;  %10930 = vmatprep.mubr.msk.f32.mxu0 %vm485_vm0, %v15009_v20  ;;  %v15234_v20 = vld [vmem:[#allocation2 + $0x1e9] sm:$0xff] }
 0x385   : > { %10873 = vmatmul.mubr.msk.f32.gmra.mxu1 %vm485_vm0, %v15216_v62  ;;  %10931 = vmatmul.mubr.msk.f32.gmra.mxu0 %vm485_vm0, %v15019_v9  ;;  %v15240_v9 = vld [vmem:[#allocation2 + $0x1f1] sm:$0xff] }
 0x386   : > { %10875 = vmatprep.mubr.msk.f32.mxu1 %vm485_vm0, %v15222_v13  ;;  %10933 = vmatprep.mubr.msk.f32.mxu0 %vm485_vm0, %v15028_v53  ;;  %v6472_v53 = vld [vmem:[#allocation2 + $0x28] sm:$0xff] }
 0x389   : > { %10876 = vmatmul.mubr.msk.f32.gmra.mxu1 %vm485_vm0, %v15228_v24  ;;  %10934 = vmatmul.mubr.msk.f32.gmra.mxu0 %vm485_vm0, %v15036_v29  ;;  %v6473_v29 = vld [vmem:[#allocation2 + $0x30] sm:$0xff] }
 0x38a   : > { %10878 = vmatprep.mubr.msk.f32.mxu1 %vm485_vm0, %v15234_v20  ;;  %10936 = vmatprep.mubr.msk.f32.mxu0 %vm485_vm0, %v15042_v37  ;;  %v15252_v37 = vld [vmem:[#allocation2 + $0x207] sm:$0xff] }
 0x38d   : > { %10879 = vmatmul.mubr.msk.f32.gmra.mxu1 %vm485_vm0, %v15240_v9  ;;  %10937 = vmatmul.mubr.msk.f32.gmra.mxu0 %vm485_vm0, %v15047_v51  ;;  %v15257_v51 = vld [vmem:[#allocation2 + $0x48] sm:$0xff] }
 0x38e   : > { %10939 = vmatprep.mubr.msk.f32.mxu0 %vm485_vm0, %v15052_v56  ;;  %10961 = vmatprep.mubr.msk.f32.mxu1 %vm485_vm0, %v6472_v53  ;;  %v15261_v56 = vld [vmem:[#allocation2 + $0x20f] sm:$0xff] }
 0x38f   : > { %v7693_v53 = vld [vmem:[#allocation9 + $0x1f0] sm:$0xff] }
 0x391   : > { %10940 = vmatmul.mubr.msk.f32.gmra.mxu0 %vm485_vm0, %v15062_v28  ;;  %10962 = vmatmul.mubr.msk.f32.vlgmr.msra.gmra.mxu1 %vm485_vm0, %v6473_v29  ;;  %v7298_v28 = vld [vmem:[#allocation9 + $0x1a8] sm:$0xff] }
 0x392   : > { %11074 = vmatpush3.msra.mxu1 %v15140_v42  ;;  %10942 = vmatprep.mubr.msk.f32.mxu0 %vm485_vm0, %v15252_v37  ;;  %v15269_v42 = vld [vmem:[#allocation2 + $0x68] sm:$0xff] }
 0x393   : > { %10964 = vmatprep.mubr.msk.f32.mxu1 %vm485_vm0, %v15257_v51  ;;  %11075 = vmatprep.subr.mxu1 %v7299_v63  ;;  %v7660_v29 = vld [vmem:[#allocation2 + $0xa8] sm:$0xff] }
 0x394   : > { %11076 = vmatpush3.msra.mxu1 %v7299_v63 }
 0x395   : > { %10943 = vmatmul.mubr.msk.f32.gmra.mxu0 %vm485_vm0, %v15261_v56  ;;  %10965 = vmatmul.mubr.msk.f32.gmra.mxu1 %vm485_vm0, %v15263_v61 }
 0x396   : > { %10967 = vmatprep.mubr.msk.f32.mxu1 %vm485_vm0, %v15269_v42  ;;  %11025 = vmatprep.mubr.msk.f32.mxu0 %vm485_vm0, %v15058_v10  ;;  %v7296_v10 = vld [vmem:[#allocation9 + $0x198] sm:$0xff] }
 0x397   : > { %11077 = vmatprep.subr.mxu1 %v7298_v28 }
 0x398   : > { %11078 = vmatpush3.msra.mxu1 %v7298_v28 }
 0x399   : > { %10968 = vmatmul.mubr.msk.f32.gmra.mxu1 %vm485_vm0, %v14618_v49  ;;  %11026 = vmatmul.mubr.msk.f32.vlgmr.msra.gmra.mxu0 %vm485_vm0, %v15064_v45  ;;  %v7692_v45 = vld [vmem:[#allocation9 + $0x1e8] sm:$0xff]  ;;  %v7295_v49 = vld [vmem:[#allocation9 + $0x190] sm:$0xff] }
 0x39a   : > { %10970 = vmatprep.mubr.msk.f32.mxu1 %vm485_vm0, %v14631_v26  ;;  %11028 = vmatprep.mubr.msk.f32.mxu0 %vm485_vm0, %v15070_v6  ;;  %v7691_v26 = vld [vmem:[#allocation9 + $0x1e0] sm:$0xff] }
 0x39b   : > { %11079 = vmatprep.subr.mxu1 %v7297_v32  ;;  %11138 = vmatpush3.msra.mxu0 %v15173_v60  ;;  %v7264_v6 = vld [vmem:[#allocation2 + $0x87] sm:$0xff] }
 0x39c   : > { %11080 = vmatpush3.msra.mxu1 %v7297_v32  ;;  %11139 = vmatprep.subr.mxu0 %v7693_v53  ;;  %v7268_v60 = vld [vmem:[#allocation2 + $0xc7] sm:$0xff]  ;;  %v7661_v32 = vld [vmem:[#allocation2 + $0xb0] sm:$0xff] }
 0x39d   : > { %10971 = vmatmul.mubr.msk.f32.gmra.mxu1 %vm485_vm0, %v14663_v12  ;;  %11029 = vmatmul.mubr.msk.f32.gmra.mxu0 %vm485_vm0, %v15076_v22  ;;  %v7690_v12 = vld [vmem:[#allocation9 + $0x1d8] sm:$0xff] }
 0x39e   : > { %10973 = vmatprep.mubr.msk.f32.mxu1 %vm485_vm0, %v14676_v47  ;;  %11031 = vmatprep.mubr.msk.f32.mxu0 %vm485_vm0, %v15082_v48  ;;  %v7294_v48 = vld [vmem:[#allocation9 + $0x188] sm:$0xff]  ;;  %v7293_v47 = vld [vmem:[#allocation9 + $0x180] sm:$0xff] }
 0x39f   : > { %11081 = vmatprep.subr.mxu1 %v7296_v10  ;;  %11140 = vmatpush3.msra.mxu0 %v7693_v53  ;;  %v8082_v53 = vld [vmem:[#allocation9 + $0x208] sm:$0xff] }
 0x3a0   : > { %11082 = vmatpush3.msra.mxu1 %v7296_v10  ;;  %11141 = vmatprep.subr.mxu0 %v7692_v45 }
 0x3a1   : > { %10974 = vmatmul.mubr.msk.f32.gmra.mxu1 %vm485_vm0, %v14707_v35  ;;  %11032 = vmatmul.mubr.msk.f32.gmra.mxu0 %vm485_vm0, %v15089_v25  ;;  %v7689_v35 = vld [vmem:[#allocation9 + $0x1d0] sm:$0xff] }
 0x3a2   : > { %10976 = vmatprep.mubr.msk.f32.mxu1 %vm485_vm0, %v14723_v4  ;;  %11034 = vmatprep.mubr.msk.f32.mxu0 %vm485_vm0, %v15095_v57  ;;  %v8088_v4 = vld [vmem:[#allocation9 + $0x238] sm:$0xff]  ;;  %v7265_v25 = vld [vmem:[#allocation2 + $0x8f] sm:$0xff]  ;;  %v8085_v57 = vld [vmem:[#allocation9 + $0x220] sm:$0xff] }
 0x3a3   : > { %11083 = vmatprep.subr.mxu1 %v7295_v49  ;;  %11142 = vmatpush3.msra.mxu0 %v7692_v45 }
 0x3a4   : > { %11084 = vmatpush3.msra.mxu1 %v7295_v49  ;;  %11143 = vmatprep.subr.mxu0 %v7691_v26  ;;  %v7272_v49 = vld [vmem:[#allocation2 + $0x107] sm:$0xff] }
 0x3a5   : > { %10977 = vmatmul.mubr.msk.f32.gmra.mxu1 %vm485_vm0, %v14755_v7  ;;  %11035 = vmatmul.mubr.msk.f32.gmra.mxu0 %vm485_vm0, %v15102_v41  ;;  %v7688_v7 = vld [vmem:[#allocation9 + $0x1c8] sm:$0xff] }
 0x3a6   : > { %10979 = vmatprep.mubr.msk.f32.mxu1 %vm485_vm0, %v14770_v2  ;;  %11037 = vmatprep.mubr.msk.f32.mxu0 %vm485_vm0, %v15108_v30  ;;  %v7687_v2 = vld [vmem:[#allocation9 + $0x1c0] sm:$0xff] }
 0x3a7   : > { %11085 = vmatprep.subr.mxu1 %v7294_v48  ;;  %11144 = vmatpush3.msra.mxu0 %v7691_v26  ;;  %v7662_v26 = vld [vmem:[#allocation2 + $0xc8] sm:$0xff] }
 0x3a8   : > { %11086 = vmatpush3.msra.mxu1 %v7294_v48  ;;  %11145 = vmatprep.subr.mxu0 %v7690_v12 }
 0x3a9   : > { %10980 = vmatmul.mubr.msk.f32.gmra.mxu1 %vm485_vm0, %v14800_v55  ;;  %11038 = vmatmul.mubr.msk.f32.gmra.mxu0 %vm485_vm0, %v15114_v11  ;;  %v17059_v55 = vld [vmem:[#allocation121_spill] sm:$0xff]  ;;  %v7266_v11 = vld [vmem:[#allocation2 + $0xa7] sm:$0xff] }
 0x3aa   : > { %10982 = vmatprep.mubr.msk.f32.mxu1 %vm485_vm0, %v14813_v14  ;;  %11040 = vmatprep.mubr.msk.f32.mxu0 %vm485_vm0, %v15120_v38  ;;  %v17060_v14 = vld [vmem:[#allocation129_spill] sm:$0xff] }
 0x3ab   : > { %11087 = vmatprep.subr.mxu1 %v7293_v47  ;;  %11146 = vmatpush3.msra.mxu0 %v7690_v12 }
 0x3ac   : > { %11088 = vmatpush3.msra.mxu1 %v7293_v47  ;;  %11147 = vmatprep.subr.mxu0 %v7689_v35 }
 0x3ad   : > { %10983 = vmatmul.mubr.msk.f32.gmra.mxu1 %vm485_vm0, %v14844_v1  ;;  %11041 = vmatmul.mubr.msk.f32.gmra.mxu0 %vm485_vm0, %v15126_v3  ;;  %v15376_v1 = vld [vmem:[#allocation2 + $0x208] sm:$0xff] }
 0x3ae   : > { %10985 = vmatprep.mubr.msk.f32.mxu1 %vm485_vm0, %v14855_v23  ;;  %11043 = vmatprep.mubr.msk.f32.mxu0 %vm485_vm0, %v15132_v27  ;;  %v15382_v23 = vld [vmem:[#allocation2 + $0x210] sm:$0xff] }
 0x3af   : > { %11201 = vmatprep.subr.mxu1 %v8088_v4  ;;  %11148 = vmatpush3.msra.mxu0 %v7689_v35 }
 0x3b0   : > { %11149 = vmatprep.subr.mxu0 %v7688_v7 }
 0x3b1   : > { %10986 = vmatmul.mubr.msk.f32.gmra.mxu1 %vm485_vm0, %v14882_v8  ;;  %11044 = vmatmul.mubr.msk.f32.gmra.mxu0 %vm485_vm0, %v15138_v59  ;;  %v7260_v8 = vld [vmem:[#allocation2 + $0x47] sm:$0xff] }
 0x3b2   : > { %10988 = vmatprep.mubr.msk.f32.mxu1 %vm485_vm0, %v14895_v18  ;;  %11046 = vmatprep.mubr.msk.f32.mxu0 %vm485_vm0, %v15146_v17  ;;  %v7261_v18 = vld [vmem:[#allocation2 + $0x4f] sm:$0xff] }
 0x3b3   : > { %11150 = vmatpush3.msra.mxu0 %v7688_v7  ;;  %v7267_v17 = vld [vmem:[#allocation2 + $0xaf] sm:$0xff] }
 0x3b4   : > { %11151 = vmatprep.subr.mxu0 %v7687_v2  ;;  %v7663_v7 = vld [vmem:[#allocation2 + $0xd0] sm:$0xff] }
 0x3b5   : > { %10989 = vmatmul.mubr.msk.f32.gmra.mxu1 %vm485_vm0, %v14919_v54  ;;  %11047 = vmatmul.mubr.msk.f32.gmra.mxu0 %vm485_vm0, %v15153_v40  ;;  %v7657_v40 = vld [vmem:[#allocation2 + $0x70] sm:$0xff] }
 0x3b6   : > { %10991 = vmatprep.mubr.msk.f32.mxu1 %vm485_vm0, %v14928_v16  ;;  %11049 = vmatprep.mubr.msk.f32.mxu0 %vm485_vm0, %v15159_v15  ;;  %v15394_v16 = vld [vmem:[#allocation2 + $0x209] sm:$0xff]  ;;  %v8084_v15 = vld [vmem:[#allocation9 + $0x218] sm:$0xff] }
 0x3b7   : > { %11152 = vmatpush3.msra.mxu0 %v7687_v2  ;;  %v8081_v2 = vld [vmem:[#allocation9 + $0x200] sm:$0xff] }
 0x3b9   : > { %10992 = vmatmul.mubr.msk.f32.gmra.mxu1 %vm485_vm0, %v14951_v58  ;;  %11050 = vmatmul.mubr.msk.f32.gmra.mxu0 %vm485_vm0, %v15165_v39 }
 0x3ba   : > { %10994 = vmatprep.mubr.msk.f32.mxu1 %vm485_vm0, %v14965_v33  ;;  %11052 = vmatprep.mubr.msk.f32.mxu0 %vm485_vm0, %v15171_v19  ;;  %v15399_v33 = vld [vmem:[#allocation2 + $0x211] sm:$0xff] }
 0x3bd   : > { %10995 = vmatmul.mubr.msk.f32.gmra.mxu1 %vm485_vm0, %v14981_v36  ;;  %11053 = vmatmul.mubr.msk.f32.gmra.mxu0 %vm485_vm0, %v15179_v44  ;;  %v7263_v36 = vld [vmem:[#allocation2 + $0x6f] sm:$0xff] }
 0x3be   : > { %10997 = vmatprep.mubr.msk.f32.mxu1 %vm485_vm0, %v14990_v43  ;;  %11055 = vmatprep.mubr.msk.f32.mxu0 %vm485_vm0, %v15186_v34  ;;  %v8086_v43 = vld [vmem:[#allocation9 + $0x228] sm:$0xff] }
 0x3bf   : > { %v7658_v44 = vld [vmem:[#allocation2 + $0x88] sm:$0xff] }
 0x3c1   : > { %10998 = vmatmul.mubr.msk.f32.gmra.mxu1 %vm485_vm0, %v14999_v0  ;;  %11056 = vmatmul.mubr.msk.f32.gmra.mxu0 %vm485_vm0, %v15192_v31 }
 0x3c2   : > { %11000 = vmatprep.mubr.msk.f32.mxu1 %vm485_vm0, %v15007_v50  ;;  %11058 = vmatprep.mubr.msk.f32.mxu0 %vm485_vm0, %v15198_v21  ;;  %v8087_v50 = vld [vmem:[#allocation9 + $0x230] sm:$0xff] }
 0x3c5   : > { %11001 = vmatmul.mubr.msk.f32.gmra.mxu1 %vm485_vm0, %v15017_v52  ;;  %11059 = vmatmul.mubr.msk.f32.gmra.mxu0 %vm485_vm0, %v15204_v46  ;;  %v7262_v52 = vld [vmem:[#allocation2 + $0x67] sm:$0xff] }
 0x3c6   : > { %11003 = vmatprep.mubr.msk.f32.mxu1 %vm485_vm0, %v17059_v55  ;;  %11061 = vmatprep.mubr.msk.f32.mxu0 %vm485_vm0, %v15210_v5  ;;  %v7269_v5 = vld [vmem:[#allocation2 + $0xcf] sm:$0xff] }
 0x3c7   : > { %v10707_v54 = vpop.f32.mrf.mxu1 }
 0x3c9   : > { %11004 = vmatmul.mubr.msk.f32.gmra.mxu1 %vm485_vm0, %v17060_v14  ;;  %11062 = vmatmul.mubr.msk.f32.gmra.mxu0 %vm485_vm0, %v15216_v62  ;;  %v5204_v58 = vpop.f32.mrf.mxu1  ;;  %v7659_v62 = vld [vmem:[#allocation2 + $0x90] sm:$0xff] }
 0x3ca   : > { %11006 = vmatprep.mubr.msk.f32.mxu1 %vm485_vm0, %v15376_v1  ;;  %11064 = vmatprep.mubr.msk.f32.mxu0 %vm485_vm0, %v15222_v13  ;;  %v8083_v13 = vld [vmem:[#allocation9 + $0x210] sm:$0xff] }
 0x3cb   : > { %v10710_v0 = vpop.f32.mrf.mxu1 }
 0x3cd   : > { %11007 = vmatmul.mubr.msk.f32.gmra.mxu1 %vm485_vm0, %v15382_v23  ;;  %11065 = vmatmul.mubr.msk.f32.gmra.mxu0 %vm485_vm0, %v15228_v24  ;;  %v5214_v22 = vpop.f32.mrf.mxu1 }
 0x3ce   : > { %11067 = vmatprep.mubr.msk.f32.mxu0 %vm485_vm0, %v15234_v20  ;;  %11089 = vmatprep.mubr.msk.f32.mxu1 %vm485_vm0, %v7260_v8  ;;  %v7274_v8 = vld [vmem:[#allocation2 + $0x127] sm:$0xff] }
 0x3d0   : > { %v10771_v30 = vpop.f32.mrf.mxu0 }
 0x3d1   : > { %11068 = vmatmul.mubr.msk.f32.gmra.mxu0 %vm485_vm0, %v15240_v9  ;;  %11090 = vmatmul.mubr.msk.f32.vlgmr.msra.gmra.mxu1 %vm485_vm0, %v7261_v18  ;;  %v10713_v41 = vpop.f32.mrf.mxu1  ;;  %v15410_v38 = vadd.f32 %v10771_v30, %v10707_v54  ;;  %v7270_v9 = vld [vmem:[#allocation2 + $0xe7] sm:$0xff] }
 0x3d2   : > { %11202 = vmatpush3.msra.mxu1 %v8088_v4  ;;  %11070 = vmatprep.mubr.msk.f32.mxu0 %vm485_vm0, %v15394_v16  ;;  %v5525_v27 = vpop.f32.mrf.mxu0  ;;  %v7273_v4 = vld [vmem:[#allocation2 + $0x10f] sm:$0xff] }
 0x3d3   : > { %11092 = vmatprep.mubr.msk.f32.mxu1 %vm485_vm0, %v7262_v52  ;;  %11203 = vmatprep.subr.mxu1 %v8087_v50  ;;  %v5224_v3 = vpop.f32.mrf.mxu1  ;;  %v15415_v59 = vadd.f32 %v5525_v27, %v5204_v58  ;;  %v7664_v18 = vld [vmem:[#allocation2 + $0xe8] sm:$0xff]  ;;  %v7667_v27 = vld [vmem:[#allocation2 + $0x110] sm:$0xff] }
 0x3d4   : > { %11204 = vmatpush3.msra.mxu1 %v8087_v50 }
 0x3d5   : > { %11071 = vmatmul.mubr.msk.f32.gmra.mxu0 %vm485_vm0, %v15399_v33  ;;  %11093 = vmatmul.mubr.msk.f32.gmra.mxu1 %vm485_vm0, %v7263_v36  ;;  %v7275_v36 = vld [vmem:[#allocation2 + $0x12f] sm:$0xff] }
 0x3d6   : > { %11095 = vmatprep.mubr.msk.f32.mxu1 %vm485_vm0, %v7264_v6  ;;  %11153 = vmatprep.mubr.msk.f32.mxu0 %vm485_vm0, %v15257_v51  ;;  %v10716_v39 = vpop.f32.mrf.mxu1 }
 0x3d7   : > { %11205 = vmatprep.subr.mxu1 %v8086_v43  ;;  %v10774_v19 = vpop.f32.mrf.mxu0 }
 0x3d8   : > { %11206 = vmatpush3.msra.mxu1 %v8086_v43  ;;  %v15419_v34 = vadd.f32 %v10774_v19, %v10710_v0  ;;  %v5234_v31 = vpop.f32.mrf.mxu1  ;;  %v7665_v43 = vld [vmem:[#allocation2 + $0xf0] sm:$0xff] }
 0x3d9   : > { %11096 = vmatmul.mubr.msk.f32.gmra.mxu1 %vm485_vm0, %v7265_v25  ;;  %11154 = vmatmul.mubr.msk.f32.vlgmr.msra.gmra.mxu0 %vm485_vm0, %v15263_v61  ;;  %v5535_v21 = vpop.f32.mrf.mxu0  ;;  %v7666_v25 = vld [vmem:[#allocation2 + $0x108] sm:$0xff] }
 0x3da   : > { %11098 = vmatprep.mubr.msk.f32.mxu1 %vm485_vm0, %v7266_v11  ;;  %11156 = vmatprep.mubr.msk.f32.mxu0 %vm485_vm0, %v15269_v42  ;;  %v15423_v46 = vadd.f32 %v5535_v21, %v5214_v22  ;;  %v10719_v24 = vpop.f32.mrf.mxu1  ;;  %v7271_v42 = vld [vmem:[#allocation2 + $0xef] sm:$0xff]  ;;  %v7276_v22 = vld [vmem:[#allocation2 + $0x147] sm:$0xff] }
 0x3db   : > { %11207 = vmatprep.subr.mxu1 %v8085_v57  ;;  %v7279_v21 = vld [vmem:[#allocation2 + $0x16f] sm:$0xff] }
 0x3dc   : > { %11208 = vmatpush3.msra.mxu1 %v8085_v57  ;;  %v10777_v20 = vpop.f32.mrf.mxu0  ;;  %v5244_v51 = vpop.f32.mrf.mxu1 }
 0x3dd   : > { %11099 = vmatmul.mubr.msk.f32.gmra.mxu1 %vm485_vm0, %v7267_v17  ;;  %11157 = vmatmul.mubr.msk.f32.gmra.mxu0 %vm485_vm0, %v7657_v40  ;;  %v15427_v63 = vadd.f32 %v10777_v20, %v10713_v41  ;;  %v7670_v20 = vld [vmem:[#allocation2 + $0x148] sm:$0xff] }
 0x3de   : > { %11101 = vmatprep.mubr.msk.f32.mxu1 %vm485_vm0, %v7268_v60  ;;  %11159 = vmatprep.mubr.msk.f32.mxu0 %vm485_vm0, %v7658_v44  ;;  %v5545_v61 = vpop.f32.mrf.mxu0 }
 0x3df   : > { %11209 = vmatprep.subr.mxu1 %v8084_v15  ;;  %v15431_v28 = vadd.f32 %v5545_v61, %v5224_v3  ;;  %v7277_v3 = vld [vmem:[#allocation2 + $0x14f] sm:$0xff] }
 0x3e0   : > { %11210 = vmatpush3.msra.mxu1 %v8084_v15  ;;  %v10722_v10 = vpop.f32.mrf.mxu1  ;;  %v7278_v15 = vld [vmem:[#allocation2 + $0x167] sm:$0xff] }
 0x3e1   : > { %11102 = vmatmul.mubr.msk.f32.gmra.mxu1 %vm485_vm0, %v7269_v5  ;;  %11160 = vmatmul.mubr.msk.f32.gmra.mxu0 %vm485_vm0, %v7659_v62  ;;  %v10780_v45 = vpop.f32.mrf.mxu0  ;;  %v7669_v5 = vld [vmem:[#allocation2 + $0x130] sm:$0xff] }
 0x3e2   : > { %11104 = vmatprep.mubr.msk.f32.mxu1 %vm485_vm0, %v7270_v9  ;;  %11162 = vmatprep.mubr.msk.f32.mxu0 %vm485_vm0, %v7660_v29  ;;  %v15435_v48 = vadd.f32 %v10780_v45, %v10716_v39  ;;  %v5254_v12 = vpop.f32.mrf.mxu1  ;;  %v7668_v39 = vld [vmem:[#allocation2 + $0x128] sm:$0xff] }
 0x3e3   : > { %11211 = vmatprep.subr.mxu1 %v8083_v13  ;;  %v5555_v47 = vpop.f32.mrf.mxu0  ;;  %v7282_v45 = vld [vmem:[#allocation2 + $0x1a7] sm:$0xff] }
 0x3e4   : > { %11212 = vmatpush3.msra.mxu1 %v8083_v13  ;;  %v15439_v35 = vadd.f32 %v5555_v47, %v5234_v31 }
 0x3e5   : > { %11105 = vmatmul.mubr.msk.f32.gmra.mxu1 %vm485_vm0, %v7271_v42  ;;  %11163 = vmatmul.mubr.msk.f32.gmra.mxu0 %vm485_vm0, %v7661_v32  ;;  %v7281_v42 = vld [vmem:[#allocation2 + $0x18f] sm:$0xff] }
 0x3e6   : > { %11107 = vmatprep.mubr.msk.f32.mxu1 %vm485_vm0, %v7272_v49  ;;  %11165 = vmatprep.mubr.msk.f32.mxu0 %vm485_vm0, %v7662_v26  ;;  %v10725_v55 = vpop.f32.mrf.mxu1  ;;  %v7671_v32 = vld [vmem:[#allocation2 + $0x150] sm:$0xff]  ;;  %v7672_v49 = vld [vmem:[#allocation2 + $0x168] sm:$0xff] }
 0x3e7   : > { %11213 = vmatprep.subr.mxu1 %v8082_v53  ;;  %v10783_v14 = vpop.f32.mrf.mxu0 }
 0x3e8   : > { %11214 = vmatpush3.msra.mxu1 %v8082_v53  ;;  %v15443_v50 = vadd.f32 %v10783_v14, %v10719_v24  ;;  %v5264_v54 = vpop.f32.mrf.mxu1  ;;  %v7280_v24 = vld [vmem:[#allocation2 + $0x187] sm:$0xff] }
 0x3e9   : > { %11108 = vmatmul.mubr.msk.f32.gmra.mxu1 %vm485_vm0, %v7273_v4  ;;  %11166 = vmatmul.mubr.msk.f32.gmra.mxu0 %vm485_vm0, %v7663_v7  ;;  %v5565_v52 = vpop.f32.mrf.mxu0  ;;  %v7283_v7 = vld [vmem:[#allocation2 + $0x1af] sm:$0xff] }
 0x3ea   : > { %11110 = vmatprep.mubr.msk.f32.mxu1 %vm485_vm0, %v7274_v8  ;;  %11168 = vmatprep.mubr.msk.f32.mxu0 %vm485_vm0, %v7664_v18  ;;  %v15447_v58 = vadd.f32 %v5565_v52, %v5244_v51  ;;  %v10728_v0 = vpop.f32.mrf.mxu1  ;;  %v7284_v8 = vld [vmem:[#allocation2 + $0x1c7] sm:$0xff] }
 0x3eb   : > { %11215 = vmatprep.subr.mxu1 %v8081_v2  ;;  %v10786_v6 = vpop.f32.mrf.mxu0  ;;  %v7674_v18 = vld [vmem:[#allocation2 + $0x188] sm:$0xff] }
 0x3ec   : > { %11216 = vmatpush3.msra.mxu1 %v8081_v2  ;;  %v15451_v57 = vadd.f32 %v10786_v6, %v10722_v10  ;;  %v5274_v41 = vpop.f32.mrf.mxu1  ;;  %v7673_v2 = vld [vmem:[#allocation2 + $0x170] sm:$0xff] }
 0x3ed   : > { %11111 = vmatmul.mubr.msk.f32.gmra.mxu1 %vm485_vm0, %v7275_v36  ;;  %11169 = vmatmul.mubr.msk.f32.gmra.mxu0 %vm485_vm0, %v7665_v43  ;;  %v5575_v30 = vpop.f32.mrf.mxu0  ;;  %v7675_v6 = vld [vmem:[#allocation2 + $0x190] sm:$0xff] }
 0x3ee   : > { %11113 = vmatprep.mubr.msk.f32.mxu1 %vm485_vm0, %v7276_v22  ;;  %11171 = vmatprep.mubr.msk.f32.mxu0 %vm485_vm0, %v7666_v25  ;;  %v15455_v11 = vadd.f32 %v5575_v30, %v5254_v12  ;;  %v7676_v30 = vld [vmem:[#allocation2 + $0x1a8] sm:$0xff] }
 0x3ef   : > { %v10731_v17 = vpop.f32.mrf.mxu1 }
 0x3f0   : > { %v10789_v40 = vpop.f32.mrf.mxu0 }
 0x3f1   : > { %11114 = vmatmul.mubr.msk.f32.gmra.mxu1 %vm485_vm0, %v7277_v3  ;;  %11172 = vmatmul.mubr.msk.f32.gmra.mxu0 %vm485_vm0, %v7667_v27  ;;  %v15459_v19 = vadd.f32 %v10789_v40, %v10725_v55  ;;  %v5284_v60 = vpop.f32.mrf.mxu1 }
 0x3f2   : > { %11116 = vmatprep.mubr.msk.f32.mxu1 %vm485_vm0, %v7278_v15  ;;  %11174 = vmatprep.mubr.msk.f32.mxu0 %vm485_vm0, %v7668_v39  ;;  %v5585_v44 = vpop.f32.mrf.mxu0  ;;  %v7287_v15 = vld [vmem:[#allocation2 + $0x1ef] sm:$0xff] }
 0x3f3   : > { %v15463_v31 = vadd.f32 %v5585_v44, %v5264_v54  ;;  %v10734_v62 = vpop.f32.mrf.mxu1  ;;  %v7677_v39 = vld [vmem:[#allocation2 + $0x1b0] sm:$0xff] }
 0x3f4   : > { %v10792_v13 = vpop.f32.mrf.mxu0 }
 0x3f5   : > { %11117 = vmatmul.mubr.msk.f32.gmra.mxu1 %vm485_vm0, %v7279_v21  ;;  %11175 = vmatmul.mubr.msk.f32.gmra.mxu0 %vm485_vm0, %v7669_v5  ;;  %v15467_v9 = vadd.f32 %v10792_v13, %v10728_v0  ;;  %v5294_v29 = vpop.f32.mrf.mxu1  ;;  %v7285_v0 = vld [vmem:[#allocation2 + $0x1cf] sm:$0xff] }
 0x3f6   : > { %11119 = vmatprep.mubr.msk.f32.mxu1 %vm485_vm0, %v7280_v24  ;;  %11177 = vmatprep.mubr.msk.f32.mxu0 %vm485_vm0, %v7670_v20  ;;  %v5595_v51 = vpop.f32.mrf.mxu0  ;;  %v7678_v21 = vld [vmem:[#allocation2 + $0x1c8] sm:$0xff]  ;;  %v7679_v20 = vld [vmem:[#allocation2 + $0x1d0] sm:$0xff] }
 0x3f7   : > { %v15471_v61 = vadd.f32 %v5595_v51, %v5274_v41  ;;  %v7286_v41 = vld [vmem:[#allocation2 + $0x1e7] sm:$0xff] }
 0x3f8   : > { %v10737_v53 = vpop.f32.mrf.mxu1 }
 0x3f9   : > { %v10795_v10 = vpop.f32.mrf.mxu0  ;;  %11120 = vmatmul.mubr.msk.f32.gmra.mxu1 %vm485_vm0, %v7281_v42  ;;  %11178 = vmatmul.mubr.msk.f32.gmra.mxu0 %vm485_vm0, %v7671_v32  ;;  %v7290_v42 = vld [vmem:[#allocation2 + $0x227] sm:$0xff] }
 0x3fa   : > { %v15475_v26 = vadd.f32 %v10795_v10, %v10731_v17  ;;  %11122 = vmatprep.mubr.msk.f32.mxu1 %vm485_vm0, %v7282_v45  ;;  %11180 = vmatprep.mubr.msk.f32.mxu0 %vm485_vm0, %v7672_v49  ;;  %v5304_v12 = vpop.f32.mrf.mxu1  ;;  %v7680_v32 = vld [vmem:[#allocation2 + $0x1e8] sm:$0xff] }
 0x3fb   : > { %v5605_v47 = vpop.f32.mrf.mxu0  ;;  %v7291_v49 = vld [vmem:[#allocation2 + $0x22f] sm:$0xff] }
 0x3fc   : > { %v15479_v4 = vadd.f32 %v5605_v47, %v5284_v60  ;;  %v10740_v55 = vpop.f32.mrf.mxu1 }
 0x3fd   : > { %v10798_v14 = vpop.f32.mrf.mxu0  ;;  %11123 = vmatmul.mubr.msk.f32.gmra.mxu1 %vm485_vm0, %v7283_v7  ;;  %11181 = vmatmul.mubr.msk.f32.gmra.mxu0 %vm485_vm0, %v7673_v2 }
 0x3fe   : > { %v15483_v54 = vadd.f32 %v10798_v14, %v10734_v62  ;;  %11125 = vmatprep.mubr.msk.f32.mxu1 %vm485_vm0, %v7284_v8  ;;  %11183 = vmatprep.mubr.msk.f32.mxu0 %vm485_vm0, %v7674_v18  ;;  %v5314_v52 = vpop.f32.mrf.mxu1  ;;  %v8049_v18 = vld [vmem:[#allocation2 + $0x51] sm:$0xff] }
 0x3ff   : > { %v5615_v36 = vpop.f32.mrf.mxu0 }
 0x400   : > { %v15487_v43 = vadd.f32 %v5615_v36, %v5294_v29  ;;  %v10743_v22 = vpop.f32.mrf.mxu1 }
 0x401   : > { %v10801_v25 = vpop.f32.mrf.mxu0  ;;  %11126 = vmatmul.mubr.msk.f32.gmra.mxu1 %vm485_vm0, %v7285_v0  ;;  %11184 = vmatmul.mubr.msk.f32.gmra.mxu0 %vm485_vm0, %v7675_v6  ;;  %v7684_v0 = vld [vmem:[#allocation2 + $0x228] sm:$0xff] }
 0x402   : > { %v15491_v3 = vadd.f32 %v10801_v25, %v10737_v53  ;;  %11128 = vmatprep.mubr.msk.f32.mxu1 %vm485_vm0, %v7286_v41  ;;  %11186 = vmatprep.mubr.msk.f32.mxu0 %vm485_vm0, %v7676_v30  ;;  %v5324_v27 = vpop.f32.mrf.mxu1  ;;  %v8050_v6 = vld [vmem:[#allocation2 + $0x69] sm:$0xff] }
 0x403   : > { %v5625_v17 = vpop.f32.mrf.mxu0 }
 0x404   : > { %v15495_v40 = vadd.f32 %v5625_v17, %v5304_v12  ;;  %v10746_v60 = vpop.f32.mrf.mxu1  ;;  %v7681_v12 = vld [vmem:[#allocation2 + $0x1f0] sm:$0xff] }
 0x405   : > { %v10804_v44 = vpop.f32.mrf.mxu0  ;;  %11129 = vmatmul.mubr.msk.f32.gmra.mxu1 %vm485_vm0, %v7287_v15  ;;  %11187 = vmatmul.mubr.msk.f32.gmra.mxu0 %vm485_vm0, %v7677_v39  ;;  %v7685_v17 = vld [vmem:[#allocation2 + $0x230] sm:$0xff] }
 0x406   : > { %v15499_v5 = vadd.f32 %v10804_v44, %v10740_v55  ;;  %11131 = vmatprep.mubr.msk.f32.mxu1 %vm485_vm0, %v15252_v37  ;;  %11189 = vmatprep.mubr.msk.f32.mxu0 %vm485_vm0, %v7678_v21  ;;  %v5334_v62 = vpop.f32.mrf.mxu1 }
 0x407   : > { %v5635_v13 = vpop.f32.mrf.mxu0 }
 0x408   : > { %v15504_v24 = vadd.f32 %v5635_v13, %v5314_v52  ;;  %v10749_v29 = vpop.f32.mrf.mxu1 }
 0x409   : > { %v10807_v51 = vpop.f32.mrf.mxu0  ;;  %11132 = vmatmul.mubr.msk.f32.gmra.mxu1 %vm485_vm0, %v15261_v56  ;;  %11190 = vmatmul.mubr.msk.f32.gmra.mxu0 %vm485_vm0, %v7679_v20  ;;  %v8048_v56 = vld [vmem:[#allocation2 + $0x49] sm:$0xff]  ;;  %v8053_v20 = vld [vmem:[#allocation2 + $0x91] sm:$0xff] }
 0x40a   : > { %v15509_v53 = vadd.f32 %v10807_v51, %v10743_v22  ;;  %11134 = vmatprep.mubr.msk.f32.mxu1 %vm485_vm0, %v7290_v42  ;;  %11192 = vmatprep.mubr.msk.f32.mxu0 %vm485_vm0, %v7680_v32  ;;  %v5344_v37 = vpop.f32.mrf.mxu1  ;;  %v8054_v42 = vld [vmem:[#allocation2 + $0xa9] sm:$0xff] }
 0x40b   : > { %v5645_v10 = vpop.f32.mrf.mxu0 }
 0x40c   : > { %v15513_v45 = vadd.f32 %v5645_v10, %v5324_v27  ;;  %v10752_v47 = vpop.f32.mrf.mxu1 }
 0x40d   : > { %v10810_v7 = vpop.f32.mrf.mxu0  ;;  %11135 = vmatmul.mubr.msk.f32.gmra.mxu1 %vm485_vm0, %v7291_v49  ;;  %11193 = vmatmul.mubr.msk.f32.gmra.mxu0 %vm485_vm0, %v7681_v12 }
 0x40e   : > { %v15517_v2 = vadd.f32 %v10810_v7, %v10746_v60  ;;  %11195 = vmatprep.mubr.msk.f32.mxu0 %vm485_vm0, %v15376_v1  ;;  %11217 = vmatprep.mubr.msk.f32.mxu1 %vm485_vm0, %v8048_v56  ;;  %v5354_v55 = vpop.f32.mrf.mxu1  ;;  %v8052_v60 = vld [vmem:[#allocation2 + $0x89] sm:$0xff] }
 0x40f   : > { %v5655_v14 = vpop.f32.mrf.mxu0  ;;  %v8056_v56 = vld [vmem:[#allocation2 + $0xc9] sm:$0xff] }
 0x410   : > { %v15522_v8 = vadd.f32 %v5655_v14, %v5334_v62  ;;  %v10835_v36 = vpop.f32.mrf.mxu1 }
 0x411   : > { %v10813_v52 = vpop.f32.mrf.mxu0  ;;  %11196 = vmatmul.mubr.msk.f32.gmra.mxu0 %vm485_vm0, %v15382_v23  ;;  %11218 = vmatmul.mubr.msk.f32.vlgmr.msra.gmra.mxu1 %vm485_vm0, %v8049_v18  ;;  %v6047_v1 = vadd.f32 %v10835_v36, %v15410_v38  ;;  %v8051_v23 = vld [vmem:[#allocation2 + $0x71] sm:$0xff] }
 0x412   : > { %v15527_v22 = vadd.f32 %v10813_v52, %v10749_v29  ;;  %11198 = vmatprep.mubr.msk.f32.mxu0 %vm485_vm0, %v7684_v0  ;;  %11220 = vmatprep.mubr.msk.f32.mxu1 %vm485_vm0, %v8050_v6  ;;  %v5887_v41 = vpop.f32.mrf.mxu1 }
 0x413   : > { %v5665_v25 = vpop.f32.mrf.mxu0  ;;  %v6046_v27 = vadd.f32 %v5887_v41, %v15415_v59 }
 0x414   : > { %v15532_v30 = vadd.f32 %v5665_v25, %v5344_v37 }
 0x415   : > { %v10816_v15 = vpop.f32.mrf.mxu0  ;;  %v10838_v39 = vpop.f32.mrf.mxu1  ;;  %11199 = vmatmul.mubr.msk.f32.gmra.mxu0 %vm485_vm0, %v7685_v17  ;;  %11221 = vmatmul.mubr.msk.f32.gmra.mxu1 %vm485_vm0, %v8051_v23 }
 0x416   : > { %v15537_v38 = vadd.f32 %v10816_v15, %v10752_v47  ;;  %v6049_v44 = vadd.f32 %v10838_v39, %v15419_v34  ;;  %11223 = vmatprep.mubr.msk.f32.mxu1 %vm485_vm0, %v8052_v60  ;;  %v8055_v47 = vld [vmem:[#allocation2 + $0xb1] sm:$0xff]  ;;  %v8060_v60 = vld [vmem:[#allocation2 + $0x109] sm:$0xff] }
 0x417   : > { %v5675_v21 = vpop.f32.mrf.mxu0  ;;  %v5897_v62 = vpop.f32.mrf.mxu1 }
 0x418   : > { %v15541_v13 = vadd.f32 %v5675_v21, %v5354_v55  ;;  %v6048_v59 = vadd.f32 %v5897_v62, %v15423_v46 }
 0x419   : > { %v10841_v29 = vpop.f32.mrf.mxu1  ;;  %v10899_v51 = vpop.f32.mrf.mxu0  ;;  %11224 = vmatmul.mubr.msk.f32.gmra.mxu1 %vm485_vm0, %v8053_v20 }
 0x41a   : > { %v6051_v32 = vadd.f32 %v10841_v29, %v15427_v63  ;;  %v15546_v37 = vadd.f32 %v10899_v51, %v6047_v1  ;;  %11226 = vmatprep.mubr.msk.f32.mxu1 %vm485_vm0, %v8054_v42  ;;  %v8058_v1 = vld [vmem:[#allocation2 + $0xe9] sm:$0xff] }
 0x41b   : > { %v5907_v34 = vpop.f32.mrf.mxu1  ;;  %v6281_v10 = vpop.f32.mrf.mxu0  ;;  %v8062_v42 = vld [vmem:[#allocation2 + $0x129] sm:$0xff] }
 0x41c   : > { %v6050_v49 = vadd.f32 %v5907_v34, %v15431_v28  ;;  %v15550_v12 = vadd.f32 %v6281_v10, %v6046_v27  ;;  %v8057_v28 = vld [vmem:[#allocation2 + $0xd1] sm:$0xff] }
 0x41d   : > { %v10844_v46 = vpop.f32.mrf.mxu1  ;;  %v10902_v7 = vpop.f32.mrf.mxu0  ;;  %11227 = vmatmul.mubr.msk.f32.gmra.mxu1 %vm485_vm0, %v8055_v47 }
 0x41e   : > { %v6053_v55 = vadd.f32 %v10844_v46, %v15435_v48  ;;  %v15554_v14 = vadd.f32 %v10902_v7, %v6049_v44  ;;  %11229 = vmatprep.mubr.msk.f32.mxu1 %vm485_vm0, %v8056_v56  ;;  %v8064_v56 = vld [vmem:[#allocation2 + $0x149] sm:$0xff] }
 0x41f   : > { %v5917_v63 = vpop.f32.mrf.mxu1  ;;  %v6291_v18 = vpop.f32.mrf.mxu0 }
 0x420   : > { %v6052_v52 = vadd.f32 %v5917_v63, %v15439_v35  ;;  %v15558_v36 = vadd.f32 %v6291_v18, %v6048_v59  ;;  %v8059_v35 = vld [vmem:[#allocation2 + $0xf1] sm:$0xff] }
 0x421   : > { %v10847_v0 = vpop.f32.mrf.mxu1  ;;  %v10905_v6 = vpop.f32.mrf.mxu0  ;;  %11230 = vmatmul.mubr.msk.f32.gmra.mxu1 %vm485_vm0, %v8057_v28 }
 0x422   : > { %v6055_v25 = vadd.f32 %v10847_v0, %v15443_v50  ;;  %v15562_v41 = vadd.f32 %v10905_v6, %v6051_v32  ;;  %11232 = vmatprep.mubr.msk.f32.mxu1 %vm485_vm0, %v8058_v1  ;;  %v8066_v1 = vld [vmem:[#allocation2 + $0x169] sm:$0xff] }
 0x423   : > { %v5927_v48 = vpop.f32.mrf.mxu1  ;;  %v6301_v27 = vpop.f32.mrf.mxu0 }
 0x424   : > { %v6054_v17 = vadd.f32 %v5927_v48, %v15447_v58  ;;  %v15566_v23 = vadd.f32 %v6301_v27, %v6050_v49  ;;  %v8061_v58 = vld [vmem:[#allocation2 + $0x111] sm:$0xff] }
 0x425   : > { %v10850_v15 = vpop.f32.mrf.mxu1  ;;  %v10908_v39 = vpop.f32.mrf.mxu0  ;;  %11233 = vmatmul.mubr.msk.f32.gmra.mxu1 %vm485_vm0, %v8059_v35 }
 0x426   : > { %v6057_v44 = vadd.f32 %v10850_v15, %v15451_v57  ;;  %v15570_v21 = vadd.f32 %v10908_v39, %v6053_v55  ;;  %11235 = vmatprep.mubr.msk.f32.mxu1 %vm485_vm0, %v8060_v60  ;;  %v8068_v60 = vld [vmem:[#allocation2 + $0x189] sm:$0xff] }
 0x427   : > { %v5937_v50 = vpop.f32.mrf.mxu1  ;;  %v6311_v62 = vpop.f32.mrf.mxu0 }
 0x428   : > { %v6056_v59 = vadd.f32 %v5937_v50, %v15455_v11  ;;  %v15574_v20 = vadd.f32 %v6311_v62, %v6052_v52  ;;  %v8063_v11 = vld [vmem:[#allocation2 + $0x131] sm:$0xff] }
 0x429   : > { %v10853_v29 = vpop.f32.mrf.mxu1  ;;  %v10911_v51 = vpop.f32.mrf.mxu0  ;;  %11236 = vmatmul.mubr.msk.f32.gmra.mxu1 %vm485_vm0, %v8061_v58 }
 0x42a   : > { %v6059_v32 = vadd.f32 %v10853_v29, %v15459_v19  ;;  %v15578_v34 = vadd.f32 %v10911_v51, %v6055_v25  ;;  %11238 = vmatprep.mubr.msk.f32.mxu1 %vm485_vm0, %v8062_v42  ;;  %v8070_v42 = vld [vmem:[#allocation2 + $0x1a9] sm:$0xff] }
 0x42b   : > { %v5947_v57 = vpop.f32.mrf.mxu1  ;;  %v6321_v10 = vpop.f32.mrf.mxu0 }
 0x42c   : > { %v6058_v49 = vadd.f32 %v5947_v57, %v15463_v31  ;;  %v15582_v47 = vadd.f32 %v6321_v10, %v6054_v17  ;;  %v8065_v31 = vld [vmem:[#allocation2 + $0x151] sm:$0xff] }
 0x42d   : > { %v10856_v46 = vpop.f32.mrf.mxu1  ;;  %v10914_v7 = vpop.f32.mrf.mxu0  ;;  %11239 = vmatmul.mubr.msk.f32.gmra.mxu1 %vm485_vm0, %v8063_v11 }
 0x42e   : > { %v6061_v55 = vadd.f32 %v10856_v46, %v15467_v9  ;;  %v15586_v63 = vadd.f32 %v10914_v7, %v6057_v44  ;;  %11241 = vmatprep.mubr.msk.f32.mxu1 %vm485_vm0, %v8064_v56  ;;  %v8072_v56 = vld [vmem:[#allocation2 + $0x1c9] sm:$0xff] }
 0x42f   : > { %v5957_v19 = vpop.f32.mrf.mxu1  ;;  %v6331_v18 = vpop.f32.mrf.mxu0 }
 0x430   : > { %v6060_v52 = vadd.f32 %v5957_v19, %v15471_v61  ;;  %v15590_v28 = vadd.f32 %v6331_v18, %v6056_v59  ;;  %v8067_v61 = vld [vmem:[#allocation2 + $0x171] sm:$0xff] }
 0x431   : > { %v10859_v0 = vpop.f32.mrf.mxu1  ;;  %v10917_v6 = vpop.f32.mrf.mxu0  ;;  %11242 = vmatmul.mubr.msk.f32.gmra.mxu1 %vm485_vm0, %v8065_v31 }
 0x432   : > { %v6063_v25 = vadd.f32 %v10859_v0, %v15475_v26  ;;  %v15594_v48 = vadd.f32 %v10917_v6, %v6059_v32  ;;  %11244 = vmatprep.mubr.msk.f32.mxu1 %vm485_vm0, %v8066_v1  ;;  %v8074_v1 = vld [vmem:[#allocation2 + $0x1e9] sm:$0xff] }
 0x433   : > { %v5967_v9 = vpop.f32.mrf.mxu1  ;;  %v6341_v27 = vpop.f32.mrf.mxu0 }
 0x434   : > { %v6062_v17 = vadd.f32 %v5967_v9, %v15479_v4  ;;  %v15598_v35 = vadd.f32 %v6341_v27, %v6058_v49  ;;  %v8069_v4 = vld [vmem:[#allocation2 + $0x191] sm:$0xff] }
 0x435   : > { %v10862_v15 = vpop.f32.mrf.mxu1  ;;  %v10920_v39 = vpop.f32.mrf.mxu0  ;;  %11245 = vmatmul.mubr.msk.f32.gmra.mxu1 %vm485_vm0, %v8067_v61 }
 0x436   : > { %v6065_v44 = vadd.f32 %v10862_v15, %v15483_v54  ;;  %v15602_v50 = vadd.f32 %v10920_v39, %v6061_v55  ;;  %11247 = vmatprep.mubr.msk.f32.mxu1 %vm485_vm0, %v8068_v60 }
 0x437   : > { %v5977_v26 = vpop.f32.mrf.mxu1  ;;  %v6351_v62 = vpop.f32.mrf.mxu0 }
 0x438   : > { %v6064_v59 = vadd.f32 %v5977_v26, %v15487_v43  ;;  %v15606_v58 = vadd.f32 %v6351_v62, %v6060_v52  ;;  %v8071_v43 = vld [vmem:[#allocation2 + $0x1b1] sm:$0xff] }
 0x439   : > { %v10865_v29 = vpop.f32.mrf.mxu1  ;;  %v10923_v51 = vpop.f32.mrf.mxu0  ;;  %11248 = vmatmul.mubr.msk.f32.gmra.mxu1 %vm485_vm0, %v8069_v4 }
 0x43a   : > { %v6067_v32 = vadd.f32 %v10865_v29, %v15491_v3  ;;  %v15610_v57 = vadd.f32 %v10923_v51, %v6063_v25  ;;  %11250 = vmatprep.mubr.msk.f32.mxu1 %vm485_vm0, %v8070_v42  ;;  %v8078_v29 = vld [vmem:[#allocation2 + $0x229] sm:$0xff] }
 0x43b   : > { %v5987_v54 = vpop.f32.mrf.mxu1  ;;  %v6361_v10 = vpop.f32.mrf.mxu0 }
 0x43c   : > { %v6066_v49 = vadd.f32 %v5987_v54, %v15495_v40  ;;  %v15614_v11 = vadd.f32 %v6361_v10, %v6062_v17  ;;  %v8073_v40 = vld [vmem:[#allocation2 + $0x1d1] sm:$0xff] }
 0x43d   : > { %v10868_v46 = vpop.f32.mrf.mxu1  ;;  %v10926_v7 = vpop.f32.mrf.mxu0  ;;  %11251 = vmatmul.mubr.msk.f32.gmra.mxu1 %vm485_vm0, %v8071_v43 }
 0x43e   : > { %v6069_v55 = vadd.f32 %v10868_v46, %v15499_v5  ;;  %v15618_v19 = vadd.f32 %v10926_v7, %v6065_v44  ;;  %11253 = vmatprep.mubr.msk.f32.mxu1 %vm485_vm0, %v8072_v56 }
 0x43f   : > { %v5997_v3 = vpop.f32.mrf.mxu1  ;;  %v6371_v18 = vpop.f32.mrf.mxu0 }
 0x440   : > { %v6068_v52 = vadd.f32 %v5997_v3, %v15504_v24  ;;  %v15622_v31 = vadd.f32 %v6371_v18, %v6064_v59  ;;  %v8075_v24 = vld [vmem:[#allocation2 + $0x1f1] sm:$0xff] }
 0x441   : > { %v10871_v0 = vpop.f32.mrf.mxu1  ;;  %v10929_v6 = vpop.f32.mrf.mxu0  ;;  %11254 = vmatmul.mubr.msk.f32.gmra.mxu1 %vm485_vm0, %v8073_v40 }
 0x442   : > { %v6071_v25 = vadd.f32 %v10871_v0, %v15509_v53  ;;  %v15626_v9 = vadd.f32 %v10929_v6, %v6067_v32  ;;  %11256 = vmatprep.mubr.msk.f32.mxu1 %vm485_vm0, %v8074_v1 }
 0x443   : > { %v6007_v5 = vpop.f32.mrf.mxu1  ;;  %v6381_v27 = vpop.f32.mrf.mxu0 }
 0x444   : > { %v6070_v17 = vadd.f32 %v6007_v5, %v15513_v45  ;;  %v15630_v61 = vadd.f32 %v6381_v27, %v6066_v49 }
 0x445   : > { %v10874_v15 = vpop.f32.mrf.mxu1  ;;  %v10932_v39 = vpop.f32.mrf.mxu0  ;;  %11257 = vmatmul.mubr.msk.f32.gmra.mxu1 %vm485_vm0, %v8075_v24 }
 0x446   : > { %v6073_v60 = vadd.f32 %v10874_v15, %v15517_v2  ;;  %v15634_v44 = vadd.f32 %v10932_v39, %v6069_v55  ;;  %11259 = vmatprep.mubr.msk.f32.mxu1 %vm485_vm0, %v15394_v16 }
 0x447   : > { %v6017_v53 = vpop.f32.mrf.mxu1  ;;  %v6391_v26 = vpop.f32.mrf.mxu0 }
 0x448   : > { %v6072_v62 = vadd.f32 %v6017_v53, %v15522_v8  ;;  %v15639_v59 = vadd.f32 %v6391_v26, %v6068_v52  ;;  %v8079_v8 = vld [vmem:[#allocation2 + $0x231] sm:$0xff] }
 0x449   : > { %v10877_v45 = vpop.f32.mrf.mxu1  ;;  %v10935_v4 = vpop.f32.mrf.mxu0  ;;  %11260 = vmatmul.mubr.msk.f32.gmra.mxu1 %vm485_vm0, %v15399_v33 }
 0x44a   : > { %v6075_v51 = vadd.f32 %v10877_v45, %v15527_v22  ;;  %v15644_v2 = vadd.f32 %v10935_v4, %v6071_v25  ;;  %11262 = vmatprep.mubr.msk.f32.mxu1 %vm485_vm0, %v8078_v29 }
 0x44b   : > { %v6027_v42 = vpop.f32.mrf.mxu1  ;;  %v6401_v16 = vpop.f32.mrf.mxu0 }
 0x44c   : > { %v6074_v32 = vadd.f32 %v6027_v42, %v15532_v30  ;;  %v15648_v54 = vadd.f32 %v6401_v16, %v6070_v17 }
 0x44d   : > { %v10880_v10 = vpop.f32.mrf.mxu1  ;;  %v10938_v49 = vpop.f32.mrf.mxu0  ;;  %11263 = vmatmul.mubr.msk.f32.gmra.mxu1 %vm485_vm0, %v8079_v8 }
 0x44e   : > { %v6077_v33 = vadd.f32 %v10880_v10, %v15537_v38  ;;  %v15652_v43 = vadd.f32 %v10938_v49, %v6073_v60 }
 0x44f   : > { %v6037_v22 = vpop.f32.mrf.mxu1  ;;  %v6411_v46 = vpop.f32.mrf.mxu0 }
 0x450   : > { %v6076_v7 = vadd.f32 %v6037_v22, %v15541_v13  ;;  %v15655_v56 = vadd.f32 %v6411_v46, %v6072_v62 }
 0x451   : > { %v10941_v55 = vpop.f32.mrf.mxu0  ;;  %v10963_v3 = vpop.f32.mrf.mxu1 }
 0x452   : > { %v15657_v30 = vadd.f32 %v10941_v55, %v6075_v51  ;;  %v15660_v18 = vadd.f32 %v10963_v3, %v15546_v37 }
 0x453   : > { %v6421_v52 = vpop.f32.mrf.mxu0  ;;  %v6675_v40 = vpop.f32.mrf.mxu1 }
 0x454   : > { %v15662_v0 = vadd.f32 %v6421_v52, %v6074_v32  ;;  %v15665_v38 = vadd.f32 %v6675_v40, %v15550_v12 }
 0x455   : > { %v10944_v6 = vpop.f32.mrf.mxu0  ;;  %v10966_v1 = vpop.f32.mrf.mxu1 }
 0x456   : > { %v15667_v25 = vadd.f32 %v10944_v6, %v6077_v33  ;;  %v15670_v13 = vadd.f32 %v10966_v1, %v15554_v14 }
 0x457   : > { %v6431_v5 = vpop.f32.mrf.mxu0  ;;  %v6685_v27 = vpop.f32.mrf.mxu1 }
 0x458   : > { %v15672_v17 = vadd.f32 %v6431_v5, %v6076_v7  ;;  %v15675_v37 = vadd.f32 %v6685_v27, %v15558_v36 }
 0x459   : > { %v10969_v24 = vpop.f32.mrf.mxu1  ;;  %v15677_v15 = vpop.f32.mrf.mxu0 }
 0x45a   : > { %v15680_v12 = vadd.f32 %v10969_v24, %v15562_v41 }
 0x45b   : > { %v6695_v39 = vpop.f32.mrf.mxu1  ;;  %v15682_v60 = vpop.f32.mrf.mxu0 }
 0x45c   : > { %v15685_v53 = vadd.f32 %v6695_v39, %v15566_v23 }
 0x45d   : > { %v10972_v14 = vpop.f32.mrf.mxu1  ;;  %v15687_v26 = vpop.f32.mrf.mxu0 }
 0x45e   : > { %v15690_v62 = vadd.f32 %v10972_v14, %v15570_v21 }
 0x45f   : > { %v6705_v36 = vpop.f32.mrf.mxu1  ;;  %v15692_v45 = vpop.f32.mrf.mxu0 }
 0x460   : > { %v15695_v4 = vadd.f32 %v6705_v36, %v15574_v20 }
 0x461   : > { %v10975_v41 = vpop.f32.mrf.mxu1  ;;  %v15697_v29 = vpop.f32.mrf.mxu0 }
 0x462   : > { %v15700_v51 = vadd.f32 %v10975_v41, %v15578_v34 }
 0x463   : > { %v6715_v23 = vpop.f32.mrf.mxu1  ;;  %v15702_v42 = vpop.f32.mrf.mxu0 }
 0x464   : > { %v15705_v16 = vadd.f32 %v6715_v23, %v15582_v47 }
 0x465   : > { %v10978_v21 = vpop.f32.mrf.mxu1  ;;  %v15707_v32 = vpop.f32.mrf.mxu0 }
 0x466   : > { %v15710_v8 = vadd.f32 %v10978_v21, %v15586_v63 }
 0x467   : > { %v6725_v20 = vpop.f32.mrf.mxu1  ;;  %v15712_v10 = vpop.f32.mrf.mxu0 }
 0x468   : > { %v15715_v49 = vadd.f32 %v6725_v20, %v15590_v28 }
 0x469   : > { %v10981_v34 = vpop.f32.mrf.mxu1  ;;  %v15717_v33 = vpop.f32.mrf.mxu0 }
 0x46a   : > { %v15720_v22 = vadd.f32 %v10981_v34, %v15594_v48 }
 0x46b   : > { %v6735_v47 = vpop.f32.mrf.mxu1  ;;  %v15722_v46 = vpop.f32.mrf.mxu0 }
 0x46c   : > { %17061 = vst [vmem:[#allocation123_spill] sm:$0xff] %v15720_v22  ;;  %v15725_v7 = vadd.f32 %v6735_v47, %v15598_v35 }
 0x46d   : > { %v10984_v63 = vpop.f32.mrf.mxu1  ;;  %v15727_v55 = vpop.f32.mrf.mxu0 }
 0x46e   : > { %17062 = vst [vmem:[#allocation95_spill] sm:$0xff] %v15725_v7  ;;  %v15730_v3 = vadd.f32 %v10984_v63, %v15602_v50 }
 0x46f   : > { %v6745_v28 = vpop.f32.mrf.mxu1  ;;  %v15732_v52 = vpop.f32.mrf.mxu0 }
 0x470   : > { %17063 = vst [vmem:[#allocation104_spill] sm:$0xff] %v15730_v3  ;;  %v15735_v40 = vadd.f32 %v6745_v28, %v15606_v58 }
 0x471   : > { %v10987_v48 = vpop.f32.mrf.mxu1  ;;  %v15737_v6 = vpop.f32.mrf.mxu0 }
 0x472   : > { %17064 = vst [vmem:[#allocation105_spill] sm:$0xff] %v15735_v40  ;;  %17065 = vst [vmem:[#allocation125_spill] sm:$0xff] %v15737_v6  ;;  %v15740_v1 = vadd.f32 %v10987_v48, %v15610_v57 }
 0x473   : > { %v6755_v35 = vpop.f32.mrf.mxu1  ;;  %v15742_v5 = vpop.f32.mrf.mxu0 }
 0x474   : > { %17066 = vst [vmem:[#allocation128_spill] sm:$0xff] %v15740_v1  ;;  %17067 = vst [vmem:[#allocation130_spill] sm:$0xff] %v15742_v5  ;;  %v15745_v27 = vadd.f32 %v6755_v35, %v15614_v11 }
 0x475   : > { %v10990_v50 = vpop.f32.mrf.mxu1  ;;  %v15747_v24 = vpop.f32.mrf.mxu0 }
 0x476   : > { %17068 = vst [vmem:[#allocation106_spill] sm:$0xff] %v15745_v27  ;;  %17069 = vst [vmem:[#allocation131_spill] sm:$0xff] %v15747_v24  ;;  %v15750_v39 = vadd.f32 %v10990_v50, %v15618_v19 }
 0x477   : > { %v6765_v58 = vpop.f32.mrf.mxu1  ;;  %v15752_v14 = vpop.f32.mrf.mxu0 }
 0x478   : > { %17070 = vst [vmem:[#allocation140_spill] sm:$0xff] %v15750_v39  ;;  %17071 = vst [vmem:[#allocation132_spill] sm:$0xff] %v15752_v14  ;;  %v15755_v36 = vadd.f32 %v6765_v58, %v15622_v31 }
 0x479   : > { %v10993_v57 = vpop.f32.mrf.mxu1  ;;  %v15757_v41 = vpop.f32.mrf.mxu0 }
 0x47a   : > { %17072 = vst [vmem:[#allocation99_spill] sm:$0xff] %v15755_v36  ;;  %17073 = vst [vmem:[#allocation108_spill] sm:$0xff] %v15757_v41  ;;  %v15760_v23 = vadd.f32 %v10993_v57, %v15626_v9 }
 0x47b   : > { %v6775_v11 = vpop.f32.mrf.mxu1  ;;  %v15762_v21 = vpop.f32.mrf.mxu0 }
 0x47c   : > { %17074 = vst [vmem:[#allocation109_spill] sm:$0xff] %v15760_v23  ;;  %17075 = vst [vmem:[#allocation133_spill] sm:$0xff] %v15762_v21  ;;  %v15765_v20 = vadd.f32 %v6775_v11, %v15630_v61 }
 0x47d   : > { %v10996_v19 = vpop.f32.mrf.mxu1  ;;  %v15767_v34 = vpop.f32.mrf.mxu0 }
 0x47e   : > { %17076 = vst [vmem:[#allocation134_spill] sm:$0xff] %v15765_v20  ;;  %17077 = vst [vmem:[#allocation85_spill] sm:$0xff] %v15767_v34  ;;  %v15770_v47 = vadd.f32 %v10996_v19, %v15634_v44 }
 0x47f   : > { %v6785_v31 = vpop.f32.mrf.mxu1  ;;  %v15772_v63 = vpop.f32.mrf.mxu0 }
 0x480   : > { %17078 = vst [vmem:[#allocation135_spill] sm:$0xff] %v15770_v47  ;;  %17079 = vst [vmem:[#allocation55_spill] sm:$0xff] %v15772_v63  ;;  %v15775_v28 = vadd.f32 %v6785_v31, %v15639_v59 }
 0x481   : > { %v10999_v9 = vpop.f32.mrf.mxu1  ;;  %v15777_v48 = vpop.f32.mrf.mxu0 }
 0x482   : > { %17080 = vst [vmem:[#allocation136_spill] sm:$0xff] %v15775_v28  ;;  %17081 = vst [vmem:[#allocation110_spill] sm:$0xff] %v15777_v48  ;;  %v15780_v35 = vadd.f32 %v10999_v9, %v15644_v2 }
 0x483   : > { %v6795_v61 = vpop.f32.mrf.mxu1  ;;  %v15782_v50 = vpop.f32.mrf.mxu0 }
 0x484   : > { %17082 = vst [vmem:[#allocation64_spill] sm:$0xff] %v15780_v35  ;;  %17083 = vst [vmem:[#allocation137_spill] sm:$0xff] %v15782_v50  ;;  %v15785_v58 = vadd.f32 %v6795_v61, %v15648_v54 }
 0x485   : > { %v11002_v44 = vpop.f32.mrf.mxu1  ;;  %v15787_v57 = vpop.f32.mrf.mxu0 }
 0x486   : > { %17084 = vst [vmem:[#allocation59_spill] sm:$0xff] %v15785_v58  ;;  %17085 = vst [vmem:[#allocation103_spill] sm:$0xff] %v15787_v57  ;;  %v15790_v11 = vadd.f32 %v11002_v44, %v15652_v43 }
 0x487   : > { %v6805_v59 = vpop.f32.mrf.mxu1  ;;  %v15792_v19 = vpop.f32.mrf.mxu0 }
 0x488   : > { %17086 = vst [vmem:[#allocation111_spill] sm:$0xff] %v15790_v11  ;;  %17087 = vst [vmem:[#allocation71_spill] sm:$0xff] %v15792_v19  ;;  %v15795_v31 = vadd.f32 %v6805_v59, %v15655_v56 }
 0x489   : > { %v11005_v2 = vpop.f32.mrf.mxu1  ;;  %v15797_v9 = vpop.f32.mrf.mxu0 }
 0x48a   : > { %17088 = vst [vmem:[#allocation138_spill] sm:$0xff] %v15795_v31  ;;  %17089 = vst [vmem:[#allocation72_spill] sm:$0xff] %v15797_v9  ;;  %v15800_v35 = vadd.f32 %v11005_v2, %v15657_v30 }
 0x48b   : > { %v6815_v54 = vpop.f32.mrf.mxu1  ;;  %v15802_v61 = vpop.f32.mrf.mxu0 }
 0x48c   : > { %17090 = vst [vmem:[#allocation139_spill] sm:$0xff] %v15800_v35  ;;  %17091 = vst [vmem:[#allocation60_spill] sm:$0xff] %v15802_v61  ;;  %v15805_v58 = vadd.f32 %v6815_v54, %v15662_v0 }
 0x48d   : > { %v11008_v43 = vpop.f32.mrf.mxu1  ;;  %v15807_v44 = vpop.f32.mrf.mxu0 }
 0x48e   : > { %17092 = vst [vmem:[#allocation126_spill] sm:$0xff] %v15805_v58  ;;  %17093 = vst [vmem:[#allocation61_spill] sm:$0xff] %v15807_v44  ;;  %v15810_v11 = vadd.f32 %v11008_v43, %v15667_v25 }
 0x48f   : > { %v6825_v56 = vpop.f32.mrf.mxu1  ;;  %v15812_v59 = vpop.f32.mrf.mxu0 }
 0x490   : > { %17094 = vst [vmem:[#allocation68_spill] sm:$0xff] %v15810_v11  ;;  %17095 = vst [vmem:[#allocation141_spill] sm:$0xff] %v15812_v59  ;;  %v15815_v31 = vadd.f32 %v6825_v56, %v15672_v17 }
 0x491   : > { %v15817_v30 = vpop.f32.mrf.mxu0  ;;  %v11091_v2 = vpop.f32.mrf.mxu1 }
 0x492   : > { %17096 = vst [vmem:[#allocation62_spill] sm:$0xff] %v15815_v31  ;;  %17097 = vst [vmem:[#allocation77_spill] sm:$0xff] %v15817_v30 }
 0x493   : > { %v15819_v35 = vpop.f32.mrf.mxu0  ;;  %v15821_v61 = vpop.f32.mrf.mxu1 }
 0x494   : > { %17098 = vst [vmem:[#allocation142_spill] sm:$0xff] %v15819_v35 }
 0x495   : > { %v15823_v0 = vpop.f32.mrf.mxu0  ;;  %v15825_v54 = vpop.f32.mrf.mxu1 }
 0x496   : > { %17099 = vst [vmem:[#allocation66_spill] sm:$0xff] %v15823_v0 }
 0x497   : > { %v15827_v58 = vpop.f32.mrf.mxu0  ;;  %v15829_v25 = vpop.f32.mrf.mxu1 }
 0x498   : > { %17100 = vst [vmem:[#allocation143_spill] sm:$0xff] %v15827_v58 }
 0x499   : > { %v15831_v43 = vpop.f32.mrf.mxu1  ;;  %v15833_v11 = vpop.f32.mrf.mxu0 }
 0x49b   : > { %v15835_v17 = vpop.f32.mrf.mxu1  ;;  %v15837_v56 = vpop.f32.mrf.mxu0 }
 0x49d   : > { %v15839_v31 = vpop.f32.mrf.mxu1  ;;  %v15841_v35 = vpop.f32.mrf.mxu0 }
 0x49f   : > { %v15843_v30 = vpop.f32.mrf.mxu1  ;;  %v15845_v0 = vpop.f32.mrf.mxu0 }
 0x4a1   : > { %v15847_v59 = vpop.f32.mrf.mxu1  ;;  %v15849_v58 = vpop.f32.mrf.mxu0 }
 0x4a3   : > { %v15851_v44 = vpop.f32.mrf.mxu1  ;;  %v15853_v9 = vpop.f32.mrf.mxu0 }
 0x4a5   : > { %v15855_v19 = vpop.f32.mrf.mxu1  ;;  %v15857_v28 = vpop.f32.mrf.mxu0 }
 0x4a7   : > { %v15859_v57 = vpop.f32.mrf.mxu1  ;;  %v15863_v50 = vpop.f32.mrf.mxu0 }
 0x4a8   : > { %17101 = vst [vmem:[#allocation67_spill] sm:$0xff] %v15859_v57 }
 0x4a9   : > { %v15861_v47 = vpop.f32.mrf.mxu1  ;;  %v15869_v23 = vpop.f32.mrf.mxu0 }
 0x4aa   : > { %17102 = vst [vmem:[#allocation112_spill] sm:$0xff] %v15861_v47  ;;  %v17132_v47 = vld [vmem:[#allocation83_spill] sm:$0xff] }
 0x4ab   : > { %v15865_v20 = vpop.f32.mrf.mxu1  ;;  %v15875_v34 = vpop.f32.mrf.mxu0 }
 0x4ac   : > { %17103 = vst [vmem:[#allocation51_spill] sm:$0xff] %v15865_v20 }
 0x4ad   : > { %v15867_v48 = vpop.f32.mrf.mxu1  ;;  %v15881_v27 = vpop.f32.mrf.mxu0 }
 0x4ae   : > { %17104 = vst [vmem:[#allocation52_spill] sm:$0xff] %v15867_v48  ;;  %17109 = vst [vmem:[#allocation54_spill] sm:$0xff] %v15881_v27  ;;  %v17140_v27 = vld [vmem:[#allocation87_spill] sm:$0xff] }
 0x4af   : > { %v15871_v63 = vpop.f32.mrf.mxu1  ;;  %v15887_v48 = vpop.f32.mrf.mxu0 }
 0x4b0   : > { %17105 = vst [vmem:[#allocation69_spill] sm:$0xff] %v15871_v63  ;;  %17112 = vst [vmem:[#allocation70_spill] sm:$0xff] %v15887_v48  ;;  %v17128_v48 = vld [vmem:[#allocation80_spill] sm:$0xff] }
 0x4b1   : > { %v15873_v36 = vpop.f32.mrf.mxu1 }
 0x4b2   : > { %17106 = vst [vmem:[#allocation65_spill] sm:$0xff] %v15873_v36  ;;  %v15893_v36 = vpop.f32.mrf.mxu0 }
 0x4b3   : > { %v15877_v39 = vpop.f32.mrf.mxu1  ;;  %17115 = vst [vmem:[#allocation115_spill] sm:$0xff] %v15893_v36  ;;  %v15916_v36 = vld [vmem:[%s14044_s14] ss:$0 sm:$0xff]  ;;  %s11467_s14 = scalar_lea.vmem %s11466_s26, 8192 }
 0x4b4   : > { %17107 = vst [vmem:[#allocation53_spill] sm:$0xff] %v15877_v39  ;;  %p11469_p1 = scmp.lt.s32.totalorder %s11467_s14, %s11461_s11 }
 0x4b5   : > { %v15879_v21 = vpop.f32.mrf.mxu1 }
 0x4b6   : > { %17108 = vst [vmem:[#allocation73_spill] sm:$0xff] %v15879_v21  ;;  %v15899_v21 = vpop.f32.mrf.mxu0  ;;  %p11470_p4 = por %p11469_p1, %p11468_p13 }
 0x4b7   : > { %v15883_v41 = vpop.f32.mrf.mxu1  ;;  %17118 = vst [vmem:[#allocation78_spill] sm:$0xff] %v15899_v21 }
 0x4b8   : > { %17110 = vst [vmem:[#allocation75_spill] sm:$0xff] %v15883_v41  ;;  %v15905_v24 = vpop.f32.mrf.mxu0  ;;  %p11471_p5 = pnand %p11470_p4, %p11464_p9 }
 0x4b9   : > { %v15885_v20 = vpop.f32.mrf.mxu1  ;;  %17121 = vst [vmem:[#allocation129_spill] sm:$0xff] %v15905_v24  ;;  %v17130_v24 = vld [vmem:[#allocation76_spill] sm:$0xff] }
 0x4ba   : > { %17111 = vst [vmem:[#allocation56_spill] sm:$0xff] %v15885_v20 }
 0x4bb   : > { %v15889_v1 = vpop.f32.mrf.mxu1 }
 0x4bc   : > { %17113 = vst [vmem:[#allocation107_spill] sm:$0xff] %v15889_v1  ;;  %v15911_v1 = vpop.f32.mrf.mxu0 }
 0x4bd   : > { %v15891_v63 = vpop.f32.mrf.mxu1  ;;  %17124 = vst [vmem:[#allocation146_spill] sm:$0xff] %v15911_v1  ;;  %v17131_v1 = vld [vmem:[#allocation82_spill] sm:$0xff] }
 0x4be   : > { %17114 = vst [vmem:[#allocation113_spill] sm:$0xff] %v15891_v63 }
 0x4bf   : > { %v15895_v14 = vpop.f32.mrf.mxu1 }
 0x4c0   : > { %17116 = vst [vmem:[#allocation58_spill] sm:$0xff] %v15895_v14  ;;  %v17126_v14 = vld [vmem:[#allocation74_spill] sm:$0xff] }
 0x4c1   : > { %v15897_v39 = vpop.f32.mrf.mxu1 }
 0x4c2   : > { %17117 = vst [vmem:[#allocation57_spill] sm:$0xff] %v15897_v39  ;;  %v17127_v39 = vmax.f32 %v17126_v14, 0.0  ;;  %v17133_v14 = vmax.f32 %v17132_v47, 0.0  ;;  %v17143_v47 = vld [vmem:[#allocation88_spill] sm:$0xff] }
 0x4c3   : > { %v15901_v40 = vpop.f32.mrf.mxu1 }
 0x4c4   : > { %17119 = vst [vmem:[#allocation63_spill] sm:$0xff] %v15901_v40  ;;  %v8514_v21 = vmul.f32 %v15916_v36, %v17127_v39  ;;  %v17129_v40 = vmax.f32 %v17128_v48, 0.0  ;;  %v15939_v39 = vmul.f32 %v15916_v36, %v17133_v14  ;;  %v17144_v14 = vmax.f32 %v17143_v47, 0.0 }
 0x4c5   : > { %v15903_v41 = vpop.f32.mrf.mxu1 }
 0x4c6   : > { %17120 = vst [vmem:[#allocation121_spill] sm:$0xff] %v15903_v41  ;;  %v15924_v41 = vmul.f32 %v15916_v36, %v17129_v40  ;;  %v17135_v40 = vld [vmem:[#allocation84_spill] sm:$0xff]  ;;  %v15961_v6 = vmul.f32 %v15916_v36, %v17144_v14  ;;  %v17152_v14 = vld [vmem:[#allocation91_spill] sm:$0xff] }
 0x4c7   : > { %v15907_v20 = vpop.f32.mrf.mxu1  ;;  %v17136_v5 = vmax.f32 %v17135_v40, 0.0  ;;  %v7228_v40 = vadd.f32 %v15682_v60, %v15665_v38  ;;  %v17154_v38 = vld [vmem:[#allocation86_spill] sm:$0xff] }
 0x4c8   : > { %17122 = vst [vmem:[#allocation144_spill] sm:$0xff] %v15907_v20  ;;  %v7229_v20 = vadd.f32 %v15677_v15, %v15660_v18  ;;  %v17137_v18 = vld [vmem:[#allocation79_spill] sm:$0xff]  ;;  %17145 = vst [vmem:[#allocation82_spill] sm:$0xff] %v15961_v6  ;;  %v17153_v6 = vmax.f32 %v17152_v14, 0.0  ;;  %v17155_v60 = vmax.f32 %v17154_v38, 0.0  ;;  %v7231_v14 = vadd.f32 %v15687_v26, %v15670_v13  ;;  %v17169_v13 = vld [vmem:[#allocation96_spill] sm:$0xff] }
 0x4c9   : > { %v15909_v3 = vpop.f32.mrf.mxu1  ;;  %v15946_v7 = vmul.f32 %v15916_v36, %v17136_v5  ;;  %v17138_v15 = vmax.f32 %v17137_v18, 0.0  ;;  %v17147_v18 = vld [vmem:[#allocation81_spill] sm:$0xff]  ;;  %v17170_v26 = vmax.f32 %v17169_v13, 0.0 }
 0x4ca   : > { %17123 = vst [vmem:[#allocation145_spill] sm:$0xff] %v15909_v3  ;;  %v15930_v3 = vmul.f32 %v15916_v36, %v17130_v24  ;;  %v7623_v5 = vadd.f32 %v11091_v2, %v7229_v20  ;;  %v17148_v22 = vmax.f32 %v17147_v18, 0.0  ;;  %v15987_v20 = vmul.f32 %v15916_v36, %v17155_v60  ;;  %v17157_v2 = vld [vmem:[#allocation118_spill] sm:$0xff] }
 0x4cb   : > { %v15913_v63 = vpop.f32.mrf.mxu1  ;;  %v15951_v24 = vmul.f32 %v15916_v36, %v17138_v15 }
 0x4cc   : > { %17125 = vst [vmem:[#allocation147_spill] sm:$0xff] %v15913_v63  ;;  %v15934_v63 = vmul.f32 %v15916_v36, %v17131_v1  ;;  %v17141_v1 = vmax.f32 %v17140_v27, 0.0  ;;  %v15970_v15 = vmul.f32 %v15916_v36, %v17148_v22  ;;  %v17149_v27 = vld [vmem:[#allocation90_spill] sm:$0xff]  ;;  %17156 = vst [vmem:[#allocation79_spill] sm:$0xff] %v15987_v20  ;;  %v17158_v22 = vmax.f32 %v17157_v2, 0.0 }
 0x4cd   : > { %v15941_v48 = vpop.f32.mrf.mxu1  ;;  %17139 = vst [vmem:[#allocation80_spill] sm:$0xff] %v15951_v24  ;;  %v17150_v24 = vmax.f32 %v17149_v27, 0.0  ;;  %v17160_v27 = vld [vmem:[#allocation93_spill] sm:$0xff]  ;;  %v8017_v38 = vadd.f32 %v15833_v11, %v7623_v5  ;;  %v16021_v11 = vmul.f32 %v15916_v36, %v17170_v26 }
 0x4ce   : > { %17134 = vst [vmem:[#allocation74_spill] sm:$0xff] %v15941_v48  ;;  %v15956_v57 = vmul.f32 %v15916_v36, %v17141_v1  ;;  %v15965_v48 = vpop.f32.mrf.mxu0  ;;  %v15992_v18 = vmul.f32 %v15916_v36, %v17158_v22  ;;  %v16011_v22 = vld [vmem:[%s16462_s5] ss:$0 sm:$0xff] }
 0x4cf   : > { %17146 = vst [vmem:[#allocation83_spill] sm:$0xff] %v15965_v48  ;;  %v15975_v1 = vmul.f32 %v15916_v36, %v17150_v24  ;;  %v15977_v47 = vpop.f32.mrf.mxu1  ;;  %v17161_v24 = vmax.f32 %v17160_v27, 0.0  ;;  %v17166_v27 = vld [vmem:[#allocation89_spill] sm:$0xff]  ;;  %17171 = vst [vmem:[#allocation91_spill] sm:$0xff] %v16021_v11 }
 0x4d0   : > { %17142 = vst [vmem:[#allocation76_spill] sm:$0xff] %v15956_v57  ;;  %17151 = vst [vmem:[#allocation84_spill] sm:$0xff] %v15977_v47  ;;  %v15982_v57 = vmul.f32 %v15916_v36, %v17153_v6  ;;  %v7622_v6 = vadd.f32 %v15821_v61, %v7228_v40  ;;  %v17163_v47 = vld [vmem:[#allocation94_spill] sm:$0xff] }
 0x4d1   : > { %17159 = vst [vmem:[#allocation87_spill] sm:$0xff] %v15992_v18  ;;  %v15997_v48 = vmul.f32 %v15916_v36, %v17161_v24  ;;  %v17164_v60 = vmax.f32 %v17163_v47, 0.0  ;;  %v11219_v2 = vpop.f32.mrf.mxu1  ;;  %v17167_v24 = vmax.f32 %v17166_v27, 0.0  ;;  %v17172_v61 = vld [vmem:[#allocation114_spill] sm:$0xff]  ;;  %v17174_v47 = vld [vmem:[#allocation120_spill] sm:$0xff]  ;;  %v7625_v27 = vadd.f32 %v15825_v54, %v7231_v14  ;;  %v17177_v18 = vld [vmem:[#allocation97_spill] sm:$0xff] }
 0x4d2   : > { %v17173_v40 = vmax.f32 %v17172_v61, 0.0  ;;  %v8411_v13 = vadd.f32 %v11219_v2, %v8017_v38  ;;  %v17178_v26 = vmax.f32 %v17177_v18, 0.0  ;;  %v7230_v61 = vadd.f32 %v15692_v45, %v15675_v37  ;;  %v17181_v54 = vld [vmem:[#allocation122_spill] sm:$0xff] }
 0x4d3   : > { %17162 = vst [vmem:[#allocation88_spill] sm:$0xff] %v15997_v48  ;;  %v16006_v20 = vmul.f32 %v15916_v36, %v17164_v60  ;;  %v16016_v48 = vmul.f32 %v15916_v36, %v17167_v24  ;;  %v17175_v60 = vmax.f32 %v17174_v47, 0.0  ;;  %v8016_v24 = vadd.f32 %v15837_v56, %v7622_v6  ;;  %v17179_v47 = vld [vmem:[#allocation98_spill] sm:$0xff]  ;;  %v17184_v6 = vld [vmem:[#allocation92_spill] sm:$0xff] }
 0x4d4   : > { %v16026_v5 = vmul.f32 %v15916_v36, %v17173_v40  ;;  %v16040_v11 = vmul.f32 %v15916_v36, %v17178_v26  ;;  %v8251_v40 = vpop.f32.mrf.mxu1  ;;  %v17182_v56 = vmax.f32 %v17181_v54, 0.0  ;;  %v17185_v18 = vmax.f32 %v17184_v6, 0.0 }
 0x4d5   : > { %17165 = vst [vmem:[#allocation81_spill] sm:$0xff] %v16006_v20  ;;  %17168 = vst [vmem:[#allocation90_spill] sm:$0xff] %v16016_v48  ;;  %v16031_v20 = vmul.f32 %v15916_v36, %v17175_v60  ;;  %v16035_v48 = vpop.f32.mrf.mxu0  ;;  %v17180_v60 = vmax.f32 %v17179_v47, 0.0  ;;  %v7233_v37 = vadd.f32 %v15697_v29, %v15680_v12  ;;  %v8019_v45 = vadd.f32 %v15841_v35, %v7625_v27  ;;  %v16080_v27 = vld [vmem:[%s14260_s23] ss:$0 sm:$0xff] }
 0x4d6   : > { %v16052_v14 = vmul.f32 %v15916_v36, %v17182_v56  ;;  %v16057_v38 = vmul.f32 %v15916_v36, %v17185_v18  ;;  %v8450_v2 = vadd.f32 %v16011_v22, %v8411_v13  ;;  %v8410_v26 = vadd.f32 %v8251_v40, %v8016_v24  ;;  %v11222_v54 = vpop.f32.mrf.mxu1  ;;  %v17187_v56 = vld [vmem:[#allocation100_spill] sm:$0xff] }
 0x4d7   : > { %17176 = vst [vmem:[#allocation86_spill] sm:$0xff] %v16031_v20  ;;  %v16047_v20 = vmul.f32 %v15916_v36, %v17180_v60  ;;  %v7232_v47 = vadd.f32 %v15702_v42, %v15685_v53  ;;  %v7624_v60 = vadd.f32 %v15829_v25, %v7230_v61  ;;  %v17189_v18 = vld [vmem:[#allocation116_spill] sm:$0xff]  ;;  %v7627_v29 = vadd.f32 %v15831_v43, %v7233_v37  ;;  %v16077_v35 = vpop.f32.mrf.mxu0 }
 0x4d8   : > { %17183 = vst [vmem:[#allocation118_spill] sm:$0xff] %v16052_v14  ;;  %17186 = vst [vmem:[#allocation93_spill] sm:$0xff] %v16057_v38  ;;  %v17188_v14 = vmax.f32 %v17187_v56, 0.0  ;;  %v17190_v38 = vmax.f32 %v17189_v18, 0.0  ;;  %v8482_v53 = vmul.f32 %v16080_v27, %v8450_v2  ;;  %v8449_v42 = vadd.f32 %v16011_v22, %v8410_v26  ;;  %v8261_v40 = vpop.f32.mrf.mxu1 }
 0x4d9   : > { %v8413_v25 = vadd.f32 %v11222_v54, %v8019_v45  ;;  %v7235_v24 = vadd.f32 %v15707_v32, %v15690_v62  ;;  %v7626_v13 = vadd.f32 %v15835_v17, %v7232_v47  ;;  %v8018_v61 = vadd.f32 %v15845_v0, %v7624_v60  ;;  %v16100_v47 = vpop.f32.mrf.mxu0  ;;  %v17193_v60 = vld [vmem:[#allocation33_spill] sm:$0xff] }
 0x4da   : > { %v16069_v6 = vmul.f32 %v15916_v36, %v17188_v14  ;;  %v16074_v12 = vmul.f32 %v15916_v36, %v17190_v38  ;;  %v17191_v14 = vld [vmem:[#allocation117_spill] sm:$0xff]  ;;  %v8021_v37 = vadd.f32 %v15849_v58, %v7627_v29  ;;  %v8546_v56 = vadd.f32 %v8514_v21, %v8482_v53  ;;  %v11225_v26 = vpop.f32.mrf.mxu1 }
 0x4db   : > { %v17192_v38 = vmax.f32 %v17191_v14, 0.0  ;;  %v8481_v2 = vmul.f32 %v16080_v27, %v8449_v42  ;;  %v8452_v45 = vadd.f32 %v16011_v22, %v8413_v25  ;;  %v7234_v62 = vadd.f32 %v15712_v10, %v15695_v4 }
 0x4dc   : > { %v7629_v32 = vadd.f32 %v15839_v31, %v7235_v24  ;;  %v8020_v0 = vadd.f32 %v15853_v9, %v7626_v13  ;;  %v8412_v17 = vadd.f32 %v8261_v40, %v8018_v61  ;;  %v8578_v54 = vadd.f32 %v8546_v56, %v17193_v60  ;;  %v8271_v9 = vpop.f32.mrf.mxu1  ;;  %v16124_v61 = vpop.f32.mrf.mxu0 }
 0x4dd   : > { %v16091_v43 = vmul.f32 %v15916_v36, %v17192_v38  ;;  %v8545_v21 = vadd.f32 %v15924_v41, %v8481_v2  ;;  %v8484_v58 = vmul.f32 %v16080_v27, %v8452_v45  ;;  %v8415_v18 = vadd.f32 %v11225_v26, %v8021_v37  ;;  %v17194_v41 = vld [vmem:[#allocation32_spill] sm:$0xff] }
 0x4de   : > { %v7237_v29 = vadd.f32 %v15717_v33, %v15700_v51  ;;  %v7628_v4 = vadd.f32 %v15843_v30, %v7234_v62  ;;  %v8023_v10 = vadd.f32 %v15857_v28, %v7629_v32  ;;  %v8451_v31 = vadd.f32 %v16011_v22, %v8412_v17  ;;  %8610 = vst.msk [vmem:[%s16111_s19 + $0x8] sm:$0xff] %vm485_vm0, %v8578_v54  ;;  %v11228_v13 = vpop.f32.mrf.mxu1  ;;  %v17197_v17 = vld [vmem:[#allocation35_spill] sm:$0xff] }
 0x4df   : > { %v8577_v53 = vadd.f32 %v8545_v21, %v17194_v41  ;;  %v8548_v42 = vadd.f32 %v15930_v3, %v8484_v58  ;;  %v8454_v25 = vadd.f32 %v16011_v22, %v8415_v18  ;;  %v8414_v51 = vadd.f32 %v8271_v9, %v8020_v0  ;;  %v17195_v3 = vld [vmem:[#allocation31_spill] sm:$0xff]  ;;  %v16145_v0 = vpop.f32.mrf.mxu0  ;;  %v17203_v9 = vld [vmem:[#allocation80_spill] sm:$0xff] }
 0x4e0   : > { %v7236_v33 = vadd.f32 %v15722_v46, %v15705_v16  ;;  %v7239_v28 = vadd.f32 %v15727_v55, %v15710_v8  ;;  %v8022_v30 = vadd.f32 %v15863_v50, %v7628_v4  ;;  %v8483_v24 = vmul.f32 %v16080_v27, %v8451_v31  ;;  %v8281_v37 = vpop.f32.mrf.mxu1  ;;  %v17198_v21 = vld [vmem:[#allocation123_spill] sm:$0xff]  ;;  %v17202_v31 = vld [vmem:[#allocation34_spill] sm:$0xff] }
 0x4e1   : > { %8609 = vst.msk [vmem:[%s16111_s19] sm:$0xff] %vm485_vm0, %v8577_v53  ;;  %v8580_v40 = vadd.f32 %v8548_v42, %v17195_v3  ;;  %v8486_v14 = vmul.f32 %v16080_v27, %v8454_v25  ;;  %v8453_v38 = vadd.f32 %v16011_v22, %v8414_v51  ;;  %v8417_v16 = vadd.f32 %v11228_v13, %v8023_v10  ;;  %v17200_v18 = vld [vmem:[#allocation67_spill] sm:$0xff]  ;;  %v17205_v51 = vld [vmem:[#allocation130_spill] sm:$0xff] }
 0x4e2   : > { %v7238_v46 = vadd.f32 %v15732_v52, %v15715_v49  ;;  %v7631_v8 = vadd.f32 %v15847_v59, %v7237_v29  ;;  %v7630_v55 = vadd.f32 %v15851_v44, %v7236_v33  ;;  %v8547_v50 = vadd.f32 %v15934_v63, %v8483_v24  ;;  %v17196_v44 = vld [vmem:[#allocation30_spill] sm:$0xff]  ;;  %v11231_v59 = vpop.f32.mrf.mxu1  ;;  %v17204_v25 = vld [vmem:[#allocation95_spill] sm:$0xff] }
 0x4e3   : > { %8612 = vst.msk [vmem:[%s16111_s19 + $0x18] sm:$0xff] %vm485_vm0, %v8580_v40  ;;  %v8550_v56 = vadd.f32 %v15939_v39, %v8486_v14  ;;  %v8485_v2 = vmul.f32 %v16080_v27, %v8453_v38  ;;  %v8456_v45 = vadd.f32 %v16011_v22, %v8417_v16  ;;  %v8416_v62 = vadd.f32 %v8281_v37, %v8022_v30  ;;  %v17201_v29 = vld [vmem:[#allocation54_spill] sm:$0xff]  ;;  %v16167_v14 = vpop.f32.mrf.mxu0  ;;  %v17208_v38 = vld [vmem:[#allocation40_spill] sm:$0xff] }
 0x4e4   : > { %v7633_v32 = vadd.f32 %v15855_v19, %v7239_v28  ;;  %v8025_v49 = vadd.f32 %v15869_v23, %v7631_v8  ;;  %v8024_v52 = vadd.f32 %v15875_v34, %v7630_v55  ;;  %v8579_v63 = vadd.f32 %v8547_v50, %v17196_v44  ;;  %v17199_v19 = vld [vmem:[#allocation125_spill] sm:$0xff]  ;;  %v8291_v10 = vpop.f32.mrf.mxu1  ;;  %v17206_v28 = vld [vmem:[#allocation112_spill] sm:$0xff]  ;;  %v17207_v24 = vld [vmem:[#allocation70_spill] sm:$0xff] }
 0x4e5   : > { %v8582_v39 = vadd.f32 %v8550_v56, %v17197_v17  ;;  %v8549_v26 = vadd.f32 %v15946_v7, %v8485_v2  ;;  %v8488_v60 = vmul.f32 %v16080_v27, %v8456_v45  ;;  %v8455_v54 = vadd.f32 %v16011_v22, %v8416_v62  ;;  %v17210_v37 = vld [vmem:[#allocation104_spill] sm:$0xff]  ;;  %v17211_v56 = vld [vmem:[#allocation131_spill] sm:$0xff]  ;;  %v17212_v45 = vld [vmem:[#allocation105_spill] sm:$0xff] }
 0x4e6   : > { %v7241_v58 = vadd.f32 %v17199_v19, %v17198_v21  ;;  %v7632_v23 = vadd.f32 %v17200_v18, %v7238_v46  ;;  %v8027_v34 = vadd.f32 %v17201_v29, %v7633_v32  ;;  %8611 = vst.msk [vmem:[%s16111_s19 + $0x10] sm:$0xff] %vm485_vm0, %v8579_v63  ;;  %v8419_v4 = vadd.f32 %v11231_v59, %v8025_v49  ;;  %v11234_v40 = vpop.f32.mrf.mxu1  ;;  %v17209_v46 = vld [vmem:[#allocation76_spill] sm:$0xff]  ;;  %v17214_v49 = vld [vmem:[#allocation115_spill] sm:$0xff] }
 0x4e7   : > { %8614 = vst.msk [vmem:[%s16111_s19 + $0x28] sm:$0xff] %vm485_vm0, %v8582_v39  ;;  %v8581_v7 = vadd.f32 %v8549_v26, %v17202_v31  ;;  %v8552_v41 = vadd.f32 %v17203_v9, %v8488_v60  ;;  %v8487_v53 = vmul.f32 %v16080_v27, %v8455_v54  ;;  %v8418_v42 = vadd.f32 %v8291_v10, %v8024_v52  ;;  %v17213_v62 = vld [vmem:[#allocation132_spill] sm:$0xff]  ;;  %v16190_v31 = vpop.f32.mrf.mxu0 }
 0x4e8   : > { %v7240_v33 = vadd.f32 %v17205_v51, %v17204_v25  ;;  %v7635_v30 = vadd.f32 %v17206_v28, %v7241_v58  ;;  %v8026_v13 = vadd.f32 %v17207_v24, %v7632_v23  ;;  %v8458_v3 = vadd.f32 %v16011_v22, %v8419_v4  ;;  %v8301_v63 = vpop.f32.mrf.mxu1  ;;  %v17215_v59 = vld [vmem:[#allocation36_spill] sm:$0xff]  ;;  %v17218_v58 = vld [vmem:[#allocation51_spill] sm:$0xff]  ;;  %v17222_v51 = vld [vmem:[#allocation78_spill] sm:$0xff] }
 0x4e9   : > { %8613 = vst.msk [vmem:[%s16111_s19 + $0x20] sm:$0xff] %vm485_vm0, %v8581_v7  ;;  %v8584_v16 = vadd.f32 %v8552_v41, %v17208_v38  ;;  %v8551_v8 = vadd.f32 %v17209_v46, %v8487_v53  ;;  %v8457_v55 = vadd.f32 %v16011_v22, %v8418_v42  ;;  %v8421_v50 = vadd.f32 %v11234_v40, %v8027_v34  ;;  %v17216_v54 = vld [vmem:[#allocation128_spill] sm:$0xff]  ;;  %v17220_v34 = vld [vmem:[#allocation82_spill] sm:$0xff]  ;;  %v17221_v42 = vld [vmem:[#allocation69_spill] sm:$0xff] }
 0x4ea   : > { %v7243_v2 = vadd.f32 %v17211_v56, %v17210_v37  ;;  %v7242_v32 = vadd.f32 %v17213_v62, %v17212_v45  ;;  %v8029_v52 = vadd.f32 %v17214_v49, %v7635_v30  ;;  %v8490_v44 = vmul.f32 %v16080_v27, %v8458_v3  ;;  %v17217_v21 = vld [vmem:[#allocation108_spill] sm:$0xff]  ;;  %v11237_v10 = vpop.f32.mrf.mxu1  ;;  %v17223_v28 = vld [vmem:[#allocation129_spill] sm:$0xff]  ;;  %v17224_v24 = vld [vmem:[#allocation42_spill] sm:$0xff]  ;;  %v16211_v49 = vpop.f32.mrf.mxu0 }
 0x4eb   : > { %8616 = vst.msk [vmem:[%s16111_s19 + $0x38] sm:$0xff] %vm485_vm0, %v8584_v16  ;;  %v8583_v17 = vadd.f32 %v8551_v8, %v17215_v59  ;;  %v8489_v39 = vmul.f32 %v16080_v27, %v8457_v55  ;;  %v8460_v26 = vadd.f32 %v16011_v22, %v8421_v50  ;;  %v8420_v60 = vadd.f32 %v8301_v63, %v8026_v13  ;;  %v17219_v23 = vld [vmem:[#allocation52_spill] sm:$0xff]  ;;  %v17225_v40 = vld [vmem:[#allocation41_spill] sm:$0xff]  ;;  %v17226_v8 = vld [vmem:[#allocation106_spill] sm:$0xff] }
 0x4ec   : > { %v7245_v19 = vadd.f32 %v17217_v21, %v17216_v54  ;;  %v7634_v18 = vadd.f32 %v17218_v58, %v7240_v33  ;;  %v7637_v29 = vadd.f32 %v17219_v23, %v7243_v2  ;;  %v8554_v4 = vadd.f32 %v17220_v34, %v8490_v44  ;;  %v8311_v3 = vpop.f32.mrf.mxu1  ;;  %v17227_v55 = vld [vmem:[#allocation133_spill] sm:$0xff]  ;;  %v17229_v2 = vld [vmem:[#allocation146_spill] sm:$0xff]  ;;  %v17234_v21 = vld [vmem:[#allocation83_spill] sm:$0xff] }
 0x4ed   : > { %8615 = vst.msk [vmem:[%s16111_s19 + $0x30] sm:$0xff] %vm485_vm0, %v8583_v17  ;;  %v8553_v7 = vadd.f32 %v15970_v15, %v8489_v39  ;;  %v8492_v9 = vmul.f32 %v16080_v27, %v8460_v26  ;;  %v8459_v41 = vadd.f32 %v16011_v22, %v8420_v60  ;;  %v8423_v53 = vadd.f32 %v11237_v10, %v8029_v52  ;;  %v17228_v37 = vld [vmem:[#allocation65_spill] sm:$0xff]  ;;  %v17231_v17 = vld [vmem:[#allocation140_spill] sm:$0xff]  ;;  %v17235_v23 = vld [vmem:[#allocation43_spill] sm:$0xff] }
 0x4ee   : > { %v7636_v25 = vadd.f32 %v17221_v42, %v7242_v32  ;;  %v8028_v33 = vadd.f32 %v17222_v51, %v7634_v18  ;;  %v8031_v30 = vadd.f32 %v17223_v28, %v7637_v29  ;;  %v8586_v13 = vadd.f32 %v8554_v4, %v17224_v24  ;;  %v11240_v32 = vpop.f32.mrf.mxu1  ;;  %v17232_v39 = vld [vmem:[#allocation85_spill] sm:$0xff]  ;;  %v17236_v34 = vld [vmem:[#allocation79_spill] sm:$0xff]  ;;  %v17240_v42 = vld [vmem:[#allocation110_spill] sm:$0xff] }
 0x4ef   : > { %v8585_v38 = vadd.f32 %v8553_v7, %v17225_v40  ;;  %v8556_v15 = vadd.f32 %v15975_v1, %v8492_v9  ;;  %v8491_v16 = vmul.f32 %v16080_v27, %v8459_v41  ;;  %v8462_v46 = vadd.f32 %v16011_v22, %v8423_v53  ;;  %v17230_v1 = vld [vmem:[#allocation44_spill] sm:$0xff]  ;;  %v17233_v60 = vld [vmem:[#allocation53_spill] sm:$0xff]  ;;  %v17237_v7 = vld [vmem:[#allocation99_spill] sm:$0xff] }
 0x4f0   : > { %v7244_v50 = vadd.f32 %v17227_v55, %v17226_v8  ;;  %v7639_v56 = vadd.f32 %v17228_v37, %v7245_v19  ;;  %v8030_v45 = vadd.f32 %v17229_v2, %v7636_v25  ;;  %8618 = vst.msk [vmem:[%s16111_s19 + $0x48] sm:$0xff] %vm485_vm0, %v8586_v13  ;;  %v8422_v62 = vadd.f32 %v8311_v3, %v8028_v33  ;;  %v8321_v18 = vpop.f32.mrf.mxu1  ;;  %v17238_v9 = vld [vmem:[#allocation55_spill] sm:$0xff]  ;;  %v17239_v53 = vld [vmem:[#allocation109_spill] sm:$0xff]  ;;  %v17241_v24 = vld [vmem:[#allocation46_spill] sm:$0xff] }
 0x4f1   : > { %8617 = vst.msk [vmem:[%s16111_s19 + $0x40] sm:$0xff] %vm485_vm0, %v8585_v38  ;;  %v8588_v52 = vadd.f32 %v8556_v15, %v17230_v1  ;;  %v8555_v44 = vadd.f32 %v15982_v57, %v8491_v16  ;;  %v8494_v63 = vmul.f32 %v16080_v27, %v8462_v46  ;;  %v8425_v59 = vadd.f32 %v11240_v32, %v8031_v30  ;;  %v16234_v30 = vpop.f32.mrf.mxu0  ;;  %v17242_v15 = vld [vmem:[#allocation134_spill] sm:$0xff]  ;;  %v17243_v16 = vld [vmem:[#allocation137_spill] sm:$0xff]  ;;  %v17246_v37 = vld [vmem:[#allocation87_spill] sm:$0xff] }
 0x4f2   : > { %v7247_v26 = vadd.f32 %v17232_v39, %v17231_v17  ;;  %v7638_v54 = vadd.f32 %v17233_v60, %v7244_v50  ;;  %v8033_v19 = vadd.f32 %v17234_v21, %v7639_v56  ;;  %v8461_v58 = vadd.f32 %v16011_v22, %v8422_v62  ;;  %v11243_v28 = vpop.f32.mrf.mxu1  ;;  %v17244_v8 = vld [vmem:[#allocation73_spill] sm:$0xff]  ;;  %v17250_v21 = vld [vmem:[#allocation48_spill] sm:$0xff] }
 0x4f3   : > { %8620 = vst.msk [vmem:[%s16111_s19 + $0x58] sm:$0xff] %vm485_vm0, %v8588_v52  ;;  %v8587_v29 = vadd.f32 %v8555_v44, %v17235_v23  ;;  %v8558_v57 = vadd.f32 %v17236_v34, %v8494_v63  ;;  %v8464_v4 = vadd.f32 %v16011_v22, %v8425_v59  ;;  %v8424_v10 = vadd.f32 %v8321_v18, %v8030_v45  ;;  %v17247_v45 = vld [vmem:[#allocation88_spill] sm:$0xff]  ;;  %v17249_v39 = vld [vmem:[#allocation45_spill] sm:$0xff]  ;;  %v17252_v34 = vld [vmem:[#allocation135_spill] sm:$0xff] }
 0x4f4   : > { %v7246_v41 = vadd.f32 %v17238_v9, %v17237_v7  ;;  %v7249_v25 = vadd.f32 %v17240_v42, %v17239_v53  ;;  %v8032_v51 = vadd.f32 %v16035_v48, %v7638_v54  ;;  %v8493_v33 = vmul.f32 %v16080_v27, %v8461_v58  ;;  %v17245_v48 = vld [vmem:[#allocation75_spill] sm:$0xff]  ;;  %v8331_v2 = vpop.f32.mrf.mxu1  ;;  %v17248_v44 = vld [vmem:[#allocation56_spill] sm:$0xff]  ;;  %v16255_v54 = vpop.f32.mrf.mxu0  ;;  %v17251_v58 = vld [vmem:[#allocation81_spill] sm:$0xff] }
 0x4f5   : > { %8619 = vst.msk [vmem:[%s16111_s19 + $0x50] sm:$0xff] %vm485_vm0, %v8587_v29  ;;  %v8590_v13 = vadd.f32 %v8558_v57, %v17241_v24  ;;  %v8496_v3 = vmul.f32 %v16080_v27, %v8464_v4  ;;  %v8463_v40 = vadd.f32 %v16011_v22, %v8424_v10  ;;  %v8427_v38 = vadd.f32 %v11243_v28, %v8033_v19  ;;  %v17253_v57 = vld [vmem:[#allocation103_spill] sm:$0xff]  ;;  %v17256_v42 = vld [vmem:[#allocation90_spill] sm:$0xff]  ;;  %v17257_v28 = vld [vmem:[#allocation136_spill] sm:$0xff] }
 0x4f6   : > { %v7248_v46 = vadd.f32 %v17243_v16, %v17242_v15  ;;  %v7641_v55 = vadd.f32 %v17244_v8, %v7247_v26  ;;  %v7640_v50 = vadd.f32 %v17245_v48, %v7246_v41  ;;  %v8557_v56 = vadd.f32 %v17246_v37, %v8493_v33  ;;  %v11246_v60 = vpop.f32.mrf.mxu1  ;;  %v17254_v10 = vld [vmem:[#allocation107_spill] sm:$0xff]  ;;  %v7987_v16 = vpop.f32.mrf.mxu0 }
 0x4f7   : > { %8622 = vst.msk [vmem:[%s16111_s19 + $0x68] sm:$0xff] %vm485_vm0, %v8590_v13  ;;  %v8560_v62 = vadd.f32 %v17247_v45, %v8496_v3  ;;  %v8495_v32 = vmul.f32 %v16080_v27, %v8463_v40  ;;  %v8466_v1 = vadd.f32 %v16011_v22, %v8427_v38  ;;  %v8426_v52 = vadd.f32 %v8331_v2, %v8032_v51  ;;  %v17255_v41 = vld [vmem:[#allocation47_spill] sm:$0xff]  ;;  %v17259_v3 = vld [vmem:[#allocation113_spill] sm:$0xff]  ;;  %v17263_v2 = vld [vmem:[#allocation72_spill] sm:$0xff] }
 0x4f8   : > { %v7643_v63 = vadd.f32 %v17248_v44, %v7249_v25  ;;  %v8035_v59 = vadd.f32 %v16077_v35, %v7641_v55  ;;  %v8034_v17 = vadd.f32 %v16100_v47, %v7640_v50  ;;  %v8589_v26 = vadd.f32 %v8557_v56, %v17249_v39  ;;  %v8341_v9 = vpop.f32.mrf.mxu1  ;;  %v17258_v24 = vld [vmem:[#allocation71_spill] sm:$0xff]  ;;  %v17262_v56 = vld [vmem:[#allocation64_spill] sm:$0xff] }
 0x4f9   : > { %v8592_v19 = vadd.f32 %v8560_v62, %v17250_v21  ;;  %v8559_v18 = vadd.f32 %v17251_v58, %v8495_v32  ;;  %v8498_v23 = vmul.f32 %v16080_v27, %v8466_v1  ;;  %v8465_v29 = vadd.f32 %v16011_v22, %v8426_v52  ;;  %v17261_v55 = vld [vmem:[#allocation91_spill] sm:$0xff]  ;;  %v17265_v32 = vld [vmem:[#allocation60_spill] sm:$0xff]  ;;  %v17268_v21 = vld [vmem:[#allocation61_spill] sm:$0xff] }
 0x4fa   : > { %v7251_v4 = vadd.f32 %v17253_v57, %v17252_v34  ;;  %v7642_v35 = vadd.f32 %v17254_v10, %v7248_v46  ;;  %v8037_v47 = vadd.f32 %v16124_v61, %v7643_v63  ;;  %8621 = vst.msk [vmem:[%s16111_s19 + $0x60] sm:$0xff] %vm485_vm0, %v8589_v26  ;;  %v8429_v7 = vadd.f32 %v11246_v60, %v8035_v59  ;;  %v11249_v15 = vpop.f32.mrf.mxu1  ;;  %v17260_v46 = vld [vmem:[#allocation20_spill] sm:$0xff]  ;;  %v17264_v62 = vld [vmem:[#allocation59_spill] sm:$0xff]  ;;  %v17266_v63 = vld [vmem:[#allocation37_spill] sm:$0xff]  ;;  %v11197_v57 = vpop.f32.mrf.mxu0 }
 0x4fb   : > { %8624 = vst.msk [vmem:[%s16111_s19 + $0x78] sm:$0xff] %vm485_vm0, %v8592_v19  ;;  %v8591_v53 = vadd.f32 %v8559_v18, %v17255_v41  ;;  %v8562_v25 = vadd.f32 %v17256_v42, %v8498_v23  ;;  %v8497_v51 = vmul.f32 %v16080_v27, %v8465_v29  ;;  %v8428_v33 = vadd.f32 %v8341_v9, %v8034_v17  ;;  %v17267_v60 = vld [vmem:[#allocation111_spill] sm:$0xff]  ;;  %v17269_v58 = vld [vmem:[#allocation58_spill] sm:$0xff]  ;;  %v17270_v23 = vld [vmem:[#allocation57_spill] sm:$0xff] }
 0x4fc   : > { %v7250_v13 = vadd.f32 %v17258_v24, %v17257_v28  ;;  %v7645_v40 = vadd.f32 %v17259_v3, %v7251_v4  ;;  %v8036_v61 = vadd.f32 %v16145_v0, %v7642_v35  ;;  %v8468_v38 = vadd.f32 %v16011_v22, %v8429_v7  ;;  %v8351_v44 = vpop.f32.mrf.mxu1  ;;  %v17271_v4 = vld [vmem:[#allocation86_spill] sm:$0xff]  ;;  %v17272_v9 = vld [vmem:[#allocation63_spill] sm:$0xff] }
 0x4fd   : > { %8623 = vst.msk [vmem:[%s16111_s19 + $0x70] sm:$0xff] %vm485_vm0, %v8591_v53  ;;  %v8594_v8 = vadd.f32 %v8562_v25, %v17260_v46  ;;  %v8561_v48 = vadd.f32 %v17261_v55, %v8497_v51  ;;  %v8467_v50 = vadd.f32 %v16011_v22, %v8428_v33  ;;  %v8431_v37 = vadd.f32 %v11249_v15, %v8037_v47  ;;  %v17274_v33 = vld [vmem:[#allocation21_spill] sm:$0xff]  ;;  %v7997_v55 = vpop.f32.mrf.mxu0 }
 0x4fe   : > { %v7253_v45 = vadd.f32 %v17263_v2, %v17262_v56  ;;  %v7252_v0 = vadd.f32 %v17265_v32, %v17264_v62  ;;  %v8039_v1 = vadd.f32 %v16167_v14, %v7645_v40  ;;  %v8500_v52 = vmul.f32 %v16080_v27, %v8468_v38  ;;  %v11252_v34 = vpop.f32.mrf.mxu1  ;;  %v17275_v40 = vld [vmem:[#allocation138_spill] sm:$0xff]  ;;  %v17277_v15 = vld [vmem:[#allocation121_spill] sm:$0xff]  ;;  %v17279_v2 = vld [vmem:[#allocation139_spill] sm:$0xff] }
 0x4ff   : > { %8626 = vst.msk [vmem:[%s16111_s19 + $0x88] sm:$0xff] %vm485_vm0, %v8594_v8  ;;  %v8593_v59 = vadd.f32 %v8561_v48, %v17266_v63  ;;  %v8499_v17 = vmul.f32 %v16080_v27, %v8467_v50  ;;  %v8470_v39 = vadd.f32 %v16011_v22, %v8431_v37  ;;  %v8430_v26 = vadd.f32 %v8351_v44, %v8036_v61  ;;  %v17276_v61 = vld [vmem:[#allocation141_spill] sm:$0xff]  ;;  %v17281_v32 = vld [vmem:[#allocation144_spill] sm:$0xff]  ;;  %v17282_v44 = vld [vmem:[#allocation23_spill] sm:$0xff] }
 0x500   : > { %v7255_v19 = vadd.f32 %v17268_v21, %v17267_v60  ;;  %v7644_v18 = vadd.f32 %v17269_v58, %v7250_v13  ;;  %v7647_v29 = vadd.f32 %v17270_v23, %v7253_v45  ;;  %v8564_v14 = vadd.f32 %v16026_v5, %v8500_v52  ;;  %v17273_v5 = vld [vmem:[#allocation22_spill] sm:$0xff]  ;;  %v8361_v51 = vpop.f32.mrf.mxu1  ;;  %v17280_v45 = vld [vmem:[#allocation77_spill] sm:$0xff] }
 0x501   : > { %8625 = vst.msk [vmem:[%s16111_s19 + $0x80] sm:$0xff] %vm485_vm0, %v8593_v59  ;;  %v8563_v10 = vadd.f32 %v17271_v4, %v8499_v17  ;;  %v8502_v35 = vmul.f32 %v16080_v27, %v8470_v39  ;;  %v8469_v47 = vadd.f32 %v16011_v22, %v8430_v26  ;;  %v8433_v7 = vadd.f32 %v11252_v34, %v8039_v1  ;;  %v17283_v59 = vld [vmem:[#allocation118_spill] sm:$0xff] }
 0x502   : > { %v7646_v41 = vadd.f32 %v17272_v9, %v7252_v0  ;;  %v8038_v53 = vadd.f32 %v16190_v31, %v7644_v18  ;;  %v8041_v42 = vadd.f32 %v16211_v49, %v7647_v29  ;;  %v8596_v25 = vadd.f32 %v8564_v14, %v17273_v5  ;;  %v11255_v8 = vpop.f32.mrf.mxu1  ;;  %v17284_v26 = vld [vmem:[#allocation126_spill] sm:$0xff]  ;;  %v11200_v14 = vpop.f32.mrf.mxu0  ;;  %v17290_v9 = vld [vmem:[#allocation143_spill] sm:$0xff] }
 0x503   : > { %v8595_v28 = vadd.f32 %v8563_v10, %v17274_v33  ;;  %v8566_v24 = vadd.f32 %v16040_v11, %v8502_v35  ;;  %v8501_v13 = vmul.f32 %v16080_v27, %v8469_v47  ;;  %v8472_v3 = vadd.f32 %v16011_v22, %v8433_v7  ;;  %v17278_v11 = vld [vmem:[#allocation24_spill] sm:$0xff]  ;;  %v17285_v60 = vld [vmem:[#allocation142_spill] sm:$0xff]  ;;  %v17292_v5 = vld [vmem:[#allocation147_spill] sm:$0xff] }
 0x504   : > { %v7254_v38 = vadd.f32 %v17276_v61, %v17275_v40  ;;  %v7649_v46 = vadd.f32 %v17277_v15, %v7255_v19  ;;  %v8040_v31 = vadd.f32 %v16234_v30, %v7646_v41  ;;  %8628 = vst.msk [vmem:[%s16111_s19 + $0x98] sm:$0xff] %vm485_vm0, %v8596_v25  ;;  %v8432_v49 = vadd.f32 %v8361_v51, %v8038_v53  ;;  %v8371_v52 = vpop.f32.mrf.mxu1  ;;  %v17286_v19 = vld [vmem:[#allocation68_spill] sm:$0xff]  ;;  %v17287_v58 = vld [vmem:[#allocation66_spill] sm:$0xff]  ;;  %v17291_v53 = vld [vmem:[#allocation145_spill] sm:$0xff] }
 0x505   : > { %8627 = vst.msk [vmem:[%s16111_s19 + $0x90] sm:$0xff] %vm485_vm0, %v8595_v28  ;;  %v8598_v48 = vadd.f32 %v8566_v24, %v17278_v11  ;;  %v8565_v50 = vadd.f32 %v16047_v20, %v8501_v13  ;;  %v8504_v37 = vmul.f32 %v16080_v27, %v8472_v3  ;;  %v8435_v56 = vadd.f32 %v11255_v8, %v8041_v42  ;;  %v17288_v34 = vld [vmem:[#allocation26_spill] sm:$0xff]  ;;  %v17293_v25 = vld [vmem:[#allocation93_spill] sm:$0xff]  ;;  %v8007_v8 = vpop.f32.mrf.mxu0  ;;  %v17296_v11 = vld [vmem:[#allocation27_spill] sm:$0xff] }
 0x506   : > { %v7257_v62 = vadd.f32 %v17280_v45, %v17279_v2  ;;  %v7648_v30 = vadd.f32 %v17281_v32, %v7254_v38  ;;  %v8043_v0 = vadd.f32 %v16255_v54, %v7649_v46  ;;  %v8471_v1 = vadd.f32 %v16011_v22, %v8432_v49  ;;  %v11258_v29 = vpop.f32.mrf.mxu1  ;;  %v17289_v7 = vld [vmem:[#allocation62_spill] sm:$0xff]  ;;  %v17295_v46 = vld [vmem:[#allocation25_spill] sm:$0xff] }
 0x507   : > { %8630 = vst.msk [vmem:[%s16111_s19 + $0xa8] sm:$0xff] %vm485_vm0, %v8598_v48  ;;  %v8597_v63 = vadd.f32 %v8565_v50, %v17282_v44  ;;  %v8568_v20 = vadd.f32 %v17283_v59, %v8504_v37  ;;  %v8474_v17 = vadd.f32 %v16011_v22, %v8435_v56  ;;  %v8434_v39 = vadd.f32 %v8371_v52, %v8040_v31  ;;  %v17294_v40 = vld [vmem:[#allocation74_spill] sm:$0xff]  ;;  %v17297_v56 = vld [vmem:[#allocation84_spill] sm:$0xff] }
 0x508   : > { %v7256_v21 = vadd.f32 %v17285_v60, %v17284_v26  ;;  %v7259_v18 = vadd.f32 %v17287_v58, %v17286_v19  ;;  %v8042_v54 = vadd.f32 %v7987_v16, %v7648_v30  ;;  %v8503_v23 = vmul.f32 %v16080_v27, %v8471_v1  ;;  %v8381_v33 = vpop.f32.mrf.mxu1  ;;  %v17302_v58 = vld [vmem:[#allocation119_spill] sm:$0xff] }
 0x509   : > { %8629 = vst.msk [vmem:[%s16111_s19 + $0xa0] sm:$0xff] %vm485_vm0, %v8597_v63  ;;  %v8600_v4 = vadd.f32 %v8568_v20, %v17288_v34  ;;  %v8506_v10 = vmul.f32 %v16080_v27, %v8474_v17  ;;  %v8473_v35 = vadd.f32 %v16011_v22, %v8434_v39  ;;  %v8437_v47 = vadd.f32 %v11258_v29, %v8043_v0  ;;  %v17300_v0 = vld [vmem:[#allocation28_spill] sm:$0xff]  ;;  %v17301_v17 = vld [vmem:[#allocation39_spill] sm:$0xff]  ;;  %v17304_v29 = vld [vmem:[#allocation38_spill] sm:$0xff] }
 0x50a   : > { %v7258_v41 = vadd.f32 %v17290_v9, %v17289_v7  ;;  %v7651_v42 = vadd.f32 %v17291_v53, %v7257_v62  ;;  %v7650_v16 = vadd.f32 %v17292_v5, %v7256_v21  ;;  %v8567_v51 = vadd.f32 %v17293_v25, %v8503_v23  ;;  %v11261_v49 = vpop.f32.mrf.mxu1  ;;  %v17305_v9 = vld [vmem:[#allocation124_spill] sm:$0xff]  ;;  %v17307_v5 = vld [vmem:[#allocation19_spill] sm:$0xff]  ;;  %v17308_v25 = vld [vmem:[#allocation29_spill] sm:$0xff] }
 0x50b   : > { %8632 = vst.msk [vmem:[%s16111_s19 + $0xb8] sm:$0xff] %vm485_vm0, %v8600_v4  ;;  %v8570_v28 = vadd.f32 %v16069_v6, %v8506_v10  ;;  %v8505_v24 = vmul.f32 %v16080_v27, %v8473_v35  ;;  %v8476_v13 = vadd.f32 %v16011_v22, %v8437_v47  ;;  %v8436_v3 = vadd.f32 %v8381_v33, %v8042_v54 }
 0x50c   : > { %v7653_v61 = vadd.f32 %v17294_v40, %v7259_v18  ;;  %v8045_v38 = vadd.f32 %v11197_v57, %v7651_v42  ;;  %v8044_v15 = vadd.f32 %v7997_v55, %v7650_v16  ;;  %v8599_v31 = vadd.f32 %v8567_v51, %v17295_v46  ;;  %v17298_v57 = vld [vmem:[#allocation101_spill] sm:$0xff]  ;;  %v8391_v30 = vpop.f32.mrf.mxu1  ;;  %v17303_v18 = vld [vmem:[#allocation127_spill] sm:$0xff] }
 0x50d   : > { %v8602_v48 = vadd.f32 %v8570_v28, %v17296_v11  ;;  %v8569_v50 = vadd.f32 %v16074_v12, %v8505_v24  ;;  %v8508_v6 = vmul.f32 %v16080_v27, %v8476_v13  ;;  %v8475_v37 = vadd.f32 %v16011_v22, %v8436_v3  ;;  %v17309_v24 = vld [vmem:[#allocation102_spill] sm:$0xff] }
 0x50e   : > { %v7652_v2 = vadd.f32 %v17297_v56, %v7258_v41  ;;  %v8047_v45 = vadd.f32 %v11200_v14, %v7653_v61  ;;  %8631 = vst.msk [vmem:[%s16111_s19 + $0xb0] sm:$0xff] %vm485_vm0, %v8599_v31  ;;  %v17299_v55 = vmax.f32 %v17298_v57, 0.0  ;;  %v8439_v32 = vadd.f32 %v11261_v49, %v8045_v38  ;;  %v11264_v20 = vpop.f32.mrf.mxu1 }
 0x50f   : > { %8634 = vst.msk [vmem:[%s16111_s19 + $0xc8] sm:$0xff] %vm485_vm0, %v8602_v48  ;;  %v8601_v12 = vadd.f32 %v8569_v50, %v17300_v0  ;;  %v8572_v1 = vadd.f32 %v16091_v43, %v8508_v6  ;;  %v8507_v52 = vmul.f32 %v16080_v27, %v8475_v37  ;;  %v8438_v44 = vadd.f32 %v8391_v30, %v8044_v15 }
 0x510   : > { %v8539_v62 = vmul.f32 %v15916_v36, %v17299_v55  ;;  %v8046_v63 = vadd.f32 %v8007_v8, %v7652_v2  ;;  %v8478_v59 = vadd.f32 %v16011_v22, %v8439_v32  ;;  %v8441_v21 = vadd.f32 %v11264_v20, %v8047_v45  ;;  %v8401_v23 = vpop.f32.mrf.mxu1 }
 0x511   : > { %8633 = vst.msk [vmem:[%s16111_s19 + $0xc0] sm:$0xff] %vm485_vm0, %v8601_v12  ;;  %v8604_v39 = vadd.f32 %v8572_v1, %v17301_v17  ;;  %v8477_v60 = vadd.f32 %v16011_v22, %v8438_v44  ;;  %v8542_v43 = vmul.f32 %v15916_v36, %v17302_v58  ;;  %v8541_v54 = vmul.f32 %v15916_v36, %v17303_v18 }
 0x512   : > { %v8571_v26 = vadd.f32 %v8539_v62, %v8507_v52  ;;  %v8510_v19 = vmul.f32 %v16080_v27, %v8478_v59  ;;  %v8480_v4 = vadd.f32 %v16011_v22, %v8441_v21  ;;  %v8440_v10 = vadd.f32 %v8401_v23, %v8046_v63 }
 0x513   : > { %8636 = vst.msk [vmem:[%s16111_s19 + $0xd8] sm:$0xff] %vm485_vm0, %v8604_v39  ;;  %v8509_v34 = vmul.f32 %v16080_v27, %v8477_v60  ;;  %v17306_v41 = vmax.f32 %v17305_v9, 0.0  ;;  %v17310_v13 = vmax.f32 %v17309_v24, 0.0 }
 0x514   : > { %v8603_v14 = vadd.f32 %v8571_v26, %v17304_v29  ;;  %v8574_v35 = vadd.f32 %v8542_v43, %v8510_v19  ;;  %v8512_v7 = vmul.f32 %v16080_v27, %v8480_v4  ;;  %v8479_v42 = vadd.f32 %v16011_v22, %v8440_v10  ;;  %v17311_v22 = vld [vmem:[#allocation50_spill] sm:$0xff] }
 0x515   : > { %v8573_v47 = vadd.f32 %v8541_v54, %v8509_v34  ;;  %v8544_v53 = vmul.f32 %v15916_v36, %v17306_v41  ;;  %v8543_v3 = vmul.f32 %v15916_v36, %v17310_v13  ;;  %v17312_v36 = vld [vmem:[#allocation49_spill] sm:$0xff] }
 0x516   : > { %8635 = vst.msk [vmem:[%s16111_s19 + $0xd0] sm:$0xff] %vm485_vm0, %v8603_v14  ;;  %v8606_v16 = vadd.f32 %v8574_v35, %v17307_v5  ;;  %v8511_v28 = vmul.f32 %v16080_v27, %v8479_v42 }
 0x517   : > { %v8605_v51 = vadd.f32 %v8573_v47, %v17308_v25  ;;  %v8576_v33 = vadd.f32 %v8544_v53, %v8512_v7 }
 0x518   : > { %8638 = vst.msk [vmem:[%s16111_s19 + $0xe8] sm:$0xff] %vm485_vm0, %v8606_v16  ;;  %v8575_v61 = vadd.f32 %v8543_v3, %v8511_v28 }
 0x519   : > { %8637 = vst.msk [vmem:[%s16111_s19 + $0xe0] sm:$0xff] %vm485_vm0, %v8605_v51  ;;  %v8608_v40 = vadd.f32 %v8576_v33, %v17311_v22 }
 0x51a   : > { %v8607_v27 = vadd.f32 %v8575_v61, %v17312_v36 }
 0x51b   : > { %8640 = vst.msk [vmem:[%s16111_s19 + $0xf8] sm:$0xff] %vm485_vm0, %v8608_v40 }
 0x51c   : > { %8639 = vst.msk [vmem:[%s16111_s19 + $0xf0] sm:$0xff] %vm485_vm0, %v8607_v27 }
 0x51d   : > { %11474 = shalt.err (!%p11471_p5)
}
 0x51e   : > { %s11475_s29 = scalar_lea.hbm %s16407_s24, 4096  ;;  %s11479_s4 = scalar_lea.hbm %s16465_s8, 8192 }
 0x51f   : > { %p11476_p7 = scmp.ne.s32.totalorder %s16407_s24, %s11475_s29  ;;  %p11480_p6 = scmp.lt.s32.totalorder %s16407_s24, %s16465_s8 }
 0x520   : > { %p11481_p12 = scmp.lt.s32.totalorder %s11479_s4, %s11475_s29 }
 0x521   : > { %p11477_p8 = pnand %p11476_p7, %p17313_p3 }
 0x522   : > { %p11482_p0 = por %p11481_p12, %p11480_p6 }
 0x523   : > { %p11478_p2 = pneg %p11477_p8 }
 0x525   : > { %p11483_p10 = pnand %p11482_p0, %p11478_p2 }
 0x527   : > { %11486 = shalt.err (!%p11483_p10)
}
 0x528   : > { %s11546_s21 = smov 128   ;;  %s11547_s19 = smov 8  }
 0x529   : > { %11277 = dma.vmem_to_hbm [thread:$0]  (%p17313_p3), %s16409_s20, 4096, %s16407_s24, %s8642_s9, %s11546_s21, %s11546_s21, %s11547_s19  }
 0x52a PF: > { %s8670_s18 = sand.u32 1, %s11525_s27   ;;  %p17314_p11 = scmp.ne.s32.totalorder %s16633_s12, 0 }
 0x52b   : > { %p17315_p9 = scmp.ge.s32.totalorder %s11537_s30, 2  ;;  %s8671_s2 = scalar_lea.sflag [#allocation5], %s8670_s18 }
 0x52d   : > { %p11294_p13 = pnand %p17315_p9, %p17314_p11 }
 0x52f   : > { %p11295_p1 = pneg %p11294_p13 }
 0x531   : > { %11520 = dma.done.wait (%p11295_p1), %s8671_s2, 4096  }
 0x532   : > { %11522 = vsyncadd (%p11295_p1), %s8671_s2, 4294963200  ;;  %s17316_s13 = sld [smem:[#allocation17_spill]]  ;;  %p25_p4 = scmp.ge.s32.totalorder %s11671_s10, 4  }
 0x533   : > { %s17317_s29 = sld [smem:[#allocation18_spill]]  ;;  %s17318_s27 = smov %s11529_s28 }
 0x534   : > { %s17320_s30 = smov %s11671_s10  ;;  %27 = sbr.rel (!%p25_p4) target bundleno = 12 (0xc), region = 143 }
 0x538   : > { %s17319_s28 = smov %s17316_s13 }
 0x539   :  { %8676 = vsyncpa [#allocation4], 1 }
 0x53a   :  { %8678 = vsyncpa [#allocation4 + $0x1], 1 }
 0x53b   :  { %8679 = vsyncpa [#allocation7], 1 }
 0x53c   :  { %8681 = vsyncpa [#allocation7 + $0x1], 1 }
 0x53d   :  { %8682 = vsyncpa [#allocation10], 1 }
 0x53e   :  { %8683 = vsyncpa [#allocation5], 1 }
 0x53f   :  { %8685 = vsyncpa [#allocation5 + $0x1], 1 }

</bundles_post_ra>
